<compile_context>
chip_gen: v7x
topology: tpu7x:2x2x1
jax: 0.10.0
libtpu: 0.0.40
codegen_flags: <defaults>
</compile_context>

<pallas_src>
import math

import numpy as np

import jax
import jax.numpy as jnp
from jax.experimental import pallas as pl
from jax.experimental.pallas import tpu as pltpu

BN_EPS = 1e-5
BN_SCALE = 1.0 / math.sqrt(1.0 + BN_EPS)  # eval-mode BN with default running stats


# ------------------------------ Pallas kernel --------------------------------


def _zero_halo_ring(ref, hi, wi):
    """Zero only the 1-pixel halo ring of a (hi+2, wi+2, C) scratch buffer."""
    c = ref.shape[-1]
    dt = ref.dtype
    ref[0:1, :, :] = jnp.zeros((1, wi + 2, c), dt)
    ref[hi + 1:hi + 2, :, :] = jnp.zeros((1, wi + 2, c), dt)
    ref[1:hi + 1, 0:1, :] = jnp.zeros((hi, 1, c), dt)
    ref[1:hi + 1, wi + 1:wi + 2, :] = jnp.zeros((hi, 1, c), dt)


def decoder_kernel(x_ref, low_ref, kron_ref, wproj_ref, w1_ref, w2_ref,
                   wlast_ref, blast_ref, out_ref, cat_ref, y1_ref):
    """Fused Decoder forward for one batch element.

    x_ref:     (Hx, Wx, Cx)        high-level (ASPP) features, f32
    low_ref:   (Hl, Wl, Cl)        low-level backbone features, f32
    kron_ref:  (Hl*Wl, Hx*Wx)      kron(rh, rw) bilinear resize operator, bf16
    wproj_ref: (Cl, 128)           1x1 projection weight, BN folded, cols 48: zero, bf16
    w1_ref:    (9, 384, 256)       conv1 taps, BN folded, rows 304: zero, bf16
    w2_ref:    (9, 256, 256)       conv2 taps, BN folded, bf16
    wlast_ref: (256, Cpad)         classifier, cols >= num_classes zero, bf16
    blast_ref: (1, Cpad)           classifier bias (padded), f32
    out_ref:   (Hl, Wl, Cpad)      bf16 output (lane-dense)
    cat_ref:   (Hl+2, Wl+2, 384)   bf16 VMEM scratch: [x_up | proj_low_padded], zero halo
    y1_ref:    (Hl+2, Wl+2, 256)   bf16 VMEM scratch: conv1 output, zero halo
    """
    Hx, Wx, Cx = x_ref.shape
    Hl, Wl, Cl = low_ref.shape
    Cproj = wproj_ref.shape[-1]
    Ccat = cat_ref.shape[-1]
    Cmid = y1_ref.shape[-1]
    Cpad = out_ref.shape[-1]

    # Only the halo ring needs zeroing; the interior is fully rewritten below.
    _zero_halo_ring(cat_ref, Hl, Wl)
    _zero_halo_ring(y1_ref, Hl, Wl)

    # --- F.interpolate(x, (Hl, Wl), bilinear, align_corners=True): one matmul ---
    xflat = x_ref[...].reshape(Hx * Wx, Cx).astype(jnp.bfloat16)
    xup = jnp.dot(kron_ref[...], xflat, preferred_element_type=jnp.float32)
    cat_ref[1:1 + Hl, 1:1 + Wl, 0:Cx] = (
        xup.reshape(Hl, Wl, Cx).astype(cat_ref.dtype))

    # --- feature_projection: 1x1 conv (+folded BN) + ReLU (lane-padded to 128) ---
    low = low_ref[...].reshape(Hl * Wl, Cl).astype(jnp.bfloat16)
    proj = jnp.dot(low, wproj_ref[...], preferred_element_type=jnp.float32)
    cat_ref[1:1 + Hl, 1:1 + Wl, Cx:Cx + Cproj] = (
        jnp.maximum(proj, 0.0).reshape(Hl, Wl, Cproj).astype(cat_ref.dtype))

    # --- conv1: 3x3 pad=1 on the concat (+folded BN), ReLU; acc stays in vregs ---
    acc = jnp.zeros((Hl * Wl, Cmid), jnp.float32)
    for t in range(9):
        dy, dx = t // 3, t % 3
        p = cat_ref[dy:dy + Hl, dx:dx + Wl, :].reshape(Hl * Wl, Ccat)
        acc = acc + jnp.dot(p, w1_ref[t], preferred_element_type=jnp.float32)
    # Dropout(0.5) is identity in eval mode.
    y1_ref[1:1 + Hl, 1:1 + Wl, :] = (
        jnp.maximum(acc, 0.0).reshape(Hl, Wl, Cmid).astype(y1_ref.dtype))

    # --- conv2: 3x3 pad=1 (+folded BN), ReLU; acc stays in vregs -----------------
    acc2 = jnp.zeros((Hl * Wl, Cmid), jnp.float32)
    for t in range(9):
        dy, dx = t // 3, t % 3
        p = y1_ref[dy:dy + Hl, dx:dx + Wl, :].reshape(Hl * Wl, Cmid)
        acc2 = acc2 + jnp.dot(p, w2_ref[t], preferred_element_type=jnp.float32)
    # Dropout(0.1) is identity in eval mode.
    y2 = jnp.maximum(acc2, 0.0).astype(jnp.bfloat16)

    # --- last_linear: 1x1 conv + bias, lane-padded classifier head ---------------
    out = jnp.dot(y2, wlast_ref[...], preferred_element_type=jnp.float32) + blast_ref[...]
    out_ref[...] = out.reshape(Hl, Wl, Cpad).astype(out_ref.dtype)


# ------------------------------ JAX glue -------------------------------------


def resize_matrix(out_size, in_size):
    """1-D bilinear resize matrix (numpy), align_corners=True."""
    if in_size == 1 or out_size == 1:
        # align_corners with a single input/output sample degenerates to index 0.
        m = np.zeros((out_size, in_size), np.float64)
        m[:, 0] = 1.0
        return m
    src = np.arange(out_size, dtype=np.float64) * (in_size - 1) / (out_size - 1)
    i0 = np.clip(np.floor(src).astype(np.int64), 0, in_size - 1)
    i1 = np.minimum(i0 + 1, in_size - 1)
    frac = src - i0
    m = np.zeros((out_size, in_size), np.float64)
    rows = np.arange(out_size)
    m[rows, i0] += 1.0 - frac
    m[rows, i1] += frac
    return m


def init_params(key, low_level_inplanes, num_classes):
    """Synthetic weights mirroring Decoder.__init__ shapes (kaiming), BN folded.

    Layouts (channels-last): 1x1 -> (Cin, Cout), 3x3 -> (9, Cin, Cout).
    conv1's Cin is laid out as [x(256) | proj_low(48) | zero-pad(80)] to match the
    in-kernel concat buffer (torch.cat((x, low_level_feat), dim=1) ordering).
    """
    concat_ch = 256 + 48
    ccat_pad = 384
    cproj_pad = 128
    k = jax.random.split(key, 5)

    def kaiming(rng, shape, fan_in):
        return jax.random.normal(rng, shape, jnp.float32) * math.sqrt(2.0 / fan_in)

    w_proj = kaiming(k[0], (low_level_inplanes, 48), low_level_inplanes) * BN_SCALE
    w_proj_pad = jnp.zeros((low_level_inplanes, cproj_pad), jnp.float32)
    w_proj_pad = w_proj_pad.at[:, :48].set(w_proj)

    w1 = kaiming(k[1], (9, concat_ch, 256), concat_ch * 9) * BN_SCALE
    w1_pad = jnp.zeros((9, ccat_pad, 256), jnp.float32).at[:, :concat_ch, :].set(w1)

    w2 = kaiming(k[2], (9, 256, 256), 256 * 9) * BN_SCALE

    w_last = kaiming(k[3], (256, num_classes), 256)
    bound = 1.0 / math.sqrt(256.0)
    b_last = jax.random.uniform(k[4], (num_classes,), jnp.float32, -bound, bound)

    cpad = ((num_classes + 127) // 128) * 128  # lane-dense classifier head
    w_last_pad = jnp.zeros((256, cpad), jnp.float32).at[:, :num_classes].set(w_last)
    b_last_pad = jnp.zeros((1, cpad), jnp.float32).at[0, :num_classes].set(b_last)

    return dict(
        w_proj_pad=w_proj_pad.astype(jnp.bfloat16),
        w1_pad=w1_pad.astype(jnp.bfloat16),
        w2=w2.astype(jnp.bfloat16),
        w_last_pad=w_last_pad.astype(jnp.bfloat16),
        b_last_pad=b_last_pad,
    )


def decoder_forward(x_nchw, low_nchw, params, num_classes):
    """Forward pass of Decoder. Inputs/outputs are NCHW (PyTorch convention)."""
    N, Cx, Hx, Wx = x_nchw.shape
    Nl, Cl, Hl, Wl = low_nchw.shape
    assert N == Nl

    # TODO(synk): at production resolutions accept NHWC directly (or fold the
    # transpose into the kernel) to avoid an extra HBM pass on the activations.
    x = jnp.transpose(x_nchw, (0, 2, 3, 1)).astype(jnp.float32)      # NHWC
    low = jnp.transpose(low_nchw, (0, 2, 3, 1)).astype(jnp.float32)  # NHWC

    # align_corners=True bilinear resize as a single precomputed operator.
    # (Hl*Wl, Hx*Wx) = (64, 16) here; switch to the separable two-matmul form
    # at production spatial resolutions where kron would be too large.
    rh = resize_matrix(Hl, Hx)
    rw = resize_matrix(Wl, Wx)
    kron = jnp.asarray(np.kron(rh, rw), dtype=jnp.bfloat16)

    cproj_pad = params["w_proj_pad"].shape[-1]
    ccat_pad = params["w1_pad"].shape[1]
    cpad = params["w_last_pad"].shape[-1]

    def full(shape):   # whole array resident in VMEM, same block every grid step
        return pl.BlockSpec(shape, lambda n, _s=shape: (0,) * len(_s))

    def per_n(shape):  # one batch element per grid step, batch dim squeezed
        return pl.BlockSpec((None,) + shape,
                            lambda n, _s=shape: (n,) + (0,) * len(_s))

    out_pad = pl.pallas_call(
        decoder_kernel,
        out_shape=jax.ShapeDtypeStruct((N, Hl, Wl, cpad), jnp.bfloat16),
        grid_spec=pltpu.PrefetchScalarGridSpec(
            num_scalar_prefetch=0,
            grid=(N,),
            in_specs=[
                per_n((Hx, Wx, Cx)),
                per_n((Hl, Wl, Cl)),
                full((Hl * Wl, Hx * Wx)),
                full((Cl, cproj_pad)),
                full((9, ccat_pad, 256)),
                full((9, 256, 256)),
                full((256, cpad)),
                full((1, cpad)),
            ],
            out_specs=per_n((Hl, Wl, cpad)),
            scratch_shapes=[
                pltpu.VMEM((Hl + 2, Wl + 2, ccat_pad), jnp.bfloat16),
                pltpu.VMEM((Hl + 2, Wl + 2, 256), jnp.bfloat16),
            ],
        ),
        # Batch axis split across TensorCores on megacore parts (v7x).
        # TODO(synk): set vmem_limit_bytes once row-tiled grids / bigger tiles
        # are added for production resolutions.
        compiler_params=pltpu.CompilerParams(dimension_semantics=("parallel",)),
    )(x, low, kron, params["w_proj_pad"], params["w1_pad"], params["w2"],
      params["w_last_pad"], params["b_last_pad"])

    out = out_pad[..., :num_classes].astype(jnp.float32)  # (N, Hl, Wl, num_classes)
    return jnp.transpose(out, (0, 3, 1, 2))               # back to NCHW


if __name__ == "__main__":
    NUM_CLASSES = 6
    LOW_LEVEL_INPLANES = 24  # backbone == 'mobilenet'

    key = jax.random.PRNGKey(0)
    kx, kl, kp = jax.random.split(key, 3)

    # x: high-level (ASPP) features; low_level_feat: early backbone features (NCHW).
    x = jax.random.normal(kx, (2, 256, 4, 4), jnp.float32)
    low_level_feat = jax.random.normal(kl, (2, LOW_LEVEL_INPLANES, 8, 8), jnp.float32)

    params = init_params(kp, LOW_LEVEL_INPLANES, NUM_CLASSES)

    fwd = jax.jit(lambda a, b: decoder_forward(a, b, params, NUM_CLASSES))
    out = fwd(x, low_level_feat)
    jax.block_until_ready(out)

    assert out.shape == (2, NUM_CLASSES, 8, 8), out.shape
    assert bool(jnp.all(jnp.isfinite(out)))
    print("KERNEL_OK")
</pallas_src>

<mosaic_0001>
module attributes {stable_mosaic.version = 11 : i64} {
  func.func @decoder_kernel(%arg0: i32, %arg1: memref<1x4x4x256xf32, #tpu.memory_space<vmem>>, %arg2: memref<1x8x8x24xf32, #tpu.memory_space<vmem>>, %arg3: memref<64x16xbf16, #tpu.memory_space<vmem>>, %arg4: memref<24x128xbf16, #tpu.memory_space<vmem>>, %arg5: memref<9x384x256xbf16, #tpu.memory_space<vmem>>, %arg6: memref<9x256x256xbf16, #tpu.memory_space<vmem>>, %arg7: memref<256x128xbf16, #tpu.memory_space<vmem>>, %arg8: memref<1x128xf32, #tpu.memory_space<vmem>>, %arg9: memref<1x8x8x128xbf16, #tpu.memory_space<vmem>>, %arg10: memref<10x10x384xbf16, #tpu.memory_space<vmem>>, %arg11: memref<10x10x256xbf16, #tpu.memory_space<vmem>>) attributes {dimension_semantics = [#tpu.dimension_semantics<parallel>], iteration_bounds = array<i64: 2>, scalar_prefetch = 0 : i64, scratch_operands = 2 : i64, tpu.core_type = #tpu.core_type<tc>, window_params = [{transform_indices = @transform_0, window_bounds = array<i64: 1, 4, 4, 256>}, {transform_indices = @transform_1, window_bounds = array<i64: 1, 8, 8, 24>}, {pipeline_mode = #tpu.pipeline_mode<synchronous>, transform_indices = @transform_2, window_bounds = array<i64: 64, 16>}, {pipeline_mode = #tpu.pipeline_mode<synchronous>, transform_indices = @transform_3, window_bounds = array<i64: 24, 128>}, {pipeline_mode = #tpu.pipeline_mode<synchronous>, transform_indices = @transform_4, window_bounds = array<i64: 9, 384, 256>}, {pipeline_mode = #tpu.pipeline_mode<synchronous>, transform_indices = @transform_5, window_bounds = array<i64: 9, 256, 256>}, {pipeline_mode = #tpu.pipeline_mode<synchronous>, transform_indices = @transform_6, window_bounds = array<i64: 256, 128>}, {pipeline_mode = #tpu.pipeline_mode<synchronous>, transform_indices = @transform_7, window_bounds = array<i64: 1, 128>}, {transform_indices = @transform_8, window_bounds = array<i64: 1, 8, 8, 128>}]} {
    %cst = arith.constant 0.000000e+00 : bf16
    %0 = vector.broadcast %cst : bf16 to vector<1x10x384xbf16>
    %c0 = arith.constant 0 : index
    %c0_0 = arith.constant 0 : index
    %c0_1 = arith.constant 0 : index
    %1 = vector.load %arg10[%c0, %c0_0, %c0_1] : memref<10x10x384xbf16, #tpu.memory_space<vmem>>, vector<1x10x384xbf16>
    tpu.vector_store %arg10[%c0, %c0_0, %c0_1], %0 {strides = array<i32>} : memref<10x10x384xbf16, #tpu.memory_space<vmem>>, vector<1x10x384xbf16>,
    %cst_2 = arith.constant 0.000000e+00 : bf16
    %2 = vector.broadcast %cst_2 : bf16 to vector<1x10x384xbf16>
    %c9 = arith.constant 9 : index
    %c0_3 = arith.constant 0 : index
    %c0_4 = arith.constant 0 : index
    %3 = vector.load %arg10[%c9, %c0_3, %c0_4] : memref<10x10x384xbf16, #tpu.memory_space<vmem>>, vector<1x10x384xbf16>
    tpu.vector_store %arg10[%c9, %c0_3, %c0_4], %2 {strides = array<i32>} : memref<10x10x384xbf16, #tpu.memory_space<vmem>>, vector<1x10x384xbf16>,
    %cst_5 = arith.constant 0.000000e+00 : bf16
    %4 = vector.broadcast %cst_5 : bf16 to vector<8x1x384xbf16>
    %c1 = arith.constant 1 : index
    %c0_6 = arith.constant 0 : index
    %c0_7 = arith.constant 0 : index
    %5 = vector.load %arg10[%c1, %c0_6, %c0_7] : memref<10x10x384xbf16, #tpu.memory_space<vmem>>, vector<8x1x384xbf16>
    tpu.vector_store %arg10[%c1, %c0_6, %c0_7], %4 {strides = array<i32>} : memref<10x10x384xbf16, #tpu.memory_space<vmem>>, vector<8x1x384xbf16>,
    %cst_8 = arith.constant 0.000000e+00 : bf16
    %6 = vector.broadcast %cst_8 : bf16 to vector<8x1x384xbf16>
    %c1_9 = arith.constant 1 : index
    %c9_10 = arith.constant 9 : index
    %c0_11 = arith.constant 0 : index
    %7 = vector.load %arg10[%c1_9, %c9_10, %c0_11] : memref<10x10x384xbf16, #tpu.memory_space<vmem>>, vector<8x1x384xbf16>
    tpu.vector_store %arg10[%c1_9, %c9_10, %c0_11], %6 {strides = array<i32>} : memref<10x10x384xbf16, #tpu.memory_space<vmem>>, vector<8x1x384xbf16>,
    %cst_12 = arith.constant 0.000000e+00 : bf16
    %8 = vector.broadcast %cst_12 : bf16 to vector<1x10x256xbf16>
    %c0_13 = arith.constant 0 : index
    %c0_14 = arith.constant 0 : index
    %c0_15 = arith.constant 0 : index
    %9 = vector.load %arg11[%c0_13, %c0_14, %c0_15] : memref<10x10x256xbf16, #tpu.memory_space<vmem>>, vector<1x10x256xbf16>
    tpu.vector_store %arg11[%c0_13, %c0_14, %c0_15], %8 {strides = array<i32>} : memref<10x10x256xbf16, #tpu.memory_space<vmem>>, vector<1x10x256xbf16>,
    %cst_16 = arith.constant 0.000000e+00 : bf16
    %10 = vector.broadcast %cst_16 : bf16 to vector<1x10x256xbf16>
    %c9_17 = arith.constant 9 : index
    %c0_18 = arith.constant 0 : index
    %c0_19 = arith.constant 0 : index
    %11 = vector.load %arg11[%c9_17, %c0_18, %c0_19] : memref<10x10x256xbf16, #tpu.memory_space<vmem>>, vector<1x10x256xbf16>
    tpu.vector_store %arg11[%c9_17, %c0_18, %c0_19], %10 {strides = array<i32>} : memref<10x10x256xbf16, #tpu.memory_space<vmem>>, vector<1x10x256xbf16>,
    %cst_20 = arith.constant 0.000000e+00 : bf16
    %12 = vector.broadcast %cst_20 : bf16 to vector<8x1x256xbf16>
    %c1_21 = arith.constant 1 : index
    %c0_22 = arith.constant 0 : index
    %c0_23 = arith.constant 0 : index
    %13 = vector.load %arg11[%c1_21, %c0_22, %c0_23] : memref<10x10x256xbf16, #tpu.memory_space<vmem>>, vector<8x1x256xbf16>
    tpu.vector_store %arg11[%c1_21, %c0_22, %c0_23], %12 {strides = array<i32>} : memref<10x10x256xbf16, #tpu.memory_space<vmem>>, vector<8x1x256xbf16>,
    %cst_24 = arith.constant 0.000000e+00 : bf16
    %14 = vector.broadcast %cst_24 : bf16 to vector<8x1x256xbf16>
    %c1_25 = arith.constant 1 : index
    %c9_26 = arith.constant 9 : index
    %c0_27 = arith.constant 0 : index
    %15 = vector.load %arg11[%c1_25, %c9_26, %c0_27] : memref<10x10x256xbf16, #tpu.memory_space<vmem>>, vector<8x1x256xbf16>
    tpu.vector_store %arg11[%c1_25, %c9_26, %c0_27], %14 {strides = array<i32>} : memref<10x10x256xbf16, #tpu.memory_space<vmem>>, vector<8x1x256xbf16>,
    %c0_28 = arith.constant 0 : index
    %c0_29 = arith.constant 0 : index
    %c0_30 = arith.constant 0 : index
    %c0_31 = arith.constant 0 : index
    %16 = vector.load %arg1[%c0_28, %c0_29, %c0_30, %c0_31] : memref<1x4x4x256xf32, #tpu.memory_space<vmem>>, vector<1x4x4x256xf32>
    %17 = vector.shape_cast %16 : vector<1x4x4x256xf32> to vector<4x4x256xf32>
    %18 = vector.shape_cast %17 : vector<4x4x256xf32> to vector<16x256xf32>
    %19 = arith.truncf %18 : vector<16x256xf32> to vector<16x256xbf16>
    %c0_32 = arith.constant 0 : index
    %c0_33 = arith.constant 0 : index
    %20 = vector.load %arg3[%c0_32, %c0_33] : memref<64x16xbf16, #tpu.memory_space<vmem>>, vector<64x16xbf16>
    %cst_34 = arith.constant dense<0.000000e+00> : vector<64x256xf32>
    %21 = tpu.matmul %20, %19, %cst_34 {dimension_numbers = #tpu.dot_dimension_numbers<[1], [0], [0], [1], [0, 0, 1, 1], [], []>} : vector<64x16xbf16>, vector<16x256xbf16>, vector<64x256xf32> -> vector<64x256xf32>
    %22 = vector.shape_cast %21 : vector<64x256xf32> to vector<8x8x256xf32>
    %23 = arith.truncf %22 : vector<8x8x256xf32> to vector<8x8x256xbf16>
    %c1_35 = arith.constant 1 : index
    %c1_36 = arith.constant 1 : index
    %c0_37 = arith.constant 0 : index
    %24 = vector.load %arg10[%c1_35, %c1_36, %c0_37] : memref<10x10x384xbf16, #tpu.memory_space<vmem>>, vector<8x8x256xbf16>
    tpu.vector_store %arg10[%c1_35, %c1_36, %c0_37], %23 {strides = array<i32>} : memref<10x10x384xbf16, #tpu.memory_space<vmem>>, vector<8x8x256xbf16>,
    %c0_38 = arith.constant 0 : index
    %c0_39 = arith.constant 0 : index
    %c0_40 = arith.constant 0 : index
    %c0_41 = arith.constant 0 : index
    %25 = vector.load %arg2[%c0_38, %c0_39, %c0_40, %c0_41] : memref<1x8x8x24xf32, #tpu.memory_space<vmem>>, vector<1x8x8x24xf32>
    %26 = vector.shape_cast %25 : vector<1x8x8x24xf32> to vector<8x8x24xf32>
    %27 = vector.shape_cast %26 : vector<8x8x24xf32> to vector<64x24xf32>
    %28 = arith.truncf %27 : vector<64x24xf32> to vector<64x24xbf16>
    %c0_42 = arith.constant 0 : index
    %c0_43 = arith.constant 0 : index
    %29 = vector.load %arg4[%c0_42, %c0_43] : memref<24x128xbf16, #tpu.memory_space<vmem>>, vector<24x128xbf16>
    %cst_44 = arith.constant dense<0.000000e+00> : vector<64x128xf32>
    %30 = tpu.matmul %28, %29, %cst_44 {dimension_numbers = #tpu.dot_dimension_numbers<[1], [0], [0], [1], [0, 0, 1, 1], [], []>} : vector<64x24xbf16>, vector<24x128xbf16>, vector<64x128xf32> -> vector<64x128xf32>
    %cst_45 = arith.constant 0.000000e+00 : f32
    %31 = vector.broadcast %cst_45 : f32 to vector<64x128xf32>
    %32 = arith.maximumf %30, %31 : vector<64x128xf32>
    %33 = vector.shape_cast %32 : vector<64x128xf32> to vector<8x8x128xf32>
    %34 = arith.truncf %33 : vector<8x8x128xf32> to vector<8x8x128xbf16>
    %c1_46 = arith.constant 1 : index
    %c1_47 = arith.constant 1 : index
    %c256 = arith.constant 256 : index
    %35 = vector.load %arg10[%c1_46, %c1_47, %c256] : memref<10x10x384xbf16, #tpu.memory_space<vmem>>, vector<8x8x128xbf16>
    tpu.vector_store %arg10[%c1_46, %c1_47, %c256], %34 {strides = array<i32>} : memref<10x10x384xbf16, #tpu.memory_space<vmem>>, vector<8x8x128xbf16>,
    %cst_48 = arith.constant 0.000000e+00 : f32
    %36 = vector.broadcast %cst_48 : f32 to vector<64x256xf32>
    %c0_49 = arith.constant 0 : index
    %c0_50 = arith.constant 0 : index
    %c0_51 = arith.constant 0 : index
    %37 = vector.load %arg10[%c0_49, %c0_50, %c0_51] : memref<10x10x384xbf16, #tpu.memory_space<vmem>>, vector<8x8x384xbf16>
    %38 = vector.shape_cast %37 : vector<8x8x384xbf16> to vector<64x384xbf16>
    %c0_52 = arith.constant 0 : index
    %c0_53 = arith.constant 0 : index
    %c0_54 = arith.constant 0 : index
    %39 = vector.load %arg5[%c0_52, %c0_53, %c0_54] : memref<9x384x256xbf16, #tpu.memory_space<vmem>>, vector<1x384x256xbf16>
    %40 = vector.shape_cast %39 : vector<1x384x256xbf16> to vector<384x256xbf16>
    %cst_55 = arith.constant dense<0.000000e+00> : vector<64x256xf32>
    %41 = tpu.matmul %38, %40, %cst_55 {dimension_numbers = #tpu.dot_dimension_numbers<[1], [0], [0], [1], [0, 0, 1, 1], [], []>} : vector<64x384xbf16>, vector<384x256xbf16>, vector<64x256xf32> -> vector<64x256xf32>
    %42 = arith.addf %36, %41 : vector<64x256xf32>
    %c0_56 = arith.constant 0 : index
    %c1_57 = arith.constant 1 : index
    %c0_58 = arith.constant 0 : index
    %43 = vector.load %arg10[%c0_56, %c1_57, %c0_58] : memref<10x10x384xbf16, #tpu.memory_space<vmem>>, vector<8x8x384xbf16>
    %44 = vector.shape_cast %43 : vector<8x8x384xbf16> to vector<64x384xbf16>
    %c1_59 = arith.constant 1 : index
    %c0_60 = arith.constant 0 : index
    %c0_61 = arith.constant 0 : index
    %45 = vector.load %arg5[%c1_59, %c0_60, %c0_61] : memref<9x384x256xbf16, #tpu.memory_space<vmem>>, vector<1x384x256xbf16>
    %46 = vector.shape_cast %45 : vector<1x384x256xbf16> to vector<384x256xbf16>
    %cst_62 = arith.constant dense<0.000000e+00> : vector<64x256xf32>
    %47 = tpu.matmul %44, %46, %cst_62 {dimension_numbers = #tpu.dot_dimension_numbers<[1], [0], [0], [1], [0, 0, 1, 1], [], []>} : vector<64x384xbf16>, vector<384x256xbf16>, vector<64x256xf32> -> vector<64x256xf32>
    %48 = arith.addf %42, %47 : vector<64x256xf32>
    %c0_63 = arith.constant 0 : index
    %c2 = arith.constant 2 : index
    %c0_64 = arith.constant 0 : index
    %49 = vector.load %arg10[%c0_63, %c2, %c0_64] : memref<10x10x384xbf16, #tpu.memory_space<vmem>>, vector<8x8x384xbf16>
    %50 = vector.shape_cast %49 : vector<8x8x384xbf16> to vector<64x384xbf16>
    %c2_65 = arith.constant 2 : index
    %c0_66 = arith.constant 0 : index
    %c0_67 = arith.constant 0 : index
    %51 = vector.load %arg5[%c2_65, %c0_66, %c0_67] : memref<9x384x256xbf16, #tpu.memory_space<vmem>>, vector<1x384x256xbf16>
    %52 = vector.shape_cast %51 : vector<1x384x256xbf16> to vector<384x256xbf16>
    %cst_68 = arith.constant dense<0.000000e+00> : vector<64x256xf32>
    %53 = tpu.matmul %50, %52, %cst_68 {dimension_numbers = #tpu.dot_dimension_numbers<[1], [0], [0], [1], [0, 0, 1, 1], [], []>} : vector<64x384xbf16>, vector<384x256xbf16>, vector<64x256xf32> -> vector<64x256xf32>
    %54 = arith.addf %48, %53 : vector<64x256xf32>
    %c1_69 = arith.constant 1 : index
    %c0_70 = arith.constant 0 : index
    %c0_71 = arith.constant 0 : index
    %55 = vector.load %arg10[%c1_69, %c0_70, %c0_71] : memref<10x10x384xbf16, #tpu.memory_space<vmem>>, vector<8x8x384xbf16>
    %56 = vector.shape_cast %55 : vector<8x8x384xbf16> to vector<64x384xbf16>
    %c3 = arith.constant 3 : index
    %c0_72 = arith.constant 0 : index
    %c0_73 = arith.constant 0 : index
    %57 = vector.load %arg5[%c3, %c0_72, %c0_73] : memref<9x384x256xbf16, #tpu.memory_space<vmem>>, vector<1x384x256xbf16>
    %58 = vector.shape_cast %57 : vector<1x384x256xbf16> to vector<384x256xbf16>
    %cst_74 = arith.constant dense<0.000000e+00> : vector<64x256xf32>
    %59 = tpu.matmul %56, %58, %cst_74 {dimension_numbers = #tpu.dot_dimension_numbers<[1], [0], [0], [1], [0, 0, 1, 1], [], []>} : vector<64x384xbf16>, vector<384x256xbf16>, vector<64x256xf32> -> vector<64x256xf32>
    %60 = arith.addf %54, %59 : vector<64x256xf32>
    %c1_75 = arith.constant 1 : index
    %c1_76 = arith.constant 1 : index
    %c0_77 = arith.constant 0 : index
    %61 = vector.load %arg10[%c1_75, %c1_76, %c0_77] : memref<10x10x384xbf16, #tpu.memory_space<vmem>>, vector<8x8x384xbf16>
    %62 = vector.shape_cast %61 : vector<8x8x384xbf16> to vector<64x384xbf16>
    %c4 = arith.constant 4 : index
    %c0_78 = arith.constant 0 : index
    %c0_79 = arith.constant 0 : index
    %63 = vector.load %arg5[%c4, %c0_78, %c0_79] : memref<9x384x256xbf16, #tpu.memory_space<vmem>>, vector<1x384x256xbf16>
    %64 = vector.shape_cast %63 : vector<1x384x256xbf16> to vector<384x256xbf16>
    %cst_80 = arith.constant dense<0.000000e+00> : vector<64x256xf32>
    %65 = tpu.matmul %62, %64, %cst_80 {dimension_numbers = #tpu.dot_dimension_numbers<[1], [0], [0], [1], [0, 0, 1, 1], [], []>} : vector<64x384xbf16>, vector<384x256xbf16>, vector<64x256xf32> -> vector<64x256xf32>
    %66 = arith.addf %60, %65 : vector<64x256xf32>
    %c1_81 = arith.constant 1 : index
    %c2_82 = arith.constant 2 : index
    %c0_83 = arith.constant 0 : index
    %67 = vector.load %arg10[%c1_81, %c2_82, %c0_83] : memref<10x10x384xbf16, #tpu.memory_space<vmem>>, vector<8x8x384xbf16>
    %68 = vector.shape_cast %67 : vector<8x8x384xbf16> to vector<64x384xbf16>
    %c5 = arith.constant 5 : index
    %c0_84 = arith.constant 0 : index
    %c0_85 = arith.constant 0 : index
    %69 = vector.load %arg5[%c5, %c0_84, %c0_85] : memref<9x384x256xbf16, #tpu.memory_space<vmem>>, vector<1x384x256xbf16>
    %70 = vector.shape_cast %69 : vector<1x384x256xbf16> to vector<384x256xbf16>
    %cst_86 = arith.constant dense<0.000000e+00> : vector<64x256xf32>
    %71 = tpu.matmul %68, %70, %cst_86 {dimension_numbers = #tpu.dot_dimension_numbers<[1], [0], [0], [1], [0, 0, 1, 1], [], []>} : vector<64x384xbf16>, vector<384x256xbf16>, vector<64x256xf32> -> vector<64x256xf32>
    %72 = arith.addf %66, %71 : vector<64x256xf32>
    %c2_87 = arith.constant 2 : index
    %c0_88 = arith.constant 0 : index
    %c0_89 = arith.constant 0 : index
    %73 = vector.load %arg10[%c2_87, %c0_88, %c0_89] : memref<10x10x384xbf16, #tpu.memory_space<vmem>>, vector<8x8x384xbf16>
    %74 = vector.shape_cast %73 : vector<8x8x384xbf16> to vector<64x384xbf16>
    %c6 = arith.constant 6 : index
    %c0_90 = arith.constant 0 : index
    %c0_91 = arith.constant 0 : index
    %75 = vector.load %arg5[%c6, %c0_90, %c0_91] : memref<9x384x256xbf16, #tpu.memory_space<vmem>>, vector<1x384x256xbf16>
    %76 = vector.shape_cast %75 : vector<1x384x256xbf16> to vector<384x256xbf16>
    %cst_92 = arith.constant dense<0.000000e+00> : vector<64x256xf32>
    %77 = tpu.matmul %74, %76, %cst_92 {dimension_numbers = #tpu.dot_dimension_numbers<[1], [0], [0], [1], [0, 0, 1, 1], [], []>} : vector<64x384xbf16>, vector<384x256xbf16>, vector<64x256xf32> -> vector<64x256xf32>
    %78 = arith.addf %72, %77 : vector<64x256xf32>
    %c2_93 = arith.constant 2 : index
    %c1_94 = arith.constant 1 : index
    %c0_95 = arith.constant 0 : index
    %79 = vector.load %arg10[%c2_93, %c1_94, %c0_95] : memref<10x10x384xbf16, #tpu.memory_space<vmem>>, vector<8x8x384xbf16>
    %80 = vector.shape_cast %79 : vector<8x8x384xbf16> to vector<64x384xbf16>
    %c7 = arith.constant 7 : index
    %c0_96 = arith.constant 0 : index
    %c0_97 = arith.constant 0 : index
    %81 = vector.load %arg5[%c7, %c0_96, %c0_97] : memref<9x384x256xbf16, #tpu.memory_space<vmem>>, vector<1x384x256xbf16>
    %82 = vector.shape_cast %81 : vector<1x384x256xbf16> to vector<384x256xbf16>
    %cst_98 = arith.constant dense<0.000000e+00> : vector<64x256xf32>
    %83 = tpu.matmul %80, %82, %cst_98 {dimension_numbers = #tpu.dot_dimension_numbers<[1], [0], [0], [1], [0, 0, 1, 1], [], []>} : vector<64x384xbf16>, vector<384x256xbf16>, vector<64x256xf32> -> vector<64x256xf32>
    %84 = arith.addf %78, %83 : vector<64x256xf32>
    %c2_99 = arith.constant 2 : index
    %c2_100 = arith.constant 2 : index
    %c0_101 = arith.constant 0 : index
    %85 = vector.load %arg10[%c2_99, %c2_100, %c0_101] : memref<10x10x384xbf16, #tpu.memory_space<vmem>>, vector<8x8x384xbf16>
    %86 = vector.shape_cast %85 : vector<8x8x384xbf16> to vector<64x384xbf16>
    %c8 = arith.constant 8 : index
    %c0_102 = arith.constant 0 : index
    %c0_103 = arith.constant 0 : index
    %87 = vector.load %arg5[%c8, %c0_102, %c0_103] : memref<9x384x256xbf16, #tpu.memory_space<vmem>>, vector<1x384x256xbf16>
    %88 = vector.shape_cast %87 : vector<1x384x256xbf16> to vector<384x256xbf16>
    %cst_104 = arith.constant dense<0.000000e+00> : vector<64x256xf32>
    %89 = tpu.matmul %86, %88, %cst_104 {dimension_numbers = #tpu.dot_dimension_numbers<[1], [0], [0], [1], [0, 0, 1, 1], [], []>} : vector<64x384xbf16>, vector<384x256xbf16>, vector<64x256xf32> -> vector<64x256xf32>
    %90 = arith.addf %84, %89 : vector<64x256xf32>
    %cst_105 = arith.constant 0.000000e+00 : f32
    %91 = vector.broadcast %cst_105 : f32 to vector<64x256xf32>
    %92 = arith.maximumf %90, %91 : vector<64x256xf32>
    %93 = vector.shape_cast %92 : vector<64x256xf32> to vector<8x8x256xf32>
    %94 = arith.truncf %93 : vector<8x8x256xf32> to vector<8x8x256xbf16>
    %c1_106 = arith.constant 1 : index
    %c1_107 = arith.constant 1 : index
    %c0_108 = arith.constant 0 : index
    %95 = vector.load %arg11[%c1_106, %c1_107, %c0_108] : memref<10x10x256xbf16, #tpu.memory_space<vmem>>, vector<8x8x256xbf16>
    tpu.vector_store %arg11[%c1_106, %c1_107, %c0_108], %94 {strides = array<i32>} : memref<10x10x256xbf16, #tpu.memory_space<vmem>>, vector<8x8x256xbf16>,
    %cst_109 = arith.constant 0.000000e+00 : f32
    %96 = vector.broadcast %cst_109 : f32 to vector<64x256xf32>
    %c0_110 = arith.constant 0 : index
    %c0_111 = arith.constant 0 : index
    %c0_112 = arith.constant 0 : index
    %97 = vector.load %arg11[%c0_110, %c0_111, %c0_112] : memref<10x10x256xbf16, #tpu.memory_space<vmem>>, vector<8x8x256xbf16>
    %98 = vector.shape_cast %97 : vector<8x8x256xbf16> to vector<64x256xbf16>
    %c0_113 = arith.constant 0 : index
    %c0_114 = arith.constant 0 : index
    %c0_115 = arith.constant 0 : index
    %99 = vector.load %arg6[%c0_113, %c0_114, %c0_115] : memref<9x256x256xbf16, #tpu.memory_space<vmem>>, vector<1x256x256xbf16>
    %100 = vector.shape_cast %99 : vector<1x256x256xbf16> to vector<256x256xbf16>
    %cst_116 = arith.constant dense<0.000000e+00> : vector<64x256xf32>
    %101 = tpu.matmul %98, %100, %cst_116 {dimension_numbers = #tpu.dot_dimension_numbers<[1], [0], [0], [1], [0, 0, 1, 1], [], []>} : vector<64x256xbf16>, vector<256x256xbf16>, vector<64x256xf32> -> vector<64x256xf32>
    %102 = arith.addf %96, %101 : vector<64x256xf32>
    %c0_117 = arith.constant 0 : index
    %c1_118 = arith.constant 1 : index
    %c0_119 = arith.constant 0 : index
    %103 = vector.load %arg11[%c0_117, %c1_118, %c0_119] : memref<10x10x256xbf16, #tpu.memory_space<vmem>>, vector<8x8x256xbf16>
    %104 = vector.shape_cast %103 : vector<8x8x256xbf16> to vector<64x256xbf16>
    %c1_120 = arith.constant 1 : index
    %c0_121 = arith.constant 0 : index
    %c0_122 = arith.constant 0 : index
    %105 = vector.load %arg6[%c1_120, %c0_121, %c0_122] : memref<9x256x256xbf16, #tpu.memory_space<vmem>>, vector<1x256x256xbf16>
    %106 = vector.shape_cast %105 : vector<1x256x256xbf16> to vector<256x256xbf16>
    %cst_123 = arith.constant dense<0.000000e+00> : vector<64x256xf32>
    %107 = tpu.matmul %104, %106, %cst_123 {dimension_numbers = #tpu.dot_dimension_numbers<[1], [0], [0], [1], [0, 0, 1, 1], [], []>} : vector<64x256xbf16>, vector<256x256xbf16>, vector<64x256xf32> -> vector<64x256xf32>
    %108 = arith.addf %102, %107 : vector<64x256xf32>
    %c0_124 = arith.constant 0 : index
    %c2_125 = arith.constant 2 : index
    %c0_126 = arith.constant 0 : index
    %109 = vector.load %arg11[%c0_124, %c2_125, %c0_126] : memref<10x10x256xbf16, #tpu.memory_space<vmem>>, vector<8x8x256xbf16>
    %110 = vector.shape_cast %109 : vector<8x8x256xbf16> to vector<64x256xbf16>
    %c2_127 = arith.constant 2 : index
    %c0_128 = arith.constant 0 : index
    %c0_129 = arith.constant 0 : index
    %111 = vector.load %arg6[%c2_127, %c0_128, %c0_129] : memref<9x256x256xbf16, #tpu.memory_space<vmem>>, vector<1x256x256xbf16>
    %112 = vector.shape_cast %111 : vector<1x256x256xbf16> to vector<256x256xbf16>
    %cst_130 = arith.constant dense<0.000000e+00> : vector<64x256xf32>
    %113 = tpu.matmul %110, %112, %cst_130 {dimension_numbers = #tpu.dot_dimension_numbers<[1], [0], [0], [1], [0, 0, 1, 1], [], []>} : vector<64x256xbf16>, vector<256x256xbf16>, vector<64x256xf32> -> vector<64x256xf32>
    %114 = arith.addf %108, %113 : vector<64x256xf32>
    %c1_131 = arith.constant 1 : index
    %c0_132 = arith.constant 0 : index
    %c0_133 = arith.constant 0 : index
    %115 = vector.load %arg11[%c1_131, %c0_132, %c0_133] : memref<10x10x256xbf16, #tpu.memory_space<vmem>>, vector<8x8x256xbf16>
    %116 = vector.shape_cast %115 : vector<8x8x256xbf16> to vector<64x256xbf16>
    %c3_134 = arith.constant 3 : index
    %c0_135 = arith.constant 0 : index
    %c0_136 = arith.constant 0 : index
    %117 = vector.load %arg6[%c3_134, %c0_135, %c0_136] : memref<9x256x256xbf16, #tpu.memory_space<vmem>>, vector<1x256x256xbf16>
    %118 = vector.shape_cast %117 : vector<1x256x256xbf16> to vector<256x256xbf16>
    %cst_137 = arith.constant dense<0.000000e+00> : vector<64x256xf32>
    %119 = tpu.matmul %116, %118, %cst_137 {dimension_numbers = #tpu.dot_dimension_numbers<[1], [0], [0], [1], [0, 0, 1, 1], [], []>} : vector<64x256xbf16>, vector<256x256xbf16>, vector<64x256xf32> -> vector<64x256xf32>
    %120 = arith.addf %114, %119 : vector<64x256xf32>
    %c1_138 = arith.constant 1 : index
    %c1_139 = arith.constant 1 : index
    %c0_140 = arith.constant 0 : index
    %121 = vector.load %arg11[%c1_138, %c1_139, %c0_140] : memref<10x10x256xbf16, #tpu.memory_space<vmem>>, vector<8x8x256xbf16>
    %122 = vector.shape_cast %121 : vector<8x8x256xbf16> to vector<64x256xbf16>
    %c4_141 = arith.constant 4 : index
    %c0_142 = arith.constant 0 : index
    %c0_143 = arith.constant 0 : index
    %123 = vector.load %arg6[%c4_141, %c0_142, %c0_143] : memref<9x256x256xbf16, #tpu.memory_space<vmem>>, vector<1x256x256xbf16>
    %124 = vector.shape_cast %123 : vector<1x256x256xbf16> to vector<256x256xbf16>
    %cst_144 = arith.constant dense<0.000000e+00> : vector<64x256xf32>
    %125 = tpu.matmul %122, %124, %cst_144 {dimension_numbers = #tpu.dot_dimension_numbers<[1], [0], [0], [1], [0, 0, 1, 1], [], []>} : vector<64x256xbf16>, vector<256x256xbf16>, vector<64x256xf32> -> vector<64x256xf32>
    %126 = arith.addf %120, %125 : vector<64x256xf32>
    %c1_145 = arith.constant 1 : index
    %c2_146 = arith.constant 2 : index
    %c0_147 = arith.constant 0 : index
    %127 = vector.load %arg11[%c1_145, %c2_146, %c0_147] : memref<10x10x256xbf16, #tpu.memory_space<vmem>>, vector<8x8x256xbf16>
    %128 = vector.shape_cast %127 : vector<8x8x256xbf16> to vector<64x256xbf16>
    %c5_148 = arith.constant 5 : index
    %c0_149 = arith.constant 0 : index
    %c0_150 = arith.constant 0 : index
    %129 = vector.load %arg6[%c5_148, %c0_149, %c0_150] : memref<9x256x256xbf16, #tpu.memory_space<vmem>>, vector<1x256x256xbf16>
    %130 = vector.shape_cast %129 : vector<1x256x256xbf16> to vector<256x256xbf16>
    %cst_151 = arith.constant dense<0.000000e+00> : vector<64x256xf32>
    %131 = tpu.matmul %128, %130, %cst_151 {dimension_numbers = #tpu.dot_dimension_numbers<[1], [0], [0], [1], [0, 0, 1, 1], [], []>} : vector<64x256xbf16>, vector<256x256xbf16>, vector<64x256xf32> -> vector<64x256xf32>
    %132 = arith.addf %126, %131 : vector<64x256xf32>
    %c2_152 = arith.constant 2 : index
    %c0_153 = arith.constant 0 : index
    %c0_154 = arith.constant 0 : index
    %133 = vector.load %arg11[%c2_152, %c0_153, %c0_154] : memref<10x10x256xbf16, #tpu.memory_space<vmem>>, vector<8x8x256xbf16>
    %134 = vector.shape_cast %133 : vector<8x8x256xbf16> to vector<64x256xbf16>
    %c6_155 = arith.constant 6 : index
    %c0_156 = arith.constant 0 : index
    %c0_157 = arith.constant 0 : index
    %135 = vector.load %arg6[%c6_155, %c0_156, %c0_157] : memref<9x256x256xbf16, #tpu.memory_space<vmem>>, vector<1x256x256xbf16>
    %136 = vector.shape_cast %135 : vector<1x256x256xbf16> to vector<256x256xbf16>
    %cst_158 = arith.constant dense<0.000000e+00> : vector<64x256xf32>
    %137 = tpu.matmul %134, %136, %cst_158 {dimension_numbers = #tpu.dot_dimension_numbers<[1], [0], [0], [1], [0, 0, 1, 1], [], []>} : vector<64x256xbf16>, vector<256x256xbf16>, vector<64x256xf32> -> vector<64x256xf32>
    %138 = arith.addf %132, %137 : vector<64x256xf32>
    %c2_159 = arith.constant 2 : index
    %c1_160 = arith.constant 1 : index
    %c0_161 = arith.constant 0 : index
    %139 = vector.load %arg11[%c2_159, %c1_160, %c0_161] : memref<10x10x256xbf16, #tpu.memory_space<vmem>>, vector<8x8x256xbf16>
    %140 = vector.shape_cast %139 : vector<8x8x256xbf16> to vector<64x256xbf16>
    %c7_162 = arith.constant 7 : index
    %c0_163 = arith.constant 0 : index
    %c0_164 = arith.constant 0 : index
    %141 = vector.load %arg6[%c7_162, %c0_163, %c0_164] : memref<9x256x256xbf16, #tpu.memory_space<vmem>>, vector<1x256x256xbf16>
    %142 = vector.shape_cast %141 : vector<1x256x256xbf16> to vector<256x256xbf16>
    %cst_165 = arith.constant dense<0.000000e+00> : vector<64x256xf32>
    %143 = tpu.matmul %140, %142, %cst_165 {dimension_numbers = #tpu.dot_dimension_numbers<[1], [0], [0], [1], [0, 0, 1, 1], [], []>} : vector<64x256xbf16>, vector<256x256xbf16>, vector<64x256xf32> -> vector<64x256xf32>
    %144 = arith.addf %138, %143 : vector<64x256xf32>
    %c2_166 = arith.constant 2 : index
    %c2_167 = arith.constant 2 : index
    %c0_168 = arith.constant 0 : index
    %145 = vector.load %arg11[%c2_166, %c2_167, %c0_168] : memref<10x10x256xbf16, #tpu.memory_space<vmem>>, vector<8x8x256xbf16>
    %146 = vector.shape_cast %145 : vector<8x8x256xbf16> to vector<64x256xbf16>
    %c8_169 = arith.constant 8 : index
    %c0_170 = arith.constant 0 : index
    %c0_171 = arith.constant 0 : index
    %147 = vector.load %arg6[%c8_169, %c0_170, %c0_171] : memref<9x256x256xbf16, #tpu.memory_space<vmem>>, vector<1x256x256xbf16>
    %148 = vector.shape_cast %147 : vector<1x256x256xbf16> to vector<256x256xbf16>
    %cst_172 = arith.constant dense<0.000000e+00> : vector<64x256xf32>
    %149 = tpu.matmul %146, %148, %cst_172 {dimension_numbers = #tpu.dot_dimension_numbers<[1], [0], [0], [1], [0, 0, 1, 1], [], []>} : vector<64x256xbf16>, vector<256x256xbf16>, vector<64x256xf32> -> vector<64x256xf32>
    %150 = arith.addf %144, %149 : vector<64x256xf32>
    %cst_173 = arith.constant 0.000000e+00 : f32
    %151 = vector.broadcast %cst_173 : f32 to vector<64x256xf32>
    %152 = arith.maximumf %150, %151 : vector<64x256xf32>
    %153 = arith.truncf %152 : vector<64x256xf32> to vector<64x256xbf16>
    %c0_174 = arith.constant 0 : index
    %c0_175 = arith.constant 0 : index
    %154 = vector.load %arg7[%c0_174, %c0_175] : memref<256x128xbf16, #tpu.memory_space<vmem>>, vector<256x128xbf16>
    %cst_176 = arith.constant dense<0.000000e+00> : vector<64x128xf32>
    %155 = tpu.matmul %153, %154, %cst_176 {dimension_numbers = #tpu.dot_dimension_numbers<[1], [0], [0], [1], [0, 0, 1, 1], [], []>} : vector<64x256xbf16>, vector<256x128xbf16>, vector<64x128xf32> -> vector<64x128xf32>
    %c0_177 = arith.constant 0 : index
    %c0_178 = arith.constant 0 : index
    %156 = vector.load %arg8[%c0_177, %c0_178] : memref<1x128xf32, #tpu.memory_space<vmem>>, vector<1x128xf32>
    %157 = vector.broadcast %156 : vector<1x128xf32> to vector<64x128xf32>
    %158 = arith.addf %155, %157 : vector<64x128xf32>
    %159 = vector.shape_cast %158 : vector<64x128xf32> to vector<8x8x128xf32>
    %160 = arith.truncf %159 : vector<8x8x128xf32> to vector<8x8x128xbf16>
    %c0_179 = arith.constant 0 : index
    %c0_180 = arith.constant 0 : index
    %c0_181 = arith.constant 0 : index
    %c0_182 = arith.constant 0 : index
    %161 = vector.load %arg9[%c0_179, %c0_180, %c0_181, %c0_182] : memref<1x8x8x128xbf16, #tpu.memory_space<vmem>>, vector<1x8x8x128xbf16>
    %162 = vector.shape_cast %161 : vector<1x8x8x128xbf16> to vector<8x8x128xbf16>
    %163 = vector.shape_cast %160 : vector<8x8x128xbf16> to vector<1x8x8x128xbf16>
    tpu.vector_store %arg9[%c0_179, %c0_180, %c0_181, %c0_182], %163 {strides = array<i32>} : memref<1x8x8x128xbf16, #tpu.memory_space<vmem>>, vector<1x8x8x128xbf16>,
    return
  }
  func.func @transform_0(%arg0: i32) -> (i32, i32, i32, i32) {
    %c0_i32 = arith.constant 0 : i32
    %c0_i32_0 = arith.constant 0 : i32
    %c0_i32_1 = arith.constant 0 : i32
    %c0_i32_2 = arith.constant 0 : i32
    return %arg0, %c0_i32, %c0_i32_0, %c0_i32_1 : i32, i32, i32, i32
  }
  func.func @transform_1(%arg0: i32) -> (i32, i32, i32, i32) {
    %c0_i32 = arith.constant 0 : i32
    %c0_i32_0 = arith.constant 0 : i32
    %c0_i32_1 = arith.constant 0 : i32
    %c0_i32_2 = arith.constant 0 : i32
    return %arg0, %c0_i32, %c0_i32_0, %c0_i32_1 : i32, i32, i32, i32
  }
  func.func @transform_2(%arg0: i32) -> (i32, i32) {
    %c0_i32 = arith.constant 0 : i32
    %c0_i32_0 = arith.constant 0 : i32
    %c0_i32_1 = arith.constant 0 : i32
    return %c0_i32, %c0_i32_0 : i32, i32
  }
  func.func @transform_3(%arg0: i32) -> (i32, i32) {
    %c0_i32 = arith.constant 0 : i32
    %c0_i32_0 = arith.constant 0 : i32
    %c0_i32_1 = arith.constant 0 : i32
    return %c0_i32, %c0_i32_0 : i32, i32
  }
  func.func @transform_4(%arg0: i32) -> (i32, i32, i32) {
    %c0_i32 = arith.constant 0 : i32
    %c0_i32_0 = arith.constant 0 : i32
    %c0_i32_1 = arith.constant 0 : i32
    %c0_i32_2 = arith.constant 0 : i32
    return %c0_i32, %c0_i32_0, %c0_i32_1 : i32, i32, i32
  }
  func.func @transform_5(%arg0: i32) -> (i32, i32, i32) {
    %c0_i32 = arith.constant 0 : i32
    %c0_i32_0 = arith.constant 0 : i32
    %c0_i32_1 = arith.constant 0 : i32
    %c0_i32_2 = arith.constant 0 : i32
    return %c0_i32, %c0_i32_0, %c0_i32_1 : i32, i32, i32
  }
  func.func @transform_6(%arg0: i32) -> (i32, i32) {
    %c0_i32 = arith.constant 0 : i32
    %c0_i32_0 = arith.constant 0 : i32
    %c0_i32_1 = arith.constant 0 : i32
    return %c0_i32, %c0_i32_0 : i32, i32
  }
  func.func @transform_7(%arg0: i32) -> (i32, i32) {
    %c0_i32 = arith.constant 0 : i32
    %c0_i32_0 = arith.constant 0 : i32
    %c0_i32_1 = arith.constant 0 : i32
    return %c0_i32, %c0_i32_0 : i32, i32
  }
  func.func @transform_8(%arg0: i32) -> (i32, i32, i32, i32) {
    %c0_i32 = arith.constant 0 : i32
    %c0_i32_0 = arith.constant 0 : i32
    %c0_i32_1 = arith.constant 0 : i32
    %c0_i32_2 = arith.constant 0 : i32
    return %arg0, %c0_i32, %c0_i32_0, %c0_i32_1 : i32, i32, i32, i32
  }
}

</mosaic_0001>

<bundles_post_ra>
// kernel: _lambda_.1
= control target key start
LH: loop header
LB: loop body
LE: loop exit
PB: predicated region body
PF: predicated region fallthrough
CT: control target
= control target key end

     0   :  { %s14085_s27 = smov 0   ;;  %s18077_s0 = inlined_call_operand.vmem [shape: f32[2,4,4,256], index: 0, kind: input, shape index: {}]   ;;  %s18078_s1 = inlined_call_operand.vmem [shape: f32[2,8,8,24], index: 1, kind: input, shape index: {}]   ;;  %s18079_s2 = inlined_call_operand.vmem [shape: bf16[64,16], index: 2, kind: input, shape index: {}]   ;;  %s18080_s3 = inlined_call_operand.vmem [shape: bf16[24,128], index: 3, kind: input, shape index: {}]   ;;  %s18081_s4 = inlined_call_operand.vmem [shape: bf16[9,384,256], index: 4, kind: input, shape index: {}]   ;;  %s18082_s5 = inlined_call_operand.vmem [shape: bf16[9,256,256], index: 5, kind: input, shape index: {}]   ;;  %s18083_s6 = inlined_call_operand.vmem [shape: bf16[256,128], index: 6, kind: input, shape index: {}]   ;;  %s18084_s7 = inlined_call_operand.vmem [shape: f32[1,128], index: 7, kind: input, shape index: {}]   ;;  %s18085_s8 = inlined_call_operand.vmem [shape: bf16[2,8,8,128], index: 8, kind: output, shape index: {}]  }
   0x1 LB: > { %s10636_s28 = sadd.s32 4294967295, %s14037_s27   ;;  %p10640_p0 = scmp.ge.s32.totalorder %s14037_s27, 1  ;;  %s14037_s27 = sphi %s14085_s27, %s18_s27  }
   0x2   : > { %p272_p1 = scmp.lt.s32.totalorder %s14037_s27, 3 }
   0x4   : > { %p273_p2 = pnand %p10640_p0, %p272_p1 }
   0x6   : > { %276 = sbr.rel (%p273_p2) target bundleno = 2215 (0x8a7), region = 52 }
   0xd   : > { %v12834_v0 = vld [vmem:[%s18080_s3] sm:$0xff]   ;;  %vm767_vm0 = vcmask 1043456   ;;  %p311_p3 = scmp.lt.s32.totalorder %s10636_s28, 1  ;;  %v12835_v1 = vld [vmem:[%s18080_s3 + $0x8] ss:$0 sps:$4 sm:$0xff]   ;;  %vm769_vm2 = vcmask 1047556  }
   0xe   : > { %12412 = vmatprep.subr.bf16.mxu1 %v12834_v0  ;;  %vm392_vm1 = vsmask.f32 7938  ;;  %v14039_v2 = vmov 0   ;;  %v859_v3 = vsel %vm767_vm0, %v12835_v1, 0  ;;  %vm394_vm3 = vsmask.f32 7954 }
   0xf   : > { %12413 = vmatpush3.bf16.msra.mxu1 %v12834_v0  ;;  %s18249_s28 = smov (!%p311_p3, %s10636_s28), 1  ;;  %590 = vmatprep.mubr.bf16.mxu0 %v14039_v2  ;;  %327 = vst [vmem:[#allocation2] sm:$0xff] %v14039_v2  ;;  %328 = vst [vmem:[#allocation2 + $0x8] sm:$0xf] %v14039_v2  ;;  %v18113_v5 = vmov 0  ;;  %vm844_vm7 = vcmask 195584  }
  0x10   : > { %329 = vst [vmem:[#allocation2 + $0xc] sm:$0x11] %v14039_v2  ;;  %330 = vst [vmem:[#allocation2 + $0x14] sm:$0x1] %v14039_v2  ;;  %12824 = vmatprep.subr.msk.bf16.mxu1 %vm767_vm0, %v12835_v1  ;;  %s12317_s11 = sshll.u32 %s18249_s28, 6  ;;  %s12316_s12 = sshll.u32 %s18249_s28, 5 }
  0x11   : > { %332 = vst [vmem:[#allocation2 + $0xd8] sm:$0xff] %v14039_v2  ;;  %333 = vst [vmem:[#allocation2 + $0xe0] sm:$0xf] %v14039_v2  ;;  %s320_s15 = scalar_lea.vmem %s18078_s1, %s12317_s11  ;;  %s315_s18 = scalar_lea.vmem %s18077_s0, %s12316_s12  ;;  %v12842_v19 = vld [vmem:[%s18079_s2] sm:$0xff]   ;;  %vm545_vm8 = vcmask 130048   ;;  %vm337_vm9 = vcmask 1040384  }
  0x12   : > { %334 = vst [vmem:[#allocation2 + $0xe4] sm:$0x11] %v14039_v2  ;;  %335 = vst [vmem:[#allocation2 + $0xec] sm:$0x1] %v14039_v2  ;;  %v820_v6 = vld [vmem:[%s320_s15] sm:$0xff]  ;;  %v821_v7 = vld [vmem:[%s320_s15 + $0x8] sm:$0xff]  ;;  %s18068_s21 = scalar_lea.vmem %s18085_s8, %s12316_s12 }
  0x13   : > { %445 = vst [vmem:[#allocation3] sm:$0xff] %v14039_v2  ;;  %446 = vst [vmem:[#allocation3 + $0x8] sm:$0x11] %v14039_v2  ;;  %12415 = vmatpush3.bf16.msra.mxu1 %v859_v3  ;;  %v828_v8 = vpack.c.bf16 %v821_v7, %v820_v6  ;;  %v12836_v9 = vld [vmem:[%s315_s18 + $0x4] ss:$8 sps:$4 sm:$0xff]   ;;  %v822_v11 = vld [vmem:[%s320_s15 + $0x10] sm:$0xff] }
  0x14   : > { %448 = vst [vmem:[#allocation3 + $0x90] sm:$0xff] %v14039_v2  ;;  %449 = vst [vmem:[#allocation3 + $0x98] sm:$0x11] %v14039_v2  ;;  %v12838_v10 = vld [vmem:[%s315_s18 + $0x14] ss:$8 sps:$4 sm:$0xff]   ;;  %v824_v17 = vld [vmem:[%s320_s15 + $0x20] sm:$0xff] }
  0x15   : > { %vm14118_vm4 = vmand %vm767_vm0, %vm392_vm1  ;;  %12416 = vmatprep.mubr.msk.bf16.mxu1 %vm844_vm7, %v828_v8  ;;  %v823_v12 = vld [vmem:[%s320_s15 + $0x18] sm:$0xff]  ;;  %v12840_v13 = vld [vmem:[%s315_s18] ss:$8 sps:$4 sm:$0xff]   ;;  %v516_v14 = vpack.c.bf16 %v12838_v10, %v12836_v9  ;;  %vm338_vm10 = vsmask.f32 256  ;;  %vm340_vm13 = vcmask 1044484  }
  0x16   : > { %vm770_vm5 = vmand %vm769_vm2, %vm394_vm3  ;;  %v829_v15 = vpack.c.bf16 %v823_v12, %v822_v11  ;;  %v12841_v16 = vld [vmem:[%s315_s18 + $0x10] ss:$8 sps:$4 sm:$0xff]   ;;  %v825_v18 = vld [vmem:[%s320_s15 + $0x28] sm:$0xff]  ;;  %v18120_v58 = vmov 0  ;;  %vm341_vm0 = vsmask.f32 4352 }
  0x17   : > { %vm14136_vm6 = vmor %vm770_vm5, %vm14118_vm4  ;;  %v830_v20 = vpack.c.bf16 %v825_v18, %v824_v17  ;;  %v826_v21 = vld [vmem:[%s320_s15 + $0x30] sm:$0xff]  ;;  %558 = vmatprep.subr.bf16.mxu0 %v516_v14  ;;  %v515_v22 = vpack.c.bf16 %v12841_v16, %v12840_v13  ;;  %v827_v23 = vld [vmem:[%s320_s15 + $0x38] sm:$0xff]  ;;  %v18123_v13 = vmov 0  ;;  %vm1175_vm5 = vsmask.f32 7440 }
  0x18   : > { %v18114_v5 = vsel %vm14136_vm6, 4294967295, %v18113_v5  ;;  %12417 = vmatmul.mubr.msk.bf16.vlgmr.msra.gmra.mrb[0].mxu1 %vm844_vm7, %v829_v15  ;;  %v12846_v24 = vld [vmem:[%s18081_s4 + $0x180] ss:$8 sps:$4 sm:$0xff]   ;;  %v12848_v25 = vld [vmem:[%s18081_s4 + $0x184] ss:$8 sps:$4 sm:$0xff]   ;;  %v831_v27 = vpack.c.bf16 %v827_v23, %v826_v21  ;;  %vm14163_vm11 = vmand %vm337_vm9, %vm338_vm10 }
  0x19   : > { %18115 = vst [vmem:[#allocation4_spill] sm:$0xff] %v18114_v5  ;;  %12420 = vmatprep.mubr.msk.bf16.mxu1 %vm844_vm7, %v830_v20  ;;  %559 = vmatpush1.bf16.msra.mxu0 %v515_v22  ;;  %v12851_v26 = vld [vmem:[%s18081_s4 + $0x194] ss:$8 sps:$4 sm:$0xff]   ;;  %v12849_v28 = vld [vmem:[%s18081_s4 + $0x190] ss:$8 sps:$4 sm:$0xff]   ;;  %vm14168_vm12 = vmand %vm337_vm9, %vm392_vm1 }
  0x1a   : > { %1738 = vmatprep.subr.bf16.mxu1 %v12848_v25  ;;  %v12854_v29 = vld [vmem:[%s18081_s4 + $0x1a4] ss:$8 sps:$4 sm:$0xff]   ;;  %v12852_v33 = vld [vmem:[%s18081_s4 + $0x1a0] ss:$8 sps:$4 sm:$0xff]   ;;  %v12857_v34 = vld [vmem:[%s18081_s4 + $0x1b4] ss:$8 sps:$4 sm:$0xff]  }
  0x1b   : > { %1739 = vmatpush1.bf16.msra.mxu1 %v12846_v24  ;;  %v12843_v32 = vld [vmem:[%s18079_s2 + $0x8] sm:$0xff]   ;;  %v12855_v35 = vld [vmem:[%s18081_s4 + $0x1b0] ss:$8 sps:$4 sm:$0xff]   ;;  %v412_v41 = vld [vmem:[#allocation2 + $0x5c] sm:$0x1] }
  0x1c   : > { %10651 = vmatmul.mubr.msk.bf16.vlgmr.msra.gmra.mrb[0].mxu0 %vm545_vm8, %v12842_v19  ;;  %1740 = vmatprep.subr.bf16.mxu1 %v12851_v26  ;;  %v12860_v36 = vld [vmem:[%s18081_s4 + $0x1c4] ss:$8 sps:$4 sm:$0xff]   ;;  %v12870_v37 = vld [vmem:[%s18081_s4 + $0x280] ss:$8 sps:$4 sm:$0xff]   ;;  %v359_v39 = vld [vmem:[#allocation2 + $0x50] sm:$0x1] }
  0x1d   : > { %600 = vmatprep.mubr.bf16.mxu0 %v14039_v2  ;;  %v12872_v38 = vld [vmem:[%s18081_s4 + $0x284] ss:$8 sps:$4 sm:$0xff]   ;;  %v360_v40 = vsel %vm14163_vm11, 0, %v359_v39  ;;  %v413_v42 = vsel %vm14168_vm12, 0, %v412_v41  ;;  %v12844_v43 = vld [vmem:[%s18079_s2 + $0x10] sm:$0xff]   ;;  %v12845_v48 = vld [vmem:[%s18079_s2 + $0x18] sm:$0xff]  }
  0x1e   : > { %361 = vst [vmem:[#allocation2 + $0x50] sm:$0x1] %v360_v40  ;;  %v12858_v44 = vld [vmem:[%s18081_s4 + $0x1c0] ss:$8 sps:$4 sm:$0xff]   ;;  %1811 = vmatprep.subr.bf16.mxu0 %v12872_v38  ;;  %414 = vst [vmem:[#allocation2 + $0x5c] sm:$0x1] %v413_v42 }
  0x1f   : > { %1741 = vmatpush1.bf16.msra.mxu1 %v12849_v28  ;;  %v12863_v45 = vld [vmem:[%s18081_s4 + $0x1d4] ss:$8 sps:$4 sm:$0xff]   ;;  %1812 = vmatpush1.bf16.msra.mxu0 %v12870_v37  ;;  %v12861_v46 = vld [vmem:[%s18081_s4 + $0x1d0] ss:$8 sps:$4 sm:$0xff]   ;;  %v12866_v47 = vld [vmem:[%s18081_s4 + $0x1e4] ss:$8 sps:$4 sm:$0xff]  }
  0x20   : > { %12421 = vmatmul.mubr.msk.bf16.gmra.mrb[4].mxu1 %vm844_vm7, %v831_v27  ;;  %1742 = vmatprep.subr.bf16.mxu1 %v12854_v29  ;;  %v12864_v49 = vld [vmem:[%s18081_s4 + $0x1e0] ss:$8 sps:$4 sm:$0xff]   ;;  %v12869_v50 = vld [vmem:[%s18081_s4 + $0x1f4] ss:$8 sps:$4 sm:$0xff]   ;;  %v12867_v51 = vld [vmem:[%s18081_s4 + $0x1f0] ss:$8 sps:$4 sm:$0xff]  }
  0x21   : > { %vm395_vm14 = vmand %vm340_vm13, %vm394_vm3  ;;  %v12875_v52 = vld [vmem:[%s18081_s4 + $0x204] ss:$8 sps:$4 sm:$0xff]   ;;  %v12873_v53 = vld [vmem:[%s18081_s4 + $0x200] ss:$8 sps:$4 sm:$0xff]   ;;  %vm1174_vm3 = vsmask.f32 3328 }
  0x22   : > { %v12878_v54 = vld [vmem:[%s18081_s4 + $0x294] ss:$8 sps:$4 sm:$0xff]   ;;  %v347_v55 = vld [vmem:[#allocation2 + $0x20] sm:$0x1]  ;;  %v400_v56 = vld [vmem:[#allocation2 + $0x2c] sm:$0x1] }
  0x23   : > { %1743 = vmatpush1.bf16.msra.mxu1 %v12852_v33  ;;  %v12876_v57 = vld [vmem:[%s18081_s4 + $0x290] ss:$8 sps:$4 sm:$0xff]   ;;  %vm14247_vm15 = vmor %vm395_vm14, %vm14168_vm12  ;;  %v348_v59 = vsel %vm14163_vm11, 0, %v347_v55  ;;  %v401_v60 = vsel %vm14168_vm12, 0, %v400_v56  ;;  %v365_v61 = vld [vmem:[#allocation2 + $0x68] sm:$0x1]  ;;  %1813 = vmatprep.subr.bf16.mxu0 %v12878_v54 }
  0x24   : > { %10652 = vmatmul.mubr.msk.bf16.gmra.mrb[4].mxu0 %vm545_vm8, %v12843_v32  ;;  %1744 = vmatprep.subr.bf16.mxu1 %v12857_v34  ;;  %v18121_v58 = vsel %vm14247_vm15, 4294967295, %v18120_v58  ;;  %v418_v62 = vld [vmem:[#allocation2 + $0x74] sm:$0x1]  ;;  %349 = vst [vmem:[#allocation2 + $0x20] sm:$0x1] %v348_v59  ;;  %v366_v63 = vsel %vm14163_vm11, 0, %v365_v61  ;;  %vm342_vm1 = vmand %vm340_vm13, %vm341_vm0 }
  0x25   : > { %610 = vmatprep.mubr.bf16.mxu0 %v14039_v2  ;;  %18122 = vst [vmem:[#allocation5_spill] sm:$0xff] %v18121_v58  ;;  %402 = vst [vmem:[#allocation2 + $0x2c] sm:$0x1] %v401_v60  ;;  %v419_v0 = vsel %vm14168_vm12, 0, %v418_v62  ;;  %v353_v1 = vld [vmem:[#allocation2 + $0x38] sm:$0x1]  ;;  %1814 = vmatpush1.bf16.msra.mxu0 %v12876_v57 }
  0x26   : > { %367 = vst [vmem:[#allocation2 + $0x68] sm:$0x1] %v366_v63  ;;  %420 = vst [vmem:[#allocation2 + $0x74] sm:$0x1] %v419_v0  ;;  %v354_v3 = vsel %vm14163_vm11, 0, %v353_v1 }
  0x27   : > { %1745 = vmatpush1.bf16.msra.mxu1 %v12855_v35  ;;  %v397_v7 = vld [vmem:[#allocation2 + $0x24] sm:$0x11]  ;;  %v12879_v8 = vld [vmem:[%s18081_s4 + $0x210] ss:$8 sps:$4 sm:$0xff]   ;;  %355 = vst [vmem:[#allocation2 + $0x38] sm:$0x1] %v354_v3  ;;  %vm14280_vm2 = vmor %vm342_vm1, %vm14163_vm11 }
  0x28   : > { %1746 = vmatprep.subr.bf16.mxu1 %v12860_v36  ;;  %v398_v9 = vsel %vm14247_vm15, 0, %v397_v7  ;;  %v12881_v10 = vld [vmem:[%s18081_s4 + $0x214] ss:$8 sps:$4 sm:$0xff]   ;;  %v12884_v11 = vld [vmem:[%s18081_s4 + $0x2a4] ss:$8 sps:$4 sm:$0xff]   ;;  %v18124_v13 = vsel %vm14280_vm2, 4294967295, %v18123_v13  ;;  %vm14405_vm7 = vmor %vm1174_vm3, %vm1175_vm5 }
  0x29   : > { %399 = vst [vmem:[#allocation2 + $0x24] sm:$0x11] %v398_v9  ;;  %v12887_v12 = vld [vmem:[%s18081_s4 + $0x224] ss:$8 sps:$4 sm:$0xff]   ;;  %18125 = vst [vmem:[#allocation6_spill] sm:$0xff] %v18124_v13  ;;  %1815 = vmatprep.subr.bf16.mxu0 %v12884_v11 }
  0x2a   : > { %v344_v14 = vld [vmem:[#allocation2 + $0x18] sm:$0x11]  ;;  %v12882_v16 = vld [vmem:[%s18081_s4 + $0x2a0] ss:$8 sps:$4 sm:$0xff]   ;;  %v424_v20 = vld [vmem:[#allocation2 + $0x8c] sm:$0x1] }
  0x2b   : > { %1747 = vmatpush1.bf16.msra.mxu1 %v12858_v44  ;;  %v345_v15 = vsel %vm14280_vm2, 0, %v344_v14  ;;  %v12885_v17 = vld [vmem:[%s18081_s4 + $0x220] ss:$8 sps:$4 sm:$0xff]   ;;  %1816 = vmatpush1.bf16.msra.mxu0 %v12882_v16  ;;  %v12888_v21 = vld [vmem:[%s18081_s4 + $0x2b0] ss:$8 sps:$4 sm:$0xff]   ;;  %v425_v24 = vsel %vm14168_vm12, 0, %v424_v20 }
  0x2c   : > { %10653 = vmatmul.mubr.msk.bf16.gmra.mrb[8].mxu0 %vm545_vm8, %v12844_v43  ;;  %1748 = vmatprep.subr.bf16.mxu1 %v12863_v45  ;;  %346 = vst [vmem:[#allocation2 + $0x18] sm:$0x11] %v345_v15  ;;  %v371_v18 = vld [vmem:[#allocation2 + $0x80] sm:$0x1]  ;;  %v12890_v22 = vld [vmem:[%s18081_s4 + $0x2b4] ss:$8 sps:$4 sm:$0xff]  }
  0x2d   : > { %620 = vmatprep.mubr.bf16.mxu0 %v14039_v2  ;;  %v372_v19 = vsel %vm14163_vm11, 0, %v371_v18  ;;  %v383_v23 = vld [vmem:[#allocation2 + $0xb0] sm:$0x1]  ;;  %426 = vst [vmem:[#allocation2 + $0x8c] sm:$0x1] %v425_v24  ;;  %1817 = vmatprep.subr.bf16.mxu0 %v12890_v22  ;;  %v14398_v22 = vld [vmem:[#allocation2] sm:$0xff] }
  0x2e   : > { %373 = vst [vmem:[#allocation2 + $0x80] sm:$0x1] %v372_v19  ;;  %v384_v25 = vsel %vm14163_vm11, 0, %v383_v23  ;;  %v403_v26 = vld [vmem:[#allocation2 + $0x3c] sm:$0x11]  ;;  %v1178_v23 = vshrl.u32 %v14398_v22, 16 }
  0x2f   : > { %1749 = vmatpush1.bf16.msra.mxu1 %v12861_v46  ;;  %v389_v27 = vld [vmem:[#allocation2 + $0xc8] sm:$0x1]  ;;  %385 = vst [vmem:[#allocation2 + $0xb0] sm:$0x1] %v384_v25  ;;  %v436_v28 = vld [vmem:[#allocation2 + $0xbc] sm:$0x1]  ;;  %1818 = vmatpush1.bf16.msra.mxu0 %v12888_v21 }
  0x30   : > { %1750 = vmatprep.subr.bf16.mxu1 %v12866_v47  ;;  %v404_v29 = vsel %vm14247_vm15, 0, %v403_v26  ;;  %v390_v32 = vsel %vm14163_vm11, 0, %v389_v27  ;;  %v437_v33 = vsel %vm14168_vm12, 0, %v436_v28  ;;  %v442_v34 = vld [vmem:[#allocation2 + $0xd4] sm:$0x1]  ;;  %v1181_v24 = vshll.u32 %v14398_v22, 16 }
  0x31   : > { %405 = vst [vmem:[#allocation2 + $0x3c] sm:$0x11] %v404_v29  ;;  %391 = vst [vmem:[#allocation2 + $0xc8] sm:$0x1] %v390_v32  ;;  %v377_v35 = vld [vmem:[#allocation2 + $0x98] sm:$0x1] }
  0x32   : > { %438 = vst [vmem:[#allocation2 + $0xbc] sm:$0x1] %v437_v33  ;;  %v443_v36 = vsel %vm14168_vm12, 0, %v442_v34  ;;  %v378_v37 = vsel %vm14163_vm11, 0, %v377_v35  ;;  %v430_v38 = vld [vmem:[#allocation2 + $0xa4] sm:$0x1] }
  0x33   : > { %1751 = vmatpush1.bf16.msra.mxu1 %v12864_v49  ;;  %v409_v39 = vld [vmem:[#allocation2 + $0x54] sm:$0x11]  ;;  %444 = vst [vmem:[#allocation2 + $0xd4] sm:$0x1] %v443_v36  ;;  %379 = vst [vmem:[#allocation2 + $0x98] sm:$0x1] %v378_v37 }
  0x34   : > { %10654 = vmatmul.mubr.msk.bf16.gmra.mrb[12].mxu0 %vm545_vm8, %v12845_v48  ;;  %1752 = vmatprep.subr.bf16.mxu1 %v12869_v50  ;;  %v350_v40 = vld [vmem:[#allocation2 + $0x30] sm:$0x11]  ;;  %v431_v41 = vsel %vm14168_vm12, 0, %v430_v38  ;;  %v410_v42 = vsel %vm14247_vm15, 0, %v409_v39  ;;  %v356_v45 = vld [vmem:[#allocation2 + $0x48] sm:$0x11] }
  0x35   : > { %1843 = vmatprep.mubr.bf16.mxu0 %v14039_v2  ;;  %v406_v2 = vld [vmem:[#allocation2 + $0x44] sm:$0x1]  ;;  %v12891_v43 = vld [vmem:[%s18081_s4 + $0x230] ss:$8 sps:$4 sm:$0xff]   ;;  %v351_v44 = vsel %vm14280_vm2, 0, %v350_v40  ;;  %v357_v31 = vsel %vm14280_vm2, 0, %v356_v45 }
  0x36   : > { %v407_v6 = vsel %vm14168_vm12, 0, %v406_v2  ;;  %432 = vst [vmem:[#allocation2 + $0xa4] sm:$0x1] %v431_v41  ;;  %411 = vst [vmem:[#allocation2 + $0x54] sm:$0x11] %v410_v42  ;;  %v1180_v28 = vrot.slane %v1178_v23, 4 }
  0x37   : > { %1753 = vmatpush1.bf16.msra.mxu1 %v12867_v51  ;;  %408 = vst [vmem:[#allocation2 + $0x44] sm:$0x1] %v407_v6  ;;  %v12893_v46 = vld [vmem:[%s18081_s4 + $0x234] ss:$8 sps:$4 sm:$0xff]   ;;  %352 = vst [vmem:[#allocation2 + $0x30] sm:$0x11] %v351_v44 }
  0x38   : > { %1754 = vmatprep.subr.bf16.mxu1 %v12875_v52  ;;  %v12894_v47 = vld [vmem:[%s18081_s4 + $0x2c0] ss:$8 sps:$4 sm:$0xff]   ;;  %358 = vst [vmem:[#allocation2 + $0x48] sm:$0x11] %v357_v31  ;;  %v12896_v48 = vld [vmem:[%s18081_s4 + $0x2c4] ss:$8 sps:$4 sm:$0xff]  }
  0x39   : > { %v12897_v49 = vld [vmem:[%s18081_s4 + $0x240] ss:$8 sps:$4 sm:$0xff]   ;;  %v12899_v50 = vld [vmem:[%s18081_s4 + $0x244] ss:$8 sps:$4 sm:$0xff]   ;;  %1819 = vmatprep.subr.bf16.mxu0 %v12896_v48  ;;  %v12902_v51 = vld [vmem:[%s18081_s4 + $0x2d4] ss:$8 sps:$4 sm:$0xff]  }
  0x3a   : > { %1820 = vmatpush1.bf16.msra.mxu0 %v12894_v47  ;;  %v12900_v52 = vld [vmem:[%s18081_s4 + $0x2d0] ss:$8 sps:$4 sm:$0xff]   ;;  %v421_v57 = vld [vmem:[#allocation2 + $0x84] sm:$0x11]  ;;  %v12914_v6 = vld [vmem:[%s18081_s4 + $0x2f4] ss:$8 sps:$4 sm:$0xff]  }
  0x3b   : > { %1755 = vmatpush1.bf16.msra.mxu1 %v12873_v53  ;;  %v12905_v53 = vld [vmem:[%s18081_s4 + $0x254] ss:$8 sps:$4 sm:$0xff]   ;;  %v415_v54 = vld [vmem:[#allocation2 + $0x6c] sm:$0x11]  ;;  %1821 = vmatprep.subr.bf16.mxu0 %v12902_v51  ;;  %v12906_v59 = vld [vmem:[%s18081_s4 + $0x2e0] ss:$8 sps:$4 sm:$0xff]  }
  0x3c   : > { %1756 = vmatprep.subr.bf16.mxu1 %v12881_v10  ;;  %v416_v55 = vsel %vm14247_vm15, 0, %v415_v54  ;;  %v12903_v56 = vld [vmem:[%s18081_s4 + $0x250] ss:$8 sps:$4 sm:$0xff]   ;;  %v362_v60 = vld [vmem:[#allocation2 + $0x60] sm:$0x11]  ;;  %v422_v61 = vsel %vm14247_vm15, 0, %v421_v57 }
  0x3d   : > { %417 = vst [vmem:[#allocation2 + $0x6c] sm:$0x11] %v416_v55  ;;  %v12908_v62 = vld [vmem:[%s18081_s4 + $0x2e4] ss:$8 sps:$4 sm:$0xff]   ;;  %v363_v63 = vsel %vm14280_vm2, 0, %v362_v60  ;;  %v1183_v29 = vrot.slane %v1181_v24, 5 }
  0x3e   : > { %1822 = vmatpush1.bf16.msra.mxu0 %v12900_v52  ;;  %v368_v0 = vld [vmem:[#allocation2 + $0x78] sm:$0x11]  ;;  %423 = vst [vmem:[#allocation2 + $0x84] sm:$0x11] %v422_v61  ;;  %364 = vst [vmem:[#allocation2 + $0x60] sm:$0x11] %v363_v63 }
  0x3f   : > { %1757 = vmatpush1.bf16.msra.mxu1 %v12879_v8  ;;  %v369_v1 = vsel %vm14280_vm2, 0, %v368_v0  ;;  %1823 = vmatprep.subr.bf16.mxu0 %v12908_v62  ;;  %v12909_v2 = vld [vmem:[%s18081_s4 + $0x260] ss:$8 sps:$4 sm:$0xff]   ;;  %v12911_v3 = vld [vmem:[%s18081_s4 + $0x264] ss:$8 sps:$4 sm:$0xff]   ;;  %v1184_v35 = vor.u32 %v1183_v29, %v1180_v28  ;;  %vm2383_vm8 = vcmask 1046532  }
  0x40   : > { %1758 = vmatprep.subr.bf16.mxu1 %v12887_v12  ;;  %370 = vst [vmem:[#allocation2 + $0x78] sm:$0x11] %v369_v1  ;;  %v12917_v7 = vld [vmem:[%s18081_s4 + $0x274] ss:$8 sps:$4 sm:$0xff]   ;;  %v12912_v8 = vld [vmem:[%s18081_s4 + $0x2f0] ss:$8 sps:$4 sm:$0xff]  }
  0x41   : > { %v374_v9 = vld [vmem:[#allocation2 + $0x90] sm:$0x11]  ;;  %v427_v10 = vld [vmem:[#allocation2 + $0x9c] sm:$0x11]  ;;  %v12920_v18 = vld [vmem:[%s18081_s4 + $0x104] ss:$8 sps:$4 sm:$0xff]  }
  0x42   : > { %1824 = vmatpush1.bf16.msra.mxu0 %v12906_v59  ;;  %v433_v11 = vld [vmem:[#allocation2 + $0xb4] sm:$0x11]  ;;  %v375_v12 = vsel %vm14280_vm2, 0, %v374_v9  ;;  %v428_v14 = vsel %vm14247_vm15, 0, %v427_v10  ;;  %v12923_v20 = vld [vmem:[%s18081_s4 + $0x4] ss:$8 sps:$4 sm:$0xff]  }
  0x43   : > { %1759 = vmatpush1.bf16.msra.mxu1 %v12885_v17  ;;  %1825 = vmatprep.subr.bf16.mxu0 %v12914_v6  ;;  %v434_v15 = vsel %vm14247_vm15, 0, %v433_v11  ;;  %v12915_v16 = vld [vmem:[%s18081_s4 + $0x270] ss:$8 sps:$4 sm:$0xff]   ;;  %376 = vst [vmem:[#allocation2 + $0x90] sm:$0x11] %v375_v12 }
  0x44   : > { %1760 = vmatprep.subr.bf16.mxu1 %v12893_v46  ;;  %429 = vst [vmem:[#allocation2 + $0x9c] sm:$0x11] %v428_v14  ;;  %v380_v17 = vld [vmem:[#allocation2 + $0xa8] sm:$0x11]  ;;  %435 = vst [vmem:[#allocation2 + $0xb4] sm:$0x11] %v434_v15 }
  0x45   : > { %v381_v19 = vsel %vm14280_vm2, 0, %v380_v17  ;;  %v1095_v21 = vld [vmem:[#allocation2 + $0x8] sm:$0xf]  ;;  %v1158_v25 = vld [vmem:[#allocation2 + $0xc] sm:$0x11] }
  0x46   : > { %1826 = vmatpush1.bf16.msra.mxu0 %v12912_v8  ;;  %382 = vst [vmem:[#allocation2 + $0xa8] sm:$0x11] %v381_v19  ;;  %v1192_v26 = vshrl.u32 %v1095_v21, 16  ;;  %v1195_v27 = vshll.u32 %v1095_v21, 16  ;;  %v1187_v34 = vshll.u32 %v1158_v25, 16 }
  0x47   : > { %1761 = vmatpush1.bf16.msra.mxu1 %v12891_v43  ;;  %2261 = vmatprep.subr.bf16.mxu0 %v12920_v18  ;;  %v14402_v36 = vld [vmem:[#allocation2 + $0x14] sm:$0x1]  ;;  %v1185_v43 = vrot.slane %v1184_v35, 4  ;;  %v1058_v59 = vld [vmem:[#allocation2 + $0x50] sm:$0xf] }
  0x48   : > { %1762 = vmatprep.subr.bf16.mxu1 %v12899_v50  ;;  %v1194_v32 = vrot.slane %v1192_v26, 4  ;;  %v1197_v33 = vrot.slane %v1195_v27, 5  ;;  %v1201_v39 = vshll.u32 %v14402_v36, 16  ;;  %v1189_v40 = vrot.slane %v1187_v34, 5  ;;  %v1061_v60 = vld [vmem:[#allocation2 + $0x5c] sm:$0x1] }
  0x49   : > { %v1064_v11 = vld [vmem:[#allocation2 + $0x68] sm:$0xf]  ;;  %v1067_v26 = vld [vmem:[#allocation2 + $0x74] sm:$0x1]  ;;  %v13931_v46 = vld [vmem:[%s18082_s5 + $0x850] ss:$8 sps:$4 sm:$0xff]  }
  0x4a   : > { %v1198_v38 = vor.u32 %v1197_v33, %v1194_v32  ;;  %v14411_v52 = vrot.slane %v1201_v39, 5 }
  0x4b   : > { %1763 = vmatpush1.bf16.msra.mxu1 %v12897_v49 }
  0x4c   : > { %1764 = vmatprep.subr.bf16.mxu1 %v12905_v53  ;;  %v14409_v51 = vrot.slane %v1198_v38, 4  ;;  %v1055_v38 = vld [vmem:[#allocation2 + $0x44] sm:$0x1] }
  0x4e   : > { %v1204_v17 = vsel %vm14405_vm7, %v14409_v51, %v14411_v52 }
  0x4f   : > { %1765 = vmatpush1.bf16.msra.mxu1 %v12903_v56  ;;  %v14415_v56 = vsel %vm14405_vm7, %v1185_v43, %v1189_v40 }
  0x50   : > { %1766 = vmatprep.subr.bf16.mxu1 %v12911_v3  ;;  %v1049_v3 = vld [vmem:[#allocation2 + $0x2c] sm:$0x1] }
  0x53   : > { %1767 = vmatpush1.bf16.msra.mxu1 %v12909_v2  ;;  %v1046_v2 = vld [vmem:[#allocation2 + $0x20] sm:$0xf] }
  0x54   : > { %1768 = vmatprep.subr.bf16.mxu1 %v12917_v7 }
  0x57   : > { %1769 = vmatpush1.bf16.msra.mxu1 %v12915_v16 }
  0x58   : > { %2188 = vmatprep.subr.bf16.mxu1 %v12923_v20 }
  0xeb   : > { %v12418_v37 = vpop.f32.mrb[0].mxu1 }
  0xec   : > { %v928_v41 = vmax.f32 %v12418_v37, 0.0  ;;  %v895_v42 = vpop.f32.mrb[1].mxu1  ;;  %v1052_v37 = vld [vmem:[#allocation2 + $0x38] sm:$0xf] }
  0xed   : > { %v926_v44 = vmax.f32 %v895_v42, 0.0  ;;  %v12419_v45 = vpop.f32.mrb[2].mxu1 }
  0xee   : > { %v12329_v31 = vpack.c.bf16 %v928_v41, %v928_v41  ;;  %v929_v47 = vmax.f32 %v12419_v45, 0.0  ;;  %v898_v48 = vpop.f32.mrb[3].mxu1 }
  0xef   : > { %v12327_v49 = vpack.c.bf16 %v926_v44, %v926_v44  ;;  %v927_v50 = vmax.f32 %v898_v48, 0.0  ;;  %v592_v55 = vpop.f32.mrb[0].mxu0  ;;  %v775_v44 = vld [vmem:[#allocation2 + $0x24] sm:$0x11] }
  0xf0   : > { %v983_v53 = vshrl.u32 %v12329_v31, 16  ;;  %v12330_v54 = vpack.c.bf16 %v929_v47, %v929_v47  ;;  %v986_v57 = vshll.u32 %v12329_v31, 16  ;;  %v594_v0 = vpop.f32.mrb[1].mxu0 }
  0xf1   : > { %v967_v61 = vshrl.u32 %v12327_v49, 16  ;;  %v970_v62 = vshll.u32 %v12327_v49, 16  ;;  %v12328_v63 = vpack.c.bf16 %v927_v50, %v927_v50  ;;  %v12319_v8 = vpack.c.bf16 %v594_v0, %v592_v55  ;;  %v596_v9 = vpop.f32.mrb[2].mxu0 }
  0xf2   : > { %v985_v1 = vrot.slane %v983_v53, 7  ;;  %v991_v6 = vshrl.u32 %v12330_v54, 16  ;;  %v994_v7 = vshll.u32 %v12330_v54, 16  ;;  %v598_v16 = vpop.f32.mrb[3].mxu0  ;;  %v772_v54 = vld [vmem:[#allocation2 + $0x18] sm:$0xff] }
  0xf3   : > { %v969_v10 = vrot.slane %v967_v61, 7  ;;  %v975_v12 = vshrl.u32 %v12328_v63, 16  ;;  %v978_v14 = vshll.u32 %v12328_v63, 16  ;;  %v12422_v15 = vpop.f32.mrb[4].mxu1  ;;  %v688_v21 = vshrl.u32 %v12319_v8, 16 }
  0xf4   : > { %v988_v18 = vor.u32 %v986_v57, %v985_v1  ;;  %v989_v19 = vrot.slane %v985_v1, 4  ;;  %v993_v20 = vrot.slane %v991_v6, 7  ;;  %v911_v23 = vpop.f32.mrb[5].mxu1  ;;  %v691_v28 = vshll.u32 %v12319_v8, 16 }
  0xf5   : > { %v972_v24 = vor.u32 %v970_v62, %v969_v10  ;;  %v973_v25 = vrot.slane %v969_v10, 4  ;;  %v977_v27 = vrot.slane %v975_v12, 7  ;;  %v12423_v29 = vpop.f32.mrb[6].mxu1  ;;  %v690_v47 = vrot.slane %v688_v21, 7  ;;  %v1082_v12 = vld [vmem:[#allocation2 + $0xb0] sm:$0xf] }
  0xf6   : > { %v1059_v32 = vsel %vm14118_vm4, %v988_v18, %v1058_v59  ;;  %v1062_v33 = vsel %vm14163_vm11, %v989_v19, %v1061_v60  ;;  %v996_v34 = vor.u32 %v994_v7, %v993_v20  ;;  %v997_v35 = vrot.slane %v993_v20, 4  ;;  %v914_v39 = vpop.f32.mrb[7].mxu1  ;;  %v1070_v20 = vld [vmem:[#allocation2 + $0x80] sm:$0xf]  ;;  %v778_v21 = vld [vmem:[#allocation2 + $0x30] sm:$0xff] }
  0xf7   : > { %1060 = vst [vmem:[#allocation2 + $0x50] sm:$0xf] %v1059_v32  ;;  %1063 = vst [vmem:[#allocation2 + $0x5c] sm:$0x1] %v1062_v33  ;;  %v1047_v40 = vsel %vm14118_vm4, %v972_v24, %v1046_v2  ;;  %v1050_v41 = vsel %vm14163_vm11, %v973_v25, %v1049_v3  ;;  %v980_v42 = vor.u32 %v978_v14, %v977_v27  ;;  %v981_v43 = vrot.slane %v977_v27, 4  ;;  %v602_v49 = vpop.f32.mrb[4].mxu0 }
  0xf8   : > { %1048 = vst [vmem:[#allocation2 + $0x20] sm:$0xf] %v1047_v40  ;;  %1051 = vst [vmem:[#allocation2 + $0x2c] sm:$0x1] %v1050_v41  ;;  %v1065_v45 = vsel %vm14118_vm4, %v996_v34, %v1064_v11  ;;  %v1068_v31 = vsel %vm14163_vm11, %v997_v35, %v1067_v26  ;;  %v932_v48 = vmax.f32 %v12422_v15, 0.0  ;;  %v930_v55 = vmax.f32 %v911_v23, 0.0 }
  0xf9   : > { %1066 = vst [vmem:[#allocation2 + $0x68] sm:$0xf] %v1065_v45  ;;  %1069 = vst [vmem:[#allocation2 + $0x74] sm:$0x1] %v1068_v31  ;;  %v1053_v50 = vsel %vm14118_vm4, %v980_v42, %v1052_v37  ;;  %v1056_v53 = vsel %vm14163_vm11, %v981_v43, %v1055_v38  ;;  %v12320_v57 = vpack.c.bf16 %v598_v16, %v596_v9  ;;  %v604_v59 = vpop.f32.mrb[5].mxu0  ;;  %v694_v61 = vrot.slane %v690_v47, 4 }
  0xfa   : > { %1054 = vst [vmem:[#allocation2 + $0x38] sm:$0xf] %v1053_v50  ;;  %1057 = vst [vmem:[#allocation2 + $0x44] sm:$0x1] %v1056_v53  ;;  %v693_v60 = vor.u32 %v691_v28, %v690_v47  ;;  %v12333_v62 = vpack.c.bf16 %v932_v48, %v932_v48  ;;  %v933_v63 = vmax.f32 %v12423_v29, 0.0  ;;  %v606_v0 = vpop.f32.mrb[6].mxu0  ;;  %v12331_v1 = vpack.c.bf16 %v930_v55, %v930_v55 }
  0xfb   : > { %v696_v2 = vshrl.u32 %v12320_v57, 16  ;;  %v699_v3 = vshll.u32 %v12320_v57, 16  ;;  %v931_v6 = vmax.f32 %v914_v39, 0.0  ;;  %v608_v7 = vpop.f32.mrb[7].mxu0  ;;  %v776_v9 = vsel %vm14280_vm2, %v694_v61, %v775_v44  ;;  %v781_v23 = vld [vmem:[#allocation2 + $0x3c] sm:$0x11] }
  0xfc   : > { %v14439_v8 = vsel %vm14136_vm6, %v693_v60, %v772_v54  ;;  %v1015_v10 = vshrl.u32 %v12333_v62, 16  ;;  %v1018_v11 = vshll.u32 %v12333_v62, 16  ;;  %777 = vst [vmem:[#allocation2 + $0x24] sm:$0x11] %v776_v9  ;;  %v999_v14 = vshrl.u32 %v12331_v1, 16 }
  0xfd   : > { %774 = vst [vmem:[#allocation2 + $0x18] sm:$0xff] %v14439_v8  ;;  %v1002_v15 = vshll.u32 %v12331_v1, 16  ;;  %v698_v16 = vrot.slane %v696_v2, 7  ;;  %v12334_v18 = vpack.c.bf16 %v933_v63, %v933_v63  ;;  %v12332_v24 = vpack.c.bf16 %v931_v6, %v931_v6  ;;  %v1085_v27 = vld [vmem:[#allocation2 + $0xbc] sm:$0x1] }
  0xfe   : > { %v1017_v19 = vrot.slane %v1015_v10, 7  ;;  %v12321_v25 = vpack.c.bf16 %v604_v59, %v602_v49  ;;  %v14444_v26 = vpack.c.bf16 %v608_v7, %v606_v0  ;;  %v1001_v28 = vrot.slane %v999_v14, 7  ;;  %v1073_v37 = vld [vmem:[#allocation2 + $0x8c] sm:$0x1]  ;;  %v1088_v45 = vld [vmem:[#allocation2 + $0xc8] sm:$0xf] }
  0xff   : > { %v701_v29 = vor.u32 %v699_v3, %v698_v16  ;;  %v702_v32 = vrot.slane %v698_v16, 4  ;;  %v1023_v33 = vshrl.u32 %v12334_v18, 16  ;;  %v1026_v38 = vshll.u32 %v12334_v18, 16  ;;  %v612_v40 = vpop.f32.mrb[8].mxu0  ;;  %v1091_v50 = vld [vmem:[#allocation2 + $0xd4] sm:$0x1] }
 0x100   : > { %v1020_v34 = vor.u32 %v1018_v11, %v1017_v19  ;;  %v1021_v35 = vrot.slane %v1017_v19, 4  ;;  %v1007_v39 = vshrl.u32 %v12332_v24, 16  ;;  %v1004_v41 = vor.u32 %v1002_v15, %v1001_v28  ;;  %v614_v31 = vpop.f32.mrb[9].mxu0  ;;  %v1079_v60 = vld [vmem:[#allocation2 + $0xa4] sm:$0x1]  ;;  %v784_v16 = vld [vmem:[#allocation2 + $0x48] sm:$0xff] }
 0x101   : > { %v1005_v42 = vrot.slane %v1001_v28, 4  ;;  %v14448_v43 = vsel %vm14136_vm6, %v701_v29, %v778_v21  ;;  %v782_v44 = vsel %vm14280_vm2, %v702_v32, %v781_v23  ;;  %v1025_v49 = vrot.slane %v1023_v33, 7  ;;  %v616_v54 = vpop.f32.mrb[10].mxu0  ;;  %v1076_v2 = vld [vmem:[#allocation2 + $0x98] sm:$0xf] }
 0x102   : > { %v1083_v47 = vsel %vm14118_vm4, %v1020_v34, %v1082_v12  ;;  %v1086_v48 = vsel %vm14163_vm11, %v1021_v35, %v1085_v27  ;;  %780 = vst [vmem:[#allocation2 + $0x30] sm:$0xff] %v14448_v43  ;;  %783 = vst [vmem:[#allocation2 + $0x3c] sm:$0x11] %v782_v44  ;;  %v1009_v53 = vrot.slane %v1007_v39, 7  ;;  %v1071_v55 = vsel %vm14118_vm4, %v1004_v41, %v1070_v20  ;;  %v618_v62 = vpop.f32.mrb[11].mxu0 }
 0x103   : > { %1084 = vst [vmem:[#allocation2 + $0xb0] sm:$0xf] %v1083_v47  ;;  %1087 = vst [vmem:[#allocation2 + $0xbc] sm:$0x1] %v1086_v48  ;;  %v1074_v57 = vsel %vm14163_vm11, %v1005_v42, %v1073_v37  ;;  %v1010_v59 = vshll.u32 %v12332_v24, 16  ;;  %v704_v61 = vshrl.u32 %v12321_v25, 16  ;;  %v1028_v63 = vor.u32 %v1026_v38, %v1025_v49 }
 0x104   : > { %1072 = vst [vmem:[#allocation2 + $0x80] sm:$0xf] %v1071_v55  ;;  %1075 = vst [vmem:[#allocation2 + $0x8c] sm:$0x1] %v1074_v57  ;;  %v1029_v0 = vrot.slane %v1025_v49, 4  ;;  %v1013_v1 = vrot.slane %v1009_v53, 4  ;;  %v12323_v19 = vpack.c.bf16 %v614_v31, %v612_v40  ;;  %v12324_v29 = vpack.c.bf16 %v618_v62, %v616_v54 }
 0x105   : > { %v707_v3 = vshll.u32 %v12321_v25, 16  ;;  %v1012_v6 = vor.u32 %v1010_v59, %v1009_v53  ;;  %v706_v7 = vrot.slane %v704_v61, 7  ;;  %v712_v9 = vshrl.u32 %v14444_v26, 16  ;;  %v14463_v11 = vld [vmem:[#allocation2 + $0x20] sm:$0xf]  ;;  %v796_v47 = vld [vmem:[#allocation2 + $0x78] sm:$0xff] }
 0x106   : > { %v715_v10 = vshll.u32 %v14444_v26, 16  ;;  %v1089_v12 = vsel %vm14118_vm4, %v1028_v63, %v1088_v45  ;;  %v1092_v14 = vsel %vm14163_vm11, %v1029_v0, %v1091_v50  ;;  %v1080_v15 = vsel %vm14163_vm11, %v1013_v1, %v1079_v60  ;;  %v787_v18 = vld [vmem:[#allocation2 + $0x54] sm:$0x11]  ;;  %v793_v25 = vld [vmem:[#allocation2 + $0x6c] sm:$0x11]  ;;  %v790_v26 = vld [vmem:[#allocation2 + $0x60] sm:$0xff] }
 0x107   : > { %1090 = vst [vmem:[#allocation2 + $0xc8] sm:$0xf] %v1089_v12  ;;  %1093 = vst [vmem:[#allocation2 + $0xd4] sm:$0x1] %v1092_v14  ;;  %v1077_v20 = vsel %vm14118_vm4, %v1012_v6, %v1076_v2  ;;  %v709_v21 = vor.u32 %v707_v3, %v706_v7  ;;  %v710_v23 = vrot.slane %v706_v7, 4  ;;  %v714_v24 = vrot.slane %v712_v9, 7 }
 0x108   : > { %1081 = vst [vmem:[#allocation2 + $0xa4] sm:$0x1] %v1080_v15  ;;  %1078 = vst [vmem:[#allocation2 + $0x98] sm:$0xf] %v1077_v20  ;;  %v720_v27 = vshrl.u32 %v12323_v19, 16  ;;  %v723_v28 = vshll.u32 %v12323_v19, 16 }
 0x109   : > { %v622_v30 = vpop.f32.mrb[12].mxu0  ;;  %v1220_v32 = vshrl.u32 %v14463_v11, 16  ;;  %v14476_v33 = vsel %vm14136_vm6, %v709_v21, %v784_v16  ;;  %v788_v4 = vsel %vm14280_vm2, %v710_v23, %v787_v18  ;;  %v717_v34 = vor.u32 %v715_v10, %v714_v24  ;;  %v14481_v42 = vld [vmem:[#allocation2 + $0x2c] sm:$0x1]  ;;  %v799_v48 = vld [vmem:[#allocation2 + $0x84] sm:$0x11] }
 0x10a   : > { %v718_v35 = vrot.slane %v714_v24, 4  ;;  %v624_v37 = vpop.f32.mrb[13].mxu0  ;;  %786 = vst [vmem:[#allocation2 + $0x48] sm:$0xff] %v14476_v33  ;;  %789 = vst [vmem:[#allocation2 + $0x54] sm:$0x11] %v788_v4  ;;  %v722_v38 = vrot.slane %v720_v27, 7 }
 0x10b   : > { %v728_v39 = vshrl.u32 %v12324_v29, 16  ;;  %v731_v40 = vshll.u32 %v12324_v29, 16  ;;  %v12325_v41 = vpack.c.bf16 %v624_v37, %v622_v30  ;;  %v14483_v44 = vpop.f32.mrb[14].mxu0  ;;  %v14487_v45 = vsel %vm14136_vm6, %v717_v34, %v790_v26  ;;  %v802_v49 = vld [vmem:[#allocation2 + $0x90] sm:$0xff]  ;;  %v805_v59 = vld [vmem:[#allocation2 + $0x9c] sm:$0x11] }
 0x10c   : > { %v794_v31 = vsel %vm14280_vm2, %v718_v35, %v793_v25  ;;  %v1222_v50 = vrot.slane %v1220_v32, 4  ;;  %v1223_v53 = vshll.u32 %v14463_v11, 16  ;;  %792 = vst [vmem:[#allocation2 + $0x60] sm:$0xff] %v14487_v45  ;;  %v725_v54 = vor.u32 %v723_v28, %v722_v38  ;;  %v14493_v61 = vpop.f32.mrb[15].mxu0  ;;  %v14496_v1 = vld [vmem:[#allocation2 + $0x24] sm:$0x11] }
 0x10d   : > { %795 = vst [vmem:[#allocation2 + $0x6c] sm:$0x11] %v794_v31  ;;  %v726_v55 = vrot.slane %v722_v38, 4  ;;  %v730_v57 = vrot.slane %v728_v39, 7  ;;  %v736_v60 = vshrl.u32 %v12325_v41, 16  ;;  %v739_v62 = vshll.u32 %v12325_v41, 16 }
 0x10e   : > { %v1225_v63 = vrot.slane %v1223_v53, 5  ;;  %v1229_v0 = vshll.u32 %v14481_v42, 16  ;;  %v1206_v2 = vshrl.u32 %v14439_v8, 16  ;;  %v14501_v3 = vsel %vm14136_vm6, %v725_v54, %v796_v47  ;;  %v14505_v10 = vld [vmem:[#allocation2 + $0x38] sm:$0xf]  ;;  %v808_v23 = vld [vmem:[#allocation2 + $0xa8] sm:$0xff] }
 0x10f   : > { %v800_v6 = vsel %vm14280_vm2, %v726_v55, %v799_v48  ;;  %v733_v7 = vor.u32 %v731_v40, %v730_v57  ;;  %v734_v9 = vrot.slane %v730_v57, 4  ;;  %v14507_v12 = vld [vmem:[#allocation2 + $0x8] sm:$0xe]  ;;  %798 = vst [vmem:[#allocation2 + $0x78] sm:$0xff] %v14501_v3  ;;  %v738_v14 = vrot.slane %v736_v60, 7 }
 0x110   : > { %801 = vst [vmem:[#allocation2 + $0x84] sm:$0x11] %v800_v6  ;;  %v1226_v15 = vor.u32 %v1225_v63, %v1222_v50  ;;  %v1231_v16 = vrot.slane %v1229_v0, 5  ;;  %v1208_v18 = vrot.slane %v1206_v2, 4  ;;  %v14510_v19 = vld [vmem:[#allocation2 + $0x44] sm:$0x1] }
 0x111   : > { %v14514_v20 = vsel %vm14136_vm6, %v733_v7, %v802_v49  ;;  %v806_v21 = vsel %vm14280_vm2, %v734_v9, %v805_v59  ;;  %v811_v24 = vld [vmem:[#allocation2 + $0xb4] sm:$0x11]  ;;  %v1209_v25 = vshll.u32 %v14439_v8, 16  ;;  %v1215_v26 = vshll.u32 %v14496_v1, 16  ;;  %v14521_v30 = vld [vmem:[#allocation2 + $0x50] sm:$0xf] }
 0x112   : > { %804 = vst [vmem:[#allocation2 + $0x90] sm:$0xff] %v14514_v20  ;;  %807 = vst [vmem:[#allocation2 + $0x9c] sm:$0x11] %v806_v21  ;;  %v741_v27 = vor.u32 %v739_v62, %v738_v14  ;;  %v742_v28 = vrot.slane %v738_v14, 4  ;;  %v1227_v29 = vrot.slane %v1226_v15, 4  ;;  %v1248_v32 = vshrl.u32 %v14505_v10, 16 }
 0x113   : > { %v1211_v4 = vrot.slane %v1209_v25, 5  ;;  %v14524_v34 = vld [vmem:[#allocation2 + $0x5c] sm:$0x1]  ;;  %v1251_v35 = vshll.u32 %v14505_v10, 16  ;;  %v1257_v37 = vshll.u32 %v14510_v19, 16  ;;  %v1217_v50 = vrot.slane %v1215_v26, 5 }
 0x114   : > { %v14531_v39 = vsel %vm14136_vm6, %v741_v27, %v808_v23  ;;  %v812_v40 = vsel %vm14280_vm2, %v742_v28, %v811_v24  ;;  %v12918_v41 = vld [vmem:[%s18081_s4 + $0x100] ss:$8 sps:$4 sm:$0xff]   ;;  %v1232_v31 = vsel %vm14405_vm7, %v1227_v29, %v1231_v16  ;;  %v1250_v47 = vrot.slane %v1248_v32, 4  ;;  %v12926_v53 = vld [vmem:[%s18081_s4 + $0x114] ss:$8 sps:$4 sm:$0xff]  }
 0x115   : > { %810 = vst [vmem:[#allocation2 + $0xa8] sm:$0xff] %v14531_v39  ;;  %813 = vst [vmem:[#allocation2 + $0xb4] sm:$0x11] %v812_v40  ;;  %v10727_v48 = vcombine.low %v1204_v17, %v1232_v31  ;;  %v1212_v49 = vor.u32 %v1211_v4, %v1208_v18  ;;  %v1253_v54 = vrot.slane %v1251_v35, 5  ;;  %v14549_v55 = vld [vmem:[#allocation2 + $0x3c] sm:$0x11] }
 0x116   : > { %v12924_v57 = vld [vmem:[%s18081_s4 + $0x110] ss:$8 sps:$4 sm:$0xff]   ;;  %v1276_v59 = vshrl.u32 %v14521_v30, 16  ;;  %v1279_v60 = vshll.u32 %v14521_v30, 16  ;;  %v1285_v51 = vshll.u32 %v14524_v34, 16  ;;  %v1234_v52 = vshrl.u32 %v14448_v43, 16 }
 0x117   : > { %1844 = vmatmul.mubr.bf16.vlgmr.msra.gmra.mrb[16].mxu0 %v10727_v48  ;;  %v1213_v17 = vrot.slane %v1212_v49, 4  ;;  %v12932_v62 = vld [vmem:[%s18081_s4 + $0x124] ss:$8 sps:$4 sm:$0xff]   ;;  %v1254_v63 = vor.u32 %v1253_v54, %v1250_v47  ;;  %v1259_v0 = vrot.slane %v1257_v37, 5  ;;  %v1237_v2 = vshll.u32 %v14448_v43, 16 }
 0x118   : > { %2262 = vmatpush1.bf16.msra.mxu0 %v12918_v41  ;;  %1853 = vmatprep.mubr.bf16.mxu0 %v14398_v22  ;;  %v1278_v6 = vrot.slane %v1276_v59, 4  ;;  %v1281_v7 = vrot.slane %v1279_v60, 5  ;;  %v14563_v9 = vld [vmem:[#allocation2 + $0x54] sm:$0x11]  ;;  %v1236_v14 = vrot.slane %v1234_v52, 4  ;;  %v1243_v15 = vshll.u32 %v14549_v55, 16 }
 0x119   : > { %v1218_v16 = vsel %vm14405_vm7, %v1213_v17, %v1217_v50  ;;  %2263 = vmatprep.subr.bf16.mxu0 %v12926_v53  ;;  %v1255_v18 = vrot.slane %v1254_v63, 4  ;;  %v1287_v21 = vrot.slane %v1285_v51, 5  ;;  %v1239_v23 = vrot.slane %v1237_v2, 5  ;;  %v14568_v24 = vld [vmem:[#allocation2 + $0x68] sm:$0xf] }
 0x11a   : > { %v10725_v25 = vcombine.low %v14415_v56, %v1218_v16  ;;  %v10726_v26 = vcombine.high %v14415_v56, %v1218_v16  ;;  %v12921_v27 = vld [vmem:[%s18081_s4] ss:$8 sps:$4 sm:$0xff]   ;;  %v1282_v28 = vor.u32 %v1281_v7, %v1278_v6  ;;  %v1262_v29 = vshrl.u32 %v14476_v33, 16  ;;  %v14576_v32 = vld [vmem:[#allocation2 + $0x74] sm:$0x1] }
 0x11b   : > { %v12929_v4 = vld [vmem:[%s18081_s4 + $0x14] ss:$8 sps:$4 sm:$0xff]   ;;  %v1260_v35 = vsel %vm14405_vm7, %v1255_v18, %v1259_v0  ;;  %v1240_v37 = vor.u32 %v1239_v23, %v1236_v14  ;;  %v1265_v40 = vshll.u32 %v14476_v33, 16  ;;  %v1271_v56 = vshll.u32 %v14563_v9, 16  ;;  %v14585_v41 = vld [vmem:[#allocation2 + $0x80] sm:$0xf] }
 0x11c   : > { %1770 = vmatprep.mubr.bf16.mxu1 %v10726_v26  ;;  %2264 = vmatpush1.bf16.msra.mxu0 %v12924_v57  ;;  %v12927_v31 = vld [vmem:[%s18081_s4 + $0x10] ss:$8 sps:$4 sm:$0xff]   ;;  %v12930_v47 = vld [vmem:[%s18081_s4 + $0x120] ss:$8 sps:$4 sm:$0xff]   ;;  %v1283_v48 = vrot.slane %v1282_v28, 4  ;;  %v1264_v49 = vrot.slane %v1262_v29, 4 }
 0x11d   : > { %v1304_v50 = vshrl.u32 %v14568_v24, 16  ;;  %v1307_v53 = vshll.u32 %v14568_v24, 16  ;;  %1771 = vmatmul.mubr.bf16.vlgmr.msra.gmra.mrb[8].mxu1 %v10725_v25  ;;  %2265 = vmatprep.subr.bf16.mxu0 %v12932_v62  ;;  %v1241_v54 = vrot.slane %v1240_v37, 4  ;;  %v1245_v59 = vrot.slane %v1243_v15, 5  ;;  %v12938_v57 = vld [vmem:[%s18081_s4 + $0x134] ss:$8 sps:$4 sm:$0xff]  }
 0x11e   : > { %v1267_v60 = vrot.slane %v1265_v40, 5  ;;  %v1313_v51 = vshll.u32 %v14576_v32, 16  ;;  %2189 = vmatpush1.bf16.msra.mxu1 %v12921_v27  ;;  %v1288_v52 = vsel %vm14405_vm7, %v1283_v48, %v1287_v21  ;;  %v12935_v17 = vld [vmem:[%s18081_s4 + $0x24] ss:$8 sps:$4 sm:$0xff]   ;;  %v1332_v62 = vshrl.u32 %v14585_v41, 16 }
 0x11f   : > { %v1306_v63 = vrot.slane %v1304_v50, 4  ;;  %v1309_v0 = vrot.slane %v1307_v53, 5  ;;  %2190 = vmatprep.subr.bf16.mxu1 %v12929_v4  ;;  %v10730_v2 = vcombine.low %v1260_v35, %v1288_v52  ;;  %v1273_v7 = vrot.slane %v1271_v56, 5  ;;  %v14605_v14 = vld [vmem:[#allocation2 + $0x8c] sm:$0x1] }
 0x120   : > { %v1268_v6 = vor.u32 %v1267_v60, %v1264_v49  ;;  %v14607_v15 = vld [vmem:[#allocation2 + $0x6c] sm:$0x11]  ;;  %2266 = vmatpush1.bf16.msra.mxu0 %v12930_v47  ;;  %v12933_v16 = vld [vmem:[%s18081_s4 + $0x20] ss:$8 sps:$4 sm:$0xff]   ;;  %v1334_v23 = vrot.slane %v1332_v62, 4  ;;  %v1335_v25 = vshll.u32 %v14585_v41, 16  ;;  %v1246_v27 = vsel %vm14405_vm7, %v1241_v54, %v1245_v59 }
 0x121   : > { %v12936_v18 = vld [vmem:[%s18081_s4 + $0x130] ss:$8 sps:$4 sm:$0xff]   ;;  %v1310_v21 = vor.u32 %v1309_v0, %v1306_v63  ;;  %v1341_v26 = vshll.u32 %v14605_v14, 16  ;;  %1854 = vmatmul.mubr.bf16.gmra.mrb[20].mxu0 %v10730_v2  ;;  %2267 = vmatprep.subr.bf16.mxu0 %v12938_v57  ;;  %v12941_v29 = vld [vmem:[%s18081_s4 + $0x34] ss:$8 sps:$4 sm:$0xff]   ;;  %v1290_v35 = vshrl.u32 %v14487_v45, 16 }
 0x122   : > { %v1269_v28 = vrot.slane %v1268_v6, 4  ;;  %v12944_v4 = vld [vmem:[%s18081_s4 + $0x144] ss:$8 sps:$4 sm:$0xff]   ;;  %v1293_v37 = vshll.u32 %v14487_v45, 16  ;;  %2191 = vmatpush1.bf16.msra.mxu1 %v12927_v31  ;;  %1863 = vmatprep.mubr.bf16.mxu0 %v14398_v22  ;;  %v12942_v40 = vld [vmem:[%s18081_s4 + $0x140] ss:$8 sps:$4 sm:$0xff]  }
 0x123   : > { %v1315_v56 = vrot.slane %v1313_v51, 5  ;;  %v1337_v47 = vrot.slane %v1335_v25, 5  ;;  %v14631_v48 = vld [vmem:[#allocation2 + $0x84] sm:$0x11]  ;;  %v1299_v49 = vshll.u32 %v14607_v15, 16  ;;  %v1318_v50 = vshrl.u32 %v14501_v3, 16  ;;  %2192 = vmatprep.subr.bf16.mxu1 %v12935_v17 }
 0x124   : > { %v1274_v53 = vsel %vm14405_vm7, %v1269_v28, %v1273_v7  ;;  %v1311_v54 = vrot.slane %v1310_v21, 4  ;;  %v1292_v31 = vrot.slane %v1290_v35, 4  ;;  %v1295_v59 = vrot.slane %v1293_v37, 5  ;;  %v14637_v60 = vld [vmem:[#allocation2 + $0x98] sm:$0xf]  ;;  %2268 = vmatpush1.bf16.msra.mxu0 %v12936_v18 }
 0x125   : > { %v10729_v57 = vcombine.high %v1246_v27, %v1274_v53  ;;  %v10728_v52 = vcombine.low %v1246_v27, %v1274_v53  ;;  %v12939_v51 = vld [vmem:[%s18081_s4 + $0x30] ss:$8 sps:$4 sm:$0xff]   ;;  %v1338_v63 = vor.u32 %v1337_v47, %v1334_v23  ;;  %v1343_v0 = vrot.slane %v1341_v26, 5  ;;  %2269 = vmatprep.subr.bf16.mxu0 %v12944_v4  ;;  %v12947_v21 = vld [vmem:[%s18081_s4 + $0x44] ss:$8 sps:$4 sm:$0xff]  }
 0x126   : > { %v14642_v62 = vld [vmem:[#allocation2 + $0xb0] sm:$0xf]  ;;  %v1296_v2 = vor.u32 %v1295_v59, %v1292_v31  ;;  %v1320_v6 = vrot.slane %v1318_v50, 4  ;;  %v1321_v17 = vshll.u32 %v14501_v3, 16  ;;  %v1327_v7 = vshll.u32 %v14631_v48, 16  ;;  %2193 = vmatpush1.bf16.msra.mxu1 %v12933_v16 }
 0x127   : > { %v12950_v18 = vld [vmem:[%s18081_s4 + $0x154] ss:$8 sps:$4 sm:$0xff]   ;;  %1780 = vmatprep.mubr.bf16.mxu1 %v10729_v57  ;;  %v1339_v23 = vrot.slane %v1338_v63, 4  ;;  %v1301_v25 = vrot.slane %v1299_v49, 5  ;;  %v12948_v26 = vld [vmem:[%s18081_s4 + $0x150] ss:$8 sps:$4 sm:$0xff]   ;;  %2194 = vmatprep.subr.bf16.mxu1 %v12941_v29  ;;  %v1316_v4 = vsel %vm14405_vm7, %v1311_v54, %v1315_v56 }
 0x128   : > { %v1360_v27 = vshrl.u32 %v14637_v60, 16  ;;  %v1363_v28 = vshll.u32 %v14637_v60, 16  ;;  %1781 = vmatmul.mubr.bf16.gmra.mrb[12].mxu1 %v10728_v52  ;;  %v1297_v35 = vrot.slane %v1296_v2, 4  ;;  %v1323_v37 = vrot.slane %v1321_v17, 5  ;;  %v12956_v16 = vld [vmem:[%s18081_s4 + $0x164] ss:$8 sps:$4 sm:$0xff]   ;;  %2270 = vmatpush1.bf16.msra.mxu0 %v12942_v40 }
 0x129   : > { %v14662_v47 = vld [vmem:[#allocation2 + $0xa4] sm:$0x1]  ;;  %v1388_v49 = vshrl.u32 %v14642_v62, 16  ;;  %v1344_v50 = vsel %vm14405_vm7, %v1339_v23, %v1343_v0  ;;  %v12945_v29 = vld [vmem:[%s18081_s4 + $0x40] ss:$8 sps:$4 sm:$0xff]   ;;  %v1329_v52 = vrot.slane %v1327_v7, 5  ;;  %2271 = vmatprep.subr.bf16.mxu0 %v12950_v18 }
 0x12a   : > { %v14670_v53 = vld [vmem:[#allocation2 + $0xbc] sm:$0x1]  ;;  %v1362_v56 = vrot.slane %v1360_v27, 4  ;;  %v1365_v54 = vrot.slane %v1363_v28, 5  ;;  %v1369_v31 = vshll.u32 %v14662_v47, 16  ;;  %v10733_v59 = vcombine.low %v1316_v4, %v1344_v50  ;;  %2195 = vmatpush1.bf16.msra.mxu1 %v12939_v51 }
 0x12b   : > { %v1324_v57 = vor.u32 %v1323_v37, %v1320_v6  ;;  %v12953_v63 = vld [vmem:[%s18081_s4 + $0x54] ss:$8 sps:$4 sm:$0xff]   ;;  %v1390_v0 = vrot.slane %v1388_v49, 4  ;;  %v12954_v2 = vld [vmem:[%s18081_s4 + $0x160] ss:$8 sps:$4 sm:$0xff]   ;;  %v1391_v23 = vshll.u32 %v14642_v62, 16  ;;  %v1302_v18 = vsel %vm14405_vm7, %v1297_v35, %v1301_v25  ;;  %2196 = vmatprep.subr.bf16.mxu1 %v12947_v21 }
 0x12c   : > { %v14676_v40 = vld [vmem:[#allocation2 + $0x9c] sm:$0x11]  ;;  %v1366_v17 = vor.u32 %v1365_v54, %v1362_v56  ;;  %v1397_v27 = vshll.u32 %v14670_v53, 16  ;;  %v14683_v6 = vld [vmem:[#allocation2 + $0xb4] sm:$0x11]  ;;  %v1346_v7 = vshrl.u32 %v14514_v20, 16  ;;  %1864 = vmatmul.mubr.bf16.gmra.mrb[24].mxu0 %v10733_v59 }
 0x12d   : > { %v1325_v28 = vrot.slane %v1324_v57, 4  ;;  %v1349_v51 = vshll.u32 %v14514_v20, 16  ;;  %v1374_v4 = vshrl.u32 %v14531_v39, 16  ;;  %vm2382_vm4 = vcmask 1042432   ;;  %2272 = vmatpush1.bf16.msra.mxu0 %v12948_v26  ;;  %v12951_v37 = vld [vmem:[%s18081_s4 + $0x50] ss:$8 sps:$4 sm:$0xff]   ;;  %1873 = vmatprep.mubr.bf16.mxu0 %v14398_v22 }
 0x12e   : > { %v1367_v49 = vrot.slane %v1366_v17, 4  ;;  %v1371_v50 = vrot.slane %v1369_v31, 5  ;;  %v1393_v56 = vrot.slane %v1391_v23, 5  ;;  %v1348_v54 = vrot.slane %v1346_v7, 4  ;;  %2273 = vmatprep.subr.bf16.mxu0 %v12956_v16  ;;  %v12962_v26 = vld [vmem:[%s18081_s4 + $0x174] ss:$8 sps:$4 sm:$0xff]   ;;  %2197 = vmatpush1.bf16.msra.mxu1 %v12945_v29  ;;  %vm14753_vm9 = vmor %vm2382_vm4, %vm2383_vm8 }
 0x12f   : > { %v1330_v21 = vsel %vm14405_vm7, %v1325_v28, %v1329_v52  ;;  %v1351_v25 = vrot.slane %v1349_v51, 5  ;;  %v1355_v35 = vshll.u32 %v14676_v40, 16  ;;  %v2391_v59 = vrot.slane %v14402_v36, 5  ;;  %v12959_v17 = vld [vmem:[%s18081_s4 + $0x64] ss:$8 sps:$4 sm:$0xff]   ;;  %2198 = vmatprep.subr.bf16.mxu1 %v12953_v63 }
 0x130   : > { %v10732_v57 = vcombine.high %v1302_v18, %v1330_v21  ;;  %v10731_v38 = vcombine.low %v1302_v18, %v1330_v21  ;;  %v1394_v22 = vor.u32 %v1393_v56, %v1390_v0  ;;  %v1399_v31 = vrot.slane %v1397_v27, 5  ;;  %v12960_v16 = vld [vmem:[%s18081_s4 + $0x170] ss:$8 sps:$4 sm:$0xff]   ;;  %v12957_v27 = vld [vmem:[%s18081_s4 + $0x60] ss:$8 sps:$4 sm:$0xff]  }
 0x131   : > { %v1352_v52 = vor.u32 %v1351_v25, %v1348_v54  ;;  %v1376_v23 = vrot.slane %v1374_v4, 4  ;;  %v1377_v7 = vshll.u32 %v14531_v39, 16  ;;  %v1383_v28 = vshll.u32 %v14683_v6, 16  ;;  %2274 = vmatpush1.bf16.msra.mxu0 %v12954_v2  ;;  %v12968_v63 = vld [vmem:[%s18081_s4 + $0x304] ss:$8 sps:$4 sm:$0xff]  }
 0x132   : > { %1790 = vmatprep.mubr.bf16.mxu1 %v10732_v57  ;;  %v1372_v29 = vsel %vm14405_vm7, %v1367_v49, %v1371_v50  ;;  %v1395_v0 = vrot.slane %v1394_v22, 4  ;;  %v1357_v51 = vrot.slane %v1355_v35, 5  ;;  %2275 = vmatprep.subr.bf16.mxu0 %v12962_v26  ;;  %v386_v56 = vld [vmem:[#allocation2 + $0xc0] sm:$0x11]  ;;  %v10789_v2 = vcombine.high %v14448_v43, %v14476_v33  ;;  %v439_v54 = vld [vmem:[#allocation2 + $0xcc] sm:$0x11] }
 0x133   : > { %1791 = vmatmul.mubr.bf16.gmra.mrb[16].mxu1 %v10731_v38  ;;  %v1353_v18 = vrot.slane %v1352_v52, 4  ;;  %v1379_v4 = vrot.slane %v1377_v7, 5  ;;  %v1385_v57 = vrot.slane %v1383_v28, 5  ;;  %v12965_v38 = vld [vmem:[%s18081_s4 + $0x74] ss:$8 sps:$4 sm:$0xff]   ;;  %v440_v7 = vsel %vm14247_vm15, 0, %v439_v54 }
 0x134   : > { %2199 = vmatpush1.bf16.msra.mxu1 %v12951_v37  ;;  %v1400_v49 = vsel %vm14405_vm7, %v1395_v0, %v1399_v31  ;;  %v2338_v35 = vld [vmem:[#allocation2 + $0x30] sm:$0xee]  ;;  %v12326_v28 = vpack.c.bf16 %v14493_v61, %v14483_v44  ;;  %v12972_v0 = vld [vmem:[%s18081_s4 + $0x84] ss:$8 sps:$4 sm:$0xff]   ;;  %441 = vst [vmem:[#allocation2 + $0xcc] sm:$0x11] %v440_v7 }
 0x135   : > { %v10736_v21 = vcombine.low %v1372_v29, %v1400_v49  ;;  %v1380_v25 = vor.u32 %v1379_v4, %v1376_v23  ;;  %2200 = vmatprep.subr.bf16.mxu1 %v12959_v17  ;;  %2276 = vmatpush1.bf16.msra.mxu0 %v12960_v16  ;;  %v387_v17 = vsel %vm14280_vm2, 0, %v386_v56  ;;  %v1358_v52 = vsel %vm14405_vm7, %v1353_v18, %v1357_v51  ;;  %v12963_v16 = vld [vmem:[%s18081_s4 + $0x70] ss:$8 sps:$4 sm:$0xff]   ;;  %v14745_v29 = vld [vmem:[#allocation2] sm:$0xff]  ;;  %v2340_v18 = vld [vmem:[#allocation2 + $0x48] sm:$0xee] }
 0x136   : > { %2786 = vmatprep.subr.bf16.mxu0 %v12968_v63  ;;  %388 = vst [vmem:[#allocation2 + $0xc0] sm:$0x11] %v387_v17  ;;  %v18128_v63 = vmov 0  ;;  %v10849_v51 = vrot.slane %v2338_v35, 9  ;;  %v744_v61 = vshrl.u32 %v12326_v28, 16  ;;  %v2403_v4 = vrot.slane %v14549_v55, 5 }
 0x137   : > { %1874 = vmatmul.mubr.bf16.gmra.mrb[28].mxu0 %v10736_v21  ;;  %v1381_v23 = vrot.slane %v1380_v25, 4  ;;  %v18129_v63 = vsel %vm14753_vm9, 4294967295, %v18128_v63  ;;  %v2342_v56 = vld [vmem:[#allocation2 + $0x60] sm:$0xee]  ;;  %v10786_v35 = vcombine.high %v14745_v29, %v14439_v8  ;;  %v12975_v55 = vld [vmem:[%s18081_s4 + $0x314] ss:$8 sps:$4 sm:$0xff]  }
 0x138   : > { %2201 = vmatpush1.bf16.msra.mxu1 %v12957_v27  ;;  %2293 = vmatprep.mubr.bf16.mxu0 %v14745_v29  ;;  %18130 = vst [vmem:[#allocation7_spill] sm:$0xff] %v18129_v63  ;;  %v747_v27 = vshll.u32 %v12326_v28, 16  ;;  %v12966_v21 = vld [vmem:[%s18081_s4 + $0x300] ss:$8 sps:$4 sm:$0xff]   ;;  %v2346_v7 = vld [vmem:[#allocation2 + $0x90] sm:$0xee] }
 0x139   : > { %v1386_v44 = vsel %vm14405_vm7, %v1381_v23, %v1385_v57  ;;  %2202 = vmatprep.subr.bf16.mxu1 %v12965_v38  ;;  %v12970_v25 = vld [vmem:[%s18081_s4 + $0x80] ss:$8 sps:$4 sm:$0xff]   ;;  %v2344_v57 = vld [vmem:[#allocation2 + $0x78] sm:$0xee]  ;;  %v14774_v23 = vsel %vm14753_vm9, %v10849_v51, %v2403_v4  ;;  %v18131_v28 = vrot.slane %v14507_v12, 9  ;;  %v10853_v51 = vrot.slane %v2342_v56, 9 }
 0x13a   : > { %v10735_v49 = vcombine.high %v1358_v52, %v1386_v44  ;;  %v10734_v54 = vcombine.low %v1358_v52, %v1386_v44  ;;  %v13982_v38 = vld [vmem:[#allocation2 + $0x8] sm:$0xf]  ;;  %v746_v52 = vrot.slane %v744_v61, 7  ;;  %v10851_v44 = vrot.slane %v2340_v18, 9  ;;  %v12976_v18 = vld [vmem:[%s18081_s4 + $0x90] ss:$8 sps:$4 sm:$0xff]  }
 0x13b   : > { %v10787_v17 = vcombine.low %v13982_v38, %v14463_v11  ;;  %v14782_v8 = vsel %vm14753_vm9, %v18131_v28, %v2391_v59  ;;  %v12978_v11 = vld [vmem:[%s18081_s4 + $0x94] ss:$8 sps:$4 sm:$0xff]   ;;  %v2411_v61 = vrot.slane %v14563_v9, 5  ;;  %v2419_v4 = vrot.slane %v14607_v15, 5  ;;  %v2348_v28 = vld [vmem:[#allocation2 + $0xa8] sm:$0xee] }
 0x13c   : > { %1800 = vmatprep.mubr.bf16.mxu1 %v10735_v49  ;;  %2203 = vmatpush1.bf16.msra.mxu1 %v12963_v16  ;;  %v749_v36 = vor.u32 %v747_v27, %v746_v52  ;;  %v750_v12 = vrot.slane %v746_v52, 4  ;;  %v10855_v38 = vrot.slane %v2344_v57, 9  ;;  %v2427_v59 = vrot.slane %v14631_v48, 5  ;;  %v12973_v16 = vld [vmem:[%s18081_s4 + $0x310] ss:$8 sps:$4 sm:$0xff]  }
 0x13d   : > { %1801 = vmatmul.mubr.bf16.gmra.mrb[20].mxu1 %v10734_v54  ;;  %2204 = vmatprep.subr.bf16.mxu1 %v12972_v0  ;;  %v814_v9 = vld [vmem:[#allocation2 + $0xc0] sm:$0xff]  ;;  %v14798_v15 = vsel %vm14753_vm9, %v10851_v44, %v2411_v61  ;;  %v14802_v0 = vsel %vm14753_vm9, %v10853_v51, %v2419_v4  ;;  %v10857_v48 = vrot.slane %v2346_v7, 9  ;;  %v2435_v27 = vrot.slane %v14676_v40, 5  ;;  %v2339_v40 = vld [vmem:[#allocation2 + $0x38] sm:$0xe]  ;;  %v2958_v37 = vld [vmem:[#allocation2 + $0x90] sm:$0xff] }
 0x13e   : > { %2220 = vmatprep.mubr.bf16.mxu1 %v10786_v35  ;;  %v2337_v56 = vld [vmem:[#allocation2 + $0x20] sm:$0xe]  ;;  %v12981_v49 = vld [vmem:[%s18081_s4 + $0x324] ss:$8 sps:$4 sm:$0xff]   ;;  %v815_v54 = vsel %vm14136_vm6, %v749_v36, %v814_v9  ;;  %v14816_v7 = vsel %vm14753_vm9, %v10855_v38, %v2427_v59  ;;  %v10859_v36 = vrot.slane %v2348_v28, 9 }
 0x13f   : > { %2294 = vmatmul.mubr.bf16.vlgmr.msra.gmra.mrb[32].mxu0 %v10787_v17  ;;  %v817_v35 = vld [vmem:[#allocation2 + $0xcc] sm:$0x11]  ;;  %v2341_v17 = vld [vmem:[#allocation2 + $0x50] sm:$0xe]  ;;  %816 = vst [vmem:[#allocation2 + $0xc0] sm:$0xff] %v815_v54  ;;  %v10848_v59 = vrot.slane %v2337_v56, 9 }
 0x140   : > { %2787 = vmatpush1.bf16.msra.mxu0 %v12966_v21  ;;  %2205 = vmatpush1.bf16.msra.mxu1 %v12970_v25  ;;  %v12985_v44 = vld [vmem:[%s18081_s4 + $0xa4] ss:$8 sps:$4 sm:$0xff]   ;;  %v818_v61 = vsel %vm14280_vm2, %v750_v12, %v817_v35  ;;  %v2343_v38 = vld [vmem:[#allocation2 + $0x68] sm:$0xe]  ;;  %v14829_v21 = vsel %vm14753_vm9, %v10857_v48, %v2435_v27  ;;  %v2443_v25 = vrot.slane %v14683_v6, 5  ;;  %v2399_v12 = vrot.slane %v14481_v42, 5 }
 0x141   : > { %2788 = vmatprep.subr.bf16.mxu0 %v12975_v55  ;;  %2206 = vmatprep.subr.bf16.mxu1 %v12978_v11  ;;  %819 = vst [vmem:[#allocation2 + $0xcc] sm:$0x11] %v818_v61  ;;  %v2345_v9 = vld [vmem:[#allocation2 + $0x80] sm:$0xe]  ;;  %v10850_v54 = vrot.slane %v2339_v40, 9  ;;  %v2407_v55 = vrot.slane %v14510_v19, 5 }
 0x142   : > { %2303 = vmatprep.mubr.bf16.mxu0 %v14745_v29  ;;  %v12979_v28 = vld [vmem:[%s18081_s4 + $0x320] ss:$8 sps:$4 sm:$0xff]   ;;  %v10852_v11 = vrot.slane %v2341_v17, 9  ;;  %v2415_v35 = vrot.slane %v14524_v34, 5  ;;  %v14841_v48 = vsel %vm14753_vm9, %v10859_v36, %v2443_v25  ;;  %v14845_v42 = vsel %vm14753_vm9, %v10848_v59, %v2399_v12  ;;  %v2347_v56 = vld [vmem:[#allocation2 + $0x98] sm:$0xe] }
 0x143   : > { %v10854_v6 = vrot.slane %v2343_v38, 9  ;;  %v2423_v27 = vrot.slane %v14576_v32, 5  ;;  %v2349_v61 = vld [vmem:[#allocation2 + $0xb0] sm:$0xe]  ;;  %v12983_v19 = vld [vmem:[%s18081_s4 + $0xa0] ss:$8 sps:$4 sm:$0xff]   ;;  %v14867_v38 = vsel %vm14753_vm9, %v10850_v54, %v2407_v55 }
 0x144   : > { %2789 = vmatpush1.bf16.msra.mxu0 %v12973_v16  ;;  %2207 = vmatpush1.bf16.msra.mxu1 %v12976_v18  ;;  %v12988_v34 = vld [vmem:[%s18081_s4 + $0x334] ss:$8 sps:$4 sm:$0xff]   ;;  %v10856_v36 = vrot.slane %v2345_v9, 9  ;;  %v10790_v16 = vcombine.low %v14505_v10, %v14521_v30  ;;  %v14871_v25 = vsel %vm14753_vm9, %v10852_v11, %v2415_v35  ;;  %v2431_v59 = vrot.slane %v14605_v14, 5  ;;  %v12986_v10 = vld [vmem:[%s18081_s4 + $0x330] ss:$8 sps:$4 sm:$0xff]  }
 0x145   : > { %2790 = vmatprep.subr.bf16.mxu0 %v12981_v49  ;;  %2208 = vmatprep.subr.bf16.mxu1 %v12985_v44  ;;  %v12991_v18 = vld [vmem:[%s18081_s4 + $0xb4] ss:$8 sps:$4 sm:$0xff]   ;;  %v10858_v49 = vrot.slane %v2347_v56, 9  ;;  %v2439_v44 = vrot.slane %v14662_v47, 5  ;;  %v10860_v9 = vrot.slane %v2349_v61, 9  ;;  %v14885_v14 = vsel %vm14753_vm9, %v10854_v6, %v2423_v27  ;;  %v2954_v4 = vld [vmem:[#allocation2 + $0x60] sm:$0xff] }
 0x146   : > { %v2948_v12 = vld [vmem:[#allocation2 + $0x18] sm:$0xff]  ;;  %v2334_v55 = vld [vmem:[#allocation2] sm:$0xee]  ;;  %v14889_v11 = vsel %vm14753_vm9, %v10856_v36, %v2431_v59  ;;  %v2447_v35 = vrot.slane %v14670_v53, 5  ;;  %v2950_v6 = vld [vmem:[#allocation2 + $0x30] sm:$0xff]  ;;  %v10793_v53 = vcombine.low %v14568_v24, %v14585_v41  ;;  %v10796_v41 = vcombine.low %v14637_v60, %v14642_v62 }
 0x147   : > { %2304 = vmatmul.mubr.bf16.gmra.mrb[36].mxu0 %v10790_v16  ;;  %v12989_v54 = vld [vmem:[%s18081_s4 + $0xb0] ss:$8 sps:$4 sm:$0xff]   ;;  %v12994_v47 = vld [vmem:[%s18081_s4 + $0x344] ss:$8 sps:$4 sm:$0xff]   ;;  %v14899_v61 = vsel %vm14753_vm9, %v10858_v49, %v2439_v44  ;;  %v3512_v27 = vshrl.u32 %v2948_v12, 16  ;;  %v3515_v16 = vshll.u32 %v2948_v12, 16 }
 0x148   : > { %2791 = vmatpush1.bf16.msra.mxu0 %v12979_v28  ;;  %2209 = vmatpush1.bf16.msra.mxu1 %v12983_v19  ;;  %v12998_v28 = vld [vmem:[%s18081_s4 + $0xc4] ss:$8 sps:$4 sm:$0xff]   ;;  %v14906_v19 = vld [vmem:[#allocation2 + $0x18] sm:$0xee]  ;;  %v14910_v36 = vsel %vm14753_vm9, %v10860_v9, %v2447_v35  ;;  %v12996_v24 = vld [vmem:[%s18081_s4 + $0xc0] ss:$8 sps:$4 sm:$0xff]  }
 0x149   : > { %2792 = vmatprep.subr.bf16.mxu0 %v12988_v34  ;;  %2210 = vmatprep.subr.bf16.mxu1 %v12991_v18  ;;  %v12992_v34 = vld [vmem:[%s18081_s4 + $0x340] ss:$8 sps:$4 sm:$0xff]   ;;  %v10845_v18 = vrot.slane %v2334_v55, 9  ;;  %v13983_v59 = vld [vmem:[#allocation2 + $0xc] sm:$0x11]  ;;  %v3514_v32 = vrot.slane %v3512_v27, 4 }
 0x14a   : > { %2313 = vmatprep.mubr.bf16.mxu0 %v14745_v29  ;;  %v2387_v49 = vrot.slane %v13983_v59, 5  ;;  %v2952_v12 = vld [vmem:[#allocation2 + $0x48] sm:$0xff]  ;;  %v13001_v35 = vld [vmem:[%s18081_s4 + $0x354] ss:$8 sps:$4 sm:$0xff]   ;;  %v3517_v55 = vrot.slane %v3515_v16, 5  ;;  %v3540_v17 = vshrl.u32 %v2950_v6, 16 }
 0x14b   : > { %v14923_v9 = vld [vmem:[#allocation2 + $0x24] sm:$0x11]  ;;  %v13004_v56 = vld [vmem:[%s18081_s4 + $0xd4] ss:$8 sps:$4 sm:$0xff]   ;;  %v10847_v44 = vrot.slane %v14906_v19, 9  ;;  %v2395_v40 = vrot.slane %v14496_v1, 5 }
 0x14c   : > { %v14931_v30 = vld [vmem:[#allocation2 + $0x3c] sm:$0x11]  ;;  %v3521_v59 = vshll.u32 %v14923_v9, 16  ;;  %2793 = vmatpush1.bf16.msra.mxu0 %v12986_v10  ;;  %2211 = vmatpush1.bf16.msra.mxu1 %v12989_v54  ;;  %v3543_v51 = vshll.u32 %v2950_v6, 16  ;;  %v3518_v57 = vor.u32 %v3517_v55, %v3514_v32  ;;  %v3542_v22 = vrot.slane %v3540_v17, 4 }
 0x14d   : > { %v3549_v52 = vshll.u32 %v14931_v30, 16  ;;  %2794 = vmatprep.subr.bf16.mxu0 %v12994_v47  ;;  %2212 = vmatprep.subr.bf16.mxu1 %v12998_v28  ;;  %v14937_v27 = vld [vmem:[#allocation2 + $0x54] sm:$0x11]  ;;  %v3568_v16 = vshrl.u32 %v2952_v12, 16  ;;  %v14947_v54 = vsel %vm14753_vm9, %v10845_v18, %v2387_v49  ;;  %v3571_v6 = vshll.u32 %v2952_v12, 16 }
 0x14e   : > { %v3523_v31 = vrot.slane %v3521_v59, 5  ;;  %v12999_v10 = vld [vmem:[%s18081_s4 + $0x350] ss:$8 sps:$4 sm:$0xff]   ;;  %v3545_v47 = vrot.slane %v3543_v51, 5  ;;  %v3577_v32 = vshll.u32 %v14937_v27, 16  ;;  %v3519_v19 = vrot.slane %v3518_v57, 4 }
 0x14f   : > { %v13002_v1 = vld [vmem:[%s18081_s4 + $0xd0] ss:$8 sps:$4 sm:$0xff]   ;;  %2314 = vmatmul.mubr.bf16.gmra.mrb[40].mxu0 %v10793_v53  ;;  %v13007_v17 = vld [vmem:[%s18081_s4 + $0x364] ss:$8 sps:$4 sm:$0xff]   ;;  %v3570_v55 = vrot.slane %v3568_v16, 4  ;;  %v3596_v59 = vshrl.u32 %v2954_v4, 16 }
 0x150   : > { %v2956_v28 = vld [vmem:[#allocation2 + $0x78] sm:$0xff]  ;;  %v3599_v26 = vshll.u32 %v2954_v4, 16  ;;  %2795 = vmatpush1.bf16.msra.mxu0 %v12992_v34  ;;  %2213 = vmatpush1.bf16.msra.mxu1 %v12996_v24  ;;  %v3546_v50 = vor.u32 %v3545_v47, %v3542_v22  ;;  %v3551_v18 = vrot.slane %v3549_v52, 5  ;;  %v14953_v49 = vld [vmem:[#allocation2 + $0x6c] sm:$0x11]  ;;  %v3573_v51 = vrot.slane %v3571_v6, 5 }
 0x151   : > { %v3579_v12 = vrot.slane %v3577_v32, 5  ;;  %2796 = vmatprep.subr.bf16.mxu0 %v13001_v35  ;;  %2214 = vmatprep.subr.bf16.mxu1 %v13004_v56  ;;  %v13011_v53 = vld [vmem:[%s18081_s4 + $0xe4] ss:$8 sps:$4 sm:$0xff]   ;;  %v14960_v57 = vsel %vm14405_vm7, %v3519_v19, %v3523_v31  ;;  %v3598_v4 = vrot.slane %v3596_v59, 4  ;;  %v3605_v24 = vshll.u32 %v14953_v49, 16 }
 0x152   : > { %v3601_v34 = vrot.slane %v3599_v26, 5  ;;  %2323 = vmatprep.mubr.bf16.mxu0 %v14745_v29  ;;  %v13005_v22 = vld [vmem:[%s18081_s4 + $0x360] ss:$8 sps:$4 sm:$0xff]   ;;  %v3547_v52 = vrot.slane %v3546_v50, 4  ;;  %v3574_v56 = vor.u32 %v3573_v51, %v3570_v55  ;;  %v3624_v35 = vshrl.u32 %v2956_v28, 16 }
 0x153   : > { %v3627_v16 = vshll.u32 %v2956_v28, 16  ;;  %v14969_v47 = vsel %vm14753_vm9, %v10847_v44, %v2395_v40  ;;  %v3607_v6 = vrot.slane %v3605_v24, 5  ;;  %v14971_v32 = vld [vmem:[#allocation2 + $0x84] sm:$0x11]  ;;  %v3652_v26 = vshrl.u32 %v2958_v37, 16 }
 0x154   : > { %v3602_v31 = vor.u32 %v3601_v34, %v3598_v4  ;;  %2797 = vmatpush1.bf16.msra.mxu0 %v12999_v10  ;;  %2215 = vmatpush1.bf16.msra.mxu1 %v13002_v1  ;;  %v13009_v19 = vld [vmem:[%s18081_s4 + $0xe0] ss:$8 sps:$4 sm:$0xff]   ;;  %v14978_v50 = vsel %vm14405_vm7, %v3547_v52, %v3551_v18  ;;  %v3575_v28 = vrot.slane %v3574_v56, 4  ;;  %v3626_v55 = vrot.slane %v3624_v35, 4  ;;  %v13014_v44 = vld [vmem:[%s18081_s4 + $0x374] ss:$8 sps:$4 sm:$0xff]  }
 0x155   : > { %v3633_v40 = vshll.u32 %v14971_v32, 16  ;;  %2798 = vmatprep.subr.bf16.mxu0 %v13007_v17  ;;  %2216 = vmatprep.subr.bf16.mxu1 %v13011_v53  ;;  %v13017_v10 = vld [vmem:[%s18081_s4 + $0xf4] ss:$8 sps:$4 sm:$0xff]   ;;  %v3629_v51 = vrot.slane %v3627_v16, 5  ;;  %v10910_v17 = vcombine.high %v14947_v54, %v14969_v47  ;;  %v3654_v34 = vrot.slane %v3652_v26, 4 }
 0x156   : > { %v3603_v18 = vrot.slane %v3602_v31, 4  ;;  %v14995_v53 = vsel %vm14405_vm7, %v3575_v28, %v3579_v12  ;;  %v14997_v4 = vld [vmem:[#allocation2 + $0x9c] sm:$0x11]  ;;  %v3655_v24 = vshll.u32 %v2958_v37, 16  ;;  %v13012_v12 = vld [vmem:[%s18081_s4 + $0x370] ss:$8 sps:$4 sm:$0xff]  }
 0x157   : > { %2324 = vmatmul.mubr.bf16.gmra.mrb[44].mxu0 %v10796_v41  ;;  %v3630_v56 = vor.u32 %v3629_v51, %v3626_v55  ;;  %v3661_v35 = vshll.u32 %v14997_v4, 16  ;;  %v13015_v37 = vld [vmem:[%s18081_s4 + $0xf0] ss:$8 sps:$4 sm:$0xff]   ;;  %v3635_v41 = vrot.slane %v3633_v40, 5  ;;  %v13018_v55 = vld [vmem:[%s18081_s4 + $0x380] ss:$8 sps:$4 sm:$0xff]  }
 0x158   : > { %v15004_v52 = vsel %vm14405_vm7, %v3603_v18, %v3607_v6  ;;  %2799 = vmatpush1.bf16.msra.mxu0 %v13005_v22  ;;  %2217 = vmatpush1.bf16.msra.mxu1 %v13009_v19  ;;  %v3657_v16 = vrot.slane %v3655_v24, 5  ;;  %v13020_v22 = vld [vmem:[%s18081_s4 + $0x384] ss:$8 sps:$4 sm:$0xff]   ;;  %v13984_v19 = vld [vmem:[#allocation2 + $0x18] sm:$0xff]  ;;  %v13024_v24 = vld [vmem:[%s18081_s4 + $0x3a0] ss:$8 sps:$4 sm:$0xff]  }
 0x159   : > { %2800 = vmatprep.subr.bf16.mxu0 %v13014_v44  ;;  %2218 = vmatprep.subr.bf16.mxu1 %v13017_v10  ;;  %v3631_v31 = vrot.slane %v3630_v56, 4  ;;  %v3663_v26 = vrot.slane %v3661_v35, 5  ;;  %v10785_v28 = vcombine.low %v14745_v29, %v13984_v19  ;;  %v13023_v10 = vld [vmem:[%s18081_s4 + $0x394] ss:$8 sps:$4 sm:$0xff]   ;;  %v18132_v35 = vcombine.low %v14448_v43, %v14476_v33  ;;  %v13030_v43 = vld [vmem:[%s18081_s4 + $0x3c0] ss:$8 sps:$4 sm:$0xff]  }
 0x15a   : > { %2818 = vmatprep.mubr.bf16.mxu0 %v10910_v17  ;;  %v3658_v6 = vor.u32 %v3657_v16, %v3654_v34  ;;  %v13021_v17 = vld [vmem:[%s18081_s4 + $0x390] ss:$8 sps:$4 sm:$0xff]   ;;  %v13026_v34 = vld [vmem:[%s18081_s4 + $0x3a4] ss:$8 sps:$4 sm:$0xff]   ;;  %v13029_v56 = vld [vmem:[%s18081_s4 + $0x3b4] ss:$8 sps:$4 sm:$0xff]   ;;  %v18134_v16 = vcombine.low %v14487_v45, %v14501_v3 }
 0x15b   : > { %v15026_v40 = vsel %vm14405_vm7, %v3631_v31, %v3635_v41  ;;  %v13035_v33 = vld [vmem:[%s18081_s4 + $0x3d4] ss:$8 sps:$4 sm:$0xff]   ;;  %v13033_v31 = vld [vmem:[%s18081_s4 + $0x3d0] ss:$8 sps:$4 sm:$0xff]   ;;  %v13038_v19 = vld [vmem:[%s18081_s4 + $0x3e4] ss:$8 sps:$4 sm:$0xff]  }
 0x15c   : > { %2801 = vmatpush1.bf16.msra.mxu0 %v13012_v12  ;;  %2219 = vmatpush1.bf16.msra.mxu1 %v13015_v37  ;;  %v3659_v44 = vrot.slane %v3658_v6, 4  ;;  %v18133_v12 = vcombine.high %v14487_v45, %v14501_v3  ;;  %v13032_v37 = vld [vmem:[%s18081_s4 + $0x3c4] ss:$8 sps:$4 sm:$0xff]   ;;  %v4234_v41 = vld [vmem:[#allocation2 + $0x18] sm:$0xee]  ;;  %v18135_v6 = vcombine.high %v14514_v20, %v14531_v39  ;;  %v4284_v45 = vrot.slane %v14923_v9, 5 }
 0x15d   : > { %2802 = vmatprep.subr.bf16.mxu0 %v13020_v22  ;;  %v4236_v22 = vld [vmem:[#allocation2 + $0x30] sm:$0xee]  ;;  %v4300_v9 = vrot.slane %v14937_v27, 5  ;;  %v4241_v27 = vld [vmem:[#allocation2 + $0x68] sm:$0xe] }
 0x15e   : > { %v15033_v18 = vsel %vm14405_vm7, %v3659_v44, %v3663_v26  ;;  %v4238_v26 = vld [vmem:[#allocation2 + $0x48] sm:$0xee]  ;;  %v11187_v3 = vrot.slane %v4236_v22, 9  ;;  %v4245_v29 = vld [vmem:[#allocation2 + $0x98] sm:$0xe] }
 0x15f   : > { %2221 = vmatmul.mubr.bf16.vlgmr.msra.gmra.mrb[24].mxu1 %v10785_v28  ;;  %v11185_v28 = vrot.slane %v4234_v41, 9  ;;  %v13036_v44 = vld [vmem:[%s18081_s4 + $0x3e0] ss:$8 sps:$4 sm:$0xff]   ;;  %v4247_v62 = vld [vmem:[#allocation2 + $0xb0] sm:$0xe] }
 0x160   : > { %2803 = vmatpush1.bf16.msra.mxu0 %v13018_v55  ;;  %2230 = vmatprep.mubr.bf16.mxu1 %v10789_v2  ;;  %v13027_v2 = vld [vmem:[%s18081_s4 + $0x3b0] ss:$8 sps:$4 sm:$0xff]   ;;  %v4240_v55 = vld [vmem:[#allocation2 + $0x60] sm:$0xee]  ;;  %v15234_v58 = vld [vmem:[#allocation2 + $0x84] sm:$0x11] }
 0x161   : > { %2804 = vmatprep.subr.bf16.mxu0 %v13023_v10  ;;  %v4292_v10 = vrot.slane %v14931_v30, 5 }
 0x163   : > { %v15099_v30 = vsel %vm14753_vm9, %v11187_v3, %v4292_v10  ;;  %v4316_v3 = vrot.slane %v14971_v32, 5  ;;  %v4235_v10 = vld [vmem:[#allocation2 + $0x20] sm:$0xe] }
 0x164   : > { %2805 = vmatpush1.bf16.msra.mxu0 %v13021_v17  ;;  %v11189_v17 = vrot.slane %v4238_v26, 9  ;;  %v13044_v26 = vld [vmem:[%s18081_s4 + $0x404] ss:$8 sps:$4 sm:$0xff]  }
 0x165   : > { %2806 = vmatprep.subr.bf16.mxu0 %v13026_v34  ;;  %v4242_v34 = vld [vmem:[#allocation2 + $0x78] sm:$0xee] }
 0x166   : > { %v11193_v22 = vrot.slane %v4242_v34, 9 }
 0x167   : > { %2231 = vmatmul.mubr.bf16.gmra.mrb[28].mxu1 %v18132_v35  ;;  %v4244_v35 = vld [vmem:[#allocation2 + $0x90] sm:$0xee] }
 0x168   : > { %2807 = vmatpush1.bf16.msra.mxu0 %v13024_v24  ;;  %2240 = vmatprep.mubr.bf16.mxu1 %v18133_v12  ;;  %v13041_v24 = vld [vmem:[%s18081_s4 + $0x3f4] ss:$8 sps:$4 sm:$0xff]   ;;  %v3482_v12 = vld [vmem:[#allocation2 + $0x2c] sm:$0x1]  ;;  %v15133_v32 = vsel %vm14753_vm9, %v11193_v22, %v4316_v3 }
 0x169   : > { %2808 = vmatprep.subr.bf16.mxu0 %v13029_v56  ;;  %v15094_v56 = vsel %vm14753_vm9, %v11185_v28, %v4284_v45  ;;  %v3486_v28 = vld [vmem:[#allocation2 + $0x44] sm:$0x1]  ;;  %v4288_v41 = vrot.slane %v3482_v12, 5  ;;  %v13047_v22 = vld [vmem:[%s18081_s4 + $0x414] ss:$8 sps:$4 sm:$0xff]  }
 0x16a   : > { %v3506_v12 = vld [vmem:[#allocation2 + $0xbc] sm:$0x1] }
 0x16c   : > { %2809 = vmatpush1.bf16.msra.mxu0 %v13027_v2  ;;  %v3505_v2 = vld [vmem:[#allocation2 + $0xb4] sm:$0x11] }
 0x16d   : > { %2810 = vmatprep.subr.bf16.mxu0 %v13032_v37  ;;  %v11191_v37 = vrot.slane %v4240_v55, 9  ;;  %v11195_v55 = vrot.slane %v4244_v35, 9  ;;  %v4332_v35 = vrot.slane %v3505_v2, 5  ;;  %v4296_v2 = vrot.slane %v3486_v28, 5 }
 0x16f   : > { %2241 = vmatmul.mubr.bf16.gmra.mrb[32].mxu1 %v18134_v16  ;;  %v15111_v16 = vsel %vm14753_vm9, %v11189_v17, %v4300_v9  ;;  %v10909_v17 = vcombine.low %v14947_v54, %v14969_v47  ;;  %v4324_v9 = vrot.slane %v14997_v4, 5  ;;  %v4239_v47 = vld [vmem:[#allocation2 + $0x50] sm:$0xe] }
 0x170   : > { %2811 = vmatpush1.bf16.msra.mxu0 %v13030_v43  ;;  %2250 = vmatprep.mubr.bf16.mxu1 %v18135_v6  ;;  %v4308_v43 = vrot.slane %v14953_v49, 5  ;;  %v4248_v6 = vld [vmem:[#allocation2 + $0xc0] sm:$0xee]  ;;  %v18136_v49 = vcombine.low %v14514_v20, %v14531_v39  ;;  %v3490_v20 = vld [vmem:[#allocation2 + $0x5c] sm:$0x1]  ;;  %v11190_v51 = vrot.slane %v4239_v47, 9 }
 0x171   : > { %2812 = vmatprep.subr.bf16.mxu0 %v13035_v33  ;;  %v13039_v33 = vld [vmem:[%s18081_s4 + $0x3f0] ss:$8 sps:$4 sm:$0xff]   ;;  %v11199_v54 = vrot.slane %v4248_v6, 9  ;;  %v13042_v39 = vld [vmem:[%s18081_s4 + $0x400] ss:$8 sps:$4 sm:$0xff]   ;;  %v15140_v34 = vsel %vm14753_vm9, %v11195_v55, %v4324_v9 }
 0x172   : > { %v15121_v45 = vsel %vm14753_vm9, %v11191_v37, %v4308_v43  ;;  %v3494_v37 = vld [vmem:[#allocation2 + $0x74] sm:$0x1]  ;;  %v3498_v43 = vld [vmem:[#allocation2 + $0x8c] sm:$0x1]  ;;  %v4249_v47 = vld [vmem:[#allocation2 + $0xc8] sm:$0xe] }
 0x173   : > { %v3510_v6 = vld [vmem:[#allocation2 + $0xd4] sm:$0x1]  ;;  %v4320_v28 = vrot.slane %v3498_v43, 5 }
 0x174   : > { %2813 = vmatpush1.bf16.msra.mxu0 %v13033_v31  ;;  %v4246_v31 = vld [vmem:[#allocation2 + $0xa8] sm:$0xee] }
 0x175   : > { %2814 = vmatprep.subr.bf16.mxu0 %v13038_v19  ;;  %v3509_v19 = vld [vmem:[#allocation2 + $0xcc] sm:$0x11] }
 0x176   : > { %v4340_v4 = vrot.slane %v3509_v19, 5  ;;  %v4243_v19 = vld [vmem:[#allocation2 + $0x80] sm:$0xe] }
 0x177   : > { %2251 = vmatmul.mubr.bf16.gmra.mrb[36].mxu1 %v18136_v49  ;;  %v4237_v49 = vld [vmem:[#allocation2 + $0x38] sm:$0xe] }
 0x178   : > { %2815 = vmatpush1.bf16.msra.mxu0 %v13036_v44  ;;  %v11197_v44 = vrot.slane %v4246_v31, 9  ;;  %v3502_v31 = vld [vmem:[#allocation2 + $0xa4] sm:$0x1]  ;;  %v11188_v55 = vrot.slane %v4237_v49, 9  ;;  %v4304_v49 = vrot.slane %v3490_v20, 5 }
 0x179   : > { %2816 = vmatprep.subr.bf16.mxu0 %v13041_v24  ;;  %v11186_v24 = vrot.slane %v4235_v10, 9  ;;  %v15155_v10 = vsel %vm14753_vm9, %v11199_v54, %v4340_v4  ;;  %v11194_v4 = vrot.slane %v4243_v19, 9  ;;  %v4328_v20 = vrot.slane %v3502_v31, 5  ;;  %v4846_v31 = vld [vmem:[#allocation2 + $0x30] sm:$0xff] }
 0x17a   : > { %v15151_v3 = vsel %vm14753_vm9, %v11197_v44, %v4332_v35  ;;  %v11192_v35 = vrot.slane %v4241_v27, 9  ;;  %v15167_v54 = vsel %vm14753_vm9, %v11188_v55, %v4296_v2  ;;  %v18137_v27 = vcombine.high %v14774_v23, %v14798_v15  ;;  %v4852_v2 = vld [vmem:[#allocation2 + $0x78] sm:$0xff] }
 0x17b   : > { %v15159_v9 = vsel %vm14753_vm9, %v11186_v24, %v4288_v41  ;;  %v4312_v41 = vrot.slane %v3494_v37, 5  ;;  %v15173_v24 = vsel %vm14753_vm9, %v11190_v51, %v4304_v49  ;;  %v13045_v37 = vld [vmem:[%s18081_s4 + $0x410] ss:$8 sps:$4 sm:$0xff]   ;;  %v15187_v43 = vsel %vm14753_vm9, %v11194_v4, %v4320_v28  ;;  %v15214_v4 = vld [vmem:[#allocation2 + $0x3c] sm:$0x11] }
 0x17c   : > { %2817 = vmatpush1.bf16.msra.mxu0 %v13039_v33  ;;  %v11196_v33 = vrot.slane %v4245_v29, 9  ;;  %v11198_v51 = vrot.slane %v4247_v62, 9  ;;  %v4336_v29 = vrot.slane %v3506_v12, 5  ;;  %v11200_v19 = vrot.slane %v4249_v47, 9  ;;  %v13048_v62 = vld [vmem:[%s18081_s4 + $0x420] ss:$8 sps:$4 sm:$0xff]  }
 0x17d   : > { %2859 = vmatprep.subr.bf16.mxu0 %v13044_v26  ;;  %v4344_v49 = vrot.slane %v3510_v6, 5  ;;  %v5410_v28 = vshrl.u32 %v4846_v31, 16  ;;  %v5413_v47 = vshll.u32 %v4846_v31, 16  ;;  %v15222_v31 = vld [vmem:[#allocation2 + $0x6c] sm:$0x11] }
 0x17e   : > { %v15196_v55 = vsel %vm14753_vm9, %v11196_v33, %v4328_v20  ;;  %v15205_v12 = vsel %vm14753_vm9, %v11198_v51, %v4336_v29  ;;  %v13053_v33 = vld [vmem:[%s18081_s4 + $0x434] ss:$8 sps:$4 sm:$0xff]   ;;  %v5419_v51 = vshll.u32 %v15214_v4, 16  ;;  %v18140_v20 = vcombine.low %v14774_v23, %v14798_v15 }
 0x17f   : > { %2819 = vmatmul.mubr.bf16.vlgmr.msra.gmra.mrb[32].mxu0 %v10909_v17  ;;  %v15183_v17 = vsel %vm14753_vm9, %v11192_v35, %v4312_v41  ;;  %v4848_v35 = vld [vmem:[#allocation2 + $0x48] sm:$0xff]  ;;  %18138 = vst [vmem:[#allocation8_spill] sm:$0xff] %v15205_v12  ;;  %v4850_v41 = vld [vmem:[#allocation2 + $0x60] sm:$0xff]  ;;  %v15212_v6 = vsel %vm14753_vm9, %v11200_v19, %v4344_v49  ;;  %v5412_v26 = vrot.slane %v5410_v28, 4  ;;  %v5415_v44 = vrot.slane %v5413_v47, 5 }
 0x180   : > { %2828 = vmatprep.mubr.bf16.mxu0 %v18137_v27  ;;  %2860 = vmatpush1.bf16.msra.mxu0 %v13042_v39  ;;  %v13050_v39 = vld [vmem:[%s18081_s4 + $0x424] ss:$8 sps:$4 sm:$0xff]   ;;  %18139 = vst [vmem:[#allocation9_spill] sm:$0xff] %v15212_v6  ;;  %v15218_v27 = vld [vmem:[#allocation2 + $0x54] sm:$0x11]  ;;  %v5438_v29 = vshrl.u32 %v4848_v35, 16  ;;  %v18143_v12 = vcombine.high %v14829_v21, %v14841_v48 }
 0x181   : > { %2861 = vmatprep.subr.bf16.mxu0 %v13047_v22  ;;  %v5441_v22 = vshll.u32 %v4848_v35, 16  ;;  %v5447_v19 = vshll.u32 %v15218_v27, 16  ;;  %v5466_v49 = vshrl.u32 %v4850_v41, 16  ;;  %v13051_v35 = vld [vmem:[%s18081_s4 + $0x430] ss:$8 sps:$4 sm:$0xff]   ;;  %v5421_v59 = vrot.slane %v5419_v51, 5 }
 0x182   : > { %v5440_v60 = vrot.slane %v5438_v29, 4  ;;  %v5475_v47 = vshll.u32 %v15222_v31, 16  ;;  %v18141_v29 = vcombine.high %v14802_v0, %v14816_v7  ;;  %v5494_v15 = vshrl.u32 %v4852_v2, 16 }
 0x183   : > { %v5443_v1 = vrot.slane %v5441_v22, 5  ;;  %v5468_v28 = vrot.slane %v5466_v49, 4  ;;  %v4854_v22 = vld [vmem:[#allocation2 + $0x90] sm:$0xff]  ;;  %v5449_v5 = vrot.slane %v5447_v19, 5  ;;  %v5503_v51 = vshll.u32 %v15234_v58, 16  ;;  %v4856_v49 = vld [vmem:[#allocation2 + $0xa8] sm:$0xff] }
 0x184   : > { %2862 = vmatpush1.bf16.msra.mxu0 %v13045_v37  ;;  %v5469_v37 = vshll.u32 %v4850_v41, 16  ;;  %v5477_v19 = vrot.slane %v5475_v47, 5  ;;  %v5522_v6 = vshrl.u32 %v4854_v22, 16  ;;  %v15256_v47 = vld [vmem:[#allocation2 + $0xb4] sm:$0x11] }
 0x185   : > { %2863 = vmatprep.subr.bf16.mxu0 %v13050_v39  ;;  %v5416_v39 = vor.u32 %v5415_v44, %v5412_v26  ;;  %v5444_v41 = vor.u32 %v5443_v1, %v5440_v60  ;;  %v13056_v44 = vld [vmem:[%s18081_s4 + $0x444] ss:$8 sps:$4 sm:$0xff]   ;;  %v5505_v13 = vrot.slane %v5503_v51, 5  ;;  %v5550_v51 = vshrl.u32 %v4856_v49, 16 }
 0x186   : > { %v5471_v23 = vrot.slane %v5469_v37, 5  ;;  %v15243_v37 = vld [vmem:[#allocation2 + $0x9c] sm:$0x11] }
 0x187   : > { %2829 = vmatmul.mubr.bf16.gmra.mrb[36].mxu0 %v18140_v20  ;;  %v5417_v26 = vrot.slane %v5416_v39, 4  ;;  %v5497_v20 = vshll.u32 %v4852_v2, 16  ;;  %v5445_v1 = vrot.slane %v5444_v41, 4 }
 0x188   : > { %2838 = vmatprep.mubr.bf16.mxu0 %v18141_v29  ;;  %2864 = vmatpush1.bf16.msra.mxu0 %v13048_v62  ;;  %v13054_v62 = vld [vmem:[%s18081_s4 + $0x440] ss:$8 sps:$4 sm:$0xff]   ;;  %v5472_v60 = vor.u32 %v5471_v23, %v5468_v28  ;;  %v5496_v29 = vrot.slane %v5494_v15, 4  ;;  %v5525_v23 = vshll.u32 %v4854_v22, 16  ;;  %v5531_v15 = vshll.u32 %v15243_v37, 16 }
 0x189   : > { %2865 = vmatprep.subr.bf16.mxu0 %v13053_v33  ;;  %v13059_v33 = vld [vmem:[%s18081_s4 + $0x454] ss:$8 sps:$4 sm:$0xff]   ;;  %v15250_v2 = vsel %vm14405_vm7, %v5417_v26, %v5421_v59  ;;  %v5499_v39 = vrot.slane %v5497_v20, 5  ;;  %v15254_v41 = vsel %vm14405_vm7, %v5445_v1, %v5449_v5  ;;  %v5524_v20 = vrot.slane %v5522_v6, 4  ;;  %v13057_v6 = vld [vmem:[%s18081_s4 + $0x450] ss:$8 sps:$4 sm:$0xff]  }
 0x18a   : > { %v5473_v28 = vrot.slane %v5472_v60, 4  ;;  %v18142_v5 = vcombine.low %v14802_v0, %v14816_v7  ;;  %v5559_v60 = vshll.u32 %v15256_v47, 16  ;;  %v13062_v0 = vld [vmem:[%s18081_s4 + $0x464] ss:$8 sps:$4 sm:$0xff]   ;;  %v6143_v59 = vld [vmem:[#allocation2 + $0xb0] sm:$0xe] }
 0x18b   : > { %v5500_v26 = vor.u32 %v5499_v39, %v5496_v29  ;;  %v5533_v29 = vrot.slane %v5531_v15, 5 }
 0x18c   : > { %2866 = vmatpush1.bf16.msra.mxu0 %v13051_v35  ;;  %v5527_v35 = vrot.slane %v5525_v23, 5  ;;  %v15268_v22 = vsel %vm14405_vm7, %v5473_v28, %v5477_v19  ;;  %v5552_v19 = vrot.slane %v5550_v51, 4 }
 0x18d   : > { %2867 = vmatprep.subr.bf16.mxu0 %v13056_v44  ;;  %v5501_v1 = vrot.slane %v5500_v26, 4  ;;  %v5553_v44 = vshll.u32 %v4856_v49, 16  ;;  %v5561_v26 = vrot.slane %v5559_v60, 5  ;;  %v13066_v60 = vld [vmem:[%s18081_s4 + $0x480] ss:$8 sps:$4 sm:$0xff]  }
 0x18e   : > { %v5528_v7 = vor.u32 %v5527_v35, %v5524_v20  ;;  %v18144_v35 = vcombine.low %v14829_v21, %v14841_v48  ;;  %v13068_v48 = vld [vmem:[%s18081_s4 + $0x484] ss:$8 sps:$4 sm:$0xff]   ;;  %v6137_v21 = vld [vmem:[#allocation2 + $0x68] sm:$0xe] }
 0x18f   : > { %2839 = vmatmul.mubr.bf16.gmra.mrb[40].mxu0 %v18142_v5  ;;  %v15282_v49 = vsel %vm14405_vm7, %v5501_v1, %v5505_v13  ;;  %v5555_v39 = vrot.slane %v5553_v44, 5  ;;  %v13065_v13 = vld [vmem:[%s18081_s4 + $0x474] ss:$8 sps:$4 sm:$0xff]   ;;  %v13063_v5 = vld [vmem:[%s18081_s4 + $0x470] ss:$8 sps:$4 sm:$0xff]   ;;  %v15308_v1 = vld [vmem:[#allocation2] sm:$0xff] }
 0x190   : > { %2848 = vmatprep.mubr.bf16.mxu0 %v18143_v12  ;;  %2868 = vmatpush1.bf16.msra.mxu0 %v13054_v62  ;;  %v5529_v28 = vrot.slane %v5528_v7, 4  ;;  %v13069_v7 = vld [vmem:[%s18081_s4 + $0x490] ss:$8 sps:$4 sm:$0xff]   ;;  %v5396_v44 = vld [vmem:[#allocation2 + $0xa4] sm:$0x1] }
 0x191   : > { %2869 = vmatprep.subr.bf16.mxu0 %v13059_v33  ;;  %v5556_v23 = vor.u32 %v5555_v39, %v5552_v19  ;;  %v13060_v33 = vld [vmem:[%s18081_s4 + $0x460] ss:$8 sps:$4 sm:$0xff]   ;;  %v13074_v19 = vld [vmem:[%s18081_s4 + $0x4a4] ss:$8 sps:$4 sm:$0xff]  }
 0x192   : > { %v15296_v15 = vsel %vm14405_vm7, %v5529_v28, %v5533_v29  ;;  %v13072_v29 = vld [vmem:[%s18081_s4 + $0x4a0] ss:$8 sps:$4 sm:$0xff]   ;;  %v18146_v28 = vcombine.low %v14867_v38, %v14871_v25  ;;  %v6182_v25 = vrot.slane %v15214_v4, 5 }
 0x193   : > { %v5557_v20 = vrot.slane %v5556_v23, 4  ;;  %v6134_v39 = vld [vmem:[#allocation2 + $0x48] sm:$0xee]  ;;  %v13075_v23 = vld [vmem:[%s18081_s4 + $0x4b0] ss:$8 sps:$4 sm:$0xff]  }
 0x194   : > { %2870 = vmatpush1.bf16.msra.mxu0 %v13057_v6  ;;  %v13071_v6 = vld [vmem:[%s18081_s4 + $0x494] ss:$8 sps:$4 sm:$0xff]  }
 0x195   : > { %2871 = vmatprep.subr.bf16.mxu0 %v13062_v0  ;;  %v15303_v51 = vsel %vm14405_vm7, %v5557_v20, %v5561_v26  ;;  %v18145_v0 = vcombine.low %v14782_v8, %v14845_v42  ;;  %v13077_v8 = vld [vmem:[%s18081_s4 + $0x4b4] ss:$8 sps:$4 sm:$0xff]   ;;  %v13080_v26 = vld [vmem:[%s18081_s4 + $0x4c4] ss:$8 sps:$4 sm:$0xff]   ;;  %v13078_v20 = vld [vmem:[%s18081_s4 + $0x4c0] ss:$8 sps:$4 sm:$0xff]  }
 0x196   : > { %v6132_v42 = vld [vmem:[#allocation2 + $0x30] sm:$0xee] }
 0x197   : > { %2849 = vmatmul.mubr.bf16.gmra.mrb[44].mxu0 %v18144_v35  ;;  %v11525_v38 = vrot.slane %v6132_v42, 9  ;;  %v11527_v35 = vrot.slane %v6134_v39, 9  ;;  %v6144_v42 = vld [vmem:[#allocation2 + $0xc0] sm:$0xee]  ;;  %v5407_v39 = vld [vmem:[#allocation2 + $0xe4] sm:$0x11] }
 0x198   : > { %2872 = vmatpush1.bf16.msra.mxu0 %v13060_v33  ;;  %2891 = vmatprep.mubr.bf16.mxu0 %v15308_v1  ;;  %v6136_v33 = vld [vmem:[#allocation2 + $0x60] sm:$0xee]  ;;  %v6238_v12 = vrot.slane %v5407_v39, 5  ;;  %v5408_v39 = vld [vmem:[#allocation2 + $0xec] sm:$0x1] }
 0x199   : > { %2873 = vmatprep.subr.bf16.mxu0 %v13065_v13  ;;  %v6138_v13 = vld [vmem:[#allocation2 + $0x78] sm:$0xee] }
 0x19c   : > { %2874 = vmatpush1.bf16.msra.mxu0 %v13063_v5  ;;  %v13083_v5 = vld [vmem:[%s18081_s4 + $0x4d4] ss:$8 sps:$4 sm:$0xff]  }
 0x19d   : > { %3317 = vmatprep.subr.bf16.mxu0 %v13068_v48  ;;  %v6190_v48 = vrot.slane %v15218_v27, 5  ;;  %v13081_v27 = vld [vmem:[%s18081_s4 + $0x4d0] ss:$8 sps:$4 sm:$0xff]  }
 0x19f   : > { %2892 = vmatmul.mubr.bf16.vlgmr.msra.gmra.mrb[32].mxu0 %v18145_v0  ;;  %v6140_v0 = vld [vmem:[#allocation2 + $0x90] sm:$0xee]  ;;  %v15364_v4 = vsel %vm14753_vm9, %v11527_v35, %v6190_v48  ;;  %v6214_v35 = vrot.slane %v15243_v37, 5  ;;  %v6133_v48 = vld [vmem:[#allocation2 + $0x38] sm:$0xe] }
 0x1a0   : > { %3318 = vmatpush1.bf16.msra.mxu0 %v13066_v60  ;;  %2901 = vmatprep.mubr.bf16.mxu0 %v15308_v1  ;;  %v15360_v60 = vsel %vm14753_vm9, %v11525_v38, %v6182_v25  ;;  %18147 = vst [vmem:[#allocation10_spill] sm:$0xff] %v15364_v4  ;;  %v11533_v25 = vrot.slane %v6140_v0, 9  ;;  %v6141_v37 = vld [vmem:[#allocation2 + $0x98] sm:$0xe] }
 0x1a1   : > { %3319 = vmatprep.subr.bf16.mxu0 %v13071_v6  ;;  %v11529_v6 = vrot.slane %v6136_v33, 9  ;;  %v18148_v33 = vcombine.low %v14885_v14, %v14889_v11  ;;  %v15418_v4 = vld [vmem:[#allocation2 + $0x18] sm:$0xff] }
 0x1a2   : > { %v15398_v0 = vsel %vm14753_vm9, %v11533_v25, %v6214_v35  ;;  %v15420_v25 = vld [vmem:[#allocation2 + $0x30] sm:$0xff] }
 0x1a3   : > { %18151 = vst [vmem:[#allocation13_spill] sm:$0xff] %v15398_v0  ;;  %v18153_v0 = vcombine.low %v14899_v61, %v14910_v36 }
 0x1a4   : > { %3320 = vmatpush1.bf16.msra.mxu0 %v13069_v7  ;;  %v6142_v7 = vld [vmem:[#allocation2 + $0xa8] sm:$0xee] }
 0x1a5   : > { %3321 = vmatprep.subr.bf16.mxu0 %v13074_v19  ;;  %v5403_v19 = vld [vmem:[#allocation2 + $0xcc] sm:$0x11]  ;;  %v11535_v11 = vrot.slane %v6142_v7, 9  ;;  %v13084_v7 = vld [vmem:[%s18081_s4 + $0x4e0] ss:$8 sps:$4 sm:$0xff]  }
 0x1a7   : > { %2902 = vmatmul.mubr.bf16.gmra.mrb[36].mxu0 %v18146_v28  ;;  %v6135_v28 = vld [vmem:[#allocation2 + $0x50] sm:$0xe] }
 0x1a8   : > { %3322 = vmatpush1.bf16.msra.mxu0 %v13072_v29  ;;  %2911 = vmatprep.mubr.bf16.mxu0 %v15308_v1  ;;  %v6198_v29 = vrot.slane %v15222_v31, 5  ;;  %v13086_v31 = vld [vmem:[%s18081_s4 + $0x4e4] ss:$8 sps:$4 sm:$0xff]  }
 0x1a9   : > { %3323 = vmatprep.subr.bf16.mxu0 %v13077_v8  ;;  %v11531_v8 = vrot.slane %v6138_v13, 9  ;;  %v5380_v13 = vld [vmem:[#allocation2 + $0x44] sm:$0x1] }
 0x1aa   : > { %v15383_v38 = vsel %vm14753_vm9, %v11529_v6, %v6198_v29  ;;  %v5388_v6 = vld [vmem:[#allocation2 + $0x74] sm:$0x1]  ;;  %v5392_v29 = vld [vmem:[#allocation2 + $0x8c] sm:$0x1] }
 0x1ab   : > { %18149 = vst [vmem:[#allocation11_spill] sm:$0xff] %v15383_v38  ;;  %v11528_v38 = vrot.slane %v6135_v28, 9 }
 0x1ac   : > { %3324 = vmatpush1.bf16.msra.mxu0 %v13075_v23  ;;  %v6146_v23 = vld [vmem:[#allocation2 + $0xd8] sm:$0xee] }
 0x1ad   : > { %3325 = vmatprep.subr.bf16.mxu0 %v13080_v26  ;;  %v6206_v26 = vrot.slane %v15234_v58, 5  ;;  %v5384_v58 = vld [vmem:[#allocation2 + $0x5c] sm:$0x1]  ;;  %v11539_v62 = vrot.slane %v6146_v23, 9  ;;  %v11018_v23 = vcombine.high %v15418_v4, %v15420_v25 }
 0x1ae   : > { %v6194_v35 = vrot.slane %v5384_v58, 5  ;;  %v11534_v58 = vrot.slane %v6141_v37, 9 }
 0x1af   : > { %2912 = vmatmul.mubr.bf16.gmra.mrb[40].mxu0 %v18148_v33  ;;  %v15389_v14 = vsel %vm14753_vm9, %v11531_v8, %v6206_v26  ;;  %v6222_v33 = vrot.slane %v15256_v47, 5  ;;  %v6230_v8 = vrot.slane %v5403_v19, 5  ;;  %v6139_v26 = vld [vmem:[#allocation2 + $0x80] sm:$0xe] }
 0x1b0   : > { %3326 = vmatpush1.bf16.msra.mxu0 %v13078_v20  ;;  %2921 = vmatprep.mubr.bf16.mxu0 %v15308_v1  ;;  %18150 = vst [vmem:[#allocation12_spill] sm:$0xff] %v15389_v14  ;;  %v13091_v20 = vld [vmem:[%s18081_s4 + $0x4f4] ss:$8 sps:$4 sm:$0xff]   ;;  %v6186_v14 = vrot.slane %v5380_v13, 5 }
 0x1b1   : > { %3327 = vmatprep.subr.bf16.mxu0 %v13083_v5  ;;  %v15405_v47 = vsel %vm14753_vm9, %v11535_v11, %v6222_v33  ;;  %v11537_v5 = vrot.slane %v6144_v42, 9  ;;  %v5400_v11 = vld [vmem:[#allocation2 + $0xbc] sm:$0x1]  ;;  %v5404_v42 = vld [vmem:[#allocation2 + $0xd4] sm:$0x1]  ;;  %v11526_v33 = vrot.slane %v6133_v48, 9 }
 0x1b2   : > { %18152 = vst [vmem:[#allocation14_spill] sm:$0xff] %v15405_v47  ;;  %v11530_v47 = vrot.slane %v6137_v21, 9  ;;  %v6202_v48 = vrot.slane %v5388_v6, 5  ;;  %v6210_v21 = vrot.slane %v5392_v29, 5  ;;  %v11536_v6 = vrot.slane %v6143_v59, 9 }
 0x1b3   : > { %v15416_v19 = vsel %vm14753_vm9, %v11537_v5, %v6230_v8  ;;  %v6145_v5 = vld [vmem:[#allocation2 + $0xc8] sm:$0xe]  ;;  %v6147_v8 = vld [vmem:[#allocation2 + $0xe0] sm:$0xe]  ;;  %v15434_v13 = vsel %vm14753_vm9, %v11526_v33, %v6186_v14  ;;  %v13094_v14 = vld [vmem:[%s18081_s4 + $0x504] ss:$8 sps:$4 sm:$0xff]  }
 0x1b4   : > { %3328 = vmatpush1.bf16.msra.mxu0 %v13081_v27  ;;  %v15426_v27 = vsel %vm14753_vm9, %v11539_v62, %v6238_v12  ;;  %v15441_v12 = vsel %vm14753_vm9, %v11528_v38, %v6194_v35  ;;  %v11532_v62 = vrot.slane %v6139_v26, 9  ;;  %v15453_v36 = vsel %vm14753_vm9, %v11530_v47, %v6202_v48  ;;  %v13092_v26 = vld [vmem:[%s18081_s4 + $0x500] ss:$8 sps:$4 sm:$0xff]   ;;  %v13103_v48 = vld [vmem:[%s18081_s4 + $0x534] ss:$8 sps:$4 sm:$0xff]  }
 0x1b5   : > { %3329 = vmatprep.subr.bf16.mxu0 %v13086_v31  ;;  %v13089_v31 = vld [vmem:[%s18081_s4 + $0x4f0] ss:$8 sps:$4 sm:$0xff]   ;;  %v6218_v38 = vrot.slane %v5396_v44, 5  ;;  %v6234_v29 = vrot.slane %v5404_v42, 5  ;;  %v11540_v59 = vrot.slane %v6147_v8, 9  ;;  %v6242_v44 = vrot.slane %v5408_v39, 5 }
 0x1b6   : > { %v15457_v37 = vsel %vm14753_vm9, %v11532_v62, %v6210_v21  ;;  %v13100_v8 = vld [vmem:[%s18081_s4 + $0x524] ss:$8 sps:$4 sm:$0xff]   ;;  %v13101_v62 = vld [vmem:[%s18081_s4 + $0x530] ss:$8 sps:$4 sm:$0xff]  }
 0x1b7   : > { %2922 = vmatmul.mubr.bf16.gmra.mrb[44].mxu0 %v18153_v0  ;;  %v6226_v0 = vrot.slane %v5400_v11, 5  ;;  %v15466_v47 = vsel %vm14753_vm9, %v11534_v58, %v6218_v38  ;;  %v13106_v21 = vld [vmem:[%s18081_s4 + $0x544] ss:$8 sps:$4 sm:$0xff]   ;;  %v13104_v58 = vld [vmem:[%s18081_s4 + $0x540] ss:$8 sps:$4 sm:$0xff]  }
 0x1b8   : > { %3330 = vmatpush1.bf16.msra.mxu0 %v13084_v7  ;;  %3349 = vmatprep.mubr.bf16.mxu0 %v11018_v23  ;;  %v11538_v7 = vrot.slane %v6145_v5, 9  ;;  %v15483_v23 = vsel %vm14753_vm9, %v11540_v59, %v6242_v44  ;;  %v13095_v5 = vld [vmem:[%s18081_s4 + $0x510] ss:$8 sps:$4 sm:$0xff]   ;;  %v13116_v59 = vld [vmem:[%s18081_s4 + $0x580] ss:$8 sps:$4 sm:$0xff]  }
 0x1b9   : > { %3331 = vmatprep.subr.bf16.mxu0 %v13091_v20  ;;  %v13097_v20 = vld [vmem:[%s18081_s4 + $0x514] ss:$8 sps:$4 sm:$0xff]   ;;  %v15473_v11 = vsel %vm14753_vm9, %v11536_v6, %v6226_v0  ;;  %18156 = vst [vmem:[#allocation17_spill] sm:$0xff] %v15483_v23  ;;  %v13107_v38 = vld [vmem:[%s18081_s4 + $0x550] ss:$8 sps:$4 sm:$0xff]  }
 0x1ba   : > { %18154 = vst [vmem:[#allocation15_spill] sm:$0xff] %v15473_v11  ;;  %v15477_v42 = vsel %vm14753_vm9, %v11538_v7, %v6234_v29  ;;  %v13112_v6 = vld [vmem:[%s18081_s4 + $0x564] ss:$8 sps:$4 sm:$0xff]   ;;  %v13110_v0 = vld [vmem:[%s18081_s4 + $0x560] ss:$8 sps:$4 sm:$0xff]  }
 0x1bb   : > { %18155 = vst [vmem:[#allocation16_spill] sm:$0xff] %v15477_v42  ;;  %v13115_v7 = vld [vmem:[%s18081_s4 + $0x574] ss:$8 sps:$4 sm:$0xff]   ;;  %v13113_v29 = vld [vmem:[%s18081_s4 + $0x570] ss:$8 sps:$4 sm:$0xff]  }
 0x1bc   : > { %3332 = vmatpush1.bf16.msra.mxu0 %v13089_v31  ;;  %v13098_v31 = vld [vmem:[%s18081_s4 + $0x520] ss:$8 sps:$4 sm:$0xff]   ;;  %v13122_v44 = vld [vmem:[%s18081_s4 + $0x594] ss:$8 sps:$4 sm:$0xff]  }
 0x1bd   : > { %3333 = vmatprep.subr.bf16.mxu0 %v13094_v14  ;;  %v13109_v14 = vld [vmem:[%s18081_s4 + $0x554] ss:$8 sps:$4 sm:$0xff]   ;;  %v13158_v23 = vld [vmem:[#allocation2 + $0x80] ss:$24 sps:$4 sm:$0xff]  }
 0x1c0   : > { %3334 = vmatpush1.bf16.msra.mxu0 %v13092_v26  ;;  %v13118_v26 = vld [vmem:[%s18081_s4 + $0x584] ss:$8 sps:$4 sm:$0xff]  }
 0x1c1   : > { %3335 = vmatprep.subr.bf16.mxu0 %v13097_v20  ;;  %v11017_v20 = vcombine.low %v15418_v4, %v15420_v25  ;;  %v13124_v4 = vld [vmem:[%s18081_s4 + $0x5a0] ss:$8 sps:$4 sm:$0xff]   ;;  %v13130_v25 = vld [vmem:[%s18081_s4 + $0x5b4] ss:$8 sps:$4 sm:$0xff]  }
 0x1c4   : > { %3336 = vmatpush1.bf16.msra.mxu0 %v13095_v5  ;;  %v13988_v5 = vld [vmem:[#allocation2 + $0x48] sm:$0xff] }
 0x1c5   : > { %3337 = vmatprep.subr.bf16.mxu0 %v13100_v8  ;;  %v13989_v8 = vld [vmem:[#allocation2 + $0x60] sm:$0xff] }
 0x1c8   : > { %3338 = vmatpush1.bf16.msra.mxu0 %v13098_v31  ;;  %v11021_v31 = vcombine.high %v13988_v5, %v13989_v8 }
 0x1c9   : > { %3339 = vmatprep.subr.bf16.mxu0 %v13103_v48  ;;  %v13120_v48 = vld [vmem:[%s18081_s4 + $0x590] ss:$8 sps:$4 sm:$0xff]  }
 0x1cc   : > { %3340 = vmatpush1.bf16.msra.mxu0 %v13101_v62  ;;  %v13126_v62 = vld [vmem:[%s18081_s4 + $0x5a4] ss:$8 sps:$4 sm:$0xff]  }
 0x1cd   : > { %3341 = vmatprep.subr.bf16.mxu0 %v13106_v21  ;;  %v11020_v21 = vcombine.low %v13988_v5, %v13989_v8  ;;  %v13992_v5 = vld [vmem:[#allocation2 + $0xc0] sm:$0xff] }
 0x1d0   : > { %3342 = vmatpush1.bf16.msra.mxu0 %v13104_v58  ;;  %v13990_v58 = vld [vmem:[#allocation2 + $0x78] sm:$0xff] }
 0x1d1   : > { %3343 = vmatprep.subr.bf16.mxu0 %v13109_v14  ;;  %v13991_v14 = vld [vmem:[#allocation2 + $0x90] sm:$0xff] }
 0x1d4   : > { %3344 = vmatpush1.bf16.msra.mxu0 %v13107_v38  ;;  %v11024_v38 = vcombine.high %v13990_v58, %v13991_v14 }
 0x1d5   : > { %3345 = vmatprep.subr.bf16.mxu0 %v13112_v6  ;;  %v13128_v6 = vld [vmem:[%s18081_s4 + $0x5b0] ss:$8 sps:$4 sm:$0xff]  }
 0x1d8   : > { %3346 = vmatpush1.bf16.msra.mxu0 %v13110_v0  ;;  %v13134_v0 = vld [vmem:[%s18081_s4 + $0x5c4] ss:$8 sps:$4 sm:$0xff]  }
 0x1d9   : > { %3347 = vmatprep.subr.bf16.mxu0 %v13115_v7  ;;  %v15555_v7 = vld [vmem:[#allocation2 + $0xa8] sm:$0xff] }
 0x1da   : > { %v11027_v8 = vcombine.high %v15555_v7, %v13992_v5 }
 0x1dc   : > { %3348 = vmatpush1.bf16.msra.mxu0 %v13113_v29  ;;  %v13132_v29 = vld [vmem:[%s18081_s4 + $0x5c0] ss:$8 sps:$4 sm:$0xff]  }
 0x1dd   : > { %3390 = vmatprep.subr.bf16.mxu0 %v13118_v26  ;;  %v13137_v26 = vld [vmem:[%s18081_s4 + $0x5d4] ss:$8 sps:$4 sm:$0xff]  }
 0x1df   : > { %3350 = vmatmul.mubr.bf16.vlgmr.msra.gmra.mrb[32].mxu0 %v11017_v20 }
 0x1e0   : > { %3359 = vmatprep.mubr.bf16.mxu0 %v11021_v31  ;;  %3391 = vmatpush1.bf16.msra.mxu0 %v13116_v59 }
 0x1e1   : > { %3392 = vmatprep.subr.bf16.mxu0 %v13122_v44  ;;  %v11023_v44 = vcombine.low %v13990_v58, %v13991_v14 }
 0x1e4   : > { %3393 = vmatpush1.bf16.msra.mxu0 %v13120_v48 }
 0x1e5   : > { %3394 = vmatprep.subr.bf16.mxu0 %v13126_v62  ;;  %v13135_v62 = vld [vmem:[%s18081_s4 + $0x5d0] ss:$8 sps:$4 sm:$0xff]  }
 0x1e7   : > { %3360 = vmatmul.mubr.bf16.gmra.mrb[36].mxu0 %v11020_v21  ;;  %v13138_v21 = vld [vmem:[%s18081_s4 + $0x5e0] ss:$8 sps:$4 sm:$0xff]  }
 0x1e8   : > { %3369 = vmatprep.mubr.bf16.mxu0 %v11024_v38  ;;  %3395 = vmatpush1.bf16.msra.mxu0 %v13124_v4  ;;  %v13140_v4 = vld [vmem:[%s18081_s4 + $0x5e4] ss:$8 sps:$4 sm:$0xff]   ;;  %v13143_v38 = vld [vmem:[%s18081_s4 + $0x5f4] ss:$8 sps:$4 sm:$0xff]  }
 0x1e9   : > { %3396 = vmatprep.subr.bf16.mxu0 %v13130_v25 }
 0x1ea   : > { %v1845_v59 = vpop.f32.mrb[16].mxu0 }
 0x1eb   : > { %v1847_v20 = vpop.f32.mrb[17].mxu0 }
 0x1ec   : > { %3397 = vmatpush1.bf16.msra.mxu0 %v13128_v6  ;;  %v1849_v31 = vpop.f32.mrb[18].mxu0 }
 0x1ed   : > { %3398 = vmatprep.subr.bf16.mxu0 %v13134_v0  ;;  %v1851_v48 = vpop.f32.mrb[19].mxu0 }
 0x1ef   : > { %3370 = vmatmul.mubr.bf16.gmra.mrb[40].mxu0 %v11023_v44 }
 0x1f0   : > { %3379 = vmatprep.mubr.bf16.mxu0 %v11027_v8  ;;  %3399 = vmatpush1.bf16.msra.mxu0 %v13132_v29  ;;  %v1772_v25 = vpop.f32.mrb[8].mxu1  ;;  %v11026_v29 = vcombine.low %v15555_v7, %v13992_v5  ;;  %v13147_v5 = vld [vmem:[%s18081_s4 + $0x604] ss:$8 sps:$4 sm:$0xff]  }
 0x1f1   : > { %3400 = vmatprep.subr.bf16.mxu0 %v13137_v26  ;;  %v15573_v58 = vadd.f32 %v1845_v59, %v1772_v25  ;;  %v1774_v14 = vpop.f32.mrb[9].mxu1  ;;  %v13141_v25 = vld [vmem:[%s18081_s4 + $0x5f0] ss:$8 sps:$4 sm:$0xff]  }
 0x1f2   : > { %v15578_v6 = vadd.f32 %v1847_v20, %v1774_v14  ;;  %v1776_v0 = vpop.f32.mrb[10].mxu1  ;;  %v13144_v14 = vld [vmem:[#allocation2 + $0x20] ss:$24 sps:$4 sm:$0xff]  }
 0x1f3   : > { %v15581_v26 = vadd.f32 %v1849_v31, %v1776_v0  ;;  %v1778_v44 = vpop.f32.mrb[11].mxu1 }
 0x1f4   : > { %3401 = vmatpush1.bf16.msra.mxu0 %v13135_v62  ;;  %v15583_v8 = vadd.f32 %v1851_v48, %v1778_v44  ;;  %v1855_v39 = vpop.f32.mrb[20].mxu0  ;;  %v13145_v48 = vld [vmem:[%s18081_s4 + $0x600] ss:$8 sps:$4 sm:$0xff]  }
 0x1f5   : > { %3402 = vmatprep.subr.bf16.mxu0 %v13140_v4  ;;  %v1857_v59 = vpop.f32.mrb[21].mxu0 }
 0x1f6   : > { %v1859_v62 = vpop.f32.mrb[22].mxu0 }
 0x1f7   : > { %3380 = vmatmul.mubr.bf16.gmra.mrb[44].mxu0 %v11026_v29  ;;  %v1861_v20 = vpop.f32.mrb[23].mxu0 }
 0x1f8   : > { %3403 = vmatpush1.bf16.msra.mxu0 %v13138_v21  ;;  %3422 = vmatprep.mubr.bf16.mxu0 %v15308_v1 }
 0x1f9   : > { %3404 = vmatprep.subr.bf16.mxu0 %v13143_v38  ;;  %v13150_v38 = vld [vmem:[%s18081_s4 + $0x614] ss:$8 sps:$4 sm:$0xff]  }
 0x1fb   : > { %v1782_v31 = vpop.f32.mrb[12].mxu1 }
 0x1fc   : > { %3405 = vmatpush1.bf16.msra.mxu0 %v13141_v25  ;;  %v15595_v4 = vadd.f32 %v1855_v39, %v1782_v31  ;;  %v1784_v21 = vpop.f32.mrb[13].mxu1  ;;  %v13148_v39 = vld [vmem:[%s18081_s4 + $0x610] ss:$8 sps:$4 sm:$0xff]  }
 0x1fd   : > { %4072 = vmatprep.subr.bf16.mxu0 %v13147_v5  ;;  %v15600_v0 = vadd.f32 %v1857_v59, %v1784_v21  ;;  %v1786_v29 = vpop.f32.mrb[14].mxu1  ;;  %v13154_v59 = vld [vmem:[%s18081_s4 + $0x624] ss:$8 sps:$4 sm:$0xff]   ;;  %v13157_v21 = vld [vmem:[%s18081_s4 + $0x634] ss:$8 sps:$4 sm:$0xff]  }
 0x1fe   : > { %v15602_v44 = vadd.f32 %v1859_v62, %v1786_v29  ;;  %v1788_v25 = vpop.f32.mrb[15].mxu1 }
 0x1ff   : > { %3423 = vmatmul.mubr.bf16.vlgmr.msra.gmra.mrb[32].mxu0 %v13144_v14  ;;  %v15604_v33 = vadd.f32 %v1861_v20, %v1788_v25  ;;  %v1865_v35 = vpop.f32.mrb[24].mxu0  ;;  %v13152_v20 = vld [vmem:[%s18081_s4 + $0x620] ss:$8 sps:$4 sm:$0xff]  }
 0x200   : > { %4073 = vmatpush1.bf16.msra.mxu0 %v13145_v48  ;;  %3432 = vmatprep.mubr.bf16.mxu0 %v15308_v1  ;;  %v1867_v5 = vpop.f32.mrb[25].mxu0  ;;  %v13151_v48 = vld [vmem:[#allocation2 + $0x50] ss:$24 sps:$4 sm:$0xff]  }
 0x201   : > { %4074 = vmatprep.subr.bf16.mxu0 %v13150_v38  ;;  %v1869_v31 = vpop.f32.mrb[26].mxu0 }
 0x202   : > { %v1871_v62 = vpop.f32.mrb[27].mxu0 }
 0x204   : > { %4075 = vmatpush1.bf16.msra.mxu0 %v13148_v39  ;;  %v13155_v39 = vld [vmem:[%s18081_s4 + $0x630] ss:$8 sps:$4 sm:$0xff]  }
 0x205   : > { %4076 = vmatprep.subr.bf16.mxu0 %v13154_v59 }
 0x206   : > { %v1792_v14 = vpop.f32.mrb[16].mxu1 }
 0x207   : > { %v15619_v38 = vadd.f32 %v1865_v35, %v1792_v14  ;;  %v1794_v29 = vpop.f32.mrb[17].mxu1  ;;  %3433 = vmatmul.mubr.bf16.gmra.mrb[36].mxu0 %v13151_v48  ;;  %v13161_v35 = vld [vmem:[%s18081_s4 + $0x644] ss:$8 sps:$4 sm:$0xff]  }
 0x208   : > { %v15621_v25 = vadd.f32 %v1867_v5, %v1794_v29  ;;  %v1796_v61 = vpop.f32.mrb[18].mxu1  ;;  %4077 = vmatpush1.bf16.msra.mxu0 %v13152_v20  ;;  %3442 = vmatprep.mubr.bf16.mxu0 %v15308_v1  ;;  %v13159_v29 = vld [vmem:[%s18081_s4 + $0x640] ss:$8 sps:$4 sm:$0xff]  }
 0x209   : > { %v15627_v59 = vadd.f32 %v1869_v31, %v1796_v61  ;;  %v1798_v28 = vpop.f32.mrb[19].mxu1  ;;  %4078 = vmatprep.subr.bf16.mxu0 %v13157_v21  ;;  %v13164_v61 = vld [vmem:[%s18081_s4 + $0x654] ss:$8 sps:$4 sm:$0xff]  }
 0x20a   : > { %v15632_v14 = vadd.f32 %v1871_v62, %v1798_v28  ;;  %v1875_v5 = vpop.f32.mrb[28].mxu0  ;;  %v13162_v28 = vld [vmem:[%s18081_s4 + $0x650] ss:$8 sps:$4 sm:$0xff]  }
 0x20b   : > { %v1877_v48 = vpop.f32.mrb[29].mxu0 }
 0x20c   : > { %4079 = vmatpush1.bf16.msra.mxu0 %v13155_v39  ;;  %v1879_v20 = vpop.f32.mrb[30].mxu0  ;;  %v13168_v39 = vld [vmem:[%s18081_s4 + $0x664] ss:$8 sps:$4 sm:$0xff]  }
 0x20d   : > { %v1881_v63 = vpop.f32.mrb[31].mxu0  ;;  %4080 = vmatprep.subr.bf16.mxu0 %v13161_v35 }
 0x20f   : > { %3443 = vmatmul.mubr.bf16.gmra.mrb[40].mxu0 %v13158_v23 }
 0x210   : > { %v1802_v31 = vpop.f32.mrb[20].mxu1  ;;  %4081 = vmatpush1.bf16.msra.mxu0 %v13159_v29  ;;  %3452 = vmatprep.mubr.bf16.mxu0 %v15308_v1  ;;  %v13166_v1 = vld [vmem:[%s18081_s4 + $0x660] ss:$8 sps:$4 sm:$0xff]  }
 0x211   : > { %v15644_v62 = vadd.f32 %v1875_v5, %v1802_v31  ;;  %v1804_v21 = vpop.f32.mrb[21].mxu1  ;;  %4082 = vmatprep.subr.bf16.mxu0 %v13164_v61  ;;  %v13165_v5 = vld [vmem:[#allocation2 + $0xb0] ss:$24 sps:$4 sm:$0xff]   ;;  %v13171_v61 = vld [vmem:[%s18081_s4 + $0x674] ss:$8 sps:$4 sm:$0xff]  }
 0x212   : > { %v15649_v35 = vadd.f32 %v1877_v48, %v1804_v21  ;;  %v1806_v42 = vpop.f32.mrb[22].mxu1  ;;  %v13174_v48 = vld [vmem:[%s18081_s4 + $0x684] ss:$8 sps:$4 sm:$0xff]   ;;  %v13177_v31 = vld [vmem:[%s18081_s4 + $0x694] ss:$8 sps:$4 sm:$0xff]  }
 0x213   : > { %v15651_v23 = vadd.f32 %v1879_v20, %v1806_v42  ;;  %v1808_v29 = vpop.f32.mrb[23].mxu1  ;;  %v18157_v42 = vcombine.high %v14960_v57, %v14978_v50  ;;  %v13172_v20 = vld [vmem:[%s18081_s4 + $0x680] ss:$8 sps:$4 sm:$0xff]   ;;  %v13180_v21 = vld [vmem:[%s18081_s4 + $0x6a4] ss:$8 sps:$4 sm:$0xff]  }
 0x214   : > { %v15653_v11 = vadd.f32 %v1881_v63, %v1808_v29  ;;  %4083 = vmatpush1.bf16.msra.mxu0 %v13162_v28  ;;  %v13169_v63 = vld [vmem:[%s18081_s4 + $0x670] ss:$8 sps:$4 sm:$0xff]   ;;  %v13183_v29 = vld [vmem:[%s18081_s4 + $0x6b4] ss:$8 sps:$4 sm:$0xff]  }
 0x215   : > { %4084 = vmatprep.subr.bf16.mxu0 %v13168_v39  ;;  %v13175_v28 = vld [vmem:[%s18081_s4 + $0x690] ss:$8 sps:$4 sm:$0xff]   ;;  %v13178_v39 = vld [vmem:[%s18081_s4 + $0x6a0] ss:$8 sps:$4 sm:$0xff]  }
 0x217   : > { %3453 = vmatmul.mubr.bf16.gmra.mrb[44].mxu0 %v13165_v5  ;;  %v13186_v5 = vld [vmem:[%s18081_s4 + $0x6c4] ss:$8 sps:$4 sm:$0xff]  }
 0x218   : > { %4085 = vmatpush1.bf16.msra.mxu0 %v13166_v1  ;;  %4104 = vmatprep.mubr.bf16.mxu0 %v18157_v42  ;;  %v13181_v1 = vld [vmem:[%s18081_s4 + $0x6b0] ss:$8 sps:$4 sm:$0xff]   ;;  %v13189_v42 = vld [vmem:[%s18081_s4 + $0x6d4] ss:$8 sps:$4 sm:$0xff]  }
 0x219   : > { %4086 = vmatprep.subr.bf16.mxu0 %v13171_v61  ;;  %v13184_v61 = vld [vmem:[%s18081_s4 + $0x6c0] ss:$8 sps:$4 sm:$0xff]  }
 0x21c   : > { %4087 = vmatpush1.bf16.msra.mxu0 %v13169_v63  ;;  %v13187_v63 = vld [vmem:[%s18081_s4 + $0x6d0] ss:$8 sps:$4 sm:$0xff]  }
 0x21d   : > { %4088 = vmatprep.subr.bf16.mxu0 %v13174_v48  ;;  %v13192_v48 = vld [vmem:[%s18081_s4 + $0x6e4] ss:$8 sps:$4 sm:$0xff]  }
 0x220   : > { %4089 = vmatpush1.bf16.msra.mxu0 %v13172_v20 }
 0x221   : > { %4090 = vmatprep.subr.bf16.mxu0 %v13177_v31 }
 0x224   : > { %4091 = vmatpush1.bf16.msra.mxu0 %v13175_v28 }
 0x225   : > { %4092 = vmatprep.subr.bf16.mxu0 %v13180_v21 }
 0x228   : > { %4093 = vmatpush1.bf16.msra.mxu0 %v13178_v39 }
 0x229   : > { %4094 = vmatprep.subr.bf16.mxu0 %v13183_v29  ;;  %v13190_v29 = vld [vmem:[%s18081_s4 + $0x6e0] ss:$8 sps:$4 sm:$0xff]  }
 0x22c   : > { %4095 = vmatpush1.bf16.msra.mxu0 %v13181_v1 }
 0x22d   : > { %4096 = vmatprep.subr.bf16.mxu0 %v13186_v5 }
 0x230   : > { %4097 = vmatpush1.bf16.msra.mxu0 %v13184_v61 }
 0x231   : > { %4098 = vmatprep.subr.bf16.mxu0 %v13189_v42  ;;  %v3507_v42 = vld [vmem:[#allocation2 + $0xc0] sm:$0xff] }
 0x232   : > { %v2222_v20 = vpop.f32.mrb[24].mxu1 }
 0x233   : > { %v15707_v31 = vadd.f32 %v2222_v20, %v15573_v58  ;;  %v2224_v28 = vpop.f32.mrb[25].mxu1  ;;  %v13195_v58 = vld [vmem:[%s18081_s4 + $0x6f4] ss:$8 sps:$4 sm:$0xff]  }
 0x234   : > { %4099 = vmatpush1.bf16.msra.mxu0 %v13187_v63  ;;  %v15710_v21 = vadd.f32 %v2224_v28, %v15578_v6  ;;  %v2226_v39 = vpop.f32.mrb[26].mxu1  ;;  %v13193_v6 = vld [vmem:[%s18081_s4 + $0x6f0] ss:$8 sps:$4 sm:$0xff]  }
 0x235   : > { %v15716_v1 = vadd.f32 %v2226_v39, %v15581_v26  ;;  %4100 = vmatprep.subr.bf16.mxu0 %v13192_v48  ;;  %v2228_v5 = vpop.f32.mrb[27].mxu1  ;;  %v13198_v26 = vld [vmem:[%s18081_s4 + $0x704] ss:$8 sps:$4 sm:$0xff]   ;;  %v3680_v48 = vshrl.u32 %v15555_v7, 16  ;;  %v3708_v39 = vshrl.u32 %v3507_v42, 16 }
 0x236   : > { %v15722_v61 = vadd.f32 %v2228_v5, %v15583_v8  ;;  %v3683_v8 = vshll.u32 %v15555_v7, 16  ;;  %v13201_v7 = vld [vmem:[%s18081_s4 + $0x714] ss:$8 sps:$4 sm:$0xff]  }
 0x237   : > { %18158 = vst [vmem:[#allocation18_spill] sm:$0xff] %v15716_v1 }
 0x238   : > { %18159 = vst [vmem:[#allocation19_spill] sm:$0xff] %v15722_v61  ;;  %4101 = vmatpush1.bf16.msra.mxu0 %v13190_v29  ;;  %v3711_v29 = vshll.u32 %v3507_v42, 16  ;;  %v13196_v61 = vld [vmem:[%s18081_s4 + $0x700] ss:$8 sps:$4 sm:$0xff]  }
 0x239   : > { %4102 = vmatprep.subr.bf16.mxu0 %v13195_v58 }
 0x23a   : > { %v2232_v63 = vpop.f32.mrb[28].mxu1 }
 0x23b   : > { %v15732_v20 = vadd.f32 %v2232_v63, %v15595_v4  ;;  %v2234_v28 = vpop.f32.mrb[29].mxu1  ;;  %v3685_v63 = vrot.slane %v3683_v8, 5 }
 0x23c   : > { %4103 = vmatpush1.bf16.msra.mxu0 %v13193_v6  ;;  %v15736_v5 = vadd.f32 %v2234_v28, %v15600_v0  ;;  %v2236_v58 = vpop.f32.mrb[30].mxu1  ;;  %v18162_v0 = vcombine.low %v14960_v57, %v14978_v50  ;;  %v3682_v6 = vrot.slane %v3680_v48, 4  ;;  %v3710_v28 = vrot.slane %v3708_v39, 4  ;;  %v13993_v50 = vld [vmem:[#allocation2 + $0xb4] sm:$0x11] }
 0x23d   : > { %v15742_v1 = vadd.f32 %v2236_v58, %v15602_v44  ;;  %4145 = vmatprep.subr.bf16.mxu0 %v13198_v26  ;;  %v2238_v4 = vpop.f32.mrb[31].mxu1  ;;  %v18163_v44 = vcombine.high %v14995_v53, %v15004_v52  ;;  %v13199_v26 = vld [vmem:[%s18081_s4 + $0x710] ss:$8 sps:$4 sm:$0xff]   ;;  %v3689_v48 = vshll.u32 %v13993_v50, 16 }
 0x23e   : > { %18160 = vst [vmem:[#allocation20_spill] sm:$0xff] %v15736_v5  ;;  %v15748_v42 = vadd.f32 %v2238_v4, %v15604_v33  ;;  %v3713_v5 = vrot.slane %v3711_v29, 5  ;;  %v13204_v33 = vld [vmem:[%s18081_s4 + $0x724] ss:$8 sps:$4 sm:$0xff]   ;;  %v3686_v29 = vor.u32 %v3685_v63, %v3682_v6  ;;  %v3484_v50 = vld [vmem:[#allocation2 + $0x38] sm:$0xf] }
 0x23f   : > { %4105 = vmatmul.mubr.bf16.vlgmr.msra.gmra.mrb[32].mxu0 %v18162_v0  ;;  %v13994_v4 = vld [vmem:[#allocation2 + $0xcc] sm:$0x11] }
 0x240   : > { %18161 = vst [vmem:[#allocation21_spill] sm:$0xff] %v15748_v42  ;;  %4114 = vmatprep.mubr.bf16.mxu0 %v18163_v44  ;;  %4146 = vmatpush1.bf16.msra.mxu0 %v13196_v61  ;;  %v3714_v58 = vor.u32 %v3713_v5, %v3710_v28  ;;  %v3717_v61 = vshll.u32 %v13994_v4, 16  ;;  %v13202_v44 = vld [vmem:[%s18081_s4 + $0x720] ss:$8 sps:$4 sm:$0xff]   ;;  %v13207_v5 = vld [vmem:[%s18081_s4 + $0x734] ss:$8 sps:$4 sm:$0xff]  }
 0x241   : > { %4147 = vmatprep.subr.bf16.mxu0 %v13201_v7  ;;  %v3687_v63 = vrot.slane %v3686_v29, 4  ;;  %v3691_v28 = vrot.slane %v3689_v48, 5  ;;  %v3554_v48 = vshrl.u32 %v3484_v50, 16 }
 0x242   : > { %v2242_v57 = vpop.f32.mrb[32].mxu1 }
 0x243   : > { %v15763_v8 = vadd.f32 %v2242_v57, %v15619_v38  ;;  %v2244_v39 = vpop.f32.mrb[33].mxu1  ;;  %v3719_v57 = vrot.slane %v3717_v61, 5  ;;  %v3692_v4 = vsel %vm14405_vm7, %v3687_v63, %v3691_v28  ;;  %v13213_v63 = vld [vmem:[%s18081_s4 + $0x754] ss:$8 sps:$4 sm:$0xff]  }
 0x244   : > { %4148 = vmatpush1.bf16.msra.mxu0 %v13199_v26  ;;  %v15766_v0 = vadd.f32 %v2244_v39, %v15621_v25  ;;  %v2246_v7 = vpop.f32.mrb[34].mxu1  ;;  %v18164_v25 = vcombine.low %v14995_v53, %v15004_v52  ;;  %v3715_v26 = vrot.slane %v3714_v58, 4  ;;  %v13210_v53 = vld [vmem:[%s18081_s4 + $0x744] ss:$8 sps:$4 sm:$0xff]   ;;  %v3480_v52 = vld [vmem:[#allocation2 + $0x20] sm:$0xf] }
 0x245   : > { %v15772_v42 = vadd.f32 %v2246_v7, %v15627_v59  ;;  %4149 = vmatprep.subr.bf16.mxu0 %v13204_v33  ;;  %v2248_v38 = vpop.f32.mrb[35].mxu1  ;;  %v18165_v59 = vcombine.high %v15026_v40, %v15033_v18  ;;  %v13205_v33 = vld [vmem:[%s18081_s4 + $0x730] ss:$8 sps:$4 sm:$0xff]   ;;  %v3557_v39 = vshll.u32 %v3484_v50, 16 }
 0x246   : > { %v15778_v6 = vadd.f32 %v2248_v38, %v15632_v14  ;;  %v3720_v61 = vsel %vm14405_vm7, %v3715_v26, %v3719_v57  ;;  %v13208_v38 = vld [vmem:[%s18081_s4 + $0x740] ss:$8 sps:$4 sm:$0xff]   ;;  %v3556_v26 = vrot.slane %v3554_v48, 4 }
 0x247   : > { %4115 = vmatmul.mubr.bf16.gmra.mrb[36].mxu0 %v18164_v25  ;;  %v3529_v25 = vshll.u32 %v3480_v52, 16  ;;  %v3559_v57 = vrot.slane %v3557_v39, 5 }
 0x248   : > { %4124 = vmatprep.mubr.bf16.mxu0 %v18165_v59  ;;  %4150 = vmatpush1.bf16.msra.mxu0 %v13202_v44  ;;  %v18170_v59 = vcombine.low %v15026_v40, %v15033_v18  ;;  %v13214_v40 = vld [vmem:[%s18081_s4 + $0x760] ss:$8 sps:$4 sm:$0xff]  }
 0x249   : > { %4151 = vmatprep.subr.bf16.mxu0 %v13207_v5  ;;  %v3526_v5 = vshrl.u32 %v3480_v52, 16  ;;  %v3531_v52 = vrot.slane %v3529_v25, 5  ;;  %v3560_v48 = vor.u32 %v3559_v57, %v3556_v26  ;;  %v11134_v25 = vcombine.low %v3692_v4, %v3720_v61 }
 0x24a   : > { %v2252_v14 = vpop.f32.mrb[36].mxu1 }
 0x24b   : > { %v15793_v29 = vadd.f32 %v2252_v14, %v15644_v62  ;;  %v2254_v58 = vpop.f32.mrb[37].mxu1  ;;  %v3488_v14 = vld [vmem:[#allocation2 + $0x50] sm:$0xf]  ;;  %v3561_v57 = vrot.slane %v3560_v48, 4 }
 0x24c   : > { %4152 = vmatpush1.bf16.msra.mxu0 %v13205_v33  ;;  %v15800_v7 = vadd.f32 %v2254_v58, %v15649_v35  ;;  %v2256_v44 = vpop.f32.mrb[38].mxu1  ;;  %v11135_v35 = vcombine.high %v3692_v4, %v3720_v61  ;;  %v3492_v33 = vld [vmem:[#allocation2 + $0x68] sm:$0xf] }
 0x24d   : > { %18166 = vst [vmem:[#allocation22_spill] sm:$0xff] %v15793_v29  ;;  %v15806_v62 = vadd.f32 %v2256_v44, %v15651_v23  ;;  %4153 = vmatprep.subr.bf16.mxu0 %v13210_v53  ;;  %v2258_v50 = vpop.f32.mrb[39].mxu1  ;;  %v13211_v23 = vld [vmem:[%s18081_s4 + $0x750] ss:$8 sps:$4 sm:$0xff]   ;;  %v3528_v53 = vrot.slane %v3526_v5, 4  ;;  %v3610_v39 = vshrl.u32 %v3492_v33, 16 }
 0x24e   : > { %18167 = vst [vmem:[#allocation23_spill] sm:$0xff] %v15800_v7  ;;  %v15812_v28 = vadd.f32 %v2258_v50, %v15653_v11  ;;  %v13216_v11 = vld [vmem:[%s18081_s4 + $0x764] ss:$8 sps:$4 sm:$0xff]   ;;  %v3613_v58 = vshll.u32 %v3492_v33, 16  ;;  %v3582_v50 = vshrl.u32 %v3488_v14, 16  ;;  %v3585_v5 = vshll.u32 %v3488_v14, 16 }
 0x24f   : > { %18168 = vst [vmem:[#allocation24_spill] sm:$0xff] %v15806_v62  ;;  %4125 = vmatmul.mubr.bf16.gmra.mrb[40].mxu0 %v18170_v59  ;;  %v3532_v18 = vor.u32 %v3531_v52, %v3528_v53  ;;  %v13995_v44 = vld [vmem:[#allocation2 + $0x44] sm:$0x1]  ;;  %v3612_v59 = vrot.slane %v3610_v39, 4  ;;  %v13217_v53 = vld [vmem:[%s18081_s4 + $0x770] ss:$8 sps:$4 sm:$0xff]  }
 0x250   : > { %18169 = vst [vmem:[#allocation25_spill] sm:$0xff] %v15812_v28  ;;  %4134 = vmatprep.mubr.bf16.mxu0 %v11135_v35  ;;  %4154 = vmatpush1.bf16.msra.mxu0 %v13208_v38  ;;  %v3563_v38 = vshll.u32 %v13995_v44, 16  ;;  %v13996_v35 = vld [vmem:[#allocation2 + $0x2c] sm:$0x1]  ;;  %v3615_v33 = vrot.slane %v3613_v58, 5  ;;  %v15832_v52 = vld [vmem:[#allocation2] sm:$0xff] }
 0x251   : > { %4155 = vmatprep.subr.bf16.mxu0 %v13213_v63  ;;  %v13219_v63 = vld [vmem:[%s18081_s4 + $0x774] ss:$8 sps:$4 sm:$0xff]   ;;  %v3535_v26 = vshll.u32 %v13996_v35, 16  ;;  %v3500_v28 = vld [vmem:[#allocation2 + $0x98] sm:$0xf]  ;;  %v3533_v4 = vrot.slane %v3532_v18, 4 }
 0x252   : > { %v3565_v61 = vrot.slane %v3563_v38, 5  ;;  %v3587_v14 = vrot.slane %v3585_v5, 5  ;;  %v13222_v39 = vld [vmem:[%s18081_s4 + $0x784] ss:$8 sps:$4 sm:$0xff]   ;;  %v3666_v35 = vshrl.u32 %v3500_v28, 16  ;;  %v3669_v62 = vshll.u32 %v3500_v28, 16 }
 0x253   : > { %v3537_v48 = vrot.slane %v3535_v26, 5  ;;  %v13220_v38 = vld [vmem:[%s18081_s4 + $0x780] ss:$8 sps:$4 sm:$0xff]   ;;  %v13998_v5 = vld [vmem:[#allocation2 + $0x5c] sm:$0x1] }
 0x254   : > { %4156 = vmatpush1.bf16.msra.mxu0 %v13211_v23  ;;  %v3496_v23 = vld [vmem:[#allocation2 + $0x80] sm:$0xf]  ;;  %v3566_v44 = vsel %vm14405_vm7, %v3561_v57, %v3565_v61  ;;  %v13999_v26 = vld [vmem:[#allocation2 + $0x74] sm:$0x1]  ;;  %v3504_v61 = vld [vmem:[#allocation2 + $0xb0] sm:$0xf] }
 0x255   : > { %4157 = vmatprep.subr.bf16.mxu0 %v13216_v11  ;;  %v3584_v11 = vrot.slane %v3582_v50, 4  ;;  %v3638_v58 = vshrl.u32 %v3496_v23, 16  ;;  %v3538_v18 = vsel %vm14405_vm7, %v3533_v4, %v3537_v48  ;;  %v3619_v7 = vshll.u32 %v13999_v26, 16  ;;  %v13225_v57 = vld [vmem:[%s18081_s4 + $0x794] ss:$8 sps:$4 sm:$0xff]  }
 0x256   : > { %v3671_v4 = vrot.slane %v3669_v62, 5  ;;  %v3508_v48 = vld [vmem:[#allocation2 + $0xc8] sm:$0xf]  ;;  %v13228_v62 = vld [vmem:[%s18081_s4 + $0x7a4] ss:$8 sps:$4 sm:$0xff]  }
 0x257   : > { %4135 = vmatmul.mubr.bf16.gmra.mrb[44].mxu0 %v11134_v25  ;;  %v3616_v25 = vor.u32 %v3615_v33, %v3612_v59  ;;  %v3588_v50 = vor.u32 %v3587_v14, %v3584_v11  ;;  %v3640_v28 = vrot.slane %v3638_v58, 4  ;;  %v13223_v11 = vld [vmem:[%s18081_s4 + $0x790] ss:$8 sps:$4 sm:$0xff]   ;;  %v3722_v29 = vshrl.u32 %v3508_v48, 16 }
 0x258   : > { %4158 = vmatpush1.bf16.msra.mxu0 %v13214_v40  ;;  %4177 = vmatprep.mubr.bf16.mxu0 %v15832_v52  ;;  %v3641_v40 = vshll.u32 %v3496_v23, 16  ;;  %v11127_v23 = vcombine.low %v3538_v18, %v3566_v44  ;;  %v3621_v44 = vrot.slane %v3619_v7, 5  ;;  %v14000_v18 = vld [vmem:[#allocation2 + $0x8c] sm:$0x1] }
 0x259   : > { %4159 = vmatprep.subr.bf16.mxu0 %v13219_v63  ;;  %v3591_v63 = vshll.u32 %v13998_v5, 16  ;;  %v3617_v33 = vrot.slane %v3616_v25, 4  ;;  %v3589_v14 = vrot.slane %v3588_v50, 4  ;;  %v3647_v5 = vshll.u32 %v14000_v18, 16  ;;  %v13234_v18 = vld [vmem:[%s18081_s4 + $0x7c4] ss:$8 sps:$4 sm:$0xff]  }
 0x25a   : > { %v3643_v59 = vrot.slane %v3641_v40, 5  ;;  %v14001_v40 = vld [vmem:[#allocation2 + $0xa4] sm:$0x1]  ;;  %v3725_v50 = vshll.u32 %v3508_v48, 16 }
 0x25b   : > { %v3675_v25 = vshll.u32 %v14001_v40, 16  ;;  %v3622_v26 = vsel %vm14405_vm7, %v3617_v33, %v3621_v44 }
 0x25c   : > { %4160 = vmatpush1.bf16.msra.mxu0 %v13217_v53  ;;  %v3668_v53 = vrot.slane %v3666_v35, 4  ;;  %v3644_v58 = vor.u32 %v3643_v59, %v3640_v28  ;;  %v3694_v35 = vshrl.u32 %v3504_v61, 16  ;;  %v13231_v59 = vld [vmem:[%s18081_s4 + $0x7b4] ss:$8 sps:$4 sm:$0xff]   ;;  %v3727_v44 = vrot.slane %v3725_v50, 5 }
 0x25d   : > { %4683 = vmatprep.subr.bf16.mxu0 %v13222_v39  ;;  %v3593_v39 = vrot.slane %v3591_v63, 5  ;;  %v13226_v63 = vld [vmem:[%s18081_s4 + $0x7a0] ss:$8 sps:$4 sm:$0xff]   ;;  %v3677_v33 = vrot.slane %v3675_v25, 5  ;;  %v14003_v25 = vld [vmem:[#allocation2 + $0xd4] sm:$0x1] }
 0x25f   : > { %4178 = vmatmul.mubr.bf16.vlgmr.msra.gmra.mrb[32].mxu0 %v11127_v23  ;;  %v3672_v23 = vor.u32 %v3671_v4, %v3668_v53  ;;  %v3594_v7 = vsel %vm14405_vm7, %v3589_v14, %v3593_v39  ;;  %v3696_v53 = vrot.slane %v3694_v35, 4  ;;  %v13229_v14 = vld [vmem:[%s18081_s4 + $0x7b0] ss:$8 sps:$4 sm:$0xff]   ;;  %v3731_v35 = vshll.u32 %v14003_v25, 16  ;;  %v13258_v25 = vld [vmem:[%s18081_s4 + $0x844] ss:$8 sps:$4 sm:$0xff]  }
 0x260   : > { %4684 = vmatpush1.bf16.msra.mxu0 %v13220_v38  ;;  %4187 = vmatprep.mubr.bf16.mxu0 %v15832_v52  ;;  %v3697_v38 = vshll.u32 %v3504_v61, 16  ;;  %v11130_v28 = vcombine.low %v3594_v7, %v3622_v26  ;;  %v3645_v61 = vrot.slane %v3644_v58, 4 }
 0x261   : > { %4685 = vmatprep.subr.bf16.mxu0 %v13225_v57  ;;  %v3649_v57 = vrot.slane %v3647_v5, 5  ;;  %v3673_v4 = vrot.slane %v3672_v23, 4  ;;  %v14002_v5 = vld [vmem:[#allocation2 + $0xbc] sm:$0x1] }
 0x262   : > { %v3699_v48 = vrot.slane %v3697_v38, 5  ;;  %v13232_v38 = vld [vmem:[%s18081_s4 + $0x7c0] ss:$8 sps:$4 sm:$0xff]   ;;  %v13237_v23 = vld [vmem:[%s18081_s4 + $0x7d4] ss:$8 sps:$4 sm:$0xff]  }
 0x263   : > { %v3650_v39 = vsel %vm14405_vm7, %v3645_v61, %v3649_v57  ;;  %v3733_v57 = vrot.slane %v3731_v35, 5  ;;  %v13256_v35 = vld [vmem:[%s18081_s4 + $0x840] ss:$8 sps:$4 sm:$0xff]  }
 0x264   : > { %4686 = vmatpush1.bf16.msra.mxu0 %v13223_v11  ;;  %v3724_v11 = vrot.slane %v3722_v29, 4  ;;  %v3678_v29 = vsel %vm14405_vm7, %v3673_v4, %v3677_v33  ;;  %v3700_v58 = vor.u32 %v3699_v48, %v3696_v53  ;;  %v13238_v53 = vld [vmem:[%s18081_s4 + $0x7e0] ss:$8 sps:$4 sm:$0xff]   ;;  %v13243_v48 = vld [vmem:[%s18081_s4 + $0x7f4] ss:$8 sps:$4 sm:$0xff]  }
 0x265   : > { %4687 = vmatprep.subr.bf16.mxu0 %v13228_v62  ;;  %v3703_v62 = vshll.u32 %v14002_v5, 16  ;;  %v11133_v26 = vcombine.low %v3650_v39, %v3678_v29  ;;  %v13244_v39 = vld [vmem:[%s18081_s4 + $0x800] ss:$8 sps:$4 sm:$0xff]   ;;  %v13247_v5 = vld [vmem:[%s18081_s4 + $0x810] ss:$8 sps:$4 sm:$0xff]  }
 0x266   : > { %v3728_v40 = vor.u32 %v3727_v44, %v3724_v11  ;;  %v3701_v50 = vrot.slane %v3700_v58, 4  ;;  %v18171_v11 = vcombine.high %v15094_v56, %v15099_v30  ;;  %v13241_v44 = vld [vmem:[%s18081_s4 + $0x7f0] ss:$8 sps:$4 sm:$0xff]   ;;  %v13250_v29 = vld [vmem:[%s18081_s4 + $0x820] ss:$8 sps:$4 sm:$0xff]  }
 0x267   : > { %4188 = vmatmul.mubr.bf16.gmra.mrb[36].mxu0 %v11130_v28  ;;  %v3705_v7 = vrot.slane %v3703_v62, 5  ;;  %v13235_v28 = vld [vmem:[%s18081_s4 + $0x7d0] ss:$8 sps:$4 sm:$0xff]   ;;  %v13252_v62 = vld [vmem:[%s18081_s4 + $0x824] ss:$8 sps:$4 sm:$0xff]  }
 0x268   : > { %4688 = vmatpush1.bf16.msra.mxu0 %v13226_v63  ;;  %4197 = vmatprep.mubr.bf16.mxu0 %v15832_v52  ;;  %v3729_v63 = vrot.slane %v3728_v40, 4  ;;  %v13255_v58 = vld [vmem:[%s18081_s4 + $0x834] ss:$8 sps:$4 sm:$0xff]   ;;  %v13253_v40 = vld [vmem:[%s18081_s4 + $0x830] ss:$8 sps:$4 sm:$0xff]  }
 0x269   : > { %4689 = vmatprep.subr.bf16.mxu0 %v13231_v59  ;;  %v13240_v59 = vld [vmem:[%s18081_s4 + $0x7e4] ss:$8 sps:$4 sm:$0xff]   ;;  %v3706_v61 = vsel %vm14405_vm7, %v3701_v50, %v3705_v7  ;;  %v13262_v50 = vld [vmem:[%s18081_s4 + $0x860] ss:$8 sps:$4 sm:$0xff]   ;;  %v13267_v7 = vld [vmem:[%s18081_s4 + $0x874] ss:$8 sps:$4 sm:$0xff]  }
 0x26a   : > { %v3734_v33 = vsel %vm14405_vm7, %v3729_v63, %v3733_v57  ;;  %v13265_v63 = vld [vmem:[%s18081_s4 + $0x870] ss:$8 sps:$4 sm:$0xff]   ;;  %v13270_v57 = vld [vmem:[%s18081_s4 + $0x884] ss:$8 sps:$4 sm:$0xff]  }
 0x26b   : > { %v11136_v4 = vcombine.low %v3706_v61, %v3734_v33  ;;  %v18172_v61 = vcombine.low %v15094_v56, %v15099_v30  ;;  %v18173_v33 = vcombine.high %v15111_v16, %v15121_v45  ;;  %v13274_v56 = vld [vmem:[%s18081_s4 + $0x8a0] ss:$8 sps:$4 sm:$0xff]   ;;  %v13279_v30 = vld [vmem:[%s18081_s4 + $0x8b4] ss:$8 sps:$4 sm:$0xff]  }
 0x26c   : > { %4690 = vmatpush1.bf16.msra.mxu0 %v13229_v14  ;;  %v13246_v14 = vld [vmem:[%s18081_s4 + $0x804] ss:$8 sps:$4 sm:$0xff]  }
 0x26d   : > { %4691 = vmatprep.subr.bf16.mxu0 %v13234_v18  ;;  %v13249_v18 = vld [vmem:[%s18081_s4 + $0x814] ss:$8 sps:$4 sm:$0xff]  }
 0x26f   : > { %4198 = vmatmul.mubr.bf16.gmra.mrb[40].mxu0 %v11133_v26  ;;  %v13259_v26 = vld [vmem:[%s18081_s4 + $0x850] ss:$8 sps:$4 sm:$0xff]  }
 0x270   : > { %4692 = vmatpush1.bf16.msra.mxu0 %v13232_v38  ;;  %4207 = vmatprep.mubr.bf16.mxu0 %v15832_v52  ;;  %v13261_v38 = vld [vmem:[%s18081_s4 + $0x854] ss:$8 sps:$4 sm:$0xff]  }
 0x271   : > { %4693 = vmatprep.subr.bf16.mxu0 %v13237_v23  ;;  %v13264_v23 = vld [vmem:[%s18081_s4 + $0x864] ss:$8 sps:$4 sm:$0xff]  }
 0x274   : > { %4694 = vmatpush1.bf16.msra.mxu0 %v13235_v28  ;;  %v13268_v28 = vld [vmem:[%s18081_s4 + $0x880] ss:$8 sps:$4 sm:$0xff]  }
 0x275   : > { %4695 = vmatprep.subr.bf16.mxu0 %v13240_v59  ;;  %v13273_v59 = vld [vmem:[%s18081_s4 + $0x894] ss:$8 sps:$4 sm:$0xff]  }
 0x277   : > { %4208 = vmatmul.mubr.bf16.gmra.mrb[44].mxu0 %v11136_v4  ;;  %v13276_v4 = vld [vmem:[%s18081_s4 + $0x8a4] ss:$8 sps:$4 sm:$0xff]  }
 0x278   : > { %4696 = vmatpush1.bf16.msra.mxu0 %v13238_v53  ;;  %4715 = vmatprep.mubr.bf16.mxu0 %v18171_v11  ;;  %v13271_v53 = vld [vmem:[%s18081_s4 + $0x890] ss:$8 sps:$4 sm:$0xff]   ;;  %v18175_v11 = vcombine.high %v15133_v32, %v15140_v34 }
 0x279   : > { %4697 = vmatprep.subr.bf16.mxu0 %v13243_v48  ;;  %v18174_v48 = vcombine.low %v15111_v16, %v15121_v45  ;;  %v13280_v16 = vld [vmem:[%s18081_s4 + $0x8c0] ss:$8 sps:$4 sm:$0xff]   ;;  %v13285_v45 = vld [vmem:[%s18081_s4 + $0x8d4] ss:$8 sps:$4 sm:$0xff]  }
 0x27c   : > { %4698 = vmatpush1.bf16.msra.mxu0 %v13241_v44  ;;  %v13277_v44 = vld [vmem:[%s18081_s4 + $0x8b0] ss:$8 sps:$4 sm:$0xff]  }
 0x27d   : > { %4699 = vmatprep.subr.bf16.mxu0 %v13246_v14  ;;  %v13282_v14 = vld [vmem:[%s18081_s4 + $0x8c4] ss:$8 sps:$4 sm:$0xff]  }
 0x280   : > { %4700 = vmatpush1.bf16.msra.mxu0 %v13244_v39  ;;  %v18176_v39 = vcombine.low %v15133_v32, %v15140_v34  ;;  %v13286_v34 = vld [vmem:[%s18081_s4 + $0x8e0] ss:$8 sps:$4 sm:$0xff]   ;;  %v13291_v32 = vld [vmem:[%s18081_s4 + $0x8f4] ss:$8 sps:$4 sm:$0xff]  }
 0x281   : > { %4701 = vmatprep.subr.bf16.mxu0 %v13249_v18  ;;  %v18177_v18 = vcombine.high %v15151_v3, %v15155_v10 }
 0x284   : > { %4702 = vmatpush1.bf16.msra.mxu0 %v13247_v5  ;;  %v13283_v5 = vld [vmem:[%s18081_s4 + $0x8d0] ss:$8 sps:$4 sm:$0xff]  }
 0x285   : > { %4703 = vmatprep.subr.bf16.mxu0 %v13252_v62  ;;  %v13288_v62 = vld [vmem:[%s18081_s4 + $0x8e4] ss:$8 sps:$4 sm:$0xff]  }
 0x288   : > { %4704 = vmatpush1.bf16.msra.mxu0 %v13250_v29  ;;  %v18178_v29 = vcombine.low %v15151_v3, %v15155_v10  ;;  %v13297_v3 = vld [vmem:[%s18081_s4 + $0x914] ss:$8 sps:$4 sm:$0xff]   ;;  %v18179_v10 = vcombine.low %v15159_v9, %v15167_v54  ;;  %v18180_v54 = vcombine.low %v15173_v24, %v15183_v17  ;;  %v18181_v17 = vcombine.low %v15187_v43, %v15196_v55 }
 0x289   : > { %4705 = vmatprep.subr.bf16.mxu0 %v13255_v58  ;;  %v13289_v58 = vld [vmem:[%s18081_s4 + $0x8f0] ss:$8 sps:$4 sm:$0xff]   ;;  %v13303_v9 = vld [vmem:[%s18081_s4 + $0x934] ss:$8 sps:$4 sm:$0xff]  }
 0x28a   : > { %v13309_v24 = vld [vmem:[%s18081_s4 + $0x954] ss:$8 sps:$4 sm:$0xff]  }
 0x28b   : > { %v13317_v43 = vld [vmem:[%s18081_s4 + $0x974] ss:$8 sps:$4 sm:$0xff]  }
 0x28c   : > { %4706 = vmatpush1.bf16.msra.mxu0 %v13253_v40  ;;  %v13294_v40 = vld [vmem:[%s18081_s4 + $0x904] ss:$8 sps:$4 sm:$0xff]   ;;  %v14004_v55 = vld [vmem:[#allocation2 + $0x30] sm:$0xff] }
 0x28d   : > { %4707 = vmatprep.subr.bf16.mxu0 %v13258_v25  ;;  %v13292_v25 = vld [vmem:[%s18081_s4 + $0x900] ss:$8 sps:$4 sm:$0xff]  }
 0x290   : > { %4708 = vmatpush1.bf16.msra.mxu0 %v13256_v35  ;;  %v13295_v35 = vld [vmem:[%s18081_s4 + $0x910] ss:$8 sps:$4 sm:$0xff]  }
 0x291   : > { %4709 = vmatprep.subr.bf16.mxu0 %v13261_v38  ;;  %v13300_v38 = vld [vmem:[%s18081_s4 + $0x924] ss:$8 sps:$4 sm:$0xff]  }
 0x294   : > { %4710 = vmatpush1.bf16.msra.mxu0 %v13259_v26  ;;  %v13298_v26 = vld [vmem:[%s18081_s4 + $0x920] ss:$8 sps:$4 sm:$0xff]  }
 0x295   : > { %4711 = vmatprep.subr.bf16.mxu0 %v13264_v23  ;;  %v13301_v23 = vld [vmem:[%s18081_s4 + $0x930] ss:$8 sps:$4 sm:$0xff]  }
 0x298   : > { %4712 = vmatpush1.bf16.msra.mxu0 %v13262_v50  ;;  %v13306_v50 = vld [vmem:[%s18081_s4 + $0x944] ss:$8 sps:$4 sm:$0xff]  }
 0x299   : > { %4713 = vmatprep.subr.bf16.mxu0 %v13267_v7  ;;  %v13304_v7 = vld [vmem:[%s18081_s4 + $0x940] ss:$8 sps:$4 sm:$0xff]  }
 0x29c   : > { %4714 = vmatpush1.bf16.msra.mxu0 %v13265_v63  ;;  %v13307_v63 = vld [vmem:[%s18081_s4 + $0x950] ss:$8 sps:$4 sm:$0xff]  }
 0x29d   : > { %4756 = vmatprep.subr.bf16.mxu0 %v13270_v57  ;;  %v13312_v57 = vld [vmem:[%s18081_s4 + $0x964] ss:$8 sps:$4 sm:$0xff]  }
 0x29f   : > { %4716 = vmatmul.mubr.bf16.vlgmr.msra.gmra.mrb[32].mxu0 %v18172_v61 }
 0x2a0   : > { %4725 = vmatprep.mubr.bf16.mxu0 %v18173_v33  ;;  %4757 = vmatpush1.bf16.msra.mxu0 %v13268_v28  ;;  %v13310_v28 = vld [vmem:[%s18081_s4 + $0x960] ss:$8 sps:$4 sm:$0xff]   ;;  %v18182_v33 = vld [vmem:[#allocation8_spill] sm:$0xff] }
 0x2a1   : > { %4758 = vmatprep.subr.bf16.mxu0 %v13273_v59  ;;  %v14005_v59 = vld [vmem:[#allocation2 + $0x48] sm:$0xff] }
 0x2a2   : > { %v11358_v61 = vcombine.high %v14004_v55, %v14005_v59 }
 0x2a4   : > { %4759 = vmatpush1.bf16.msra.mxu0 %v13271_v53  ;;  %v18183_v53 = vld [vmem:[#allocation9_spill] sm:$0xff] }
 0x2a5   : > { %4760 = vmatprep.subr.bf16.mxu0 %v13276_v4  ;;  %v18184_v4 = vcombine.low %v18182_v33, %v18183_v53  ;;  %v13363_v33 = vld [vmem:[%s18081_s4 + $0xa54] ss:$8 sps:$4 sm:$0xff]  }
 0x2a7   : > { %4726 = vmatmul.mubr.bf16.gmra.mrb[36].mxu0 %v18174_v48  ;;  %v13318_v48 = vld [vmem:[%s18081_s4 + $0x980] ss:$8 sps:$4 sm:$0xff]  }
 0x2a8   : > { %4735 = vmatprep.mubr.bf16.mxu0 %v18175_v11  ;;  %4761 = vmatpush1.bf16.msra.mxu0 %v13274_v56  ;;  %v13315_v56 = vld [vmem:[%s18081_s4 + $0x970] ss:$8 sps:$4 sm:$0xff]   ;;  %v13323_v11 = vld [vmem:[%s18081_s4 + $0x994] ss:$8 sps:$4 sm:$0xff]  }
 0x2a9   : > { %4762 = vmatprep.subr.bf16.mxu0 %v13279_v30  ;;  %v13320_v30 = vld [vmem:[%s18081_s4 + $0x984] ss:$8 sps:$4 sm:$0xff]  }
 0x2ac   : > { %4763 = vmatpush1.bf16.msra.mxu0 %v13277_v44  ;;  %v13321_v44 = vld [vmem:[%s18081_s4 + $0x990] ss:$8 sps:$4 sm:$0xff]  }
 0x2ad   : > { %4764 = vmatprep.subr.bf16.mxu0 %v13282_v14  ;;  %v13326_v14 = vld [vmem:[%s18081_s4 + $0x9a4] ss:$8 sps:$4 sm:$0xff]  }
 0x2af   : > { %4736 = vmatmul.mubr.bf16.gmra.mrb[40].mxu0 %v18176_v39  ;;  %v13327_v39 = vld [vmem:[%s18081_s4 + $0x9b0] ss:$8 sps:$4 sm:$0xff]  }
 0x2b0   : > { %4745 = vmatprep.mubr.bf16.mxu0 %v18177_v18  ;;  %4765 = vmatpush1.bf16.msra.mxu0 %v13280_v16  ;;  %v13324_v16 = vld [vmem:[%s18081_s4 + $0x9a0] ss:$8 sps:$4 sm:$0xff]   ;;  %v13332_v18 = vld [vmem:[%s18081_s4 + $0x9c4] ss:$8 sps:$4 sm:$0xff]  }
 0x2b1   : > { %4766 = vmatprep.subr.bf16.mxu0 %v13285_v45  ;;  %v13329_v45 = vld [vmem:[%s18081_s4 + $0x9b4] ss:$8 sps:$4 sm:$0xff]  }
 0x2b4   : > { %4767 = vmatpush1.bf16.msra.mxu0 %v13283_v5  ;;  %v13330_v5 = vld [vmem:[%s18081_s4 + $0x9c0] ss:$8 sps:$4 sm:$0xff]  }
 0x2b5   : > { %4768 = vmatprep.subr.bf16.mxu0 %v13288_v62  ;;  %v13335_v62 = vld [vmem:[%s18081_s4 + $0x9d4] ss:$8 sps:$4 sm:$0xff]  }
 0x2b7   : > { %4746 = vmatmul.mubr.bf16.gmra.mrb[44].mxu0 %v18178_v29  ;;  %v13336_v29 = vld [vmem:[%s18081_s4 + $0x9e0] ss:$8 sps:$4 sm:$0xff]  }
 0x2b8   : > { %4769 = vmatpush1.bf16.msra.mxu0 %v13286_v34  ;;  %4788 = vmatprep.mubr.bf16.mxu0 %v15832_v52  ;;  %v13333_v34 = vld [vmem:[%s18081_s4 + $0x9d0] ss:$8 sps:$4 sm:$0xff]  }
 0x2b9   : > { %4770 = vmatprep.subr.bf16.mxu0 %v13291_v32  ;;  %v13338_v32 = vld [vmem:[%s18081_s4 + $0x9e4] ss:$8 sps:$4 sm:$0xff]  }
 0x2bc   : > { %4771 = vmatpush1.bf16.msra.mxu0 %v13289_v58  ;;  %v13341_v58 = vld [vmem:[%s18081_s4 + $0x9f4] ss:$8 sps:$4 sm:$0xff]  }
 0x2bd   : > { %5215 = vmatprep.subr.bf16.mxu0 %v13294_v40  ;;  %v13339_v40 = vld [vmem:[%s18081_s4 + $0x9f0] ss:$8 sps:$4 sm:$0xff]  }
 0x2bf   : > { %4789 = vmatmul.mubr.bf16.vlgmr.msra.gmra.mrb[32].mxu0 %v18179_v10  ;;  %v11357_v10 = vcombine.low %v14004_v55, %v14005_v59  ;;  %v13358_v55 = vld [vmem:[%s18081_s4 + $0xa40] ss:$8 sps:$4 sm:$0xff]  }
 0x2c0   : > { %5216 = vmatpush1.bf16.msra.mxu0 %v13292_v25  ;;  %4798 = vmatprep.mubr.bf16.mxu0 %v15832_v52  ;;  %v13344_v25 = vld [vmem:[%s18081_s4 + $0xa04] ss:$8 sps:$4 sm:$0xff]  }
 0x2c1   : > { %5217 = vmatprep.subr.bf16.mxu0 %v13297_v3  ;;  %v13342_v3 = vld [vmem:[%s18081_s4 + $0xa00] ss:$8 sps:$4 sm:$0xff]  }
 0x2c4   : > { %5218 = vmatpush1.bf16.msra.mxu0 %v13295_v35  ;;  %v13348_v35 = vld [vmem:[%s18081_s4 + $0xa14] ss:$8 sps:$4 sm:$0xff]  }
 0x2c5   : > { %5219 = vmatprep.subr.bf16.mxu0 %v13300_v38  ;;  %v14006_v38 = vld [vmem:[#allocation2 + $0x60] sm:$0xff] }
 0x2c7   : > { %4799 = vmatmul.mubr.bf16.gmra.mrb[36].mxu0 %v18180_v54  ;;  %v13346_v54 = vld [vmem:[%s18081_s4 + $0xa10] ss:$8 sps:$4 sm:$0xff]  }
 0x2c8   : > { %5220 = vmatpush1.bf16.msra.mxu0 %v13298_v26  ;;  %4808 = vmatprep.mubr.bf16.mxu0 %v15832_v52  ;;  %v14007_v26 = vld [vmem:[#allocation2 + $0x78] sm:$0xff] }
 0x2c9   : > { %5221 = vmatprep.subr.bf16.mxu0 %v13303_v9  ;;  %v11361_v9 = vcombine.high %v14006_v38, %v14007_v26 }
 0x2cc   : > { %5222 = vmatpush1.bf16.msra.mxu0 %v13301_v23  ;;  %v13352_v23 = vld [vmem:[%s18081_s4 + $0xa24] ss:$8 sps:$4 sm:$0xff]  }
 0x2cd   : > { %5223 = vmatprep.subr.bf16.mxu0 %v13306_v50  ;;  %v13350_v50 = vld [vmem:[%s18081_s4 + $0xa20] ss:$8 sps:$4 sm:$0xff]  }
 0x2cf   : > { %4809 = vmatmul.mubr.bf16.gmra.mrb[40].mxu0 %v18181_v17  ;;  %v14008_v17 = vld [vmem:[#allocation2 + $0x90] sm:$0xff] }
 0x2d0   : > { %5224 = vmatpush1.bf16.msra.mxu0 %v13304_v7  ;;  %4818 = vmatprep.mubr.bf16.mxu0 %v15832_v52  ;;  %v11360_v7 = vcombine.low %v14006_v38, %v14007_v26  ;;  %v13392_v38 = vld [vmem:[%s18081_s4 + $0xae0] ss:$8 sps:$4 sm:$0xff]  }
 0x2d1   : > { %5225 = vmatprep.subr.bf16.mxu0 %v13309_v24  ;;  %v13356_v24 = vld [vmem:[%s18081_s4 + $0xa34] ss:$8 sps:$4 sm:$0xff]   ;;  %v13391_v26 = vld [vmem:[#allocation2 + $0xc8] ss:$24 sps:$4 sm:$0xff]  }
 0x2d4   : > { %5226 = vmatpush1.bf16.msra.mxu0 %v13307_v63  ;;  %v14009_v63 = vld [vmem:[#allocation2 + $0xa8] sm:$0xff] }
 0x2d5   : > { %5227 = vmatprep.subr.bf16.mxu0 %v13312_v57  ;;  %v11364_v57 = vcombine.high %v14008_v17, %v14009_v63  ;;  %v11363_v59 = vcombine.low %v14008_v17, %v14009_v63  ;;  %v13401_v17 = vld [vmem:[%s18081_s4 + $0xb10] ss:$8 sps:$4 sm:$0xff]   ;;  %v13406_v63 = vld [vmem:[%s18081_s4 + $0xb24] ss:$8 sps:$4 sm:$0xff]  }
 0x2d7   : > { %4819 = vmatmul.mubr.bf16.gmra.mrb[44].mxu0 %v18184_v4  ;;  %v13361_v4 = vld [vmem:[%s18081_s4 + $0xa50] ss:$8 sps:$4 sm:$0xff]  }
 0x2d8   : > { %5228 = vmatpush1.bf16.msra.mxu0 %v13310_v28  ;;  %5247 = vmatprep.mubr.bf16.mxu0 %v11358_v61  ;;  %v13354_v28 = vld [vmem:[%s18081_s4 + $0xa30] ss:$8 sps:$4 sm:$0xff]   ;;  %v16164_v61 = vld [vmem:[#allocation2 + $0xc0] sm:$0xff] }
 0x2d9   : > { %5229 = vmatprep.subr.bf16.mxu0 %v13317_v43  ;;  %v13360_v43 = vld [vmem:[%s18081_s4 + $0xa44] ss:$8 sps:$4 sm:$0xff]   ;;  %v11367_v53 = vcombine.high %v16164_v61, %v15832_v52 }
 0x2dc   : > { %5230 = vmatpush1.bf16.msra.mxu0 %v13315_v56  ;;  %v13366_v56 = vld [vmem:[%s18081_s4 + $0xa64] ss:$8 sps:$4 sm:$0xff]  }
 0x2dd   : > { %5231 = vmatprep.subr.bf16.mxu0 %v13320_v30  ;;  %v13364_v30 = vld [vmem:[%s18081_s4 + $0xa60] ss:$8 sps:$4 sm:$0xff]  }
 0x2e0   : > { %5232 = vmatpush1.bf16.msra.mxu0 %v13318_v48  ;;  %v11366_v48 = vcombine.low %v16164_v61, %v15832_v52 }
 0x2e1   : > { %5233 = vmatprep.subr.bf16.mxu0 %v13323_v11  ;;  %v13369_v11 = vld [vmem:[%s18081_s4 + $0xa74] ss:$8 sps:$4 sm:$0xff]  }
 0x2e4   : > { %5234 = vmatpush1.bf16.msra.mxu0 %v13321_v44  ;;  %v13367_v44 = vld [vmem:[%s18081_s4 + $0xa70] ss:$8 sps:$4 sm:$0xff]  }
 0x2e5   : > { %5235 = vmatprep.subr.bf16.mxu0 %v13326_v14  ;;  %v13373_v14 = vld [vmem:[%s18081_s4 + $0xa84] ss:$8 sps:$4 sm:$0xff]  }
 0x2e8   : > { %5236 = vmatpush1.bf16.msra.mxu0 %v13324_v16  ;;  %v13371_v16 = vld [vmem:[%s18081_s4 + $0xa80] ss:$8 sps:$4 sm:$0xff]  }
 0x2e9   : > { %5237 = vmatprep.subr.bf16.mxu0 %v13329_v45  ;;  %v13370_v45 = vld [vmem:[#allocation2 + $0x38] ss:$24 sps:$4 sm:$0xff]  }
 0x2ec   : > { %5238 = vmatpush1.bf16.msra.mxu0 %v13327_v39  ;;  %v13376_v39 = vld [vmem:[%s18081_s4 + $0xa94] ss:$8 sps:$4 sm:$0xff]  }
 0x2ed   : > { %5239 = vmatprep.subr.bf16.mxu0 %v13332_v18  ;;  %v13374_v18 = vld [vmem:[%s18081_s4 + $0xa90] ss:$8 sps:$4 sm:$0xff]  }
 0x2f0   : > { %5240 = vmatpush1.bf16.msra.mxu0 %v13330_v5  ;;  %v13380_v5 = vld [vmem:[%s18081_s4 + $0xaa4] ss:$8 sps:$4 sm:$0xff]  }
 0x2f1   : > { %5241 = vmatprep.subr.bf16.mxu0 %v13335_v62  ;;  %v13378_v62 = vld [vmem:[%s18081_s4 + $0xaa0] ss:$8 sps:$4 sm:$0xff]  }
 0x2f4   : > { %5242 = vmatpush1.bf16.msra.mxu0 %v13333_v34  ;;  %v13377_v34 = vld [vmem:[#allocation2 + $0x68] ss:$24 sps:$4 sm:$0xff]  }
 0x2f5   : > { %5243 = vmatprep.subr.bf16.mxu0 %v13338_v32  ;;  %v13383_v32 = vld [vmem:[%s18081_s4 + $0xab4] ss:$8 sps:$4 sm:$0xff]  }
 0x2f8   : > { %5244 = vmatpush1.bf16.msra.mxu0 %v13336_v29  ;;  %v13381_v29 = vld [vmem:[%s18081_s4 + $0xab0] ss:$8 sps:$4 sm:$0xff]  }
 0x2f9   : > { %5245 = vmatprep.subr.bf16.mxu0 %v13341_v58  ;;  %v13387_v58 = vld [vmem:[%s18081_s4 + $0xac4] ss:$8 sps:$4 sm:$0xff]  }
 0x2fc   : > { %5246 = vmatpush1.bf16.msra.mxu0 %v13339_v40  ;;  %v13385_v40 = vld [vmem:[%s18081_s4 + $0xac0] ss:$8 sps:$4 sm:$0xff]  }
 0x2fd   : > { %5288 = vmatprep.subr.bf16.mxu0 %v13344_v25  ;;  %v13384_v25 = vld [vmem:[#allocation2 + $0x98] ss:$24 sps:$4 sm:$0xff]  }
 0x2ff   : > { %5248 = vmatmul.mubr.bf16.vlgmr.msra.gmra.mrb[32].mxu0 %v11357_v10  ;;  %v13388_v10 = vld [vmem:[%s18081_s4 + $0xad0] ss:$8 sps:$4 sm:$0xff]  }
 0x300   : > { %5257 = vmatprep.mubr.bf16.mxu0 %v11361_v9  ;;  %5289 = vmatpush1.bf16.msra.mxu0 %v13342_v3  ;;  %v13390_v3 = vld [vmem:[%s18081_s4 + $0xad4] ss:$8 sps:$4 sm:$0xff]  }
 0x301   : > { %5290 = vmatprep.subr.bf16.mxu0 %v13348_v35  ;;  %v13394_v35 = vld [vmem:[%s18081_s4 + $0xae4] ss:$8 sps:$4 sm:$0xff]   ;;  %v13397_v9 = vld [vmem:[%s18081_s4 + $0xaf4] ss:$8 sps:$4 sm:$0xff]  }
 0x304   : > { %5291 = vmatpush1.bf16.msra.mxu0 %v13346_v54  ;;  %v18185_v54 = vcombine.high %v15250_v2, %v15254_v41 }
 0x305   : > { %5292 = vmatprep.subr.bf16.mxu0 %v13352_v23  ;;  %v13395_v23 = vld [vmem:[%s18081_s4 + $0xaf0] ss:$8 sps:$4 sm:$0xff]  }
 0x307   : > { %5258 = vmatmul.mubr.bf16.gmra.mrb[36].mxu0 %v11360_v7  ;;  %v13398_v7 = vld [vmem:[%s18081_s4 + $0xb00] ss:$8 sps:$4 sm:$0xff]  }
 0x308   : > { %5267 = vmatprep.mubr.bf16.mxu0 %v11364_v57  ;;  %5293 = vmatpush1.bf16.msra.mxu0 %v13350_v50  ;;  %v13400_v50 = vld [vmem:[%s18081_s4 + $0xb04] ss:$8 sps:$4 sm:$0xff]   ;;  %v13404_v57 = vld [vmem:[%s18081_s4 + $0xb20] ss:$8 sps:$4 sm:$0xff]  }
 0x309   : > { %5294 = vmatprep.subr.bf16.mxu0 %v13356_v24  ;;  %v13403_v24 = vld [vmem:[%s18081_s4 + $0xb14] ss:$8 sps:$4 sm:$0xff]  }
 0x30c   : > { %5295 = vmatpush1.bf16.msra.mxu0 %v13354_v28  ;;  %v13409_v28 = vld [vmem:[%s18081_s4 + $0xb34] ss:$8 sps:$4 sm:$0xff]  }
 0x30d   : > { %5296 = vmatprep.subr.bf16.mxu0 %v13360_v43  ;;  %v13407_v43 = vld [vmem:[%s18081_s4 + $0xb30] ss:$8 sps:$4 sm:$0xff]  }
 0x30f   : > { %5268 = vmatmul.mubr.bf16.gmra.mrb[40].mxu0 %v11363_v59  ;;  %v13410_v59 = vld [vmem:[%s18081_s4 + $0xb40] ss:$8 sps:$4 sm:$0xff]  }
 0x310   : > { %5277 = vmatprep.mubr.bf16.mxu0 %v11367_v53  ;;  %5297 = vmatpush1.bf16.msra.mxu0 %v13358_v55  ;;  %v13412_v55 = vld [vmem:[%s18081_s4 + $0xb44] ss:$8 sps:$4 sm:$0xff]   ;;  %v13413_v53 = vld [vmem:[%s18081_s4 + $0xb50] ss:$8 sps:$4 sm:$0xff]  }
 0x311   : > { %5298 = vmatprep.subr.bf16.mxu0 %v13363_v33  ;;  %v13415_v33 = vld [vmem:[%s18081_s4 + $0xb54] ss:$8 sps:$4 sm:$0xff]  }
 0x314   : > { %5299 = vmatpush1.bf16.msra.mxu0 %v13361_v4  ;;  %v13418_v4 = vld [vmem:[%s18081_s4 + $0xb64] ss:$8 sps:$4 sm:$0xff]  }
 0x315   : > { %5300 = vmatprep.subr.bf16.mxu0 %v13366_v56  ;;  %v13416_v56 = vld [vmem:[%s18081_s4 + $0xb60] ss:$8 sps:$4 sm:$0xff]  }
 0x317   : > { %5278 = vmatmul.mubr.bf16.gmra.mrb[44].mxu0 %v11366_v48  ;;  %v13419_v48 = vld [vmem:[%s18081_s4 + $0xb70] ss:$8 sps:$4 sm:$0xff]  }
 0x318   : > { %5301 = vmatpush1.bf16.msra.mxu0 %v13364_v30  ;;  %5320 = vmatprep.mubr.bf16.mxu0 %v15832_v52  ;;  %v13421_v30 = vld [vmem:[%s18081_s4 + $0xb74] ss:$8 sps:$4 sm:$0xff]  }
 0x319   : > { %5302 = vmatprep.subr.bf16.mxu0 %v13369_v11  ;;  %v13424_v11 = vld [vmem:[%s18081_s4 + $0xb84] ss:$8 sps:$4 sm:$0xff]  }
 0x31c   : > { %5303 = vmatpush1.bf16.msra.mxu0 %v13367_v44  ;;  %v5578_v44 = vshrl.u32 %v16164_v61, 16 }
 0x31d   : > { %5970 = vmatprep.subr.bf16.mxu0 %v13373_v14  ;;  %v5581_v14 = vshll.u32 %v16164_v61, 16 }
 0x31f   : > { %5321 = vmatmul.mubr.bf16.vlgmr.msra.gmra.mrb[32].mxu0 %v13370_v45  ;;  %v5609_v45 = vshll.u32 %v15832_v52, 16  ;;  %v5583_v61 = vrot.slane %v5581_v14, 5  ;;  %v13437_v14 = vld [vmem:[%s18081_s4 + $0xbd0] ss:$8 sps:$4 sm:$0xff]  }
 0x320   : > { %5971 = vmatpush1.bf16.msra.mxu0 %v13371_v16  ;;  %5330 = vmatprep.mubr.bf16.mxu0 %v15832_v52  ;;  %v5606_v16 = vshrl.u32 %v15832_v52, 16 }
 0x321   : > { %5972 = vmatprep.subr.bf16.mxu0 %v13376_v39  ;;  %v13422_v39 = vld [vmem:[%s18081_s4 + $0xb80] ss:$8 sps:$4 sm:$0xff]  }
 0x324   : > { %5973 = vmatpush1.bf16.msra.mxu0 %v13374_v18  ;;  %v13427_v18 = vld [vmem:[%s18081_s4 + $0xb94] ss:$8 sps:$4 sm:$0xff]  }
 0x325   : > { %5974 = vmatprep.subr.bf16.mxu0 %v13380_v5  ;;  %v18186_v5 = vcombine.low %v15250_v2, %v15254_v41  ;;  %v14010_v41 = vld [vmem:[#allocation2 + $0xcc] sm:$0x11] }
 0x327   : > { %5331 = vmatmul.mubr.bf16.gmra.mrb[36].mxu0 %v13377_v34  ;;  %v5608_v34 = vrot.slane %v5606_v16, 4 }
 0x328   : > { %5975 = vmatpush1.bf16.msra.mxu0 %v13378_v62  ;;  %5340 = vmatprep.mubr.bf16.mxu0 %v15832_v52  ;;  %v5580_v62 = vrot.slane %v5578_v44, 4  ;;  %v18190_v44 = vcombine.low %v15296_v15, %v15303_v51 }
 0x329   : > { %5976 = vmatprep.subr.bf16.mxu0 %v13383_v32  ;;  %v5611_v32 = vrot.slane %v5609_v45, 5 }
 0x32a   : > { %v5584_v2 = vor.u32 %v5583_v61, %v5580_v62 }
 0x32c   : > { %5977 = vmatpush1.bf16.msra.mxu0 %v13381_v29  ;;  %v18187_v29 = vcombine.high %v15268_v22, %v15282_v49 }
 0x32d   : > { %5978 = vmatprep.subr.bf16.mxu0 %v13387_v58  ;;  %v13425_v58 = vld [vmem:[%s18081_s4 + $0xb90] ss:$8 sps:$4 sm:$0xff]  }
 0x32f   : > { %5341 = vmatmul.mubr.bf16.gmra.mrb[40].mxu0 %v13384_v25  ;;  %v5587_v25 = vshll.u32 %v14010_v41, 16 }
 0x330   : > { %5979 = vmatpush1.bf16.msra.mxu0 %v13385_v40  ;;  %5350 = vmatprep.mubr.bf16.mxu0 %v15832_v52  ;;  %v13430_v40 = vld [vmem:[%s18081_s4 + $0xba4] ss:$8 sps:$4 sm:$0xff]  }
 0x331   : > { %5980 = vmatprep.subr.bf16.mxu0 %v13390_v3  ;;  %v5612_v3 = vor.u32 %v5611_v32, %v5608_v34  ;;  %v14012_v34 = vld [vmem:[#allocation2 + $0x44] sm:$0x1] }
 0x334   : > { %5981 = vmatpush1.bf16.msra.mxu0 %v13388_v10  ;;  %v14011_v10 = vld [vmem:[#allocation2 + $0xe4] sm:$0x11] }
 0x335   : > { %5982 = vmatprep.subr.bf16.mxu0 %v13394_v35  ;;  %v5615_v35 = vshll.u32 %v14011_v10, 16 }
 0x337   : > { %5351 = vmatmul.mubr.bf16.gmra.mrb[44].mxu0 %v13391_v26  ;;  %v13433_v26 = vld [vmem:[%s18081_s4 + $0xbb4] ss:$8 sps:$4 sm:$0xff]  }
 0x338   : > { %5983 = vmatpush1.bf16.msra.mxu0 %v13392_v38  ;;  %6002 = vmatprep.mubr.bf16.mxu0 %v18185_v54  ;;  %v13428_v38 = vld [vmem:[%s18081_s4 + $0xba0] ss:$8 sps:$4 sm:$0xff]   ;;  %v5585_v54 = vrot.slane %v5584_v2, 4  ;;  %v13445_v2 = vld [vmem:[%s18081_s4 + $0xbf4] ss:$8 sps:$4 sm:$0xff]  }
 0x339   : > { %5984 = vmatprep.subr.bf16.mxu0 %v13397_v9  ;;  %v18188_v9 = vcombine.low %v15268_v22, %v15282_v49  ;;  %v13436_v22 = vld [vmem:[%s18081_s4 + $0xbc4] ss:$8 sps:$4 sm:$0xff]   ;;  %v5382_v49 = vld [vmem:[#allocation2 + $0x50] sm:$0xf] }
 0x33c   : > { %5985 = vmatpush1.bf16.msra.mxu0 %v13395_v23  ;;  %v5589_v23 = vrot.slane %v5587_v25, 5 }
 0x33d   : > { %5986 = vmatprep.subr.bf16.mxu0 %v13400_v50  ;;  %v5613_v50 = vrot.slane %v5612_v3, 4  ;;  %v5394_v3 = vld [vmem:[#allocation2 + $0x98] sm:$0xf] }
 0x340   : > { %5987 = vmatpush1.bf16.msra.mxu0 %v13398_v7  ;;  %v5617_v7 = vrot.slane %v5615_v35, 5 }
 0x341   : > { %5988 = vmatprep.subr.bf16.mxu0 %v13403_v24  ;;  %v5378_v24 = vld [vmem:[#allocation2 + $0x38] sm:$0xf] }
 0x344   : > { %5989 = vmatpush1.bf16.msra.mxu0 %v13401_v17  ;;  %v18189_v17 = vcombine.high %v15296_v15, %v15303_v51  ;;  %v5433_v15 = vshll.u32 %v14012_v34, 16 }
 0x345   : > { %5990 = vmatprep.subr.bf16.mxu0 %v13406_v63  ;;  %v13431_v63 = vld [vmem:[%s18081_s4 + $0xbb0] ss:$8 sps:$4 sm:$0xff]  }
 0x346   : > { %v5435_v35 = vrot.slane %v5433_v15, 5 }
 0x348   : > { %5991 = vmatpush1.bf16.msra.mxu0 %v13404_v57  ;;  %v5424_v57 = vshrl.u32 %v5378_v24, 16 }
 0x349   : > { %5992 = vmatprep.subr.bf16.mxu0 %v13409_v28  ;;  %v5427_v28 = vshll.u32 %v5378_v24, 16  ;;  %v13443_v24 = vld [vmem:[%s18081_s4 + $0xbf0] ss:$8 sps:$4 sm:$0xff]  }
 0x34c   : > { %5993 = vmatpush1.bf16.msra.mxu0 %v13407_v43  ;;  %v5590_v43 = vsel %vm14405_vm7, %v5585_v54, %v5589_v23 }
 0x34d   : > { %5994 = vmatprep.subr.bf16.mxu0 %v13412_v55  ;;  %v5618_v55 = vsel %vm14405_vm7, %v5613_v50, %v5617_v7  ;;  %v13518_v50 = vld [vmem:[%s18082_s5 + $0x100] ss:$8 sps:$4 sm:$0xff]   ;;  %v13520_v7 = vld [vmem:[%s18082_s5 + $0x104] ss:$8 sps:$4 sm:$0xff]  }
 0x34e   : > { %7328 = vmatprep.subr.bf16.mxu1 %v13520_v7 }
 0x34f   : > { %7329 = vmatpush1.bf16.msra.mxu1 %v13518_v50 }
 0x350   : > { %5995 = vmatpush1.bf16.msra.mxu0 %v13410_v59  ;;  %v13434_v59 = vld [vmem:[%s18081_s4 + $0xbc0] ss:$8 sps:$4 sm:$0xff]  }
 0x351   : > { %5996 = vmatprep.subr.bf16.mxu0 %v13415_v33  ;;  %v5452_v33 = vshrl.u32 %v5382_v49, 16 }
 0x353   : > { %v5454_v16 = vrot.slane %v5452_v33, 4 }
 0x354   : > { %5997 = vmatpush1.bf16.msra.mxu0 %v13413_v53  ;;  %v5455_v53 = vshll.u32 %v5382_v49, 16  ;;  %v13523_v49 = vld [vmem:[%s18082_s5 + $0x114] ss:$8 sps:$4 sm:$0xff]  }
 0x355   : > { %5998 = vmatprep.subr.bf16.mxu0 %v13418_v4  ;;  %v13439_v4 = vld [vmem:[%s18081_s4 + $0xbd4] ss:$8 sps:$4 sm:$0xff]   ;;  %7330 = vmatprep.subr.bf16.mxu1 %v13523_v49 }
 0x356   : > { %v5457_v45 = vrot.slane %v5455_v53, 5 }
 0x358   : > { %5999 = vmatpush1.bf16.msra.mxu0 %v13416_v56  ;;  %v11475_v56 = vcombine.high %v5590_v43, %v5618_v55 }
 0x359   : > { %6000 = vmatprep.subr.bf16.mxu0 %v13421_v30  ;;  %v5426_v30 = vrot.slane %v5424_v57, 4  ;;  %v13448_v57 = vld [vmem:[%s18081_s4 + $0xc04] ss:$8 sps:$4 sm:$0xff]  }
 0x35c   : > { %6001 = vmatpush1.bf16.msra.mxu0 %v13419_v48  ;;  %v5429_v48 = vrot.slane %v5427_v28, 5 }
 0x35d   : > { %6043 = vmatprep.subr.bf16.mxu0 %v13424_v11  ;;  %v5390_v11 = vld [vmem:[#allocation2 + $0x80] sm:$0xf] }
 0x35e   : > { %v5511_v62 = vshll.u32 %v5390_v11, 16  ;;  %v5430_v61 = vor.u32 %v5429_v48, %v5426_v30  ;;  %v13526_v30 = vld [vmem:[%s18082_s5 + $0x124] ss:$8 sps:$4 sm:$0xff]  }
 0x35f   : > { %6003 = vmatmul.mubr.bf16.vlgmr.msra.gmra.mrb[32].mxu0 %v18186_v5  ;;  %v5508_v5 = vshrl.u32 %v5390_v11, 16  ;;  %v13446_v11 = vld [vmem:[%s18081_s4 + $0xc00] ss:$8 sps:$4 sm:$0xff]  }
 0x360   : > { %6012 = vmatprep.mubr.bf16.mxu0 %v18187_v29  ;;  %6044 = vmatpush1.bf16.msra.mxu0 %v13422_v39  ;;  %v5386_v39 = vld [vmem:[#allocation2 + $0x68] sm:$0xf]  ;;  %v5513_v25 = vrot.slane %v5511_v62, 5  ;;  %v5431_v10 = vrot.slane %v5430_v61, 4 }
 0x361   : > { %6045 = vmatprep.subr.bf16.mxu0 %v13427_v18  ;;  %v13442_v18 = vld [vmem:[%s18081_s4 + $0xbe4] ss:$8 sps:$4 sm:$0xff]   ;;  %v5480_v51 = vshrl.u32 %v5386_v39, 16  ;;  %v5483_v32 = vshll.u32 %v5386_v39, 16  ;;  %v13440_v29 = vld [vmem:[%s18081_s4 + $0xbe0] ss:$8 sps:$4 sm:$0xff]  }
 0x362   : > { %v5510_v41 = vrot.slane %v5508_v5, 4 }
 0x363   : > { %v5482_v54 = vrot.slane %v5480_v51, 4  ;;  %v5485_v23 = vrot.slane %v5483_v32, 5  ;;  %v5402_v51 = vld [vmem:[#allocation2 + $0xc8] sm:$0xf] }
 0x364   : > { %6046 = vmatpush1.bf16.msra.mxu0 %v13425_v58  ;;  %v5458_v58 = vor.u32 %v5457_v45, %v5454_v16  ;;  %v5514_v28 = vor.u32 %v5513_v25, %v5510_v41  ;;  %v13524_v32 = vld [vmem:[%s18082_s5 + $0x120] ss:$8 sps:$4 sm:$0xff]   ;;  %v14016_v25 = vld [vmem:[#allocation2 + $0xa4] sm:$0x1]  ;;  %v5595_v50 = vshll.u32 %v5402_v51, 16 }
 0x365   : > { %6047 = vmatprep.subr.bf16.mxu0 %v13430_v40  ;;  %v11474_v40 = vcombine.low %v5590_v43, %v5618_v55  ;;  %v5536_v43 = vshrl.u32 %v5394_v3, 16  ;;  %v5539_v55 = vshll.u32 %v5394_v3, 16  ;;  %v5545_v3 = vshll.u32 %v14016_v25, 16 }
 0x366   : > { %v5515_v5 = vrot.slane %v5514_v28, 4  ;;  %v13457_v28 = vld [vmem:[%s18081_s4 + $0xc34] ss:$8 sps:$4 sm:$0xff]  }
 0x367   : > { %6013 = vmatmul.mubr.bf16.gmra.mrb[36].mxu0 %v18188_v9  ;;  %v5398_v9 = vld [vmem:[#allocation2 + $0xb0] sm:$0xf]  ;;  %v5538_v62 = vrot.slane %v5536_v43, 4  ;;  %v5541_v61 = vrot.slane %v5539_v55, 5  ;;  %v5547_v49 = vrot.slane %v5545_v3, 5 }
 0x368   : > { %6022 = vmatprep.mubr.bf16.mxu0 %v18189_v17  ;;  %6048 = vmatpush1.bf16.msra.mxu0 %v13428_v38  ;;  %v14013_v38 = vld [vmem:[#allocation2 + $0x5c] sm:$0x1]  ;;  %v5459_v17 = vrot.slane %v5458_v58, 4  ;;  %v5564_v53 = vshrl.u32 %v5398_v9, 16  ;;  %v13536_v3 = vld [vmem:[%s18082_s5 + $0x160] ss:$8 sps:$4 sm:$0xff]  }
 0x369   : > { %6049 = vmatprep.subr.bf16.mxu0 %v13433_v26  ;;  %v5461_v26 = vshll.u32 %v14013_v38, 16  ;;  %v13529_v58 = vld [vmem:[%s18082_s5 + $0x134] ss:$8 sps:$4 sm:$0xff]   ;;  %v5542_v38 = vor.u32 %v5541_v61, %v5538_v62  ;;  %v14020_v61 = vld [vmem:[#allocation2 + $0xec] sm:$0x1] }
 0x36a   : > { %v5566_v34 = vrot.slane %v5564_v53, 4  ;;  %v5597_v53 = vrot.slane %v5595_v50, 5 }
 0x36b   : > { %v5463_v33 = vrot.slane %v5461_v26, 5  ;;  %v14017_v26 = vld [vmem:[#allocation2 + $0xbc] sm:$0x1]  ;;  %v5543_v43 = vrot.slane %v5542_v38, 4  ;;  %v13466_v38 = vld [vmem:[%s18081_s4 + $0xc64] ss:$8 sps:$4 sm:$0xff]  }
 0x36c   : > { %6050 = vmatpush1.bf16.msra.mxu0 %v13431_v63  ;;  %v14014_v63 = vld [vmem:[#allocation2 + $0x8c] sm:$0x1] }
 0x36d   : > { %6051 = vmatprep.subr.bf16.mxu0 %v13436_v22  ;;  %v5517_v22 = vshll.u32 %v14014_v63, 16  ;;  %v5464_v48 = vsel %vm14405_vm7, %v5459_v17, %v5463_v33  ;;  %v13532_v17 = vld [vmem:[%s18082_s5 + $0x144] ss:$8 sps:$4 sm:$0xff]  }
 0x36f   : > { %6023 = vmatmul.mubr.bf16.gmra.mrb[40].mxu0 %v18190_v44  ;;  %v5486_v44 = vor.u32 %v5485_v23, %v5482_v54  ;;  %v5519_v45 = vrot.slane %v5517_v22, 5  ;;  %v5592_v54 = vshrl.u32 %v5402_v51, 16  ;;  %v13452_v22 = vld [vmem:[%s18081_s4 + $0xc20] ss:$8 sps:$4 sm:$0xff]   ;;  %v13538_v51 = vld [vmem:[%s18082_s5 + $0x164] ss:$8 sps:$4 sm:$0xff]  }
 0x370   : > { %6032 = vmatprep.mubr.bf16.mxu0 %v11475_v56  ;;  %6052 = vmatpush1.bf16.msra.mxu0 %v13434_v59  ;;  %v5436_v59 = vsel %vm14405_vm7, %v5431_v10, %v5435_v35  ;;  %v13521_v56 = vld [vmem:[%s18082_s5 + $0x110] ss:$8 sps:$4 sm:$0xff]   ;;  %v13454_v35 = vld [vmem:[%s18081_s4 + $0xc24] ss:$8 sps:$4 sm:$0xff]  }
 0x371   : > { %6053 = vmatprep.subr.bf16.mxu0 %v13439_v4  ;;  %v5567_v4 = vshll.u32 %v5398_v9, 16  ;;  %v11467_v39 = vcombine.low %v5436_v59, %v5464_v48  ;;  %7331 = vmatpush1.bf16.msra.mxu1 %v13521_v56  ;;  %v5520_v10 = vsel %vm14405_vm7, %v5515_v5, %v5519_v45  ;;  %v5573_v9 = vshll.u32 %v14017_v26, 16  ;;  %v13535_v48 = vld [vmem:[%s18082_s5 + $0x154] ss:$8 sps:$4 sm:$0xff]  }
 0x372   : > { %7332 = vmatprep.subr.bf16.mxu1 %v13526_v30  ;;  %v5594_v59 = vrot.slane %v5592_v54, 4  ;;  %v13530_v30 = vld [vmem:[%s18082_s5 + $0x140] ss:$8 sps:$4 sm:$0xff]   ;;  %v14019_v45 = vld [vmem:[#allocation2 + $0xd4] sm:$0x1] }
 0x373   : > { %v5569_v15 = vrot.slane %v5567_v4, 5  ;;  %v5575_v55 = vrot.slane %v5573_v9, 5  ;;  %v13539_v54 = vld [vmem:[%s18082_s5 + $0x170] ss:$8 sps:$4 sm:$0xff]  }
 0x374   : > { %6054 = vmatpush1.bf16.msra.mxu0 %v13437_v14  ;;  %v14015_v14 = vld [vmem:[#allocation2 + $0x74] sm:$0x1]  ;;  %v5598_v5 = vor.u32 %v5597_v53, %v5594_v59  ;;  %v13479_v59 = vld [vmem:[%s18081_s4 + $0xcb0] ss:$8 sps:$4 sm:$0xff]   ;;  %v13482_v53 = vld [vmem:[%s18081_s4 + $0xcc0] ss:$8 sps:$4 sm:$0xff]  }
 0x375   : > { %6055 = vmatprep.subr.bf16.mxu0 %v13442_v18  ;;  %v5489_v16 = vshll.u32 %v14015_v14, 16  ;;  %v13451_v18 = vld [vmem:[%s18081_s4 + $0xc14] ss:$8 sps:$4 sm:$0xff]   ;;  %v5570_v23 = vor.u32 %v5569_v15, %v5566_v34  ;;  %7333 = vmatpush1.bf16.msra.mxu1 %v13524_v32  ;;  %v5548_v14 = vsel %vm14405_vm7, %v5543_v43, %v5547_v49  ;;  %v5629_v34 = vshll.u32 %v14020_v61, 16  ;;  %v13533_v15 = vld [vmem:[%s18082_s5 + $0x150] ss:$8 sps:$4 sm:$0xff]  }
 0x376   : > { %7334 = vmatprep.subr.bf16.mxu1 %v13529_v58  ;;  %v13458_v32 = vld [vmem:[%s18081_s4 + $0xc40] ss:$8 sps:$4 sm:$0xff]   ;;  %v13463_v58 = vld [vmem:[%s18081_s4 + $0xc54] ss:$8 sps:$4 sm:$0xff]  }
 0x377   : > { %6033 = vmatmul.mubr.bf16.gmra.mrb[44].mxu0 %v11474_v40  ;;  %v13449_v40 = vld [vmem:[%s18081_s4 + $0xc10] ss:$8 sps:$4 sm:$0xff]   ;;  %v5491_v41 = vrot.slane %v5489_v16, 5  ;;  %v5571_v33 = vrot.slane %v5570_v23, 4  ;;  %v13460_v16 = vld [vmem:[%s18081_s4 + $0xc44] ss:$8 sps:$4 sm:$0xff]  }
 0x378   : > { %6056 = vmatpush1.bf16.msra.mxu0 %v13440_v29  ;;  %6075 = vmatprep.mubr.bf16.mxu0 %v15832_v52  ;;  %v5406_v29 = vld [vmem:[#allocation2 + $0xe0] sm:$0xf]  ;;  %v5631_v25 = vrot.slane %v5629_v34, 5  ;;  %v13475_v49 = vld [vmem:[%s18081_s4 + $0xc94] ss:$8 sps:$4 sm:$0xff]  }
 0x379   : > { %6057 = vmatprep.subr.bf16.mxu0 %v13445_v2  ;;  %v5487_v2 = vrot.slane %v5486_v44, 4  ;;  %v5620_v7 = vshrl.u32 %v5406_v29, 16  ;;  %v16429_v44 = vld [vmem:[#allocation2] sm:$0xff]  ;;  %v13497_v34 = vld [vmem:[%s18081_s4 + $0xd10] ss:$8 sps:$4 sm:$0xff]  }
 0x37a   : > { %v13464_v23 = vld [vmem:[%s18081_s4 + $0xc60] ss:$8 sps:$4 sm:$0xff]  }
 0x37b   : > { %v5492_v63 = vsel %vm14405_vm7, %v5487_v2, %v5491_v41  ;;  %v5622_v4 = vrot.slane %v5620_v7, 4  ;;  %v13469_v7 = vld [vmem:[%s18081_s4 + $0xc74] ss:$8 sps:$4 sm:$0xff]   ;;  %v13476_v43 = vld [vmem:[%s18081_s4 + $0xca0] ss:$8 sps:$4 sm:$0xff]  }
 0x37c   : > { %6058 = vmatpush1.bf16.msra.mxu0 %v13443_v24  ;;  %v13527_v24 = vld [vmem:[%s18082_s5 + $0x130] ss:$8 sps:$4 sm:$0xff]  }
 0x37d   : > { %6581 = vmatprep.subr.bf16.mxu0 %v13448_v57  ;;  %v11470_v57 = vcombine.low %v5492_v63, %v5520_v10  ;;  %7335 = vmatpush1.bf16.msra.mxu1 %v13527_v24  ;;  %v13541_v10 = vld [vmem:[%s18082_s5 + $0x174] ss:$8 sps:$4 sm:$0xff]   ;;  %v13472_v63 = vld [vmem:[%s18081_s4 + $0xc84] ss:$8 sps:$4 sm:$0xff]  }
 0x37e   : > { %7336 = vmatprep.subr.bf16.mxu1 %v13532_v17  ;;  %v13467_v17 = vld [vmem:[%s18081_s4 + $0xc70] ss:$8 sps:$4 sm:$0xff]  }
 0x37f   : > { %6076 = vmatmul.mubr.bf16.vlgmr.msra.gmra.mrb[32].mxu0 %v11467_v39  ;;  %v5601_v39 = vshll.u32 %v14019_v45, 16  ;;  %v13494_v45 = vld [vmem:[%s18081_s4 + $0xd00] ss:$8 sps:$4 sm:$0xff]  }
 0x380   : > { %6582 = vmatpush1.bf16.msra.mxu0 %v13446_v11  ;;  %6085 = vmatprep.mubr.bf16.mxu0 %v15832_v52  ;;  %v5623_v52 = vshll.u32 %v5406_v29, 16  ;;  %v13455_v11 = vld [vmem:[%s18081_s4 + $0xc30] ss:$8 sps:$4 sm:$0xff]  }
 0x381   : > { %6583 = vmatprep.subr.bf16.mxu0 %v13451_v18  ;;  %v5576_v18 = vsel %vm14405_vm7, %v5571_v33, %v5575_v55  ;;  %7337 = vmatpush1.bf16.msra.mxu1 %v13530_v30  ;;  %v5603_v2 = vrot.slane %v5601_v39, 5  ;;  %v13481_v55 = vld [vmem:[%s18081_s4 + $0xcb4] ss:$8 sps:$4 sm:$0xff]   ;;  %v13484_v33 = vld [vmem:[%s18081_s4 + $0xcc4] ss:$8 sps:$4 sm:$0xff]  }
 0x382   : > { %v5625_v56 = vrot.slane %v5623_v52, 5  ;;  %7338 = vmatprep.subr.bf16.mxu1 %v13535_v48  ;;  %v11473_v29 = vcombine.low %v5548_v14, %v5576_v18  ;;  %v18191_v52 = vld [vmem:[#allocation10_spill] sm:$0xff]  ;;  %v13491_v14 = vld [vmem:[%s18081_s4 + $0xcf0] ss:$8 sps:$4 sm:$0xff]   ;;  %v13499_v39 = vld [vmem:[%s18081_s4 + $0xd14] ss:$8 sps:$4 sm:$0xff]  }
 0x383   : > { %v18192_v24 = vcombine.high %v15360_v60, %v18191_v52  ;;  %v13490_v30 = vld [vmem:[%s18081_s4 + $0xce4] ss:$8 sps:$4 sm:$0xff]   ;;  %v13488_v48 = vld [vmem:[%s18081_s4 + $0xce0] ss:$8 sps:$4 sm:$0xff]   ;;  %v18193_v18 = vcombine.low %v15360_v60, %v18191_v52  ;;  %v18205_v52 = vcombine.low %v15453_v36, %v15457_v37 }
 0x384   : > { %6584 = vmatpush1.bf16.msra.mxu0 %v13449_v40  ;;  %v5626_v62 = vor.u32 %v5625_v56, %v5622_v4  ;;  %v5599_v40 = vrot.slane %v5598_v5, 4  ;;  %v13487_v4 = vld [vmem:[%s18081_s4 + $0xcd4] ss:$8 sps:$4 sm:$0xff]   ;;  %v13485_v56 = vld [vmem:[%s18081_s4 + $0xcd0] ss:$8 sps:$4 sm:$0xff]   ;;  %v18194_v5 = vld [vmem:[#allocation11_spill] sm:$0xff] }
 0x385   : > { %6585 = vmatprep.subr.bf16.mxu0 %v13454_v35  ;;  %7339 = vmatpush1.bf16.msra.mxu1 %v13533_v15  ;;  %v13461_v35 = vld [vmem:[%s18081_s4 + $0xc50] ss:$8 sps:$4 sm:$0xff]   ;;  %v13502_v15 = vld [vmem:[%s18081_s4 + $0xd24] ss:$8 sps:$4 sm:$0xff]   ;;  %v13500_v60 = vld [vmem:[%s18081_s4 + $0xd20] ss:$8 sps:$4 sm:$0xff]  }
 0x386   : > { %v5627_v41 = vrot.slane %v5626_v62, 4  ;;  %7340 = vmatprep.subr.bf16.mxu1 %v13538_v51  ;;  %v5604_v26 = vsel %vm14405_vm7, %v5599_v40, %v5603_v2  ;;  %v18195_v62 = vld [vmem:[#allocation12_spill] sm:$0xff]  ;;  %v13542_v37 = vld [vmem:[%s18082_s5 + $0x180] ss:$8 sps:$4 sm:$0xff]  }
 0x387   : > { %6086 = vmatmul.mubr.bf16.gmra.mrb[36].mxu0 %v11470_v57  ;;  %v13473_v57 = vld [vmem:[%s18081_s4 + $0xc90] ss:$8 sps:$4 sm:$0xff]   ;;  %v18196_v61 = vcombine.high %v18194_v5, %v18195_v62  ;;  %v13505_v51 = vld [vmem:[%s18081_s4 + $0xd34] ss:$8 sps:$4 sm:$0xff]  }
 0x388   : > { %6586 = vmatpush1.bf16.msra.mxu0 %v13452_v22  ;;  %6095 = vmatprep.mubr.bf16.mxu0 %v16429_v44  ;;  %v5632_v9 = vsel %vm14405_vm7, %v5627_v41, %v5631_v25  ;;  %v13470_v22 = vld [vmem:[%s18081_s4 + $0xc80] ss:$8 sps:$4 sm:$0xff]   ;;  %v13503_v2 = vld [vmem:[%s18081_s4 + $0xd30] ss:$8 sps:$4 sm:$0xff]   ;;  %v13508_v41 = vld [vmem:[%s18081_s4 + $0xd44] ss:$8 sps:$4 sm:$0xff]  }
 0x389   : > { %6587 = vmatprep.subr.bf16.mxu0 %v13457_v28  ;;  %7341 = vmatpush1.bf16.msra.mxu1 %v13536_v3  ;;  %v11476_v50 = vcombine.low %v5604_v26, %v5632_v9  ;;  %v13478_v28 = vld [vmem:[%s18081_s4 + $0xca4] ss:$8 sps:$4 sm:$0xff]   ;;  %v13506_v25 = vld [vmem:[%s18081_s4 + $0xd40] ss:$8 sps:$4 sm:$0xff]   ;;  %v13511_v3 = vld [vmem:[%s18081_s4 + $0xd54] ss:$8 sps:$4 sm:$0xff]  }
 0x38a   : > { %7342 = vmatprep.subr.bf16.mxu1 %v13541_v10  ;;  %v13514_v26 = vld [vmem:[%s18081_s4 + $0xd64] ss:$8 sps:$4 sm:$0xff]   ;;  %v13512_v9 = vld [vmem:[%s18081_s4 + $0xd60] ss:$8 sps:$4 sm:$0xff]  }
 0x38c   : > { %6588 = vmatpush1.bf16.msra.mxu0 %v13455_v11  ;;  %v13493_v11 = vld [vmem:[%s18081_s4 + $0xcf4] ss:$8 sps:$4 sm:$0xff]  }
 0x38d   : > { %6589 = vmatprep.subr.bf16.mxu0 %v13460_v16  ;;  %7343 = vmatpush1.bf16.msra.mxu1 %v13539_v54  ;;  %v13496_v16 = vld [vmem:[%s18081_s4 + $0xd04] ss:$8 sps:$4 sm:$0xff]   ;;  %v13517_v54 = vld [vmem:[%s18081_s4 + $0xd74] ss:$8 sps:$4 sm:$0xff]  }
 0x38f   : > { %6096 = vmatmul.mubr.bf16.gmra.mrb[40].mxu0 %v11473_v29  ;;  %v18198_v29 = vld [vmem:[#allocation13_spill] sm:$0xff] }
 0x390   : > { %6590 = vmatpush1.bf16.msra.mxu0 %v13458_v32  ;;  %6105 = vmatprep.mubr.bf16.mxu0 %v16429_v44  ;;  %v18197_v32 = vcombine.low %v18194_v5, %v18195_v62  ;;  %v13553_v5 = vld [vmem:[%s18082_s5 + $0x1b4] ss:$8 sps:$4 sm:$0xff]   ;;  %v13551_v62 = vld [vmem:[%s18082_s5 + $0x1b0] ss:$8 sps:$4 sm:$0xff]  }
 0x391   : > { %6591 = vmatprep.subr.bf16.mxu0 %v13463_v58  ;;  %v18199_v58 = vld [vmem:[#allocation14_spill] sm:$0xff] }
 0x392   : > { %v18200_v40 = vcombine.high %v18198_v29, %v18199_v58  ;;  %v18201_v10 = vcombine.low %v18198_v29, %v18199_v58  ;;  %v466_v29 = vld [vmem:[#allocation3 + $0x60] sm:$0x11] }
 0x393   : > { %v467_v58 = vsel %vm14280_vm2, 0, %v466_v29 }
 0x394   : > { %6592 = vmatpush1.bf16.msra.mxu0 %v13461_v35  ;;  %v18202_v35 = vcombine.high %v15416_v19, %v15426_v27  ;;  %468 = vst [vmem:[#allocation3 + $0x60] sm:$0x11] %v467_v58 }
 0x395   : > { %6593 = vmatprep.subr.bf16.mxu0 %v13466_v38  ;;  %v13509_v38 = vld [vmem:[%s18081_s4 + $0xd50] ss:$8 sps:$4 sm:$0xff]  }
 0x397   : > { %6106 = vmatmul.mubr.bf16.gmra.mrb[44].mxu0 %v11476_v50  ;;  %v13515_v50 = vld [vmem:[%s18081_s4 + $0xd70] ss:$8 sps:$4 sm:$0xff]  }
 0x398   : > { %6594 = vmatpush1.bf16.msra.mxu0 %v13464_v23  ;;  %6613 = vmatprep.mubr.bf16.mxu0 %v18192_v24  ;;  %v18203_v23 = vcombine.low %v15416_v19, %v15426_v27  ;;  %v18206_v19 = vld [vmem:[#allocation15_spill] sm:$0xff]  ;;  %v18208_v24 = vld [vmem:[#allocation16_spill] sm:$0xff] }
 0x399   : > { %6595 = vmatprep.subr.bf16.mxu0 %v13469_v7  ;;  %v18204_v7 = vcombine.low %v15434_v13, %v15441_v12  ;;  %v18207_v27 = vcombine.low %v15466_v47, %v18206_v19  ;;  %v451_v13 = vld [vmem:[#allocation3 + $0x10] sm:$0x11]  ;;  %v475_v12 = vld [vmem:[#allocation3 + $0x18] sm:$0x11]  ;;  %v13563_v19 = vld [vmem:[%s18082_s5 + $0x1f0] ss:$8 sps:$4 sm:$0xff]  }
 0x39a   : > { %v476_v36 = vsel %vm14247_vm15, 0, %v475_v12  ;;  %v13544_v47 = vld [vmem:[%s18082_s5 + $0x184] ss:$8 sps:$4 sm:$0xff]  }
 0x39b   : > { %477 = vst [vmem:[#allocation3 + $0x18] sm:$0x11] %v476_v36  ;;  %7344 = vmatprep.subr.bf16.mxu1 %v13544_v47  ;;  %v16703_v36 = vld [vmem:[#allocation3 + $0x8] sm:$0x11]  ;;  %v18213_v47 = vld [vmem:[#allocation18_spill] sm:$0xff] }
 0x39c   : > { %6596 = vmatpush1.bf16.msra.mxu0 %v13467_v17  ;;  %v18209_v17 = vld [vmem:[#allocation17_spill] sm:$0xff]  ;;  %7345 = vmatpush1.bf16.msra.mxu1 %v13542_v37 }
 0x39d   : > { %6597 = vmatprep.subr.bf16.mxu0 %v13472_v63  ;;  %v18210_v63 = vcombine.low %v18208_v24, %v18209_v17  ;;  %v6992_v24 = vshrl.u32 %v16429_v44, 16  ;;  %v6995_v17 = vshll.u32 %v16429_v44, 16 }
 0x3a0   : > { %6598 = vmatpush1.bf16.msra.mxu0 %v13470_v22  ;;  %v13575_v22 = vld [vmem:[%s18082_s5 + $0x30] ss:$8 sps:$4 sm:$0xff]  }
 0x3a1   : > { %6599 = vmatprep.subr.bf16.mxu0 %v13475_v49  ;;  %v452_v49 = vsel %vm14280_vm2, 0, %v451_v13 }
 0x3a2   : > { %453 = vst [vmem:[#allocation3 + $0x10] sm:$0x11] %v452_v49 }
 0x3a4   : > { %6600 = vmatpush1.bf16.msra.mxu0 %v13473_v57 }
 0x3a5   : > { %6601 = vmatprep.subr.bf16.mxu0 %v13478_v28  ;;  %v454_v28 = vld [vmem:[#allocation3 + $0x20] sm:$0x11] }
 0x3a8   : > { %6602 = vmatpush1.bf16.msra.mxu0 %v13476_v43  ;;  %v478_v43 = vld [vmem:[#allocation3 + $0x28] sm:$0x11] }
 0x3a9   : > { %6603 = vmatprep.subr.bf16.mxu0 %v13481_v55  ;;  %v455_v55 = vsel %vm14280_vm2, 0, %v454_v28 }
 0x3aa   : > { %456 = vst [vmem:[#allocation3 + $0x20] sm:$0x11] %v455_v55  ;;  %v6994_v55 = vrot.slane %v6992_v24, 4 }
 0x3ac   : > { %6604 = vmatpush1.bf16.msra.mxu0 %v13479_v59  ;;  %v479_v59 = vsel %vm14247_vm15, 0, %v478_v43 }
 0x3ad   : > { %6605 = vmatprep.subr.bf16.mxu0 %v13484_v33  ;;  %v13547_v33 = vld [vmem:[%s18082_s5 + $0x194] ss:$8 sps:$4 sm:$0xff]   ;;  %480 = vst [vmem:[#allocation3 + $0x28] sm:$0x11] %v479_v59  ;;  %v6997_v59 = vrot.slane %v6995_v17, 5 }
 0x3ae   : > { %7346 = vmatprep.subr.bf16.mxu1 %v13547_v33 }
 0x3b0   : > { %6606 = vmatpush1.bf16.msra.mxu0 %v13482_v53  ;;  %v13545_v53 = vld [vmem:[%s18082_s5 + $0x190] ss:$8 sps:$4 sm:$0xff]  }
 0x3b1   : > { %6607 = vmatprep.subr.bf16.mxu0 %v13487_v4  ;;  %v457_v4 = vld [vmem:[#allocation3 + $0x30] sm:$0x11]  ;;  %7347 = vmatpush1.bf16.msra.mxu1 %v13545_v53  ;;  %v18214_v53 = vld [vmem:[#allocation19_spill] sm:$0xff] }
 0x3b4   : > { %6608 = vmatpush1.bf16.msra.mxu0 %v13485_v56  ;;  %v481_v56 = vld [vmem:[#allocation3 + $0x38] sm:$0x11] }
 0x3b5   : > { %6609 = vmatprep.subr.bf16.mxu0 %v13490_v30  ;;  %v458_v30 = vsel %vm14280_vm2, 0, %v457_v4 }
 0x3b6   : > { %459 = vst [vmem:[#allocation3 + $0x30] sm:$0x11] %v458_v30 }
 0x3b8   : > { %6610 = vmatpush1.bf16.msra.mxu0 %v13488_v48  ;;  %v482_v48 = vsel %vm14247_vm15, 0, %v481_v56 }
 0x3b9   : > { %6611 = vmatprep.subr.bf16.mxu0 %v13493_v11  ;;  %483 = vst [vmem:[#allocation3 + $0x38] sm:$0x11] %v482_v48  ;;  %v13548_v11 = vld [vmem:[%s18082_s5 + $0x1a0] ss:$8 sps:$4 sm:$0xff]   ;;  %v6998_v48 = vor.u32 %v6997_v59, %v6994_v55 }
 0x3bc   : > { %6612 = vmatpush1.bf16.msra.mxu0 %v13491_v14  ;;  %v13550_v14 = vld [vmem:[%s18082_s5 + $0x1a4] ss:$8 sps:$4 sm:$0xff]  }
 0x3bd   : > { %6654 = vmatprep.subr.bf16.mxu0 %v13496_v16  ;;  %v460_v16 = vld [vmem:[#allocation3 + $0x40] sm:$0x11]  ;;  %7348 = vmatprep.subr.bf16.mxu1 %v13550_v14 }
 0x3be   : > { %7349 = vmatpush1.bf16.msra.mxu1 %v13548_v11 }
 0x3bf   : > { %6614 = vmatmul.mubr.bf16.vlgmr.msra.gmra.mrb[32].mxu0 %v18193_v18  ;;  %7350 = vmatprep.subr.bf16.mxu1 %v13553_v5 }
 0x3c0   : > { %6623 = vmatprep.mubr.bf16.mxu0 %v18196_v61  ;;  %6655 = vmatpush1.bf16.msra.mxu0 %v13494_v45  ;;  %v461_v45 = vsel %vm14280_vm2, 0, %v460_v16  ;;  %v463_v61 = vld [vmem:[#allocation3 + $0x50] sm:$0x11] }
 0x3c1   : > { %6656 = vmatprep.subr.bf16.mxu0 %v13499_v39  ;;  %v484_v39 = vld [vmem:[#allocation3 + $0x48] sm:$0x11]  ;;  %462 = vst [vmem:[#allocation3 + $0x40] sm:$0x11] %v461_v45 }
 0x3c2   : > { %v485_v18 = vsel %vm14247_vm15, 0, %v484_v39  ;;  %7351 = vmatpush1.bf16.msra.mxu1 %v13551_v62  ;;  %v6895_v62 = vld [vmem:[#allocation3 + $0x10] sm:$0xff] }
 0x3c3   : > { %486 = vst [vmem:[#allocation3 + $0x48] sm:$0x11] %v485_v18 }
 0x3c4   : > { %6657 = vmatpush1.bf16.msra.mxu0 %v13497_v34  ;;  %v464_v34 = vsel %vm14280_vm2, 0, %v463_v61 }
 0x3c5   : > { %6658 = vmatprep.subr.bf16.mxu0 %v13502_v15  ;;  %v487_v15 = vld [vmem:[#allocation3 + $0x58] sm:$0x11]  ;;  %465 = vst [vmem:[#allocation3 + $0x50] sm:$0x11] %v464_v34  ;;  %v18215_v34 = vld [vmem:[#allocation20_spill] sm:$0xff] }
 0x3c7   : > { %6624 = vmatmul.mubr.bf16.gmra.mrb[36].mxu0 %v18197_v32  ;;  %v13556_v32 = vld [vmem:[%s18082_s5 + $0x1c4] ss:$8 sps:$4 sm:$0xff]  }
 0x3c8   : > { %6633 = vmatprep.mubr.bf16.mxu0 %v18200_v40  ;;  %6659 = vmatpush1.bf16.msra.mxu0 %v13500_v60  ;;  %v488_v60 = vsel %vm14247_vm15, 0, %v487_v15  ;;  %v490_v40 = vld [vmem:[#allocation3 + $0x68] sm:$0x11] }
 0x3c9   : > { %6660 = vmatprep.subr.bf16.mxu0 %v13505_v51  ;;  %489 = vst [vmem:[#allocation3 + $0x58] sm:$0x11] %v488_v60  ;;  %v13554_v51 = vld [vmem:[%s18082_s5 + $0x1c0] ss:$8 sps:$4 sm:$0xff]   ;;  %7352 = vmatprep.subr.bf16.mxu1 %v13556_v32 }
 0x3ca   : > { %7353 = vmatpush1.bf16.msra.mxu1 %v13554_v51  ;;  %v6898_v51 = vld [vmem:[#allocation3 + $0x18] sm:$0x11] }
 0x3cc   : > { %6661 = vmatpush1.bf16.msra.mxu0 %v13503_v2  ;;  %v491_v2 = vsel %vm14247_vm15, 0, %v490_v40 }
 0x3cd   : > { %6662 = vmatprep.subr.bf16.mxu0 %v13508_v41  ;;  %v13559_v41 = vld [vmem:[%s18082_s5 + $0x1d4] ss:$8 sps:$4 sm:$0xff]   ;;  %492 = vst [vmem:[#allocation3 + $0x68] sm:$0x11] %v491_v2  ;;  %v6999_v2 = vrot.slane %v6998_v48, 4  ;;  %v6907_v48 = vld [vmem:[#allocation3 + $0x30] sm:$0xff] }
 0x3ce   : > { %7354 = vmatprep.subr.bf16.mxu1 %v13559_v41 }
 0x3cf   : > { %6634 = vmatmul.mubr.bf16.gmra.mrb[40].mxu0 %v18201_v10  ;;  %v13557_v10 = vld [vmem:[%s18082_s5 + $0x1d0] ss:$8 sps:$4 sm:$0xff]  }
 0x3d0   : > { %6643 = vmatprep.mubr.bf16.mxu0 %v18202_v35  ;;  %6663 = vmatpush1.bf16.msra.mxu0 %v13506_v25  ;;  %v469_v25 = vld [vmem:[#allocation3 + $0x70] sm:$0x11] }
 0x3d1   : > { %6664 = vmatprep.subr.bf16.mxu0 %v13511_v3  ;;  %v493_v3 = vld [vmem:[#allocation3 + $0x78] sm:$0x11]  ;;  %v470_v35 = vsel %vm14280_vm2, 0, %v469_v25  ;;  %7355 = vmatpush1.bf16.msra.mxu1 %v13557_v10  ;;  %v6901_v10 = vld [vmem:[#allocation3 + $0x20] sm:$0xff] }
 0x3d2   : > { %471 = vst [vmem:[#allocation3 + $0x70] sm:$0x11] %v470_v35  ;;  %v6904_v35 = vld [vmem:[#allocation3 + $0x28] sm:$0x11] }
 0x3d4   : > { %6665 = vmatpush1.bf16.msra.mxu0 %v13509_v38  ;;  %v494_v38 = vsel %vm14247_vm15, 0, %v493_v3 }
 0x3d5   : > { %6666 = vmatprep.subr.bf16.mxu0 %v13514_v26  ;;  %495 = vst [vmem:[#allocation3 + $0x78] sm:$0x11] %v494_v38  ;;  %v13560_v26 = vld [vmem:[%s18082_s5 + $0x1e0] ss:$8 sps:$4 sm:$0xff]  }
 0x3d7   : > { %6644 = vmatmul.mubr.bf16.gmra.mrb[44].mxu0 %v18203_v23  ;;  %v496_v23 = vld [vmem:[#allocation3 + $0x88] sm:$0x11] }
 0x3d8   : > { %6667 = vmatpush1.bf16.msra.mxu0 %v13512_v9  ;;  %6686 = vmatprep.mubr.bf16.mxu0 %v16429_v44  ;;  %v13562_v9 = vld [vmem:[%s18082_s5 + $0x1e4] ss:$8 sps:$4 sm:$0xff]  }
 0x3d9   : > { %6668 = vmatprep.subr.bf16.mxu0 %v13517_v54  ;;  %v472_v54 = vld [vmem:[#allocation3 + $0x80] sm:$0x11]  ;;  %7356 = vmatprep.subr.bf16.mxu1 %v13562_v9 }
 0x3da   : > { %7357 = vmatpush1.bf16.msra.mxu1 %v13560_v26  ;;  %v18216_v26 = vld [vmem:[#allocation21_spill] sm:$0xff] }
 0x3dc   : > { %6669 = vmatpush1.bf16.msra.mxu0 %v13515_v50  ;;  %v473_v50 = vsel %vm14280_vm2, 0, %v472_v54 }
 0x3dd   : > { %474 = vst [vmem:[#allocation3 + $0x80] sm:$0x11] %v473_v50 }
 0x3df   : > { %6687 = vmatmul.mubr.bf16.vlgmr.msra.gmra.mrb[32].mxu0 %v18204_v7  ;;  %v497_v7 = vsel %vm14247_vm15, 0, %v496_v23 }
 0x3e0   : > { %6696 = vmatprep.mubr.bf16.mxu0 %v16429_v44  ;;  %498 = vst [vmem:[#allocation3 + $0x88] sm:$0x11] %v497_v7 }
 0x3e7   : > { %6697 = vmatmul.mubr.bf16.gmra.mrb[36].mxu0 %v18205_v52  ;;  %v13565_v52 = vld [vmem:[%s18082_s5 + $0x1f4] ss:$8 sps:$4 sm:$0xff]  }
 0x3e8   : > { %6706 = vmatprep.mubr.bf16.mxu0 %v16429_v44  ;;  %7358 = vmatprep.subr.bf16.mxu1 %v13565_v52 }
 0x3e9   : > { %7359 = vmatpush1.bf16.msra.mxu1 %v13563_v19 }
 0x3ef   : > { %6707 = vmatmul.mubr.bf16.gmra.mrb[40].mxu0 %v18207_v27  ;;  %v13568_v27 = vld [vmem:[%s18082_s5 + $0x4] ss:$8 sps:$4 sm:$0xff]  }
 0x3f0   : > { %6716 = vmatprep.mubr.bf16.mxu0 %v16429_v44  ;;  %7601 = vmatprep.subr.bf16.mxu1 %v13568_v27  ;;  %v7001_v44 = vshll.u32 %v16703_v36, 16 }
 0x3f2   : > { %v7003_v39 = vrot.slane %v7001_v44, 5 }
 0x3f7   : > { %6717 = vmatmul.mubr.bf16.gmra.mrb[44].mxu0 %v18210_v63 }
 0x4b2   : > { %v6688_v63 = vpop.f32.mrb[32].mxu0 }
 0x4b3   : > { %v12426_v13 = vadd.f32 %v6688_v63, %v15707_v31  ;;  %v6690_v12 = vpop.f32.mrb[33].mxu0 }
 0x4b4   : > { %v12429_v49 = vadd.f32 %v6690_v12, %v15710_v21  ;;  %v6692_v57 = vpop.f32.mrb[34].mxu0  ;;  %v16729_v12 = vsel %vm14405_vm7, %v6999_v2, %v7003_v39 }
 0x4b5   : > { %v6743_v37 = vmax.f32 %v12426_v13, 0.0  ;;  %v12432_v28 = vadd.f32 %v6692_v57, %v18213_v47  ;;  %v6694_v43 = vpop.f32.mrb[35].mxu0 }
 0x4b6   : > { %v6744_v33 = vmax.f32 %v12429_v49, 0.0  ;;  %v12435_v4 = vadd.f32 %v6694_v43, %v18214_v53 }
 0x4b7   : > { %v6745_v56 = vmax.f32 %v12432_v28, 0.0 }
 0x4b8   : > { %v12335_v30 = vpack.c.bf16 %v6744_v33, %v6743_v37  ;;  %v6746_v31 = vmax.f32 %v12435_v4, 0.0 }
 0x4ba   : > { %v6816_v11 = vshrl.u32 %v12335_v30, 16  ;;  %v12336_v21 = vpack.c.bf16 %v6746_v31, %v6745_v56  ;;  %v6698_v14 = vpop.f32.mrb[36].mxu0  ;;  %v6819_v5 = vshll.u32 %v12335_v30, 16 }
 0x4bb   : > { %v12438_v16 = vadd.f32 %v6698_v14, %v15732_v20  ;;  %v6700_v45 = vpop.f32.mrb[37].mxu0 }
 0x4bc   : > { %v6818_v18 = vrot.slane %v6816_v11, 7  ;;  %v6824_v61 = vshrl.u32 %v12336_v21, 16  ;;  %v12441_v15 = vadd.f32 %v6700_v45, %v18215_v34  ;;  %v6702_v60 = vpop.f32.mrb[38].mxu0  ;;  %v6827_v32 = vshll.u32 %v12336_v21, 16  ;;  %v6910_v11 = vld [vmem:[#allocation3 + $0x38] sm:$0x11] }
 0x4bd   : > { %v6747_v29 = vmax.f32 %v12438_v16, 0.0  ;;  %v12444_v58 = vadd.f32 %v6702_v60, %v15742_v1  ;;  %v6704_v40 = vpop.f32.mrb[39].mxu0 }
 0x4be   : > { %v6821_v41 = vor.u32 %v6819_v5, %v6818_v18  ;;  %v6822_v25 = vrot.slane %v6818_v18, 4  ;;  %v6826_v3 = vrot.slane %v6824_v61, 7  ;;  %v6748_v20 = vmax.f32 %v12441_v15, 0.0  ;;  %v6916_v18 = vld [vmem:[#allocation3 + $0x48] sm:$0x11] }
 0x4bf   : > { %v6749_v38 = vmax.f32 %v12444_v58, 0.0  ;;  %v12447_v9 = vadd.f32 %v6704_v40, %v18216_v26 }
 0x4c0   : > { %v16714_v23 = vsel %vm14136_vm6, %v6821_v41, %v6895_v62  ;;  %v6899_v50 = vsel %vm14280_vm2, %v6822_v25, %v6898_v51  ;;  %v6829_v7 = vor.u32 %v6827_v32, %v6826_v3  ;;  %v6830_v1 = vrot.slane %v6826_v3, 4  ;;  %v6913_v62 = vld [vmem:[#allocation3 + $0x40] sm:$0xff] }
 0x4c1   : > { %6897 = vst [vmem:[#allocation3 + $0x10] sm:$0xff] %v16714_v23  ;;  %6900 = vst [vmem:[#allocation3 + $0x18] sm:$0x11] %v6899_v50  ;;  %v12337_v52 = vpack.c.bf16 %v6748_v20, %v6747_v29  ;;  %v6750_v19 = vmax.f32 %v12447_v9, 0.0  ;;  %v7006_v27 = vshrl.u32 %v16714_v23, 16  ;;  %v7009_v24 = vshll.u32 %v16714_v23, 16 }
 0x4c2   : > { %v16723_v17 = vsel %vm14136_vm6, %v6829_v7, %v6901_v10  ;;  %v6905_v63 = vsel %vm14280_vm2, %v6830_v1, %v6904_v35  ;;  %v6708_v13 = vpop.f32.mrb[40].mxu0  ;;  %v18218_v10 = vld [vmem:[#allocation22_spill] sm:$0xff] }
 0x4c3   : > { %6903 = vst [vmem:[#allocation3 + $0x20] sm:$0xff] %v16723_v17  ;;  %6906 = vst [vmem:[#allocation3 + $0x28] sm:$0x11] %v6905_v63  ;;  %v6832_v49 = vshrl.u32 %v12337_v52, 16  ;;  %v6835_v57 = vshll.u32 %v12337_v52, 16  ;;  %v12338_v37 = vpack.c.bf16 %v6750_v19, %v6749_v38  ;;  %v12450_v47 = vadd.f32 %v6708_v13, %v15763_v8  ;;  %v6710_v28 = vpop.f32.mrb[41].mxu0 }
 0x4c4   : > { %v12453_v43 = vadd.f32 %v6710_v28, %v15766_v0  ;;  %v6712_v55 = vpop.f32.mrb[42].mxu0  ;;  %v7008_v59 = vrot.slane %v7006_v27, 4  ;;  %v7011_v33 = vrot.slane %v7009_v24, 5  ;;  %v7020_v53 = vshrl.u32 %v16723_v17, 16  ;;  %v6919_v50 = vld [vmem:[#allocation3 + $0x50] sm:$0xff]  ;;  %v18219_v52 = vld [vmem:[#allocation23_spill] sm:$0xff] }
 0x4c5   : > { %v6834_v4 = vrot.slane %v6832_v49, 7  ;;  %v6840_v56 = vshrl.u32 %v12338_v37, 16  ;;  %v6843_v44 = vshll.u32 %v12338_v37, 16  ;;  %v6751_v30 = vmax.f32 %v12450_v47, 0.0  ;;  %v6714_v31 = vpop.f32.mrb[43].mxu0  ;;  %v18220_v13 = vld [vmem:[#allocation24_spill] sm:$0xff] }
 0x4c6   : > { %v6752_v21 = vmax.f32 %v12453_v43, 0.0  ;;  %v12456_v14 = vadd.f32 %v6712_v55, %v15772_v42  ;;  %v12459_v8 = vadd.f32 %v6714_v31, %v15778_v6  ;;  %v7012_v16 = vor.u32 %v7011_v33, %v7008_v59  ;;  %v6922_v24 = vld [vmem:[#allocation3 + $0x58] sm:$0x11]  ;;  %v6925_v33 = vld [vmem:[#allocation3 + $0x60] sm:$0xff] }
 0x4c7   : > { %v6837_v45 = vor.u32 %v6835_v57, %v6834_v4  ;;  %v6838_v0 = vrot.slane %v6834_v4, 4  ;;  %v6842_v39 = vrot.slane %v6840_v56, 7  ;;  %v16737_v5 = vrot.slane %v7020_v53, 4  ;;  %v6928_v53 = vld [vmem:[#allocation3 + $0x68] sm:$0x11] }
 0x4c8   : > { %v12339_v61 = vpack.c.bf16 %v6752_v21, %v6751_v30  ;;  %v6753_v34 = vmax.f32 %v12456_v14, 0.0  ;;  %v6754_v15 = vmax.f32 %v12459_v8, 0.0  ;;  %v16739_v60 = vld [vmem:[#allocation3 + $0x18] sm:$0x11]  ;;  %v7013_v51 = vrot.slane %v7012_v16, 4  ;;  %v18221_v56 = vld [vmem:[#allocation25_spill] sm:$0xff] }
 0x4c9   : > { %v16743_v32 = vsel %vm14136_vm6, %v6837_v45, %v6907_v48  ;;  %v6911_v42 = vsel %vm14280_vm2, %v6838_v0, %v6910_v11  ;;  %v6845_v6 = vor.u32 %v6843_v44, %v6842_v39  ;;  %v6846_v29 = vrot.slane %v6842_v39, 4 }
 0x4ca   : > { %6909 = vst [vmem:[#allocation3 + $0x30] sm:$0xff] %v16743_v32  ;;  %6912 = vst [vmem:[#allocation3 + $0x38] sm:$0x11] %v6911_v42  ;;  %v6848_v58 = vshrl.u32 %v12339_v61, 16  ;;  %v6851_v40 = vshll.u32 %v12339_v61, 16  ;;  %v12340_v2 = vpack.c.bf16 %v6754_v15, %v6753_v34  ;;  %v6718_v41 = vpop.f32.mrb[44].mxu0 }
 0x4cb   : > { %v7015_v25 = vshll.u32 %v16739_v60, 16  ;;  %v16751_v3 = vsel %vm14136_vm6, %v6845_v6, %v6913_v62  ;;  %v6917_v20 = vsel %vm14280_vm2, %v6846_v29, %v6916_v18  ;;  %v12462_v35 = vadd.f32 %v6718_v41, %v18218_v10  ;;  %v6720_v38 = vpop.f32.mrb[45].mxu0  ;;  %v16763_v31 = vld [vmem:[#allocation3 + $0x28] sm:$0x11]  ;;  %v13566_v18 = vld [vmem:[%s18082_s5] ss:$8 sps:$4 sm:$0xff]  }
 0x4cc   : > { %v7023_v26 = vshll.u32 %v16723_v17, 16  ;;  %6915 = vst [vmem:[#allocation3 + $0x40] sm:$0xff] %v16751_v3  ;;  %6918 = vst [vmem:[#allocation3 + $0x48] sm:$0x11] %v6917_v20  ;;  %v6850_v9 = vrot.slane %v6848_v58, 7  ;;  %v6856_v7 = vshrl.u32 %v12340_v2, 16  ;;  %v12465_v19 = vadd.f32 %v6720_v38, %v18219_v52 }
 0x4cd   : > { %v6859_v1 = vshll.u32 %v12340_v2, 16  ;;  %v6722_v27 = vpop.f32.mrb[46].mxu0  ;;  %v6755_v63 = vmax.f32 %v12462_v35, 0.0  ;;  %v7017_v37 = vrot.slane %v7015_v25, 5  ;;  %v13571_v34 = vld [vmem:[%s18082_s5 + $0x14] ss:$8 sps:$4 sm:$0xff]  }
 0x4ce   : > { %v12468_v49 = vadd.f32 %v6722_v27, %v18220_v13  ;;  %v6724_v57 = vpop.f32.mrb[47].mxu0  ;;  %v7025_v47 = vrot.slane %v7023_v26, 5  ;;  %v6853_v28 = vor.u32 %v6851_v40, %v6850_v9  ;;  %v6854_v43 = vrot.slane %v6850_v9, 4  ;;  %v6934_v58 = vld [vmem:[#allocation3 + $0x78] sm:$0x11] }
 0x4cf   : > { %v6858_v55 = vrot.slane %v6856_v7, 7  ;;  %v6756_v59 = vmax.f32 %v12465_v19, 0.0  ;;  %v12471_v44 = vadd.f32 %v6724_v57, %v18221_v56  ;;  %v7018_v30 = vsel %vm14405_vm7, %v7013_v51, %v7017_v37  ;;  %v13569_v40 = vld [vmem:[%s18082_s5 + $0x10] ss:$8 sps:$4 sm:$0xff]   ;;  %v13574_v19 = vld [vmem:[%s18082_s5 + $0x24] ss:$8 sps:$4 sm:$0xff]  }
 0x4d0   : > { %v6757_v4 = vmax.f32 %v12468_v49, 0.0  ;;  %v7026_v48 = vor.u32 %v7025_v47, %v16737_v5  ;;  %v16768_v11 = vsel %vm14136_vm6, %v6853_v28, %v6919_v50  ;;  %v6923_v21 = vsel %vm14280_vm2, %v6854_v43, %v6922_v24  ;;  %v6931_v50 = vld [vmem:[#allocation3 + $0x70] sm:$0xff]  ;;  %v6940_v49 = vld [vmem:[#allocation3 + $0x88] sm:$0x11]  ;;  %v6937_v37 = vld [vmem:[#allocation3 + $0x80] sm:$0xff] }
 0x4d1   : > { %v6861_v14 = vor.u32 %v6859_v1, %v6858_v55  ;;  %v6862_v8 = vrot.slane %v6858_v55, 4  ;;  %6921 = vst [vmem:[#allocation3 + $0x50] sm:$0xff] %v16768_v11  ;;  %6924 = vst [vmem:[#allocation3 + $0x58] sm:$0x11] %v6923_v21  ;;  %v12341_v16 = vpack.c.bf16 %v6756_v59, %v6755_v63  ;;  %v6758_v45 = vmax.f32 %v12471_v44, 0.0 }
 0x4d2   : > { %v11689_v0 = vcombine.low %v16729_v12, %v7018_v30  ;;  %v11690_v39 = vcombine.high %v16729_v12, %v7018_v30  ;;  %v16778_v5 = vld [vmem:[#allocation3 + $0x38] sm:$0x11]  ;;  %v7027_v15 = vrot.slane %v7026_v48, 4  ;;  %v7029_v12 = vshll.u32 %v16763_v31, 16  ;;  %v13577_v48 = vld [vmem:[%s18082_s5 + $0x34] ss:$8 sps:$4 sm:$0xff]  }
 0x4d3   : > { %v16782_v62 = vsel %vm14136_vm6, %v6861_v14, %v6925_v33  ;;  %v6929_v61 = vsel %vm14280_vm2, %v6862_v8, %v6928_v53  ;;  %v6864_v51 = vshrl.u32 %v12341_v16, 16  ;;  %v6867_v42 = vshll.u32 %v12341_v16, 16  ;;  %v16798_v9 = vld [vmem:[#allocation3 + $0x48] sm:$0x11]  ;;  %v13572_v44 = vld [vmem:[%s18082_s5 + $0x20] ss:$8 sps:$4 sm:$0xff]  }
 0x4d4   : > { %6927 = vst [vmem:[#allocation3 + $0x60] sm:$0xff] %v16782_v62  ;;  %6930 = vst [vmem:[#allocation3 + $0x68] sm:$0x11] %v6929_v61  ;;  %v12342_v6 = vpack.c.bf16 %v6758_v45, %v6757_v4  ;;  %7360 = vmatprep.mubr.bf16.mxu1 %v11690_v39  ;;  %v7034_v29 = vshrl.u32 %v16743_v32, 16  ;;  %v7031_v2 = vrot.slane %v7029_v12, 5  ;;  %v7037_v41 = vshll.u32 %v16743_v32, 16 }
 0x4d5   : > { %7361 = vmatmul.mubr.bf16.vlgmr.msra.gmra.mrb[40].mxu1 %v11689_v0  ;;  %v7043_v25 = vshll.u32 %v16778_v5, 16  ;;  %v7048_v20 = vshrl.u32 %v16751_v3, 16  ;;  %v6866_v10 = vrot.slane %v6864_v51, 7  ;;  %v7051_v57 = vshll.u32 %v16751_v3, 16 }
 0x4d6   : > { %v6872_v35 = vshrl.u32 %v12342_v6, 16  ;;  %v6875_v38 = vshll.u32 %v12342_v6, 16  ;;  %7602 = vmatpush1.bf16.msra.mxu1 %v13566_v18  ;;  %v7036_v26 = vrot.slane %v7034_v29, 4  ;;  %v7032_v7 = vsel %vm14405_vm7, %v7027_v15, %v7031_v2 }
 0x4d7   : > { %7603 = vmatprep.subr.bf16.mxu1 %v13571_v34  ;;  %v7039_v1 = vrot.slane %v7037_v41, 5  ;;  %v7045_v52 = vrot.slane %v7043_v25, 5  ;;  %v7050_v27 = vrot.slane %v7048_v20, 4  ;;  %v6869_v24 = vor.u32 %v6867_v42, %v6866_v10 }
 0x4d8   : > { %v6870_v63 = vrot.slane %v6866_v10, 4  ;;  %v6874_v13 = vrot.slane %v6872_v35, 7  ;;  %v16806_v28 = vld [vmem:[#allocation3 + $0x58] sm:$0x11]  ;;  %v7057_v43 = vshll.u32 %v16798_v9, 16  ;;  %v7062_v55 = vshrl.u32 %v16768_v11, 16 }
 0x4d9   : > { %v7040_v47 = vor.u32 %v7039_v1, %v7036_v26  ;;  %v7065_v59 = vshll.u32 %v16768_v11, 16  ;;  %v16813_v33 = vsel %vm14136_vm6, %v6869_v24, %v6931_v50  ;;  %v7053_v21 = vrot.slane %v7051_v57, 5  ;;  %v13578_v26 = vld [vmem:[%s18082_s5 + $0x40] ss:$8 sps:$4 sm:$0xff]  }
 0x4da   : > { %v6935_v53 = vsel %vm14280_vm2, %v6870_v63, %v6934_v58  ;;  %v6877_v4 = vor.u32 %v6875_v38, %v6874_v13  ;;  %v6878_v56 = vrot.slane %v6874_v13, 4  ;;  %7604 = vmatpush1.bf16.msra.mxu1 %v13569_v40  ;;  %6933 = vst [vmem:[#allocation3 + $0x70] sm:$0xff] %v16813_v33  ;;  %v7059_v14 = vrot.slane %v7057_v43, 5  ;;  %v13580_v58 = vld [vmem:[%s18082_s5 + $0x44] ss:$8 sps:$4 sm:$0xff]  }
 0x4db   : > { %6936 = vst [vmem:[#allocation3 + $0x78] sm:$0x11] %v6935_v53  ;;  %v7041_v30 = vrot.slane %v7040_v47, 4  ;;  %7605 = vmatprep.subr.bf16.mxu1 %v13574_v19  ;;  %v7064_v8 = vrot.slane %v7062_v55, 4  ;;  %v7067_v0 = vrot.slane %v7065_v59, 5  ;;  %v7071_v39 = vshll.u32 %v16806_v28, 16 }
 0x4dc   : > { %v6938_v16 = vsel %vm14136_vm6, %v6877_v4, %v6937_v37  ;;  %v6941_v45 = vsel %vm14280_vm2, %v6878_v56, %v6940_v49  ;;  %v16829_v18 = vld [vmem:[#allocation3 + $0x68] sm:$0x11]  ;;  %v7054_v34 = vor.u32 %v7053_v21, %v7050_v27  ;;  %v7076_v15 = vshrl.u32 %v16782_v62, 16  ;;  %v7676_v47 = vld [vmem:[#allocation3 + $0x20] sm:$0xee] }
 0x4dd   : > { %6939 = vst [vmem:[#allocation3 + $0x80] sm:$0xff] %v6938_v16  ;;  %6942 = vst [vmem:[#allocation3 + $0x88] sm:$0x11] %v6941_v45  ;;  %v7046_v61 = vsel %vm14405_vm7, %v7041_v30, %v7045_v52  ;;  %v7079_v12 = vshll.u32 %v16782_v62, 16  ;;  %v7068_v42 = vor.u32 %v7067_v0, %v7064_v8  ;;  %v7073_v6 = vrot.slane %v7071_v39, 5 }
 0x4de   : > { %v11692_v54 = vcombine.high %v7032_v7, %v7046_v61  ;;  %v11691_v51 = vcombine.low %v7032_v7, %v7046_v61  ;;  %7606 = vmatpush1.bf16.msra.mxu1 %v13572_v44  ;;  %v7055_v29 = vrot.slane %v7054_v34, 4  ;;  %v7078_v40 = vrot.slane %v7076_v15, 4  ;;  %v13583_v52 = vld [vmem:[%s18082_s5 + $0x54] ss:$8 sps:$4 sm:$0xff]   ;;  %v7677_v43 = vld [vmem:[#allocation3 + $0x30] sm:$0xee] }
 0x4df   : > { %7607 = vmatprep.subr.bf16.mxu1 %v13577_v48  ;;  %v7081_v2 = vrot.slane %v7079_v12, 5  ;;  %v7085_v41 = vshll.u32 %v16829_v18, 16  ;;  %v7069_v25 = vrot.slane %v7068_v42, 4  ;;  %v7090_v20 = vshrl.u32 %v16813_v33, 16  ;;  %v7678_v30 = vld [vmem:[#allocation3 + $0x40] sm:$0xee] }
 0x4e0   : > { %7370 = vmatprep.mubr.bf16.mxu1 %v11692_v54  ;;  %v7093_v10 = vshll.u32 %v16813_v33, 16  ;;  %v11732_v35 = vcombine.high %v16723_v17, %v16743_v32  ;;  %v7060_v38 = vsel %vm14405_vm7, %v7055_v29, %v7059_v14  ;;  %v11731_v7 = vcombine.low %v16723_v17, %v16743_v32  ;;  %v13581_v48 = vld [vmem:[%s18082_s5 + $0x50] ss:$8 sps:$4 sm:$0xff]   ;;  %v13586_v45 = vld [vmem:[%s18082_s5 + $0x64] ss:$8 sps:$4 sm:$0xff]  }
 0x4e1   : > { %7371 = vmatmul.mubr.bf16.gmra.mrb[44].mxu1 %v11691_v51  ;;  %v7082_v50 = vor.u32 %v7081_v2, %v7078_v40  ;;  %v7074_v1 = vsel %vm14405_vm7, %v7069_v25, %v7073_v6  ;;  %v7092_v27 = vrot.slane %v7090_v20, 4  ;;  %v11734_v63 = vcombine.high %v16751_v3, %v16768_v11  ;;  %v7679_v39 = vld [vmem:[#allocation3 + $0x50] sm:$0xee]  ;;  %v7680_v54 = vld [vmem:[#allocation3 + $0x60] sm:$0xee] }
 0x4e2   : > { %7608 = vmatpush1.bf16.msra.mxu1 %v13575_v22  ;;  %v6990_v19 = vld [vmem:[#allocation3 + $0x78] sm:$0x11]  ;;  %v7095_v24 = vrot.slane %v7093_v10, 5  ;;  %v11694_v13 = vcombine.high %v7060_v38, %v7074_v1  ;;  %v11693_v49 = vcombine.low %v7060_v38, %v7074_v1  ;;  %v7087_v57 = vrot.slane %v7085_v41, 5  ;;  %v13589_v41 = vld [vmem:[%s18082_s5 + $0x74] ss:$8 sps:$4 sm:$0xff]  }
 0x4e3   : > { %7609 = vmatprep.subr.bf16.mxu1 %v13580_v58  ;;  %v7099_v37 = vshll.u32 %v6990_v19, 16  ;;  %v7083_v56 = vrot.slane %v7082_v50, 4  ;;  %v11771_v14 = vrot.slane %v7676_v47, 9  ;;  %v7708_v8 = vrot.slane %v16763_v31, 5  ;;  %v7681_v31 = vld [vmem:[#allocation3 + $0x70] sm:$0xee] }
 0x4e4   : > { %v7096_v55 = vor.u32 %v7095_v24, %v7092_v27  ;;  %7380 = vmatprep.mubr.bf16.mxu1 %v11694_v13  ;;  %v11772_v16 = vrot.slane %v7677_v43, 9  ;;  %v7712_v0 = vrot.slane %v16778_v5, 5  ;;  %v11773_v15 = vrot.slane %v7678_v30, 9  ;;  %v13584_v29 = vld [vmem:[%s18082_s5 + $0x60] ss:$8 sps:$4 sm:$0xff]  }
 0x4e5   : > { %v7101_v44 = vrot.slane %v7099_v37, 5  ;;  %v7088_v61 = vsel %vm14405_vm7, %v7083_v56, %v7087_v57  ;;  %v7716_v12 = vrot.slane %v16798_v9, 5  ;;  %v16881_v6 = vsel %vm14753_vm9, %v11771_v14, %v7708_v8  ;;  %v16922_v27 = vld [vmem:[#allocation3 + $0x18] sm:$0x11]  ;;  %v8816_v57 = vld [vmem:[#allocation3 + $0x10] sm:$0xee] }
 0x4e6   : > { %7610 = vmatpush1.bf16.msra.mxu1 %v13578_v26  ;;  %v7097_v21 = vrot.slane %v7096_v55, 4  ;;  %v16885_v5 = vsel %vm14753_vm9, %v11772_v16, %v7712_v0  ;;  %v11774_v40 = vrot.slane %v7679_v39, 9  ;;  %v7720_v2 = vrot.slane %v16806_v28, 5  ;;  %v13587_v28 = vld [vmem:[%s18082_s5 + $0x70] ss:$8 sps:$4 sm:$0xff]   ;;  %v16933_v43 = vld [vmem:[#allocation2] sm:$0xff] }
 0x4e7   : > { %7611 = vmatprep.subr.bf16.mxu1 %v13583_v52  ;;  %v11775_v25 = vrot.slane %v7680_v54, 9  ;;  %v7724_v20 = vrot.slane %v16829_v18, 5  ;;  %v11776_v10 = vrot.slane %v7681_v31, 9  ;;  %v7728_v38 = vrot.slane %v6990_v19, 5  ;;  %v8817_v37 = vld [vmem:[#allocation3 + $0x20] sm:$0xee] }
 0x4e8   : > { %v7102_v34 = vsel %vm14405_vm7, %v7097_v21, %v7101_v44  ;;  %v16901_v26 = vsel %vm14753_vm9, %v11773_v15, %v7716_v12  ;;  %v16905_v50 = vsel %vm14753_vm9, %v11774_v40, %v7720_v2  ;;  %v13592_v47 = vld [vmem:[%s18082_s5 + $0x84] ss:$8 sps:$4 sm:$0xff]   ;;  %v11730_v55 = vcombine.high %v16933_v43, %v16714_v23  ;;  %v13590_v21 = vld [vmem:[%s18082_s5 + $0x80] ss:$8 sps:$4 sm:$0xff]   ;;  %v13595_v8 = vld [vmem:[%s18082_s5 + $0x94] ss:$8 sps:$4 sm:$0xff]  }
 0x4e9   : > { %7381 = vmatmul.mubr.bf16.gmra.mrb[48].mxu1 %v11693_v49  ;;  %v11696_v51 = vcombine.high %v7088_v61, %v7102_v34  ;;  %v11695_v22 = vcombine.low %v7088_v61, %v7102_v34  ;;  %v16916_v52 = vsel %vm14753_vm9, %v11775_v25, %v7724_v20  ;;  %v16920_v19 = vsel %vm14753_vm9, %v11776_v10, %v7728_v38  ;;  %v16928_v49 = vld [vmem:[#allocation3 + $0x28] sm:$0x11]  ;;  %v16942_v14 = vld [vmem:[#allocation3 + $0x30] sm:$0xff]  ;;  %v16947_v16 = vld [vmem:[#allocation3 + $0x20] sm:$0xff] }
 0x4ea   : > { %7612 = vmatpush1.bf16.msra.mxu1 %v13581_v48  ;;  %v11993_v56 = vrot.slane %v8816_v57, 9  ;;  %v8842_v44 = vrot.slane %v16922_v27, 5  ;;  %v11994_v30 = vrot.slane %v8817_v37, 9  ;;  %v8846_v48 = vrot.slane %v16928_v49, 5  ;;  %v13593_v61 = vld [vmem:[%s18082_s5 + $0x90] ss:$8 sps:$4 sm:$0xff]  }
 0x4eb   : > { %7390 = vmatprep.mubr.bf16.mxu1 %v11696_v51  ;;  %7613 = vmatprep.subr.bf16.mxu1 %v13586_v45  ;;  %v13598_v12 = vld [vmem:[%s18082_s5 + $0xa4] ss:$8 sps:$4 sm:$0xff]   ;;  %v16971_v51 = vld [vmem:[#allocation3 + $0x48] sm:$0x11]  ;;  %v8823_v0 = vld [vmem:[#allocation3 + $0x80] sm:$0xee] }
 0x4ec   : > { %v16951_v45 = vsel %vm14753_vm9, %v11994_v30, %v8846_v48  ;;  %v16957_v39 = vsel %vm14753_vm9, %v11993_v56, %v8842_v44  ;;  %v16969_v54 = vld [vmem:[#allocation3 + $0x38] sm:$0x11]  ;;  %v8818_v31 = vld [vmem:[#allocation3 + $0x30] sm:$0xee]  ;;  %v13601_v2 = vld [vmem:[%s18082_s5 + $0xb4] ss:$8 sps:$4 sm:$0xff]  }
 0x4ed   : > { %v11995_v25 = vrot.slane %v8818_v31, 9  ;;  %v8850_v20 = vrot.slane %v16969_v54, 5  ;;  %v8854_v38 = vrot.slane %v16971_v51, 5  ;;  %v13599_v57 = vld [vmem:[%s18082_s5 + $0xb0] ss:$8 sps:$4 sm:$0xff]   ;;  %v17017_v31 = vld [vmem:[#allocation3 + $0x70] sm:$0xff] }
 0x4ee   : > { %7614 = vmatpush1.bf16.msra.mxu1 %v13584_v29  ;;  %v13596_v29 = vld [vmem:[%s18082_s5 + $0xa0] ss:$8 sps:$4 sm:$0xff]   ;;  %v12000_v34 = vrot.slane %v8823_v0, 9  ;;  %v13616_v0 = vld [vmem:[%s18082_s5 + $0x204] ss:$8 sps:$4 sm:$0xff]   ;;  %v7704_v13 = vrot.slane %v16739_v60, 5 }
 0x4ef   : > { %7615 = vmatprep.subr.bf16.mxu1 %v13589_v41  ;;  %v16981_v41 = vld [vmem:[#allocation3 + $0x50] sm:$0xff]  ;;  %v17001_v56 = vsel %vm14753_vm9, %v11995_v25, %v8850_v20  ;;  %v9520_v17 = vld [vmem:[#allocation3 + $0x38] sm:$0x11]  ;;  %v9963_v24 = vld [vmem:[#allocation3 + $0x60] sm:$0xee] }
 0x4f0   : > { %v13602_v48 = vld [vmem:[%s18082_s5 + $0xc0] ss:$8 sps:$4 sm:$0xff]   ;;  %v9526_v18 = vld [vmem:[#allocation3 + $0x68] sm:$0x11]  ;;  %v9989_v9 = vrot.slane %v9520_v17, 5 }
 0x4f1   : > { %7391 = vmatmul.mubr.bf16.gmra.mrb[52].mxu1 %v11695_v22  ;;  %v8819_v22 = vld [vmem:[#allocation3 + $0x40] sm:$0xee]  ;;  %v13626_v32 = vld [vmem:[%s18082_s5 + $0x240] ss:$8 sps:$4 sm:$0xff]   ;;  %v13634_v60 = vld [vmem:[%s18082_s5 + $0x264] ss:$8 sps:$4 sm:$0xff]  }
 0x4f2   : > { %7633 = vmatprep.mubr.bf16.mxu1 %v11730_v55  ;;  %7616 = vmatpush1.bf16.msra.mxu1 %v13587_v28  ;;  %v11996_v10 = vrot.slane %v8819_v22, 9  ;;  %v16985_v28 = vld [vmem:[#allocation3 + $0x40] sm:$0xff]  ;;  %v13604_v55 = vld [vmem:[%s18082_s5 + $0xc4] ss:$8 sps:$4 sm:$0xff]   ;;  %v10001_v17 = vrot.slane %v9526_v18, 5 }
 0x4f3   : > { %7617 = vmatprep.subr.bf16.mxu1 %v13592_v47  ;;  %v8821_v22 = vld [vmem:[#allocation3 + $0x60] sm:$0xee]  ;;  %v8822_v47 = vld [vmem:[#allocation3 + $0x70] sm:$0xee]  ;;  %v9528_v1 = vld [vmem:[#allocation3 + $0x78] sm:$0x11] }
 0x4f4   : > { %v16992_v37 = vsel %vm14753_vm9, %v11996_v10, %v8854_v38  ;;  %v13605_v10 = vld [vmem:[%s18082_s5 + $0xd0] ss:$8 sps:$4 sm:$0xff]   ;;  %v11998_v38 = vrot.slane %v8821_v22, 9  ;;  %v13640_v42 = vld [vmem:[%s18082_s5 + $0x284] ss:$8 sps:$4 sm:$0xff]  }
 0x4f6   : > { %7618 = vmatpush1.bf16.msra.mxu1 %v13590_v21  ;;  %v17010_v21 = vld [vmem:[#allocation3 + $0x58] sm:$0x11] }
 0x4f7   : > { %7619 = vmatprep.subr.bf16.mxu1 %v13595_v8  ;;  %v8820_v8 = vld [vmem:[#allocation3 + $0x50] sm:$0xee]  ;;  %v8858_v20 = vrot.slane %v17010_v21, 5 }
 0x4f8   : > { %v11997_v25 = vrot.slane %v8820_v8, 9 }
 0x4fa   : > { %7620 = vmatpush1.bf16.msra.mxu1 %v13593_v61  ;;  %v17032_v61 = vld [vmem:[#allocation3 + $0x78] sm:$0x11]  ;;  %v17039_v40 = vsel %vm14753_vm9, %v11997_v25, %v8858_v20  ;;  %v13613_v25 = vld [vmem:[%s18082_s5 + $0xf4] ss:$8 sps:$4 sm:$0xff]   ;;  %v7700_v20 = vrot.slane %v16703_v36, 5 }
 0x4fb   : > { %7621 = vmatprep.subr.bf16.mxu1 %v13598_v12  ;;  %v13607_v12 = vld [vmem:[%s18082_s5 + $0xd4] ss:$8 sps:$4 sm:$0xff]   ;;  %v8866_v30 = vrot.slane %v17032_v61, 5  ;;  %v13629_v36 = vld [vmem:[%s18082_s5 + $0x250] ss:$8 sps:$4 sm:$0xff]  }
 0x4fe   : > { %7622 = vmatpush1.bf16.msra.mxu1 %v13596_v29  ;;  %v17019_v29 = vld [vmem:[#allocation3 + $0x60] sm:$0xff] }
 0x4ff   : > { %7623 = vmatprep.subr.bf16.mxu1 %v13601_v2  ;;  %v17021_v2 = vld [vmem:[#allocation3 + $0x68] sm:$0x11] }
 0x500   : > { %v8862_v8 = vrot.slane %v17021_v2, 5 }
 0x502   : > { %7624 = vmatpush1.bf16.msra.mxu1 %v13599_v57  ;;  %v17046_v22 = vsel %vm14753_vm9, %v11998_v38, %v8862_v8  ;;  %v11999_v57 = vrot.slane %v8822_v47, 9  ;;  %v13611_v47 = vld [vmem:[%s18082_s5 + $0xf0] ss:$8 sps:$4 sm:$0xff]  }
 0x503   : > { %7625 = vmatprep.subr.bf16.mxu1 %v13604_v55  ;;  %v13610_v55 = vld [vmem:[%s18082_s5 + $0xe4] ss:$8 sps:$4 sm:$0xff]  }
 0x506   : > { %7626 = vmatpush1.bf16.msra.mxu1 %v13602_v48  ;;  %v17035_v48 = vld [vmem:[#allocation3 + $0x88] sm:$0x11] }
 0x507   : > { %7627 = vmatprep.subr.bf16.mxu1 %v13607_v12  ;;  %v13608_v12 = vld [vmem:[%s18082_s5 + $0xe0] ss:$8 sps:$4 sm:$0xff]   ;;  %v8870_v38 = vrot.slane %v17035_v48, 5 }
 0x509   : > { %v17068_v8 = vsel %vm14753_vm9, %v12000_v34, %v8870_v38  ;;  %v11729_v34 = vcombine.low %v16933_v43, %v16714_v23  ;;  %v13622_v23 = vld [vmem:[%s18082_s5 + $0x224] ss:$8 sps:$4 sm:$0xff]   ;;  %v13620_v43 = vld [vmem:[%s18082_s5 + $0x220] ss:$8 sps:$4 sm:$0xff]   ;;  %v13623_v38 = vld [vmem:[%s18082_s5 + $0x230] ss:$8 sps:$4 sm:$0xff]  }
 0x50a   : > { %7628 = vmatpush1.bf16.msra.mxu1 %v13605_v10  ;;  %18223 = vst [vmem:[#allocation8_spill] sm:$0xff] %v17068_v8  ;;  %v9962_v10 = vld [vmem:[#allocation3 + $0x50] sm:$0xee] }
 0x50b   : > { %7629 = vmatprep.subr.bf16.mxu1 %v13610_v55  ;;  %v17064_v55 = vsel %vm14753_vm9, %v11999_v57, %v8866_v30  ;;  %v13614_v30 = vld [vmem:[%s18082_s5 + $0x200] ss:$8 sps:$4 sm:$0xff]   ;;  %v13619_v57 = vld [vmem:[%s18082_s5 + $0x214] ss:$8 sps:$4 sm:$0xff]   ;;  %v12220_v59 = vrot.slane %v9962_v10, 9 }
 0x50e   : > { %7630 = vmatpush1.bf16.msra.mxu1 %v13608_v12 }
 0x50f   : > { %7631 = vmatprep.subr.bf16.mxu1 %v13613_v25  ;;  %v13617_v25 = vld [vmem:[%s18082_s5 + $0x210] ss:$8 sps:$4 sm:$0xff]  }
 0x512   : > { %7632 = vmatpush1.bf16.msra.mxu1 %v13611_v47  ;;  %v13628_v47 = vld [vmem:[%s18082_s5 + $0x244] ss:$8 sps:$4 sm:$0xff]  }
 0x513   : > { %7955 = vmatprep.subr.bf16.mxu1 %v13616_v0  ;;  %v9518_v0 = vld [vmem:[#allocation3 + $0x28] sm:$0x11] }
 0x514   : > { %v9985_v12 = vrot.slane %v9518_v0, 5  ;;  %v12221_v0 = vrot.slane %v9963_v24, 9 }
 0x515   : > { %7634 = vmatmul.mubr.bf16.vlgmr.msra.gmra.mrb[40].mxu1 %v11729_v34  ;;  %v7674_v34 = vld [vmem:[#allocation3] sm:$0xee] }
 0x516   : > { %7643 = vmatprep.mubr.bf16.mxu1 %v11732_v35  ;;  %7956 = vmatpush1.bf16.msra.mxu1 %v13614_v30  ;;  %v13625_v35 = vld [vmem:[%s18082_s5 + $0x234] ss:$8 sps:$4 sm:$0xff]  }
 0x517   : > { %7957 = vmatprep.subr.bf16.mxu1 %v13619_v57  ;;  %v9959_v30 = vld [vmem:[#allocation3 + $0x20] sm:$0xee]  ;;  %v7675_v57 = vld [vmem:[#allocation3 + $0x10] sm:$0xee] }
 0x518   : > { %v12217_v44 = vrot.slane %v9959_v30, 9  ;;  %v11770_v15 = vrot.slane %v7675_v57, 9  ;;  %v9964_v30 = vld [vmem:[#allocation3 + $0x70] sm:$0xee] }
 0x519   : > { %v12222_v24 = vrot.slane %v9964_v30, 9 }
 0x51a   : > { %7958 = vmatpush1.bf16.msra.mxu1 %v13617_v25  ;;  %v9960_v25 = vld [vmem:[#allocation3 + $0x30] sm:$0xee]  ;;  %v17158_v18 = vsel %vm14753_vm9, %v11770_v15, %v7704_v13 }
 0x51b   : > { %7959 = vmatprep.subr.bf16.mxu1 %v13622_v23  ;;  %v9961_v23 = vld [vmem:[#allocation3 + $0x40] sm:$0xee]  ;;  %v12218_v58 = vrot.slane %v9960_v25, 9  ;;  %v13632_v13 = vld [vmem:[%s18082_s5 + $0x260] ss:$8 sps:$4 sm:$0xff]  }
 0x51c   : > { %v12219_v4 = vrot.slane %v9961_v23, 9 }
 0x51d   : > { %7644 = vmatmul.mubr.bf16.gmra.mrb[44].mxu1 %v11731_v7  ;;  %v9522_v7 = vld [vmem:[#allocation3 + $0x48] sm:$0x11]  ;;  %v17135_v10 = vsel %vm14753_vm9, %v12218_v58, %v9989_v9 }
 0x51e   : > { %7653 = vmatprep.mubr.bf16.mxu1 %v11734_v63  ;;  %7960 = vmatpush1.bf16.msra.mxu1 %v13620_v43  ;;  %v13631_v63 = vld [vmem:[%s18082_s5 + $0x254] ss:$8 sps:$4 sm:$0xff]   ;;  %v9524_v43 = vld [vmem:[#allocation3 + $0x58] sm:$0x11]  ;;  %v9993_v53 = vrot.slane %v9522_v7, 5 }
 0x51f   : > { %7961 = vmatprep.subr.bf16.mxu1 %v13625_v35  ;;  %v11769_v35 = vrot.slane %v7674_v34, 9  ;;  %v9997_v8 = vrot.slane %v9524_v43, 5  ;;  %v9966_v7 = vld [vmem:[#allocation3 + $0x90] sm:$0xee] }
 0x520   : > { %v17146_v9 = vsel %vm14753_vm9, %v12219_v4, %v9993_v53 }
 0x521   : > { %v17150_v58 = vsel %vm14753_vm9, %v12220_v59, %v9997_v8  ;;  %v17154_v25 = vsel %vm14753_vm9, %v11769_v35, %v7700_v20  ;;  %v17166_v59 = vsel %vm14753_vm9, %v12221_v0, %v10001_v17  ;;  %v13637_v35 = vld [vmem:[%s18082_s5 + $0x274] ss:$8 sps:$4 sm:$0xff]   ;;  %v18226_v0 = vcombine.low %v16782_v62, %v16813_v33  ;;  %v13641_v17 = vld [vmem:[%s18082_s5 + $0x290] ss:$8 sps:$4 sm:$0xff]  }
 0x522   : > { %7962 = vmatpush1.bf16.msra.mxu1 %v13623_v38  ;;  %v18224_v38 = vcombine.low %v16751_v3, %v16768_v11  ;;  %v18225_v3 = vcombine.high %v16782_v62, %v16813_v33  ;;  %v9530_v11 = vld [vmem:[#allocation3 + $0x88] sm:$0x11]  ;;  %v12260_v23 = vcombine.high %v17146_v9, %v17150_v58  ;;  %v12259_v53 = vcombine.low %v17146_v9, %v17150_v58  ;;  %v13638_v62 = vld [vmem:[%s18082_s5 + $0x280] ss:$8 sps:$4 sm:$0xff]  }
 0x523   : > { %7963 = vmatprep.subr.bf16.mxu1 %v13628_v47  ;;  %v17131_v47 = vsel %vm14753_vm9, %v12217_v44, %v9985_v12  ;;  %v9965_v44 = vld [vmem:[#allocation3 + $0x80] sm:$0xee]  ;;  %v9532_v12 = vld [vmem:[#allocation3 + $0x98] sm:$0x11]  ;;  %v10009_v20 = vrot.slane %v9530_v11, 5  ;;  %v13973_v9 = vld [vmem:[%s18083_s6 + $0x20] sm:$0xff]  }
 0x524   : > { %v12257_v34 = vcombine.low %v17131_v47, %v17135_v10  ;;  %v12258_v57 = vcombine.high %v17131_v47, %v17135_v10  ;;  %v10013_v43 = vrot.slane %v9532_v12, 5  ;;  %v13635_v11 = vld [vmem:[%s18082_s5 + $0x270] ss:$8 sps:$4 sm:$0xff]   ;;  %v13643_v33 = vld [vmem:[%s18082_s5 + $0x294] ss:$8 sps:$4 sm:$0xff]   ;;  %v13974_v58 = vld [vmem:[%s18083_s6 + $0x68] sm:$0xff]  }
 0x525   : > { %7654 = vmatmul.mubr.bf16.gmra.mrb[48].mxu1 %v18224_v38  ;;  %v11810_v38 = vcombine.high %v17154_v25, %v17158_v18  ;;  %v13644_v12 = vld [vmem:[%s18082_s5 + $0x2a0] ss:$8 sps:$4 sm:$0xff]   ;;  %v13969_v47 = vld [vmem:[%s18083_s6 + $0x10] sm:$0xff]   ;;  %v13970_v10 = vld [vmem:[%s18083_s6 + $0x58] sm:$0xff]  }
 0x526   : > { %7663 = vmatprep.mubr.bf16.mxu1 %v18225_v3  ;;  %7964 = vmatpush1.bf16.msra.mxu1 %v13626_v32  ;;  %v10005_v32 = vrot.slane %v9528_v1, 5  ;;  %v12223_v1 = vrot.slane %v9965_v44, 9  ;;  %v13646_v44 = vld [vmem:[%s18082_s5 + $0x2a4] ss:$8 sps:$4 sm:$0xff]  }
 0x527   : > { %7965 = vmatprep.subr.bf16.mxu1 %v13631_v63  ;;  %v12224_v63 = vrot.slane %v9966_v7, 9  ;;  %v13652_v7 = vld [vmem:[%s18082_s5 + $0x2c4] ss:$8 sps:$4 sm:$0xff]  }
 0x528   : > { %v17170_v4 = vsel %vm14753_vm9, %v12222_v24, %v10005_v32  ;;  %v17184_v30 = vsel %vm14753_vm9, %v12223_v1, %v10009_v20  ;;  %v13649_v24 = vld [vmem:[%s18082_s5 + $0x2b4] ss:$8 sps:$4 sm:$0xff]   ;;  %v13647_v32 = vld [vmem:[%s18082_s5 + $0x2b0] ss:$8 sps:$4 sm:$0xff]   ;;  %v13650_v1 = vld [vmem:[%s18082_s5 + $0x2c0] ss:$8 sps:$4 sm:$0xff]  }
 0x529   : > { %v12262_v15 = vcombine.high %v17166_v59, %v17170_v4  ;;  %v12261_v8 = vcombine.low %v17166_v59, %v17170_v4  ;;  %v13655_v20 = vld [vmem:[%s18082_s5 + $0x2d4] ss:$8 sps:$4 sm:$0xff]  }
 0x52a   : > { %7966 = vmatpush1.bf16.msra.mxu1 %v13629_v36  ;;  %v17190_v36 = vsel %vm14753_vm9, %v12224_v63, %v10013_v43  ;;  %v13658_v63 = vld [vmem:[%s18082_s5 + $0x2e4] ss:$8 sps:$4 sm:$0xff]   ;;  %v13656_v43 = vld [vmem:[%s18082_s5 + $0x2e0] ss:$8 sps:$4 sm:$0xff]   ;;  %v13976_v59 = vld [vmem:[%s18083_s6 + $0x70] sm:$0xff]  }
 0x52b   : > { %7967 = vmatprep.subr.bf16.mxu1 %v13634_v60  ;;  %v12264_v60 = vcombine.high %v17184_v30, %v17190_v36  ;;  %v12263_v3 = vcombine.low %v17184_v30, %v17190_v36  ;;  %v13977_v4 = vld [vmem:[%s18083_s6 + $0x30] sm:$0xff]  }
 0x52d   : > { %7664 = vmatmul.mubr.bf16.gmra.mrb[52].mxu1 %v18226_v0  ;;  %v13664_v0 = vld [vmem:[%s18082_s5 + $0x304] ss:$8 sps:$4 sm:$0xff]  }
 0x52e   : > { %7968 = vmatpush1.bf16.msra.mxu1 %v13632_v13  ;;  %7987 = vmatprep.mubr.bf16.mxu1 %v11810_v38  ;;  %v13653_v13 = vld [vmem:[%s18082_s5 + $0x2d0] ss:$8 sps:$4 sm:$0xff]  }
 0x52f   : > { %7969 = vmatprep.subr.bf16.mxu1 %v13637_v35  ;;  %v13661_v35 = vld [vmem:[%s18082_s5 + $0x2f4] ss:$8 sps:$4 sm:$0xff]   ;;  %v13659_v38 = vld [vmem:[%s18082_s5 + $0x2f0] ss:$8 sps:$4 sm:$0xff]  }
 0x532   : > { %7970 = vmatpush1.bf16.msra.mxu1 %v13635_v11  ;;  %v13662_v11 = vld [vmem:[%s18082_s5 + $0x300] ss:$8 sps:$4 sm:$0xff]  }
 0x533   : > { %7971 = vmatprep.subr.bf16.mxu1 %v13640_v42  ;;  %v11809_v42 = vcombine.low %v17154_v25, %v17158_v18  ;;  %v13670_v25 = vld [vmem:[%s18082_s5 + $0x324] ss:$8 sps:$4 sm:$0xff]   ;;  %v13668_v18 = vld [vmem:[%s18082_s5 + $0x320] ss:$8 sps:$4 sm:$0xff]  }
 0x536   : > { %7972 = vmatpush1.bf16.msra.mxu1 %v13638_v62  ;;  %v13667_v62 = vld [vmem:[%s18082_s5 + $0x314] ss:$8 sps:$4 sm:$0xff]  }
 0x537   : > { %7973 = vmatprep.subr.bf16.mxu1 %v13643_v33  ;;  %v18227_v33 = vcombine.high %v16881_v6, %v16885_v5 }
 0x53a   : > { %7974 = vmatpush1.bf16.msra.mxu1 %v13641_v17  ;;  %v13665_v17 = vld [vmem:[%s18082_s5 + $0x310] ss:$8 sps:$4 sm:$0xff]  }
 0x53b   : > { %7975 = vmatprep.subr.bf16.mxu1 %v13646_v44  ;;  %v13673_v44 = vld [vmem:[%s18082_s5 + $0x334] ss:$8 sps:$4 sm:$0xff]  }
 0x53e   : > { %7976 = vmatpush1.bf16.msra.mxu1 %v13644_v12  ;;  %v18228_v12 = vcombine.low %v16881_v6, %v16885_v5  ;;  %v13674_v6 = vld [vmem:[%s18082_s5 + $0x340] ss:$8 sps:$4 sm:$0xff]   ;;  %v13679_v5 = vld [vmem:[%s18082_s5 + $0x354] ss:$8 sps:$4 sm:$0xff]  }
 0x53f   : > { %7977 = vmatprep.subr.bf16.mxu1 %v13649_v24  ;;  %v18229_v24 = vcombine.high %v16901_v26, %v16905_v50 }
 0x542   : > { %7978 = vmatpush1.bf16.msra.mxu1 %v13647_v32  ;;  %v13671_v32 = vld [vmem:[%s18082_s5 + $0x330] ss:$8 sps:$4 sm:$0xff]  }
 0x543   : > { %7979 = vmatprep.subr.bf16.mxu1 %v13652_v7  ;;  %v13676_v7 = vld [vmem:[%s18082_s5 + $0x344] ss:$8 sps:$4 sm:$0xff]  }
 0x546   : > { %7980 = vmatpush1.bf16.msra.mxu1 %v13650_v1  ;;  %v18230_v1 = vcombine.low %v16901_v26, %v16905_v50  ;;  %v13680_v26 = vld [vmem:[%s18082_s5 + $0x360] ss:$8 sps:$4 sm:$0xff]  }
 0x547   : > { %7981 = vmatprep.subr.bf16.mxu1 %v13655_v20  ;;  %v18231_v20 = vcombine.high %v16916_v52, %v16920_v19  ;;  %v17309_v50 = vld [vmem:[#allocation3 + $0x10] sm:$0xff] }
 0x54a   : > { %7982 = vmatpush1.bf16.msra.mxu1 %v13653_v13  ;;  %v13677_v13 = vld [vmem:[%s18082_s5 + $0x350] ss:$8 sps:$4 sm:$0xff]  }
 0x54b   : > { %7983 = vmatprep.subr.bf16.mxu1 %v13658_v63  ;;  %v13682_v63 = vld [vmem:[%s18082_s5 + $0x364] ss:$8 sps:$4 sm:$0xff]  }
 0x54e   : > { %7984 = vmatpush1.bf16.msra.mxu1 %v13656_v43  ;;  %v13687_v43 = vld [vmem:[%s18082_s5 + $0x374] ss:$8 sps:$4 sm:$0xff]  }
 0x54f   : > { %7985 = vmatprep.subr.bf16.mxu1 %v13661_v35  ;;  %v11882_v35 = vcombine.high %v17309_v50, %v16947_v16 }
 0x552   : > { %7986 = vmatpush1.bf16.msra.mxu1 %v13659_v38  ;;  %v18232_v38 = vcombine.low %v16916_v52, %v16920_v19  ;;  %v13693_v52 = vld [vmem:[%s18082_s5 + $0x394] ss:$8 sps:$4 sm:$0xff]   ;;  %v13691_v19 = vld [vmem:[%s18082_s5 + $0x390] ss:$8 sps:$4 sm:$0xff]  }
 0x553   : > { %8285 = vmatprep.subr.bf16.mxu1 %v13664_v0  ;;  %v13685_v0 = vld [vmem:[%s18082_s5 + $0x370] ss:$8 sps:$4 sm:$0xff]  }
 0x555   : > { %7988 = vmatmul.mubr.bf16.vlgmr.msra.gmra.mrb[40].mxu1 %v11809_v42  ;;  %v13688_v42 = vld [vmem:[%s18082_s5 + $0x380] ss:$8 sps:$4 sm:$0xff]  }
 0x556   : > { %7997 = vmatprep.mubr.bf16.mxu1 %v18227_v33  ;;  %8286 = vmatpush1.bf16.msra.mxu1 %v13662_v11  ;;  %v13690_v11 = vld [vmem:[%s18082_s5 + $0x384] ss:$8 sps:$4 sm:$0xff]   ;;  %v13694_v33 = vld [vmem:[%s18082_s5 + $0x3a0] ss:$8 sps:$4 sm:$0xff]  }
 0x557   : > { %8287 = vmatprep.subr.bf16.mxu1 %v13667_v62  ;;  %v13696_v62 = vld [vmem:[%s18082_s5 + $0x3a4] ss:$8 sps:$4 sm:$0xff]  }
 0x55a   : > { %8288 = vmatpush1.bf16.msra.mxu1 %v13665_v17  ;;  %v13699_v17 = vld [vmem:[%s18082_s5 + $0x3b4] ss:$8 sps:$4 sm:$0xff]  }
 0x55b   : > { %8289 = vmatprep.subr.bf16.mxu1 %v13670_v25  ;;  %v13697_v25 = vld [vmem:[%s18082_s5 + $0x3b0] ss:$8 sps:$4 sm:$0xff]  }
 0x55d   : > { %7998 = vmatmul.mubr.bf16.gmra.mrb[44].mxu1 %v18228_v12  ;;  %v13705_v12 = vld [vmem:[%s18082_s5 + $0x3d4] ss:$8 sps:$4 sm:$0xff]  }
 0x55e   : > { %8007 = vmatprep.mubr.bf16.mxu1 %v18229_v24  ;;  %8290 = vmatpush1.bf16.msra.mxu1 %v13668_v18  ;;  %v13702_v18 = vld [vmem:[%s18082_s5 + $0x3c4] ss:$8 sps:$4 sm:$0xff]   ;;  %v13703_v24 = vld [vmem:[%s18082_s5 + $0x3d0] ss:$8 sps:$4 sm:$0xff]  }
 0x55f   : > { %8291 = vmatprep.subr.bf16.mxu1 %v13673_v44  ;;  %v13700_v44 = vld [vmem:[%s18082_s5 + $0x3c0] ss:$8 sps:$4 sm:$0xff]  }
 0x562   : > { %8292 = vmatpush1.bf16.msra.mxu1 %v13671_v32  ;;  %v13708_v32 = vld [vmem:[%s18082_s5 + $0x3e4] ss:$8 sps:$4 sm:$0xff]  }
 0x563   : > { %8293 = vmatprep.subr.bf16.mxu1 %v13676_v7  ;;  %v13706_v7 = vld [vmem:[%s18082_s5 + $0x3e0] ss:$8 sps:$4 sm:$0xff]  }
 0x565   : > { %8008 = vmatmul.mubr.bf16.gmra.mrb[48].mxu1 %v18230_v1  ;;  %v13714_v1 = vld [vmem:[%s18082_s5 + $0x404] ss:$8 sps:$4 sm:$0xff]  }
 0x566   : > { %8017 = vmatprep.mubr.bf16.mxu1 %v18231_v20  ;;  %8294 = vmatpush1.bf16.msra.mxu1 %v13674_v6  ;;  %v13711_v6 = vld [vmem:[%s18082_s5 + $0x3f4] ss:$8 sps:$4 sm:$0xff]   ;;  %v13712_v20 = vld [vmem:[%s18082_s5 + $0x400] ss:$8 sps:$4 sm:$0xff]  }
 0x567   : > { %8295 = vmatprep.subr.bf16.mxu1 %v13679_v5  ;;  %v13709_v5 = vld [vmem:[%s18082_s5 + $0x3f0] ss:$8 sps:$4 sm:$0xff]  }
 0x56a   : > { %8296 = vmatpush1.bf16.msra.mxu1 %v13677_v13  ;;  %v11881_v13 = vcombine.low %v17309_v50, %v16947_v16 }
 0x56b   : > { %8297 = vmatprep.subr.bf16.mxu1 %v13682_v63  ;;  %v13718_v63 = vld [vmem:[%s18082_s5 + $0x414] ss:$8 sps:$4 sm:$0xff]  }
 0x56d   : > { %8018 = vmatmul.mubr.bf16.gmra.mrb[52].mxu1 %v18232_v38  ;;  %v8405_v38 = vshrl.u32 %v16947_v16, 16 }
 0x56e   : > { %8298 = vmatpush1.bf16.msra.mxu1 %v13680_v26  ;;  %8317 = vmatprep.mubr.bf16.mxu1 %v11882_v35  ;;  %v11884_v26 = vcombine.high %v16942_v14, %v16985_v28  ;;  %v13722_v35 = vld [vmem:[%s18082_s5 + $0x424] ss:$8 sps:$4 sm:$0xff]  }
 0x56f   : > { %8299 = vmatprep.subr.bf16.mxu1 %v13687_v43  ;;  %v13716_v43 = vld [vmem:[%s18082_s5 + $0x410] ss:$8 sps:$4 sm:$0xff]  }
 0x572   : > { %8300 = vmatpush1.bf16.msra.mxu1 %v13685_v0  ;;  %v8408_v0 = vshll.u32 %v16947_v16, 16 }
 0x573   : > { %8301 = vmatprep.subr.bf16.mxu1 %v13690_v11  ;;  %v13720_v11 = vld [vmem:[%s18082_s5 + $0x420] ss:$8 sps:$4 sm:$0xff]  }
 0x576   : > { %8302 = vmatpush1.bf16.msra.mxu1 %v13688_v42  ;;  %v11883_v42 = vcombine.low %v16942_v14, %v16985_v28 }
 0x577   : > { %8303 = vmatprep.subr.bf16.mxu1 %v13693_v52  ;;  %v13726_v52 = vld [vmem:[%s18082_s5 + $0x434] ss:$8 sps:$4 sm:$0xff]  }
 0x57a   : > { %8304 = vmatpush1.bf16.msra.mxu1 %v13691_v19  ;;  %v8391_v19 = vshrl.u32 %v17309_v50, 16 }
 0x57b   : > { %8305 = vmatprep.subr.bf16.mxu1 %v13696_v62  ;;  %v8394_v62 = vshll.u32 %v17309_v50, 16  ;;  %v17409_v50 = vld [vmem:[#allocation3 + $0x80] sm:$0xff] }
 0x57e   : > { %8306 = vmatpush1.bf16.msra.mxu1 %v13694_v33  ;;  %v11886_v33 = vcombine.high %v16981_v41, %v17019_v29 }
 0x57f   : > { %8307 = vmatprep.subr.bf16.mxu1 %v13699_v17  ;;  %v8407_v17 = vrot.slane %v8405_v38, 4 }
 0x582   : > { %8308 = vmatpush1.bf16.msra.mxu1 %v13697_v25  ;;  %v8410_v25 = vrot.slane %v8408_v0, 5 }
 0x583   : > { %8309 = vmatprep.subr.bf16.mxu1 %v13702_v18  ;;  %v13724_v18 = vld [vmem:[%s18082_s5 + $0x430] ss:$8 sps:$4 sm:$0xff]  }
 0x586   : > { %8310 = vmatpush1.bf16.msra.mxu1 %v13700_v44  ;;  %v13730_v44 = vld [vmem:[%s18082_s5 + $0x444] ss:$8 sps:$4 sm:$0xff]  }
 0x587   : > { %8311 = vmatprep.subr.bf16.mxu1 %v13705_v12  ;;  %v8393_v12 = vrot.slane %v8391_v19, 4  ;;  %v13741_v19 = vld [vmem:[%s18082_s5 + $0x474] ss:$8 sps:$4 sm:$0xff]  }
 0x58a   : > { %8312 = vmatpush1.bf16.msra.mxu1 %v13703_v24  ;;  %v8396_v24 = vrot.slane %v8394_v62, 5 }
 0x58b   : > { %8313 = vmatprep.subr.bf16.mxu1 %v13708_v32  ;;  %v8411_v32 = vor.u32 %v8410_v25, %v8407_v17  ;;  %v13744_v17 = vld [vmem:[%s18082_s5 + $0x484] ss:$8 sps:$4 sm:$0xff]   ;;  %v13742_v25 = vld [vmem:[%s18082_s5 + $0x480] ss:$8 sps:$4 sm:$0xff]  }
 0x58e   : > { %8314 = vmatpush1.bf16.msra.mxu1 %v13706_v7  ;;  %v13728_v7 = vld [vmem:[%s18082_s5 + $0x440] ss:$8 sps:$4 sm:$0xff]  }
 0x58f   : > { %8315 = vmatprep.subr.bf16.mxu1 %v13711_v6  ;;  %v11885_v6 = vcombine.low %v16981_v41, %v17019_v29 }
 0x592   : > { %8316 = vmatpush1.bf16.msra.mxu1 %v13709_v5  ;;  %v13734_v5 = vld [vmem:[%s18082_s5 + $0x454] ss:$8 sps:$4 sm:$0xff]  }
 0x593   : > { %8727 = vmatprep.subr.bf16.mxu1 %v13714_v1  ;;  %v8397_v1 = vor.u32 %v8396_v24, %v8393_v12  ;;  %v13750_v12 = vld [vmem:[%s18082_s5 + $0x4a4] ss:$8 sps:$4 sm:$0xff]   ;;  %v13748_v24 = vld [vmem:[%s18082_s5 + $0x4a0] ss:$8 sps:$4 sm:$0xff]  }
 0x595   : > { %8318 = vmatmul.mubr.bf16.vlgmr.msra.gmra.mrb[40].mxu1 %v11881_v13  ;;  %v11888_v13 = vcombine.high %v17017_v31, %v17409_v50  ;;  %v8398_v38 = vrot.slane %v8397_v1, 4  ;;  %v8436_v1 = vshll.u32 %v16985_v28, 16 }
 0x596   : > { %8327 = vmatprep.mubr.bf16.mxu1 %v11884_v26  ;;  %8728 = vmatpush1.bf16.msra.mxu1 %v13712_v20  ;;  %v8414_v20 = vshll.u32 %v16928_v49, 16  ;;  %v8412_v26 = vrot.slane %v8411_v32, 4  ;;  %v13753_v32 = vld [vmem:[%s18082_s5 + $0x4b4] ss:$8 sps:$4 sm:$0xff]  }
 0x597   : > { %8729 = vmatprep.subr.bf16.mxu1 %v13718_v63  ;;  %v8400_v63 = vshll.u32 %v16922_v27, 16  ;;  %v13736_v27 = vld [vmem:[%s18082_s5 + $0x460] ss:$8 sps:$4 sm:$0xff]  }
 0x598   : > { %v8416_v49 = vrot.slane %v8414_v20, 5  ;;  %v13754_v20 = vld [vmem:[%s18082_s5 + $0x4c0] ss:$8 sps:$4 sm:$0xff]  }
 0x599   : > { %v8402_v0 = vrot.slane %v8400_v63, 5  ;;  %v8422_v63 = vshll.u32 %v16942_v14, 16 }
 0x59a   : > { %8730 = vmatpush1.bf16.msra.mxu1 %v13716_v43  ;;  %v13732_v43 = vld [vmem:[%s18082_s5 + $0x450] ss:$8 sps:$4 sm:$0xff]  }
 0x59b   : > { %8731 = vmatprep.subr.bf16.mxu1 %v13722_v35  ;;  %v13738_v35 = vld [vmem:[%s18082_s5 + $0x464] ss:$8 sps:$4 sm:$0xff]  }
 0x59d   : > { %8328 = vmatmul.mubr.bf16.gmra.mrb[44].mxu1 %v11883_v42  ;;  %v11887_v42 = vcombine.low %v17017_v31, %v17409_v50 }
 0x59e   : > { %8337 = vmatprep.mubr.bf16.mxu1 %v11886_v33  ;;  %8732 = vmatpush1.bf16.msra.mxu1 %v13720_v11  ;;  %v17431_v11 = vsel %vm14405_vm7, %v8412_v26, %v8416_v49  ;;  %v13739_v33 = vld [vmem:[%s18082_s5 + $0x470] ss:$8 sps:$4 sm:$0xff]   ;;  %v13759_v26 = vld [vmem:[%s18082_s5 + $0x4d4] ss:$8 sps:$4 sm:$0xff]  }
 0x59f   : > { %8733 = vmatprep.subr.bf16.mxu1 %v13726_v52  ;;  %v17440_v52 = vsel %vm14405_vm7, %v8398_v38, %v8402_v0  ;;  %v13757_v38 = vld [vmem:[%s18082_s5 + $0x4d0] ss:$8 sps:$4 sm:$0xff]   ;;  %v8424_v0 = vrot.slane %v8422_v63, 5 }
 0x5a0   : > { %v11954_v62 = vcombine.high %v17440_v52, %v17431_v11 }
 0x5a2   : > { %8734 = vmatpush1.bf16.msra.mxu1 %v13724_v18  ;;  %v13747_v18 = vld [vmem:[%s18082_s5 + $0x494] ss:$8 sps:$4 sm:$0xff]  }
 0x5a3   : > { %8735 = vmatprep.subr.bf16.mxu1 %v13730_v44  ;;  %v13745_v44 = vld [vmem:[%s18082_s5 + $0x490] ss:$8 sps:$4 sm:$0xff]  }
 0x5a5   : > { %8338 = vmatmul.mubr.bf16.gmra.mrb[48].mxu1 %v11885_v6  ;;  %v13756_v6 = vld [vmem:[%s18082_s5 + $0x4c4] ss:$8 sps:$4 sm:$0xff]  }
 0x5a6   : > { %8347 = vmatprep.mubr.bf16.mxu1 %v11888_v13  ;;  %8736 = vmatpush1.bf16.msra.mxu1 %v13728_v7  ;;  %v13751_v7 = vld [vmem:[%s18082_s5 + $0x4b0] ss:$8 sps:$4 sm:$0xff]   ;;  %v8419_v13 = vshrl.u32 %v16942_v14, 16 }
 0x5a7   : > { %8737 = vmatprep.subr.bf16.mxu1 %v13734_v5  ;;  %v8433_v5 = vshrl.u32 %v16985_v28, 16 }
 0x5a8   : > { %v8421_v49 = vrot.slane %v8419_v13, 4 }
 0x5aa   : > { %8738 = vmatpush1.bf16.msra.mxu1 %v13732_v43  ;;  %v8435_v43 = vrot.slane %v8433_v5, 4  ;;  %v13763_v5 = vld [vmem:[%s18082_s5 + $0x4f0] ss:$8 sps:$4 sm:$0xff]  }
 0x5ab   : > { %8739 = vmatprep.subr.bf16.mxu1 %v13738_v35  ;;  %v8438_v35 = vrot.slane %v8436_v1, 5 }
 0x5ad   : > { %8348 = vmatmul.mubr.bf16.gmra.mrb[52].mxu1 %v11887_v42  ;;  %v8439_v42 = vor.u32 %v8438_v35, %v8435_v43  ;;  %v8489_v35 = vshrl.u32 %v17409_v50, 16 }
 0x5ae   : > { %8740 = vmatpush1.bf16.msra.mxu1 %v13736_v27  ;;  %8759 = vmatprep.mubr.bf16.mxu1 %v11954_v62  ;;  %v13762_v27 = vld [vmem:[%s18082_s5 + $0x4e4] ss:$8 sps:$4 sm:$0xff]   ;;  %v8464_v62 = vshll.u32 %v17019_v29, 16 }
 0x5af   : > { %8741 = vmatprep.subr.bf16.mxu1 %v13741_v19  ;;  %v8461_v19 = vshrl.u32 %v17019_v29, 16 }
 0x5b2   : > { %8742 = vmatpush1.bf16.msra.mxu1 %v13739_v33  ;;  %v13760_v33 = vld [vmem:[%s18082_s5 + $0x4e0] ss:$8 sps:$4 sm:$0xff]  }
 0x5b3   : > { %8743 = vmatprep.subr.bf16.mxu1 %v13744_v17  ;;  %v8425_v17 = vor.u32 %v8424_v0, %v8421_v49  ;;  %v11953_v49 = vcombine.low %v17440_v52, %v17431_v11  ;;  %v13766_v0 = vld [vmem:[%s18082_s5 + $0x500] ss:$8 sps:$4 sm:$0xff]   ;;  %v8478_v11 = vshll.u32 %v17017_v31, 16 }
 0x5b5   : > { %v8426_v1 = vrot.slane %v8425_v17, 4  ;;  %v8456_v17 = vshll.u32 %v17010_v21, 16 }
 0x5b6   : > { %8744 = vmatpush1.bf16.msra.mxu1 %v13742_v25  ;;  %v13765_v25 = vld [vmem:[%s18082_s5 + $0x4f4] ss:$8 sps:$4 sm:$0xff]  }
 0x5b7   : > { %8745 = vmatprep.subr.bf16.mxu1 %v13747_v18  ;;  %v8442_v18 = vshll.u32 %v16971_v51, 16  ;;  %v13768_v51 = vld [vmem:[%s18082_s5 + $0x504] ss:$8 sps:$4 sm:$0xff]  }
 0x5ba   : > { %8746 = vmatpush1.bf16.msra.mxu1 %v13745_v44  ;;  %v8447_v44 = vshrl.u32 %v16981_v41, 16 }
 0x5bb   : > { %8747 = vmatprep.subr.bf16.mxu1 %v13750_v12  ;;  %v8450_v12 = vshll.u32 %v16981_v41, 16 }
 0x5bc   : > { %v8449_v13 = vrot.slane %v8447_v44, 4 }
 0x5bd   : > { %v8452_v63 = vrot.slane %v8450_v12, 5  ;;  %v13769_v12 = vld [vmem:[%s18082_s5 + $0x510] ss:$8 sps:$4 sm:$0xff]  }
 0x5be   : > { %8748 = vmatpush1.bf16.msra.mxu1 %v13748_v24  ;;  %v8428_v24 = vshll.u32 %v16969_v54, 16 }
 0x5bf   : > { %8749 = vmatprep.subr.bf16.mxu1 %v13753_v32  ;;  %v8440_v32 = vrot.slane %v8439_v42, 4  ;;  %v13771_v42 = vld [vmem:[%s18082_s5 + $0x514] ss:$8 sps:$4 sm:$0xff]  }
 0x5c2   : > { %8750 = vmatpush1.bf16.msra.mxu1 %v13751_v7  ;;  %v8463_v7 = vrot.slane %v8461_v19, 4  ;;  %v8453_v19 = vor.u32 %v8452_v63, %v8449_v13  ;;  %v13777_v63 = vld [vmem:[%s18082_s5 + $0x534] ss:$8 sps:$4 sm:$0xff]  }
 0x5c3   : > { %8751 = vmatprep.subr.bf16.mxu1 %v13756_v6  ;;  %v8466_v6 = vrot.slane %v8464_v62, 5  ;;  %v8470_v62 = vshll.u32 %v17021_v2, 16  ;;  %v13774_v2 = vld [vmem:[%s18082_s5 + $0x524] ss:$8 sps:$4 sm:$0xff]  }
 0x5c5   : > { %v8467_v43 = vor.u32 %v8466_v6, %v8463_v7  ;;  %v8480_v6 = vrot.slane %v8478_v11, 5  ;;  %v13783_v11 = vld [vmem:[%s18082_s5 + $0x554] ss:$8 sps:$4 sm:$0xff]  }
 0x5c6   : > { %8752 = vmatpush1.bf16.msra.mxu1 %v13754_v20  ;;  %v8444_v20 = vrot.slane %v8442_v18, 5  ;;  %v8491_v18 = vrot.slane %v8489_v35, 4 }
 0x5c7   : > { %8753 = vmatprep.subr.bf16.mxu1 %v13759_v26  ;;  %v8430_v26 = vrot.slane %v8428_v24, 5  ;;  %v8454_v24 = vrot.slane %v8453_v19, 4 }
 0x5c8   : > { %v8445_v54 = vsel %vm14405_vm7, %v8440_v32, %v8444_v20  ;;  %v8472_v32 = vrot.slane %v8470_v62, 5 }
 0x5ca   : > { %8754 = vmatpush1.bf16.msra.mxu1 %v13757_v38  ;;  %v8492_v38 = vshll.u32 %v17409_v50, 16 }
 0x5cb   : > { %8755 = vmatprep.subr.bf16.mxu1 %v13762_v27  ;;  %v8431_v27 = vsel %vm14405_vm7, %v8426_v1, %v8430_v26 }
 0x5cc   : > { %v11956_v52 = vcombine.high %v8431_v27, %v8445_v54  ;;  %v8494_v44 = vrot.slane %v8492_v38, 5  ;;  %v11955_v20 = vcombine.low %v8431_v27, %v8445_v54  ;;  %v8484_v38 = vshll.u32 %v17032_v61, 16  ;;  %v13775_v54 = vld [vmem:[%s18082_s5 + $0x530] ss:$8 sps:$4 sm:$0xff]   ;;  %v13778_v61 = vld [vmem:[%s18082_s5 + $0x540] ss:$8 sps:$4 sm:$0xff]  }
 0x5ce   : > { %8756 = vmatpush1.bf16.msra.mxu1 %v13760_v33  ;;  %v8475_v33 = vshrl.u32 %v17017_v31, 16  ;;  %v8495_v1 = vor.u32 %v8494_v44, %v8491_v18  ;;  %v8486_v19 = vrot.slane %v8484_v38, 5  ;;  %v13784_v18 = vld [vmem:[%s18082_s5 + $0x560] ss:$8 sps:$4 sm:$0xff]  }
 0x5cf   : > { %8757 = vmatprep.subr.bf16.mxu1 %v13765_v25  ;;  %v8468_v25 = vrot.slane %v8467_v43, 4  ;;  %v8498_v43 = vshll.u32 %v17035_v48, 16  ;;  %v13808_v38 = vld [vmem:[%s18082_s5 + $0x5e0] ss:$8 sps:$4 sm:$0xff]  }
 0x5d0   : > { %v8477_v7 = vrot.slane %v8475_v33, 4 }
 0x5d1   : > { %v8473_v21 = vsel %vm14405_vm7, %v8468_v25, %v8472_v32  ;;  %v13786_v25 = vld [vmem:[%s18082_s5 + $0x564] ss:$8 sps:$4 sm:$0xff]  }
 0x5d2   : > { %8758 = vmatpush1.bf16.msra.mxu1 %v13763_v5  ;;  %v8458_v5 = vrot.slane %v8456_v17, 5  ;;  %v8481_v26 = vor.u32 %v8480_v6, %v8477_v7  ;;  %v13781_v17 = vld [vmem:[%s18082_s5 + $0x550] ss:$8 sps:$4 sm:$0xff]   ;;  %v13792_v32 = vld [vmem:[%s18082_s5 + $0x584] ss:$8 sps:$4 sm:$0xff]  }
 0x5d3   : > { %9097 = vmatprep.subr.bf16.mxu1 %v13768_v51  ;;  %v13772_v51 = vld [vmem:[%s18082_s5 + $0x520] ss:$8 sps:$4 sm:$0xff]   ;;  %v13795_v6 = vld [vmem:[%s18082_s5 + $0x594] ss:$8 sps:$4 sm:$0xff]  }
 0x5d4   : > { %v8459_v13 = vsel %vm14405_vm7, %v8454_v24, %v8458_v5  ;;  %v8482_v27 = vrot.slane %v8481_v26, 4  ;;  %v13787_v24 = vld [vmem:[%s18082_s5 + $0x570] ss:$8 sps:$4 sm:$0xff]   ;;  %v13790_v7 = vld [vmem:[%s18082_s5 + $0x580] ss:$8 sps:$4 sm:$0xff]  }
 0x5d5   : > { %8760 = vmatmul.mubr.bf16.vlgmr.msra.gmra.mrb[40].mxu1 %v11953_v49  ;;  %v11958_v35 = vcombine.high %v8459_v13, %v8473_v21  ;;  %v8496_v49 = vrot.slane %v8495_v1, 4  ;;  %v11957_v62 = vcombine.low %v8459_v13, %v8473_v21  ;;  %v13793_v5 = vld [vmem:[%s18082_s5 + $0x590] ss:$8 sps:$4 sm:$0xff]   ;;  %v13798_v21 = vld [vmem:[%s18082_s5 + $0x5a4] ss:$8 sps:$4 sm:$0xff]  }
 0x5d6   : > { %8769 = vmatprep.mubr.bf16.mxu1 %v11956_v52  ;;  %9098 = vmatpush1.bf16.msra.mxu1 %v13766_v0  ;;  %v13780_v0 = vld [vmem:[%s18082_s5 + $0x544] ss:$8 sps:$4 sm:$0xff]   ;;  %v8487_v33 = vsel %vm14405_vm7, %v8482_v27, %v8486_v19  ;;  %v13796_v1 = vld [vmem:[%s18082_s5 + $0x5a0] ss:$8 sps:$4 sm:$0xff]   ;;  %v13807_v26 = vld [vmem:[%s18082_s5 + $0x5d4] ss:$8 sps:$4 sm:$0xff]   ;;  %v18234_v19 = vcombine.low %v16957_v39, %v16951_v45 }
 0x5d7   : > { %9099 = vmatprep.subr.bf16.mxu1 %v13771_v42  ;;  %v8500_v42 = vrot.slane %v8498_v43, 5  ;;  %v13804_v13 = vld [vmem:[%s18082_s5 + $0x5c4] ss:$8 sps:$4 sm:$0xff]   ;;  %v13805_v43 = vld [vmem:[%s18082_s5 + $0x5d0] ss:$8 sps:$4 sm:$0xff]  }
 0x5d8   : > { %v13814_v27 = vld [vmem:[%s18082_s5 + $0x600] ss:$8 sps:$4 sm:$0xff]  }
 0x5d9   : > { %v8501_v48 = vsel %vm14405_vm7, %v8496_v49, %v8500_v42  ;;  %v13813_v49 = vld [vmem:[%s18082_s5 + $0x5f4] ss:$8 sps:$4 sm:$0xff]  }
 0x5da   : > { %9100 = vmatpush1.bf16.msra.mxu1 %v13769_v12  ;;  %v11960_v52 = vcombine.high %v8487_v33, %v8501_v48  ;;  %v11959_v44 = vcombine.low %v8487_v33, %v8501_v48  ;;  %v13789_v12 = vld [vmem:[%s18082_s5 + $0x574] ss:$8 sps:$4 sm:$0xff]   ;;  %v18235_v48 = vcombine.high %v17001_v56, %v16992_v37  ;;  %v18236_v33 = vcombine.low %v17001_v56, %v16992_v37  ;;  %v13826_v37 = vld [vmem:[%s18082_s5 + $0x640] ss:$8 sps:$4 sm:$0xff]  }
 0x5db   : > { %9101 = vmatprep.subr.bf16.mxu1 %v13774_v2  ;;  %v18233_v2 = vcombine.high %v16957_v39, %v16951_v45  ;;  %v13819_v42 = vld [vmem:[%s18082_s5 + $0x614] ss:$8 sps:$4 sm:$0xff]   ;;  %v13820_v45 = vld [vmem:[%s18082_s5 + $0x620] ss:$8 sps:$4 sm:$0xff]  }
 0x5dc   : > { %v13825_v39 = vld [vmem:[%s18082_s5 + $0x634] ss:$8 sps:$4 sm:$0xff]  }
 0x5dd   : > { %8770 = vmatmul.mubr.bf16.gmra.mrb[44].mxu1 %v11955_v20  ;;  %v13799_v20 = vld [vmem:[%s18082_s5 + $0x5b0] ss:$8 sps:$4 sm:$0xff]   ;;  %v13831_v56 = vld [vmem:[%s18082_s5 + $0x654] ss:$8 sps:$4 sm:$0xff]  }
 0x5de   : > { %8779 = vmatprep.mubr.bf16.mxu1 %v11958_v35  ;;  %9102 = vmatpush1.bf16.msra.mxu1 %v13772_v51  ;;  %v13801_v51 = vld [vmem:[%s18082_s5 + $0x5b4] ss:$8 sps:$4 sm:$0xff]   ;;  %v13810_v35 = vld [vmem:[%s18082_s5 + $0x5e4] ss:$8 sps:$4 sm:$0xff]  }
 0x5df   : > { %9103 = vmatprep.subr.bf16.mxu1 %v13777_v63  ;;  %v13802_v63 = vld [vmem:[%s18082_s5 + $0x5c0] ss:$8 sps:$4 sm:$0xff]  }
 0x5e2   : > { %9104 = vmatpush1.bf16.msra.mxu1 %v13775_v54  ;;  %v13811_v54 = vld [vmem:[%s18082_s5 + $0x5f0] ss:$8 sps:$4 sm:$0xff]  }
 0x5e3   : > { %9105 = vmatprep.subr.bf16.mxu1 %v13780_v0  ;;  %v13816_v0 = vld [vmem:[%s18082_s5 + $0x604] ss:$8 sps:$4 sm:$0xff]  }
 0x5e5   : > { %8780 = vmatmul.mubr.bf16.gmra.mrb[48].mxu1 %v11957_v62  ;;  %v13822_v62 = vld [vmem:[%s18082_s5 + $0x624] ss:$8 sps:$4 sm:$0xff]  }
 0x5e6   : > { %8789 = vmatprep.mubr.bf16.mxu1 %v11960_v52  ;;  %9106 = vmatpush1.bf16.msra.mxu1 %v13778_v61  ;;  %v13817_v61 = vld [vmem:[%s18082_s5 + $0x610] ss:$8 sps:$4 sm:$0xff]  }
 0x5e7   : > { %9107 = vmatprep.subr.bf16.mxu1 %v13783_v11  ;;  %v18237_v11 = vcombine.high %v17039_v40, %v17046_v22  ;;  %v13823_v52 = vld [vmem:[%s18082_s5 + $0x630] ss:$8 sps:$4 sm:$0xff]  }
 0x5ea   : > { %9108 = vmatpush1.bf16.msra.mxu1 %v13781_v17  ;;  %v13828_v17 = vld [vmem:[%s18082_s5 + $0x644] ss:$8 sps:$4 sm:$0xff]  }
 0x5eb   : > { %9109 = vmatprep.subr.bf16.mxu1 %v13786_v25  ;;  %v18238_v25 = vcombine.low %v17039_v40, %v17046_v22  ;;  %v13832_v40 = vld [vmem:[%s18082_s5 + $0x660] ss:$8 sps:$4 sm:$0xff]   ;;  %v13839_v22 = vld [vmem:[%s18082_s5 + $0x674] ss:$8 sps:$4 sm:$0xff]  }
 0x5ed   : > { %8790 = vmatmul.mubr.bf16.gmra.mrb[52].mxu1 %v11959_v44 }
 0x5ee   : > { %9110 = vmatpush1.bf16.msra.mxu1 %v13784_v18  ;;  %9129 = vmatprep.mubr.bf16.mxu1 %v18233_v2  ;;  %v18239_v18 = vld [vmem:[#allocation8_spill] sm:$0xff]  ;;  %v13834_v2 = vld [vmem:[%s18082_s5 + $0x664] ss:$8 sps:$4 sm:$0xff]  }
 0x5ef   : > { %9111 = vmatprep.subr.bf16.mxu1 %v13789_v12  ;;  %v18240_v44 = vcombine.high %v17064_v55, %v18239_v18  ;;  %v13829_v12 = vld [vmem:[%s18082_s5 + $0x650] ss:$8 sps:$4 sm:$0xff]  }
 0x5f2   : > { %9112 = vmatpush1.bf16.msra.mxu1 %v13787_v24  ;;  %v18241_v24 = vcombine.low %v17064_v55, %v18239_v18  ;;  %v13840_v55 = vld [vmem:[%s18082_s5 + $0x680] ss:$8 sps:$4 sm:$0xff]  }
 0x5f3   : > { %9113 = vmatprep.subr.bf16.mxu1 %v13792_v32  ;;  %v18242_v32 = vcombine.high %v16947_v16, %v16942_v14 }
 0x5f6   : > { %9114 = vmatpush1.bf16.msra.mxu1 %v13790_v7  ;;  %v13837_v7 = vld [vmem:[%s18082_s5 + $0x670] ss:$8 sps:$4 sm:$0xff]  }
 0x5f7   : > { %9115 = vmatprep.subr.bf16.mxu1 %v13795_v6  ;;  %v13842_v6 = vld [vmem:[%s18082_s5 + $0x684] ss:$8 sps:$4 sm:$0xff]  }
 0x5fa   : > { %9116 = vmatpush1.bf16.msra.mxu1 %v13793_v5  ;;  %v13845_v5 = vld [vmem:[%s18082_s5 + $0x694] ss:$8 sps:$4 sm:$0xff]  }
 0x5fb   : > { %9117 = vmatprep.subr.bf16.mxu1 %v13798_v21  ;;  %v13843_v21 = vld [vmem:[%s18082_s5 + $0x690] ss:$8 sps:$4 sm:$0xff]  }
 0x5fe   : > { %9118 = vmatpush1.bf16.msra.mxu1 %v13796_v1  ;;  %v13848_v1 = vld [vmem:[%s18082_s5 + $0x6a4] ss:$8 sps:$4 sm:$0xff]  }
 0x5ff   : > { %9119 = vmatprep.subr.bf16.mxu1 %v13801_v51  ;;  %v13846_v51 = vld [vmem:[%s18082_s5 + $0x6a0] ss:$8 sps:$4 sm:$0xff]  }
 0x602   : > { %9120 = vmatpush1.bf16.msra.mxu1 %v13799_v20  ;;  %v13851_v20 = vld [vmem:[%s18082_s5 + $0x6b4] ss:$8 sps:$4 sm:$0xff]  }
 0x603   : > { %9121 = vmatprep.subr.bf16.mxu1 %v13804_v13  ;;  %v13849_v13 = vld [vmem:[%s18082_s5 + $0x6b0] ss:$8 sps:$4 sm:$0xff]  }
 0x606   : > { %9122 = vmatpush1.bf16.msra.mxu1 %v13802_v63  ;;  %v13854_v63 = vld [vmem:[%s18082_s5 + $0x6c4] ss:$8 sps:$4 sm:$0xff]  }
 0x607   : > { %9123 = vmatprep.subr.bf16.mxu1 %v13807_v26  ;;  %v13852_v26 = vld [vmem:[%s18082_s5 + $0x6c0] ss:$8 sps:$4 sm:$0xff]  }
 0x60a   : > { %9124 = vmatpush1.bf16.msra.mxu1 %v13805_v43  ;;  %v13857_v43 = vld [vmem:[%s18082_s5 + $0x6d4] ss:$8 sps:$4 sm:$0xff]  }
 0x60b   : > { %9125 = vmatprep.subr.bf16.mxu1 %v13810_v35  ;;  %v13855_v35 = vld [vmem:[%s18082_s5 + $0x6d0] ss:$8 sps:$4 sm:$0xff]  }
 0x60e   : > { %9126 = vmatpush1.bf16.msra.mxu1 %v13808_v38  ;;  %v13860_v38 = vld [vmem:[%s18082_s5 + $0x6e4] ss:$8 sps:$4 sm:$0xff]  }
 0x60f   : > { %9127 = vmatprep.subr.bf16.mxu1 %v13813_v49  ;;  %v13858_v49 = vld [vmem:[%s18082_s5 + $0x6e0] ss:$8 sps:$4 sm:$0xff]  }
 0x612   : > { %9128 = vmatpush1.bf16.msra.mxu1 %v13811_v54  ;;  %v13863_v54 = vld [vmem:[%s18082_s5 + $0x6f4] ss:$8 sps:$4 sm:$0xff]  }
 0x613   : > { %9428 = vmatprep.subr.bf16.mxu1 %v13816_v0  ;;  %v13861_v0 = vld [vmem:[%s18082_s5 + $0x6f0] ss:$8 sps:$4 sm:$0xff]  }
 0x615   : > { %9130 = vmatmul.mubr.bf16.vlgmr.msra.gmra.mrb[40].mxu1 %v18234_v19  ;;  %v13870_v19 = vld [vmem:[%s18082_s5 + $0x714] ss:$8 sps:$4 sm:$0xff]  }
 0x616   : > { %9139 = vmatprep.mubr.bf16.mxu1 %v18235_v48  ;;  %9429 = vmatpush1.bf16.msra.mxu1 %v13814_v27  ;;  %v13866_v27 = vld [vmem:[%s18082_s5 + $0x704] ss:$8 sps:$4 sm:$0xff]   ;;  %v18243_v48 = vcombine.low %v16947_v16, %v16942_v14  ;;  %v13872_v14 = vld [vmem:[%s18082_s5 + $0x720] ss:$8 sps:$4 sm:$0xff]   ;;  %v13878_v16 = vld [vmem:[%s18082_s5 + $0x734] ss:$8 sps:$4 sm:$0xff]  }
 0x617   : > { %9430 = vmatprep.subr.bf16.mxu1 %v13819_v42  ;;  %v13864_v42 = vld [vmem:[%s18082_s5 + $0x700] ss:$8 sps:$4 sm:$0xff]  }
 0x61a   : > { %9431 = vmatpush1.bf16.msra.mxu1 %v13817_v61  ;;  %v18244_v61 = vcombine.high %v16985_v28, %v16981_v41 }
 0x61b   : > { %9432 = vmatprep.subr.bf16.mxu1 %v13822_v62  ;;  %v13868_v62 = vld [vmem:[%s18082_s5 + $0x710] ss:$8 sps:$4 sm:$0xff]  }
 0x61d   : > { %9140 = vmatmul.mubr.bf16.gmra.mrb[44].mxu1 %v18236_v33  ;;  %v9517_v33 = vld [vmem:[#allocation3 + $0x20] sm:$0xff] }
 0x61e   : > { %9149 = vmatprep.mubr.bf16.mxu1 %v18237_v11  ;;  %9433 = vmatpush1.bf16.msra.mxu1 %v13820_v45  ;;  %v9519_v45 = vld [vmem:[#allocation3 + $0x30] sm:$0xff] }
 0x61f   : > { %9434 = vmatprep.subr.bf16.mxu1 %v13825_v39  ;;  %v13874_v39 = vld [vmem:[%s18082_s5 + $0x724] ss:$8 sps:$4 sm:$0xff]   ;;  %v9548_v11 = vshrl.u32 %v9519_v45, 16 }
 0x622   : > { %9435 = vmatpush1.bf16.msra.mxu1 %v13823_v52  ;;  %v9551_v52 = vshll.u32 %v9519_v45, 16  ;;  %v13903_v45 = vld [vmem:[%s18082_s5 + $0x7b4] ss:$8 sps:$4 sm:$0xff]  }
 0x623   : > { %9436 = vmatprep.subr.bf16.mxu1 %v13828_v17  ;;  %v9534_v17 = vshrl.u32 %v9517_v33, 16 }
 0x624   : > { %v9553_v18 = vrot.slane %v9551_v52, 5  ;;  %v9521_v52 = vld [vmem:[#allocation3 + $0x40] sm:$0xff] }
 0x625   : > { %9150 = vmatmul.mubr.bf16.gmra.mrb[48].mxu1 %v18238_v25  ;;  %v9550_v25 = vrot.slane %v9548_v11, 4  ;;  %v13906_v11 = vld [vmem:[%s18082_s5 + $0x7c4] ss:$8 sps:$4 sm:$0xff]  }
 0x626   : > { %9159 = vmatprep.mubr.bf16.mxu1 %v18240_v44  ;;  %9437 = vmatpush1.bf16.msra.mxu1 %v13826_v37  ;;  %v9537_v37 = vshll.u32 %v9517_v33, 16  ;;  %v18246_v44 = vcombine.high %v17019_v29, %v17017_v31  ;;  %v13901_v33 = vld [vmem:[%s18082_s5 + $0x7b0] ss:$8 sps:$4 sm:$0xff]  }
 0x627   : > { %9438 = vmatprep.subr.bf16.mxu1 %v13831_v56  ;;  %v18245_v56 = vcombine.low %v16985_v28, %v16981_v41  ;;  %v9554_v41 = vor.u32 %v9553_v18, %v9550_v25  ;;  %v13880_v28 = vld [vmem:[%s18082_s5 + $0x740] ss:$8 sps:$4 sm:$0xff]   ;;  %v9565_v25 = vshll.u32 %v9521_v52, 16 }
 0x62a   : > { %9439 = vmatpush1.bf16.msra.mxu1 %v13829_v12  ;;  %v13876_v12 = vld [vmem:[%s18082_s5 + $0x730] ss:$8 sps:$4 sm:$0xff]  }
 0x62b   : > { %9440 = vmatprep.subr.bf16.mxu1 %v13834_v2  ;;  %v13882_v2 = vld [vmem:[%s18082_s5 + $0x744] ss:$8 sps:$4 sm:$0xff]  }
 0x62d   : > { %9160 = vmatmul.mubr.bf16.gmra.mrb[52].mxu1 %v18241_v24  ;;  %v13885_v24 = vld [vmem:[%s18082_s5 + $0x754] ss:$8 sps:$4 sm:$0xff]  }
 0x62e   : > { %9441 = vmatpush1.bf16.msra.mxu1 %v13832_v40  ;;  %9460 = vmatprep.mubr.bf16.mxu1 %v18242_v32  ;;  %v9536_v40 = vrot.slane %v9534_v17, 4  ;;  %v13904_v17 = vld [vmem:[%s18082_s5 + $0x7c0] ss:$8 sps:$4 sm:$0xff]  }
 0x62f   : > { %9442 = vmatprep.subr.bf16.mxu1 %v13839_v22  ;;  %v9539_v22 = vrot.slane %v9537_v37, 5  ;;  %v13909_v37 = vld [vmem:[%s18082_s5 + $0x7d4] ss:$8 sps:$4 sm:$0xff]  }
 0x631   : > { %v9540_v32 = vor.u32 %v9539_v22, %v9536_v40  ;;  %v13912_v40 = vld [vmem:[%s18082_s5 + $0x7e4] ss:$8 sps:$4 sm:$0xff]  }
 0x632   : > { %9443 = vmatpush1.bf16.msra.mxu1 %v13837_v7  ;;  %v14022_v7 = vld [vmem:[#allocation3 + $0x38] sm:$0x11] }
 0x633   : > { %9444 = vmatprep.subr.bf16.mxu1 %v13842_v6  ;;  %v9557_v6 = vshll.u32 %v14022_v7, 16 }
 0x636   : > { %9445 = vmatpush1.bf16.msra.mxu1 %v13840_v55  ;;  %v17794_v55 = vld [vmem:[#allocation2] sm:$0xff] }
 0x637   : > { %9446 = vmatprep.subr.bf16.mxu1 %v13845_v5  ;;  %v12112_v5 = vcombine.high %v17409_v50, %v17794_v55 }
 0x63a   : > { %9447 = vmatpush1.bf16.msra.mxu1 %v13843_v21  ;;  %v18247_v21 = vcombine.low %v17019_v29, %v17017_v31  ;;  %v13886_v29 = vld [vmem:[%s18082_s5 + $0x760] ss:$8 sps:$4 sm:$0xff]  }
 0x63b   : > { %9448 = vmatprep.subr.bf16.mxu1 %v13848_v1  ;;  %v14024_v1 = vld [vmem:[#allocation3 + $0x28] sm:$0x11] }
 0x63e   : > { %9449 = vmatpush1.bf16.msra.mxu1 %v13846_v51  ;;  %v9543_v51 = vshll.u32 %v14024_v1, 16  ;;  %v13915_v1 = vld [vmem:[%s18082_s5 + $0x7f4] ss:$8 sps:$4 sm:$0xff]  }
 0x63f   : > { %9450 = vmatprep.subr.bf16.mxu1 %v13851_v20  ;;  %v9555_v20 = vrot.slane %v9554_v41, 4  ;;  %v9567_v41 = vrot.slane %v9565_v25, 5 }
 0x642   : > { %9451 = vmatpush1.bf16.msra.mxu1 %v13849_v13  ;;  %v13883_v13 = vld [vmem:[%s18082_s5 + $0x750] ss:$8 sps:$4 sm:$0xff]  }
 0x643   : > { %9452 = vmatprep.subr.bf16.mxu1 %v13854_v63  ;;  %v13888_v63 = vld [vmem:[%s18082_s5 + $0x764] ss:$8 sps:$4 sm:$0xff]  }
 0x646   : > { %9453 = vmatpush1.bf16.msra.mxu1 %v13852_v26  ;;  %v9541_v26 = vrot.slane %v9540_v32, 4 }
 0x647   : > { %9454 = vmatprep.subr.bf16.mxu1 %v13857_v43  ;;  %v9559_v43 = vrot.slane %v9557_v6, 5  ;;  %v13910_v6 = vld [vmem:[%s18082_s5 + $0x7e0] ss:$8 sps:$4 sm:$0xff]  }
 0x649   : > { %v17809_v31 = vsel %vm14405_vm7, %v9555_v20, %v9559_v43 }
 0x64a   : > { %9455 = vmatpush1.bf16.msra.mxu1 %v13855_v35  ;;  %v9545_v35 = vrot.slane %v9543_v51, 5 }
 0x64b   : > { %9456 = vmatprep.subr.bf16.mxu1 %v13860_v38  ;;  %v12111_v38 = vcombine.low %v17409_v50, %v17794_v55  ;;  %v13894_v50 = vld [vmem:[%s18082_s5 + $0x784] ss:$8 sps:$4 sm:$0xff]  }
 0x64e   : > { %9457 = vmatpush1.bf16.msra.mxu1 %v13858_v49  ;;  %v17818_v49 = vsel %vm14405_vm7, %v9541_v26, %v9545_v35 }
 0x64f   : > { %9458 = vmatprep.subr.bf16.mxu1 %v13863_v54  ;;  %v13891_v54 = vld [vmem:[%s18082_s5 + $0x774] ss:$8 sps:$4 sm:$0xff]  }
 0x652   : > { %9459 = vmatpush1.bf16.msra.mxu1 %v13861_v0  ;;  %v12178_v0 = vcombine.high %v17818_v49, %v17809_v31 }
 0x653   : > { %9870 = vmatprep.subr.bf16.mxu1 %v13866_v27  ;;  %v13889_v27 = vld [vmem:[%s18082_s5 + $0x770] ss:$8 sps:$4 sm:$0xff]  }
 0x655   : > { %9461 = vmatmul.mubr.bf16.vlgmr.msra.gmra.mrb[40].mxu1 %v18243_v48  ;;  %v13895_v48 = vld [vmem:[%s18082_s5 + $0x790] ss:$8 sps:$4 sm:$0xff]  }
 0x656   : > { %9470 = vmatprep.mubr.bf16.mxu1 %v18244_v61  ;;  %9871 = vmatpush1.bf16.msra.mxu1 %v13864_v42  ;;  %v13892_v42 = vld [vmem:[%s18082_s5 + $0x780] ss:$8 sps:$4 sm:$0xff]   ;;  %v13900_v61 = vld [vmem:[%s18082_s5 + $0x7a4] ss:$8 sps:$4 sm:$0xff]  }
 0x657   : > { %9872 = vmatprep.subr.bf16.mxu1 %v13870_v19  ;;  %v13897_v19 = vld [vmem:[%s18082_s5 + $0x794] ss:$8 sps:$4 sm:$0xff]  }
 0x65a   : > { %9873 = vmatpush1.bf16.msra.mxu1 %v13868_v62  ;;  %v13898_v62 = vld [vmem:[%s18082_s5 + $0x7a0] ss:$8 sps:$4 sm:$0xff]  }
 0x65b   : > { %9874 = vmatprep.subr.bf16.mxu1 %v13874_v39  ;;  %v9523_v39 = vld [vmem:[#allocation3 + $0x50] sm:$0xff] }
 0x65d   : > { %9471 = vmatmul.mubr.bf16.gmra.mrb[44].mxu1 %v18245_v56  ;;  %v9562_v56 = vshrl.u32 %v9521_v52, 16  ;;  %v13916_v52 = vld [vmem:[%s18082_s5 + $0x800] ss:$8 sps:$4 sm:$0xff]  }
 0x65e   : > { %9480 = vmatprep.mubr.bf16.mxu1 %v18246_v44  ;;  %9875 = vmatpush1.bf16.msra.mxu1 %v13872_v14  ;;  %v9576_v14 = vshrl.u32 %v9523_v39, 16 }
 0x65f   : > { %9876 = vmatprep.subr.bf16.mxu1 %v13878_v16  ;;  %v9579_v16 = vshll.u32 %v9523_v39, 16  ;;  %v9564_v22 = vrot.slane %v9562_v56, 4  ;;  %v14027_v56 = vld [vmem:[#allocation3 + $0x78] sm:$0x11] }
 0x660   : > { %v9578_v18 = vrot.slane %v9576_v14, 4  ;;  %v12177_v14 = vcombine.low %v17818_v49, %v17809_v31  ;;  %v9613_v25 = vshll.u32 %v14027_v56, 16  ;;  %v13919_v49 = vld [vmem:[%s18082_s5 + $0x810] ss:$8 sps:$4 sm:$0xff]   ;;  %v13948_v56 = vld [vmem:[%s18082_s5 + $0x8a4] ss:$8 sps:$4 sm:$0xff]  }
 0x661   : > { %v9581_v44 = vrot.slane %v9579_v16, 5  ;;  %v9568_v51 = vor.u32 %v9567_v41, %v9564_v22  ;;  %v13924_v41 = vld [vmem:[%s18082_s5 + $0x824] ss:$8 sps:$4 sm:$0xff]  }
 0x662   : > { %9877 = vmatpush1.bf16.msra.mxu1 %v13876_v12  ;;  %v13907_v12 = vld [vmem:[%s18082_s5 + $0x7d0] ss:$8 sps:$4 sm:$0xff]  }
 0x663   : > { %9878 = vmatprep.subr.bf16.mxu1 %v13882_v2  ;;  %v9527_v2 = vld [vmem:[#allocation3 + $0x70] sm:$0xff] }
 0x664   : > { %v9604_v32 = vshrl.u32 %v9527_v2, 16  ;;  %v9607_v7 = vshll.u32 %v9527_v2, 16 }
 0x665   : > { %9481 = vmatmul.mubr.bf16.gmra.mrb[48].mxu1 %v18247_v21 }
 0x666   : > { %9490 = vmatprep.mubr.bf16.mxu1 %v12112_v5  ;;  %9879 = vmatpush1.bf16.msra.mxu1 %v13880_v28  ;;  %v9582_v28 = vor.u32 %v9581_v44, %v9578_v18  ;;  %v14025_v5 = vld [vmem:[#allocation3 + $0x58] sm:$0x11]  ;;  %v9606_v35 = vrot.slane %v9604_v32, 4  ;;  %v14028_v18 = vld [vmem:[#allocation3 + $0x68] sm:$0x11] }
 0x667   : > { %9880 = vmatprep.subr.bf16.mxu1 %v13885_v24  ;;  %v9525_v24 = vld [vmem:[#allocation3 + $0x60] sm:$0xff]  ;;  %v9585_v21 = vshll.u32 %v14025_v5, 16  ;;  %v9599_v44 = vshll.u32 %v14028_v18, 16 }
 0x668   : > { %v9590_v20 = vshrl.u32 %v9525_v24, 16  ;;  %v9583_v43 = vrot.slane %v9582_v28, 4  ;;  %v13949_v18 = vld [vmem:[%s18082_s5 + $0x8b0] ss:$8 sps:$4 sm:$0xff]  }
 0x669   : > { %v9601_v32 = vrot.slane %v9599_v44, 5  ;;  %v13954_v44 = vld [vmem:[%s18082_s5 + $0x8c4] ss:$8 sps:$4 sm:$0xff]  }
 0x66a   : > { %9881 = vmatpush1.bf16.msra.mxu1 %v13883_v13  ;;  %v9593_v13 = vshll.u32 %v9525_v24, 16  ;;  %v9615_v24 = vrot.slane %v9613_v25, 5  ;;  %v13946_v25 = vld [vmem:[%s18082_s5 + $0x8a0] ss:$8 sps:$4 sm:$0xff]  }
 0x66b   : > { %9882 = vmatprep.subr.bf16.mxu1 %v13888_v63  ;;  %v14026_v63 = vld [vmem:[#allocation3 + $0x48] sm:$0x11] }
 0x66c   : > { %v9571_v26 = vshll.u32 %v14026_v63, 16  ;;  %v13927_v63 = vld [vmem:[%s18082_s5 + $0x834] ss:$8 sps:$4 sm:$0xff]  }
 0x66d   : > { %9491 = vmatmul.mubr.bf16.gmra.mrb[52].mxu1 %v12111_v38  ;;  %v9529_v38 = vld [vmem:[#allocation3 + $0x80] sm:$0xff] }
 0x66e   : > { %9883 = vmatpush1.bf16.msra.mxu1 %v13886_v29  ;;  %9902 = vmatprep.mubr.bf16.mxu1 %v12178_v0  ;;  %v9609_v29 = vrot.slane %v9607_v7, 5  ;;  %v9587_v0 = vrot.slane %v9585_v21, 5  ;;  %v9621_v39 = vshll.u32 %v9529_v38, 16  ;;  %v14029_v21 = vld [vmem:[#allocation3 + $0x98] sm:$0x11] }
 0x66f   : > { %9884 = vmatprep.subr.bf16.mxu1 %v13891_v54  ;;  %v13913_v54 = vld [vmem:[%s18082_s5 + $0x7f0] ss:$8 sps:$4 sm:$0xff]  }
 0x672   : > { %9885 = vmatpush1.bf16.msra.mxu1 %v13889_v27  ;;  %v13918_v27 = vld [vmem:[%s18082_s5 + $0x804] ss:$8 sps:$4 sm:$0xff]  }
 0x673   : > { %9886 = vmatprep.subr.bf16.mxu1 %v13894_v50  ;;  %v9569_v50 = vrot.slane %v9568_v51, 4  ;;  %v13922_v51 = vld [vmem:[%s18082_s5 + $0x820] ss:$8 sps:$4 sm:$0xff]  }
 0x676   : > { %9887 = vmatpush1.bf16.msra.mxu1 %v13892_v42  ;;  %v9592_v42 = vrot.slane %v9590_v20, 4 }
 0x677   : > { %9888 = vmatprep.subr.bf16.mxu1 %v13897_v19  ;;  %v9595_v19 = vrot.slane %v9593_v13, 5 }
 0x67a   : > { %9889 = vmatpush1.bf16.msra.mxu1 %v13895_v48  ;;  %v9573_v48 = vrot.slane %v9571_v26, 5  ;;  %v14030_v26 = vld [vmem:[#allocation3 + $0x88] sm:$0x11] }
 0x67b   : > { %9890 = vmatprep.subr.bf16.mxu1 %v13900_v61  ;;  %v9588_v61 = vsel %vm14405_vm7, %v9583_v43, %v9587_v0  ;;  %v9627_v43 = vshll.u32 %v14030_v26, 16  ;;  %v13925_v0 = vld [vmem:[%s18082_s5 + $0x830] ss:$8 sps:$4 sm:$0xff]  }
 0x67c   : > { %v9574_v16 = vsel %vm14405_vm7, %v9569_v50, %v9573_v48  ;;  %v13928_v48 = vld [vmem:[%s18082_s5 + $0x840] ss:$8 sps:$4 sm:$0xff]  }
 0x67d   : > { %v12179_v20 = vcombine.low %v9574_v16, %v9588_v61  ;;  %v9629_v50 = vrot.slane %v9627_v43, 5 }
 0x67e   : > { %9891 = vmatpush1.bf16.msra.mxu1 %v13898_v62  ;;  %v9618_v62 = vshrl.u32 %v9529_v38, 16 }
 0x67f   : > { %9892 = vmatprep.subr.bf16.mxu1 %v13903_v45  ;;  %v9610_v45 = vor.u32 %v9609_v29, %v9606_v35 }
 0x681   : > { %v9611_v2 = vrot.slane %v9610_v45, 4 }
 0x682   : > { %9893 = vmatpush1.bf16.msra.mxu1 %v13901_v33  ;;  %v9632_v33 = vshrl.u32 %v17794_v55, 16 }
 0x683   : > { %9894 = vmatprep.subr.bf16.mxu1 %v13906_v11  ;;  %v9635_v11 = vshll.u32 %v17794_v55, 16  ;;  %v12180_v55 = vcombine.high %v9574_v16, %v9588_v61  ;;  %v9616_v7 = vsel %vm14405_vm7, %v9611_v2, %v9615_v24  ;;  %v13942_v16 = vld [vmem:[%s18082_s5 + $0x884] ss:$8 sps:$4 sm:$0xff]   ;;  %v13957_v2 = vld [vmem:[%s18082_s5 + $0x8d4] ss:$8 sps:$4 sm:$0xff]  }
 0x684   : > { %v9634_v22 = vrot.slane %v9632_v33, 4  ;;  %v13934_v33 = vld [vmem:[%s18082_s5 + $0x860] ss:$8 sps:$4 sm:$0xff]  }
 0x685   : > { %v9637_v31 = vrot.slane %v9635_v11, 5  ;;  %v13965_v24 = vld [vmem:[%s18083_s6] sm:$0xff]  }
 0x686   : > { %9895 = vmatpush1.bf16.msra.mxu1 %v13904_v17  ;;  %v13921_v17 = vld [vmem:[%s18082_s5 + $0x814] ss:$8 sps:$4 sm:$0xff]  }
 0x687   : > { %9896 = vmatprep.subr.bf16.mxu1 %v13909_v37  ;;  %v9596_v37 = vor.u32 %v9595_v19, %v9592_v42  ;;  %v9638_v5 = vor.u32 %v9637_v31, %v9634_v22  ;;  %v13960_v22 = vld [vmem:[%s18082_s5 + $0x8e4] ss:$8 sps:$4 sm:$0xff]   ;;  %v13958_v31 = vld [vmem:[%s18082_s5 + $0x8e0] ss:$8 sps:$4 sm:$0xff]  }
 0x689   : > { %v9597_v28 = vrot.slane %v9596_v37, 4  ;;  %v9639_v38 = vrot.slane %v9638_v5, 4  ;;  %v13945_v37 = vld [vmem:[%s18082_s5 + $0x894] ss:$8 sps:$4 sm:$0xff]  }
 0x68a   : > { %9897 = vmatpush1.bf16.msra.mxu1 %v13907_v12  ;;  %v9620_v12 = vrot.slane %v9618_v62, 4  ;;  %v13933_v62 = vld [vmem:[%s18082_s5 + $0x854] ss:$8 sps:$4 sm:$0xff]  }
 0x68b   : > { %9898 = vmatprep.subr.bf16.mxu1 %v13912_v40  ;;  %v9623_v40 = vrot.slane %v9621_v39, 5  ;;  %v9602_v13 = vsel %vm14405_vm7, %v9597_v28, %v9601_v32  ;;  %v13936_v39 = vld [vmem:[%s18082_s5 + $0x864] ss:$8 sps:$4 sm:$0xff]  }
 0x68c   : > { %v12182_v35 = vcombine.high %v9602_v13, %v9616_v7  ;;  %v12181_v61 = vcombine.low %v9602_v13, %v9616_v7  ;;  %v13964_v28 = vld [vmem:[%s18083_s6 + $0x40] sm:$0xff]   ;;  %v13966_v32 = vld [vmem:[%s18083_s6 + $0x48] sm:$0xff]  }
 0x68d   : > { %v13967_v7 = vld [vmem:[%s18083_s6 + $0x8] sm:$0xff]  }
 0x68e   : > { %9899 = vmatpush1.bf16.msra.mxu1 %v13910_v6  ;;  %v9624_v6 = vor.u32 %v9623_v40, %v9620_v12  ;;  %v13952_v12 = vld [vmem:[%s18082_s5 + $0x8c0] ss:$8 sps:$4 sm:$0xff]   ;;  %v13955_v40 = vld [vmem:[%s18082_s5 + $0x8d0] ss:$8 sps:$4 sm:$0xff]  }
 0x68f   : > { %9900 = vmatprep.subr.bf16.mxu1 %v13915_v1  ;;  %v9641_v1 = vshll.u32 %v14029_v21, 16 }
 0x690   : > { %v9625_v29 = vrot.slane %v9624_v6, 4  ;;  %v13968_v6 = vld [vmem:[%s18083_s6 + $0x50] sm:$0xff]  }
 0x692   : > { %9901 = vmatpush1.bf16.msra.mxu1 %v13913_v54  ;;  %v9643_v54 = vrot.slane %v9641_v1, 5  ;;  %v9630_v42 = vsel %vm14405_vm7, %v9625_v29, %v9629_v50 }
 0x693   : > { %10240 = vmatprep.subr.bf16.mxu1 %v13918_v27  ;;  %v13930_v27 = vld [vmem:[%s18082_s5 + $0x844] ss:$8 sps:$4 sm:$0xff]  }
 0x694   : > { %v9644_v19 = vsel %vm14405_vm7, %v9639_v38, %v9643_v54 }
 0x695   : > { %9903 = vmatmul.mubr.bf16.vlgmr.msra.gmra.mrb[40].mxu1 %v12177_v14  ;;  %v12184_v45 = vcombine.high %v9630_v42, %v9644_v19  ;;  %v12183_v11 = vcombine.low %v9630_v42, %v9644_v19  ;;  %v13937_v14 = vld [vmem:[%s18082_s5 + $0x870] ss:$8 sps:$4 sm:$0xff]  }
 0x696   : > { %9912 = vmatprep.mubr.bf16.mxu1 %v12180_v55  ;;  %10241 = vmatpush1.bf16.msra.mxu1 %v13916_v52  ;;  %v13939_v52 = vld [vmem:[%s18082_s5 + $0x874] ss:$8 sps:$4 sm:$0xff]  }
 0x697   : > { %10242 = vmatprep.subr.bf16.mxu1 %v13921_v17  ;;  %v13940_v17 = vld [vmem:[%s18082_s5 + $0x880] ss:$8 sps:$4 sm:$0xff]   ;;  %v13951_v55 = vld [vmem:[%s18082_s5 + $0x8b4] ss:$8 sps:$4 sm:$0xff]  }
 0x69a   : > { %10243 = vmatpush1.bf16.msra.mxu1 %v13919_v49  ;;  %v13963_v49 = vld [vmem:[%s18082_s5 + $0x8f4] ss:$8 sps:$4 sm:$0xff]  }
 0x69b   : > { %10244 = vmatprep.subr.bf16.mxu1 %v13924_v41  ;;  %v13961_v41 = vld [vmem:[%s18082_s5 + $0x8f0] ss:$8 sps:$4 sm:$0xff]  }
 0x69d   : > { %9913 = vmatmul.mubr.bf16.gmra.mrb[44].mxu1 %v12179_v20 }
 0x69e   : > { %9922 = vmatprep.mubr.bf16.mxu1 %v12182_v35  ;;  %10245 = vmatpush1.bf16.msra.mxu1 %v13922_v51 }
 0x69f   : > { %10246 = vmatprep.subr.bf16.mxu1 %v13927_v63 }
 0x6a2   : > { %10247 = vmatpush1.bf16.msra.mxu1 %v13925_v0 }
 0x6a3   : > { %10248 = vmatprep.subr.bf16.mxu1 %v13930_v27 }
 0x6a5   : > { %9923 = vmatmul.mubr.bf16.gmra.mrb[48].mxu1 %v12181_v61 }
 0x6a6   : > { %9932 = vmatprep.mubr.bf16.mxu1 %v12184_v45  ;;  %10249 = vmatpush1.bf16.msra.mxu1 %v13928_v48 }
 0x6a7   : > { %10250 = vmatprep.subr.bf16.mxu1 %v13933_v62 }
 0x6aa   : > { %10251 = vmatpush1.bf16.msra.mxu1 %v13931_v46 }
 0x6ab   : > { %10252 = vmatprep.subr.bf16.mxu1 %v13936_v39 }
 0x6ad   : > { %9933 = vmatmul.mubr.bf16.gmra.mrb[52].mxu1 %v12183_v11 }
 0x6ae   : > { %10253 = vmatpush1.bf16.msra.mxu1 %v13934_v33  ;;  %10272 = vmatprep.mubr.bf16.mxu1 %v12258_v57  ;;  %v13943_v57 = vld [vmem:[%s18082_s5 + $0x890] ss:$8 sps:$4 sm:$0xff]  }
 0x6af   : > { %10254 = vmatprep.subr.bf16.mxu1 %v13939_v52 }
 0x6b2   : > { %10255 = vmatpush1.bf16.msra.mxu1 %v13937_v14 }
 0x6b3   : > { %10256 = vmatprep.subr.bf16.mxu1 %v13942_v16 }
 0x6b6   : > { %10257 = vmatpush1.bf16.msra.mxu1 %v13940_v17 }
 0x6b7   : > { %10258 = vmatprep.subr.bf16.mxu1 %v13945_v37 }
 0x6ba   : > { %10259 = vmatpush1.bf16.msra.mxu1 %v13943_v57 }
 0x6bb   : > { %10260 = vmatprep.subr.bf16.mxu1 %v13948_v56 }
 0x6be   : > { %10261 = vmatpush1.bf16.msra.mxu1 %v13946_v25 }
 0x6bf   : > { %10262 = vmatprep.subr.bf16.mxu1 %v13951_v55 }
 0x6c2   : > { %10263 = vmatpush1.bf16.msra.mxu1 %v13949_v18 }
 0x6c3   : > { %10264 = vmatprep.subr.bf16.mxu1 %v13954_v44 }
 0x6c6   : > { %10265 = vmatpush1.bf16.msra.mxu1 %v13952_v12 }
 0x6c7   : > { %10266 = vmatprep.subr.bf16.mxu1 %v13957_v2 }
 0x6ca   : > { %10267 = vmatpush1.bf16.msra.mxu1 %v13955_v40 }
 0x6cb   : > { %10268 = vmatprep.subr.bf16.mxu1 %v13960_v22  ;;  %v12297_v22 = vld [vmem:[%s18084_s7] ss:$0 sm:$0xff] }
 0x6ce   : > { %10269 = vmatpush1.bf16.msra.mxu1 %v13958_v31 }
 0x6cf   : > { %10270 = vmatprep.subr.bf16.mxu1 %v13963_v49 }
 0x6d2   : > { %10271 = vmatpush1.bf16.msra.mxu1 %v13961_v41 }
 0x6d3   : > { %12372 = vmatprep.subr.bf16.mxu1 %v13964_v28 }
 0x6d5   : > { %10273 = vmatmul.mubr.bf16.vlgmr.msra.gmra.mrb[40].mxu1 %v12257_v34  ;;  %v13971_v34 = vld [vmem:[%s18083_s6 + $0x18] sm:$0xff]  }
 0x6d6   : > { %10282 = vmatprep.mubr.bf16.mxu1 %v12260_v23  ;;  %12373 = vmatpush3.bf16.msra.mxu1 %v13965_v24  ;;  %v13972_v23 = vld [vmem:[%s18083_s6 + $0x60] sm:$0xff]  }
 0x6d7   : > { %12374 = vmatprep.subr.bf16.mxu1 %v13966_v32 }
 0x6da   : > { %12375 = vmatpush3.bf16.msra.mxu1 %v13967_v7 }
 0x6db   : > { %12376 = vmatprep.subr.bf16.mxu1 %v13968_v6 }
 0x6dd   : > { %10283 = vmatmul.mubr.bf16.gmra.mrb[44].mxu1 %v12259_v53  ;;  %v13975_v53 = vld [vmem:[%s18083_s6 + $0x28] sm:$0xff]  }
 0x6de   : > { %10292 = vmatprep.mubr.bf16.mxu1 %v12262_v15  ;;  %12377 = vmatpush3.bf16.msra.mxu1 %v13969_v47  ;;  %v13978_v15 = vld [vmem:[%s18083_s6 + $0x78] sm:$0xff]  }
 0x6df   : > { %12378 = vmatprep.subr.bf16.mxu1 %v13970_v10 }
 0x6e2   : > { %12379 = vmatpush3.bf16.msra.mxu1 %v13971_v34 }
 0x6e3   : > { %12380 = vmatprep.subr.bf16.mxu1 %v13972_v23 }
 0x6e5   : > { %10293 = vmatmul.mubr.bf16.gmra.mrb[48].mxu1 %v12261_v8  ;;  %v13979_v8 = vld [vmem:[%s18083_s6 + $0x38] sm:$0xff]  }
 0x6e6   : > { %10302 = vmatprep.mubr.bf16.mxu1 %v12264_v60  ;;  %12381 = vmatpush3.bf16.msra.mxu1 %v13973_v9 }
 0x6e7   : > { %12382 = vmatprep.subr.bf16.mxu1 %v13974_v58 }
 0x6ea   : > { %12383 = vmatpush3.bf16.msra.mxu1 %v13975_v53 }
 0x6eb   : > { %12384 = vmatprep.subr.bf16.mxu1 %v13976_v59 }
 0x6ed   : > { %10303 = vmatmul.mubr.bf16.gmra.mrb[52].mxu1 %v12263_v3 }
 0x6ee   : > { %12385 = vmatpush3.bf16.msra.mxu1 %v13977_v4 }
 0x6ef   : > { %12386 = vmatprep.subr.bf16.mxu1 %v13978_v15 }
 0x6f2   : > { %12387 = vmatpush3.bf16.msra.mxu1 %v13979_v8 }
 0x7a8   : > { %v10274_v30 = vpop.f32.mrb[40].mxu1 }
 0x7a9   : > { %v10276_v36 = vpop.f32.mrb[41].mxu1  ;;  %v10329_v3 = vmax.f32 %v10274_v30, 0.0 }
 0x7aa   : > { %v10278_v60 = vpop.f32.mrb[42].mxu1  ;;  %v10330_v1 = vmax.f32 %v10276_v36, 0.0 }
 0x7ab   : > { %v10331_v5 = vmax.f32 %v10278_v60, 0.0  ;;  %v10280_v21 = vpop.f32.mrb[43].mxu1 }
 0x7ac   : > { %v10332_v51 = vmax.f32 %v10280_v21, 0.0 }
 0x7ad   : > { %v10345_v20 = vpack.c.bf16 %v10331_v5, %v10329_v3 }
 0x7ae   : > { %v10346_v13 = vpack.c.bf16 %v10332_v51, %v10330_v1 }
 0x7b0   : > { %v10284_v63 = vpop.f32.mrb[44].mxu1  ;;  %10520 = vmatprep.mubr.bf16.mxu1 %v10346_v13 }
 0x7b1   : > { %v10286_v26 = vpop.f32.mrb[45].mxu1  ;;  %10521 = vmatmul.mubr.bf16.vlgmr.msra.gmra.mrb[56].mxu1 %v10345_v20  ;;  %v10333_v35 = vmax.f32 %v10284_v63, 0.0 }
 0x7b2   : > { %v10288_v43 = vpop.f32.mrb[46].mxu1  ;;  %v10334_v54 = vmax.f32 %v10286_v26, 0.0 }
 0x7b3   : > { %v10335_v29 = vmax.f32 %v10288_v43, 0.0  ;;  %v10290_v38 = vpop.f32.mrb[47].mxu1 }
 0x7b4   : > { %v10336_v0 = vmax.f32 %v10290_v38, 0.0 }
 0x7b5   : > { %v10347_v27 = vpack.c.bf16 %v10335_v29, %v10333_v35 }
 0x7b6   : > { %v10348_v50 = vpack.c.bf16 %v10336_v0, %v10334_v54 }
 0x7b8   : > { %v10294_v42 = vpop.f32.mrb[48].mxu1  ;;  %10528 = vmatprep.mubr.bf16.mxu1 %v10348_v50 }
 0x7b9   : > { %v10296_v19 = vpop.f32.mrb[49].mxu1  ;;  %10529 = vmatmul.mubr.bf16.gmra.mrb[60].mxu1 %v10347_v27  ;;  %v10337_v61 = vmax.f32 %v10294_v42, 0.0 }
 0x7ba   : > { %v10298_v48 = vpop.f32.mrb[50].mxu1  ;;  %v10338_v46 = vmax.f32 %v10296_v19, 0.0 }
 0x7bb   : > { %v10339_v62 = vmax.f32 %v10298_v48, 0.0  ;;  %v10300_v45 = vpop.f32.mrb[51].mxu1 }
 0x7bc   : > { %v10340_v39 = vmax.f32 %v10300_v45, 0.0 }
 0x7bd   : > { %v10349_v33 = vpack.c.bf16 %v10339_v62, %v10337_v61 }
 0x7be   : > { %v10350_v11 = vpack.c.bf16 %v10340_v39, %v10338_v46 }
 0x7c0   : > { %v10304_v52 = vpop.f32.mrb[52].mxu1  ;;  %10536 = vmatprep.mubr.bf16.mxu1 %v10350_v11 }
 0x7c1   : > { %v10306_v14 = vpop.f32.mrb[53].mxu1  ;;  %10537 = vmatmul.mubr.bf16.gmra.mrb[64].mxu1 %v10349_v33  ;;  %v10341_v17 = vmax.f32 %v10304_v52, 0.0 }
 0x7c2   : > { %v10308_v16 = vpop.f32.mrb[54].mxu1  ;;  %v10342_v56 = vmax.f32 %v10306_v14, 0.0 }
 0x7c3   : > { %v10343_v37 = vmax.f32 %v10308_v16, 0.0  ;;  %v10310_v57 = vpop.f32.mrb[55].mxu1 }
 0x7c4   : > { %v10344_v25 = vmax.f32 %v10310_v57, 0.0 }
 0x7c5   : > { %v10351_v55 = vpack.c.bf16 %v10343_v37, %v10341_v17 }
 0x7c6   : > { %v10352_v18 = vpack.c.bf16 %v10344_v25, %v10342_v56 }
 0x7c8   : > { %10544 = vmatprep.mubr.bf16.mxu1 %v10352_v18 }
 0x7c9   : > { %10545 = vmatmul.mubr.bf16.gmra.mrb[68].mxu1 %v10351_v55 }
 0x884   : > { %v12388_v44 = vpop.f32.mrb[56].mxu1 }
 0x885   : > { %v12389_v12 = vpop.f32.mrb[57].mxu1 }
 0x886   : > { %v12390_v2 = vadd.f32 %v12389_v12, %v12388_v44  ;;  %v12391_v40 = vpop.f32.mrb[58].mxu1 }
 0x887   : > { %v12392_v31 = vpop.f32.mrb[59].mxu1 }
 0x888   : > { %v12393_v49 = vadd.f32 %v12392_v31, %v12391_v40  ;;  %v10523_v41 = vadd.f32 %v12390_v2, %v12297_v22 }
 0x88a   : > { %v10526_v28 = vadd.f32 %v12393_v49, %v12297_v22 }
 0x88c   : > { %v12346_v24 = vpack.c.bf16 %v10526_v28, %v10523_v41  ;;  %v12394_v32 = vpop.f32.mrb[60].mxu1 }
 0x88d   : > { %v12395_v7 = vpop.f32.mrb[61].mxu1 }
 0x88e   : > { %12347 = vst [vmem:[%s18068_s21] sm:$0xff] %v12346_v24   ;;  %v12396_v6 = vadd.f32 %v12395_v7, %v12394_v32  ;;  %v12397_v47 = vpop.f32.mrb[62].mxu1 }
 0x88f   : > { %v12398_v10 = vpop.f32.mrb[63].mxu1 }
 0x890   : > { %v12399_v34 = vadd.f32 %v12398_v10, %v12397_v47  ;;  %v10531_v23 = vadd.f32 %v12396_v6, %v12297_v22 }
 0x892   : > { %v10534_v9 = vadd.f32 %v12399_v34, %v12297_v22 }
 0x894   : > { %v12351_v58 = vpack.c.bf16 %v10534_v9, %v10531_v23  ;;  %v12400_v53 = vpop.f32.mrb[64].mxu1 }
 0x895   : > { %v12401_v59 = vpop.f32.mrb[65].mxu1 }
 0x896   : > { %12363 = vst [vmem:[%s18068_s21 + $0x8] sm:$0xff] %v12351_v58   ;;  %v12402_v4 = vadd.f32 %v12401_v59, %v12400_v53  ;;  %v12403_v15 = vpop.f32.mrb[66].mxu1 }
 0x897   : > { %v12404_v8 = vpop.f32.mrb[67].mxu1 }
 0x898   : > { %v12405_v30 = vadd.f32 %v12404_v8, %v12403_v15  ;;  %v10539_v36 = vadd.f32 %v12402_v4, %v12297_v22 }
 0x89a   : > { %v10542_v60 = vadd.f32 %v12405_v30, %v12297_v22 }
 0x89c   : > { %v12356_v3 = vpack.c.bf16 %v10542_v60, %v10539_v36  ;;  %v12406_v5 = vpop.f32.mrb[68].mxu1 }
 0x89d   : > { %v12407_v21 = vpop.f32.mrb[69].mxu1 }
 0x89e   : > { %12364 = vst [vmem:[%s18068_s21 + $0x10] sm:$0xff] %v12356_v3   ;;  %v12408_v1 = vadd.f32 %v12407_v21, %v12406_v5  ;;  %v12409_v51 = vpop.f32.mrb[70].mxu1 }
 0x89f   : > { %v12410_v20 = vpop.f32.mrb[71].mxu1 }
 0x8a0   : > { %v12411_v13 = vadd.f32 %v12410_v20, %v12409_v51  ;;  %v10547_v63 = vadd.f32 %v12408_v1, %v12297_v22 }
 0x8a2   : > { %v10550_v26 = vadd.f32 %v12411_v13, %v12297_v22 }
 0x8a4   : > { %v12361_v43 = vpack.c.bf16 %v10550_v26, %v10547_v63 }
 0x8a6   : > { %12365 = vst [vmem:[%s18068_s21 + $0x18] sm:$0xff] %v12361_v43  }
 0x8a7 PF: > { %s18_s27 = sadd.s32 1, %s14037_s27  }
 0x8a8   : > { %p15_p4 = scmp.ge.s32.totalorder %s18_s27, 4  }
 0x8aa   :  { %17 = sbr.rel (!%p15_p4) target bundleno = 1 (0x1), region = 107 }

</bundles_post_ra>
